<compile_context>
chip_gen: v6e
topology: v6e:2x2x1
jax: 0.10.0
libtpu: 0.0.40
codegen_flags: <defaults>
</compile_context>

<pallas_src>
import functools

import jax
import jax.numpy as jnp
from jax.experimental import pallas as pl
from jax.experimental.pallas import tpu as pltpu


# ----------------------------------------------------------------------------
# Pallas kernels
# ----------------------------------------------------------------------------
def _mm_kernel(*refs, act, has_res):
    """Tiled matmul with fused epilogue.

    Grid = (M//tm, N//tn, K//tk), K innermost. The output block index is constant
    across K, so o_ref stays resident in VMEM and serves as the f32 accumulator.
    Epilogue (last K step): y = acc * scale + bias [+ residual]; activation.
    """
    if has_res:
        a_ref, b_ref, s_ref, c_ref, r_ref, o_ref = refs
    else:
        a_ref, b_ref, s_ref, c_ref, o_ref = refs
        r_ref = None

    k = pl.program_id(2)

    @pl.when(k == 0)
    def _():
        o_ref[...] = jnp.zeros_like(o_ref)

    # bf16 x bf16 -> f32 on the MXU.
    o_ref[...] += jnp.dot(a_ref[...], b_ref[...],
                          preferred_element_type=jnp.float32)

    @pl.when(k == pl.num_programs(2) - 1)
    def _():
        y = o_ref[...] * s_ref[...] + c_ref[...]
        if r_ref is not None:
            y = y + r_ref[...]
        if act == "relu":
            y = jnp.maximum(y, 0.0)
        elif act == "sigmoid":
            y = jax.nn.sigmoid(y)
        o_ref[...] = y


def _gap_kernel(x_ref, o_ref):
    # x_ref: (1, H*W, C) -> mean over spatial -> (1, 1, C)
    o_ref[...] = jnp.mean(x_ref[...], axis=1, keepdims=True)


# ----------------------------------------------------------------------------
# Pallas wrappers
# ----------------------------------------------------------------------------
def _round_up(x, m):
    return (x + m - 1) // m * m


def _pick_tile(dim, candidates):
    for t in candidates:
        if dim % t == 0:
            return t
    return dim


def matmul_fused(a, b_p, s_p, c_p, *, act="none", residual=None, n_out=None):
    """act((a @ b) * scale + bias [+ residual]) with f32 accumulation.

    a:   (M, K) float (cast to bf16 here)
    b_p: (Kp, Np) bf16, pre-padded/pre-reshaped at init
    s_p, c_p: (1, Np) f32 per-output-channel scale / bias
    residual: optional (M, n_out) f32, added before the activation
    Returns (M, n_out) f32.
    """
    M, K = a.shape
    Kp, Np = b_p.shape
    if n_out is None:
        n_out = Np

    # 16-row alignment keeps bf16 A blocks on native (16,128) tiles.
    Mp = _round_up(max(M, 16), 16)
    tm = _pick_tile(Mp, (256, 128, 64, 32, 16))
    tn = 256 if Np % 256 == 0 else 128
    tk = 256 if Kp % 256 == 0 else 128

    a_bf = a.astype(jnp.bfloat16)
    if (M, K) != (Mp, Kp):
        a_bf = jnp.zeros((Mp, Kp), jnp.bfloat16).at[:M, :K].set(a_bf)

    has_res = residual is not None
    operands = [a_bf, b_p, s_p, c_p]
    in_specs = [
        pl.BlockSpec((tm, tk), lambda i, j, k: (i, k)),
        pl.BlockSpec((tk, tn), lambda i, j, k: (k, j)),
        pl.BlockSpec((1, tn), lambda i, j, k: (0, j)),   # constant across K
        pl.BlockSpec((1, tn), lambda i, j, k: (0, j)),   # constant across K
    ]
    if has_res:
        r = residual.astype(jnp.float32)
        if r.shape != (Mp, Np):
            r = jnp.zeros((Mp, Np), jnp.float32).at[:r.shape[0], :r.shape[1]].set(r)
        operands.append(r)
        in_specs.append(pl.BlockSpec((tm, tn), lambda i, j, k: (i, j)))

    out = pl.pallas_call(
        functools.partial(_mm_kernel, act=act, has_res=has_res),
        out_shape=jax.ShapeDtypeStruct((Mp, Np), jnp.float32),
        grid_spec=pltpu.PrefetchScalarGridSpec(
            num_scalar_prefetch=0,
            grid=(Mp // tm, Np // tn, Kp // tk),
            in_specs=in_specs,
            out_specs=pl.BlockSpec((tm, tn), lambda i, j, k: (i, j)),
        ),
        compiler_params=pltpu.CompilerParams(
            dimension_semantics=("parallel", "parallel", "arbitrary")),
    )(*operands)
    return out[:M, :n_out]


def maxpool_3x3_s2_p1(x):
    # nn.MaxPool2d(kernel_size=3, stride=2, padding=1); implicit -inf padding.
    # Single-pass reduce_window (per perf review) instead of a 9-copy HBM stack.
    # TODO(synk): could be a fully-fused Pallas kernel reading the padded tile once.
    return jax.lax.reduce_window(
        x, -jnp.inf, jax.lax.max,
        window_dimensions=(1, 3, 3, 1),
        window_strides=(1, 2, 2, 1),
        padding=((0, 0), (1, 1), (1, 1), (0, 0)))


def global_avg_pool(x):
    # AdaptiveAvgPool2d((1,1)) + flatten -> (N, C); lane-dense C=512 output.
    N, H, W, C = x.shape
    x2 = x.reshape(N, H * W, C)
    out = pl.pallas_call(
        _gap_kernel,
        out_shape=jax.ShapeDtypeStruct((N, 1, C), x.dtype),
        grid_spec=pltpu.PrefetchScalarGridSpec(
            num_scalar_prefetch=0,
            grid=(N,),
            in_specs=[pl.BlockSpec((1, H * W, C), lambda i: (i, 0, 0))],
            out_specs=pl.BlockSpec((1, 1, C), lambda i: (i, 0, 0)),
        ),
        compiler_params=pltpu.CompilerParams(
            dimension_semantics=("parallel",)),
    )(x2)
    return out.reshape(N, C)


# ----------------------------------------------------------------------------
# Conv = im2col (bf16 glue) + fused Pallas matmul
# ----------------------------------------------------------------------------
def _im2col(x, kh, kw, stride, pad):
    N, H, W, C = x.shape
    if pad > 0:
        x = jnp.pad(x, ((0, 0), (pad, pad), (pad, pad), (0, 0)))
    Ho = (H + 2 * pad - kh) // stride + 1
    Wo = (W + 2 * pad - kw) // stride + 1
    cols = []
    for i in range(kh):
        for j in range(kw):
            cols.append(x[:, i:i + stride * Ho:stride,
                          j:j + stride * Wo:stride, :])
    patches = jnp.concatenate(cols, axis=-1)          # (N,Ho,Wo,kh*kw*C)
    return patches.reshape(N * Ho * Wo, kh * kw * C), Ho, Wo


def conv_bn(x, pw, stride, pad, act, residual=None):
    """x: (N,H,W,Cin) f32. pw: packed conv dict (bf16 weight, folded BN).
    Optional residual (added before activation) is fused into the epilogue."""
    kh, kw, cout = pw["kh"], pw["kw"], pw["cout"]
    # TODO(synk): im2col still materializes kh*kw shifted copies in HBM (in bf16);
    #             a direct-conv kernel with a kh*kw reduction grid axis would remove it.
    patches, Ho, Wo = _im2col(x.astype(jnp.bfloat16), kh, kw, stride, pad)
    res = None
    if residual is not None:
        res = residual.reshape(-1, residual.shape[-1])
    y = matmul_fused(patches, pw["w"], pw["s"], pw["b"],
                     act=act, residual=res, n_out=cout)
    return y.reshape(x.shape[0], Ho, Wo, cout)


def basic_block(x, blk):
    s = blk["stride"]
    out = conv_bn(x, blk["c1"], s, 1, "relu")
    if "cd" in blk:
        shortcut = conv_bn(x, blk["cd"], s, 0, "none")
    else:
        shortcut = x
    # conv2 + BN + residual-add + ReLU fused into a single matmul epilogue.
    return conv_bn(out, blk["c2"], 1, 1, "relu", residual=shortcut)


# ----------------------------------------------------------------------------
# Deterministic parameter init (shapes per torchvision resnet18 + modifications)
# ----------------------------------------------------------------------------
def _conv_w(key, kh, kw, cin, cout):
    std = (2.0 / (kh * kw * cin)) ** 0.5
    return std * jax.random.normal(key, (kh, kw, cin, cout), jnp.float32)


def _bn_fold(key, c, eps=1e-5):
    k1, k2 = jax.random.split(key)
    gamma = 1.0 + 0.1 * jax.random.normal(k1, (c,), jnp.float32)
    beta = 0.1 * jax.random.normal(k2, (c,), jnp.float32)
    running_mean = jnp.zeros((c,), jnp.float32)
    running_var = jnp.ones((c,), jnp.float32)
    scale = gamma / jnp.sqrt(running_var + eps)
    bias = beta - running_mean * scale
    return scale, bias


def _pack_conv(w, scale, bias):
    """Pre-reshape / pre-pad / pre-cast a conv (or dense) weight + folded BN once."""
    kh, kw, cin, cout = w.shape
    K = kh * kw * cin
    tk = 256 if K > 128 else 128
    Kp = _round_up(K, tk)
    Np = _round_up(cout, 128)
    w2 = jnp.zeros((Kp, Np), jnp.bfloat16).at[:K, :cout].set(
        w.reshape(K, cout).astype(jnp.bfloat16))
    s2 = jnp.zeros((1, Np), jnp.float32).at[0, :cout].set(scale)
    b2 = jnp.zeros((1, Np), jnp.float32).at[0, :cout].set(bias)
    return {"w": w2, "s": s2, "b": b2, "kh": kh, "kw": kw, "cout": cout}


def init_resnet_proto(key):
    keys = iter(jax.random.split(key, 128))
    p = {}
    # modified conv1: Conv2d(1, 64, 3, stride=1, padding=1, bias=False) + BN1
    s, b = _bn_fold(next(keys), 64)
    p["conv1"] = _pack_conv(_conv_w(next(keys), 3, 3, 1, 64), s, b)

    layers = []
    in_c = 64
    for out_c, strides in [(64, [1, 1]), (128, [2, 1]),
                           (256, [2, 1]), (512, [2, 1])]:
        blocks = []
        for st in strides:
            blk = {"stride": st}
            s1, b1 = _bn_fold(next(keys), out_c)
            blk["c1"] = _pack_conv(_conv_w(next(keys), 3, 3, in_c, out_c), s1, b1)
            s2, b2 = _bn_fold(next(keys), out_c)
            blk["c2"] = _pack_conv(_conv_w(next(keys), 3, 3, out_c, out_c), s2, b2)
            if st != 1 or in_c != out_c:
                sd, bd = _bn_fold(next(keys), out_c)
                blk["cd"] = _pack_conv(_conv_w(next(keys), 1, 1, in_c, out_c), sd, bd)
            blocks.append(blk)
            in_c = out_c
        layers.append(blocks)
    p["layers"] = layers

    # self.linear = nn.Linear(512, 1) (+ sigmoid), packed for the same fused matmul.
    fc_w = (1.0 / 512.0 ** 0.5) * jax.random.normal(next(keys), (512, 1), jnp.float32)
    fc_b = jnp.zeros((1,), jnp.float32)
    p["fc"] = _pack_conv(fc_w.reshape(1, 1, 512, 1),
                         jnp.ones((1,), jnp.float32), fc_b)
    return p


# ----------------------------------------------------------------------------
# Forward (matches ResnetProto.forward: returns (emb, clf))
# ----------------------------------------------------------------------------
def resnet_proto_forward(params, x):
    # PyTorch: emb = x.view(-1, 1, H, W)  (NCHW, 1 channel) -> here NHWC with C=1
    N, H, W = x.shape
    h = x.reshape(N, H, W, 1).astype(jnp.float32)

    h = conv_bn(h, params["conv1"], stride=1, pad=1, act="relu")
    h = maxpool_3x3_s2_p1(h)

    for blocks in params["layers"]:
        for blk in blocks:
            h = basic_block(h, blk)

    emb = global_avg_pool(h)                                   # (N, 512)
    fc = params["fc"]
    clf = matmul_fused(emb, fc["w"], fc["s"], fc["b"],
                       act="sigmoid", n_out=fc["cout"])        # (N, 1)
    return emb, clf


# TODO(synk): BatchNorm is folded eval-mode (running stats); training-mode batch
#             statistics are not reproduced.

if __name__ == "__main__":
    key = jax.random.PRNGKey(0)
    pkey, xkey = jax.random.split(key)
    params = init_resnet_proto(pkey)
    x = jax.random.normal(xkey, (2, 16, 16), jnp.float32)

    fwd = jax.jit(functools.partial(resnet_proto_forward, params))
    emb, clf = fwd(x)
    jax.block_until_ready((emb, clf))

    assert emb.shape == (2, 512), emb.shape
    assert clf.shape == (2, 1), clf.shape
    assert bool(jnp.all(jnp.isfinite(emb)))
    assert bool(jnp.all(jnp.isfinite(clf)))
    assert bool(jnp.all((clf >= 0.0) & (clf <= 1.0)))
    print("KERNEL_OK")
</pallas_src>

<mosaic_0001>
module attributes {stable_mosaic.version = 11 : i64} {
  func.func @_mm_kernel(%arg0: i32, %arg1: i32, %arg2: i32, %arg3: memref<256x128xbf16, #tpu.memory_space<vmem>>, %arg4: memref<128x128xbf16, #tpu.memory_space<vmem>>, %arg5: memref<1x128xf32, #tpu.memory_space<vmem>>, %arg6: memref<1x128xf32, #tpu.memory_space<vmem>>, %arg7: memref<256x128xf32, #tpu.memory_space<vmem>>) attributes {dimension_semantics = [#tpu.dimension_semantics<parallel>, #tpu.dimension_semantics<parallel>, #tpu.dimension_semantics<arbitrary>], iteration_bounds = array<i64: 2, 1, 1>, scalar_prefetch = 0 : i64, scratch_operands = 0 : i64, tpu.core_type = #tpu.core_type<tc>, window_params = [{transform_indices = @transform_0, window_bounds = array<i64: 256, 128>}, {transform_indices = @transform_1, window_bounds = array<i64: 128, 128>}, {transform_indices = @transform_2, window_bounds = array<i64: 1, 128>}, {transform_indices = @transform_3, window_bounds = array<i64: 1, 128>}, {transform_indices = @transform_4, window_bounds = array<i64: 256, 128>}]} {
    %c0_i32 = arith.constant 0 : i32
    %0 = arith.cmpi eq, %arg2, %c0_i32 : i32
    %1 = arith.extui %0 : i1 to i32
    %c0_i32_0 = arith.constant 0 : i32
    %2 = arith.cmpi ne, %1, %c0_i32_0 : i32
    scf.if %2 {
      %cst_10 = arith.constant 0.000000e+00 : f32
      %12 = vector.broadcast %cst_10 : f32 to vector<256x128xf32>
      %c0_11 = arith.constant 0 : index
      %c0_12 = arith.constant 0 : index
      %13 = vector.load %arg7[%c0_11, %c0_12] : memref<256x128xf32, #tpu.memory_space<vmem>>, vector<256x128xf32>
      tpu.vector_store %arg7[%c0_11, %c0_12], %12 {strides = array<i32>} : memref<256x128xf32, #tpu.memory_space<vmem>>, vector<256x128xf32>,
    } else {
    }
    %c0 = arith.constant 0 : index
    %c0_1 = arith.constant 0 : index
    %3 = vector.load %arg7[%c0, %c0_1] : memref<256x128xf32, #tpu.memory_space<vmem>>, vector<256x128xf32>
    %c0_2 = arith.constant 0 : index
    %c0_3 = arith.constant 0 : index
    %4 = vector.load %arg3[%c0_2, %c0_3] : memref<256x128xbf16, #tpu.memory_space<vmem>>, vector<256x128xbf16>
    %c0_4 = arith.constant 0 : index
    %c0_5 = arith.constant 0 : index
    %5 = vector.load %arg4[%c0_4, %c0_5] : memref<128x128xbf16, #tpu.memory_space<vmem>>, vector<128x128xbf16>
    %cst = arith.constant dense<0.000000e+00> : vector<256x128xf32>
    %6 = tpu.matmul %4, %5, %cst {dimension_numbers = #tpu.dot_dimension_numbers<[1], [0], [0], [1], [0, 0, 1, 1], [], []>} : vector<256x128xbf16>, vector<128x128xbf16>, vector<256x128xf32> -> vector<256x128xf32>
    %7 = arith.addf %3, %6 : vector<256x128xf32>
    %c0_6 = arith.constant 0 : index
    %c0_7 = arith.constant 0 : index
    %8 = vector.load %arg7[%c0_6, %c0_7] : memref<256x128xf32, #tpu.memory_space<vmem>>, vector<256x128xf32>
    tpu.vector_store %arg7[%c0_6, %c0_7], %7 {strides = array<i32>} : memref<256x128xf32, #tpu.memory_space<vmem>>, vector<256x128xf32>,
    %c0_i32_8 = arith.constant 0 : i32
    %9 = arith.cmpi eq, %arg2, %c0_i32_8 : i32
    %10 = arith.extui %9 : i1 to i32
    %c0_i32_9 = arith.constant 0 : i32
    %11 = arith.cmpi ne, %10, %c0_i32_9 : i32
    scf.if %11 {
      %c0_10 = arith.constant 0 : index
      %c0_11 = arith.constant 0 : index
      %12 = vector.load %arg7[%c0_10, %c0_11] : memref<256x128xf32, #tpu.memory_space<vmem>>, vector<256x128xf32>
      %c0_12 = arith.constant 0 : index
      %c0_13 = arith.constant 0 : index
      %13 = vector.load %arg5[%c0_12, %c0_13] : memref<1x128xf32, #tpu.memory_space<vmem>>, vector<1x128xf32>
      %14 = vector.broadcast %13 : vector<1x128xf32> to vector<256x128xf32>
      %15 = arith.mulf %12, %14 : vector<256x128xf32>
      %c0_14 = arith.constant 0 : index
      %c0_15 = arith.constant 0 : index
      %16 = vector.load %arg6[%c0_14, %c0_15] : memref<1x128xf32, #tpu.memory_space<vmem>>, vector<1x128xf32>
      %17 = vector.broadcast %16 : vector<1x128xf32> to vector<256x128xf32>
      %18 = arith.addf %15, %17 : vector<256x128xf32>
      %cst_16 = arith.constant 0.000000e+00 : f32
      %19 = vector.broadcast %cst_16 : f32 to vector<256x128xf32>
      %20 = arith.maximumf %18, %19 : vector<256x128xf32>
      %c0_17 = arith.constant 0 : index
      %c0_18 = arith.constant 0 : index
      %21 = vector.load %arg7[%c0_17, %c0_18] : memref<256x128xf32, #tpu.memory_space<vmem>>, vector<256x128xf32>
      tpu.vector_store %arg7[%c0_17, %c0_18], %20 {strides = array<i32>} : memref<256x128xf32, #tpu.memory_space<vmem>>, vector<256x128xf32>,
    } else {
    }
    return
  }
  func.func @transform_0(%arg0: i32, %arg1: i32, %arg2: i32) -> (i32, i32) {
    %c0_i32 = arith.constant 0 : i32
    return %arg0, %arg2 : i32, i32
  }
  func.func @transform_1(%arg0: i32, %arg1: i32, %arg2: i32) -> (i32, i32) {
    %c0_i32 = arith.constant 0 : i32
    return %arg2, %arg1 : i32, i32
  }
  func.func @transform_2(%arg0: i32, %arg1: i32, %arg2: i32) -> (i32, i32) {
    %c0_i32 = arith.constant 0 : i32
    %c0_i32_0 = arith.constant 0 : i32
    return %c0_i32, %arg1 : i32, i32
  }
  func.func @transform_3(%arg0: i32, %arg1: i32, %arg2: i32) -> (i32, i32) {
    %c0_i32 = arith.constant 0 : i32
    %c0_i32_0 = arith.constant 0 : i32
    return %c0_i32, %arg1 : i32, i32
  }
  func.func @transform_4(%arg0: i32, %arg1: i32, %arg2: i32) -> (i32, i32) {
    %c0_i32 = arith.constant 0 : i32
    return %arg0, %arg1 : i32, i32
  }
}

module attributes {stable_mosaic.version = 11 : i64} {
  func.func @_mm_kernel(%arg0: i32, %arg1: i32, %arg2: i32, %arg3: memref<128x256xbf16, #tpu.memory_space<vmem>>, %arg4: memref<256x128xbf16, #tpu.memory_space<vmem>>, %arg5: memref<1x128xf32, #tpu.memory_space<vmem>>, %arg6: memref<1x128xf32, #tpu.memory_space<vmem>>, %arg7: memref<128x128xf32, #tpu.memory_space<vmem>>) attributes {dimension_semantics = [#tpu.dimension_semantics<parallel>, #tpu.dimension_semantics<parallel>, #tpu.dimension_semantics<arbitrary>], iteration_bounds = array<i64: 1, 1, 3>, scalar_prefetch = 0 : i64, scratch_operands = 0 : i64, tpu.core_type = #tpu.core_type<tc>, window_params = [{transform_indices = @transform_0, window_bounds = array<i64: 128, 256>}, {transform_indices = @transform_1, window_bounds = array<i64: 256, 128>}, {transform_indices = @transform_2, window_bounds = array<i64: 1, 128>}, {transform_indices = @transform_3, window_bounds = array<i64: 1, 128>}, {transform_indices = @transform_4, window_bounds = array<i64: 128, 128>}]} {
    %c0_i32 = arith.constant 0 : i32
    %0 = arith.cmpi eq, %arg2, %c0_i32 : i32
    %1 = arith.extui %0 : i1 to i32
    %c0_i32_0 = arith.constant 0 : i32
    %2 = arith.cmpi ne, %1, %c0_i32_0 : i32
    scf.if %2 {
      %cst_9 = arith.constant 0.000000e+00 : f32
      %12 = vector.broadcast %cst_9 : f32 to vector<128x128xf32>
      %c0_10 = arith.constant 0 : index
      %c0_11 = arith.constant 0 : index
      %13 = vector.load %arg7[%c0_10, %c0_11] : memref<128x128xf32, #tpu.memory_space<vmem>>, vector<128x128xf32>
      tpu.vector_store %arg7[%c0_10, %c0_11], %12 {strides = array<i32>} : memref<128x128xf32, #tpu.memory_space<vmem>>, vector<128x128xf32>,
    } else {
    }
    %c0 = arith.constant 0 : index
    %c0_1 = arith.constant 0 : index
    %3 = vector.load %arg7[%c0, %c0_1] : memref<128x128xf32, #tpu.memory_space<vmem>>, vector<128x128xf32>
    %c0_2 = arith.constant 0 : index
    %c0_3 = arith.constant 0 : index
    %4 = vector.load %arg3[%c0_2, %c0_3] : memref<128x256xbf16, #tpu.memory_space<vmem>>, vector<128x256xbf16>
    %c0_4 = arith.constant 0 : index
    %c0_5 = arith.constant 0 : index
    %5 = vector.load %arg4[%c0_4, %c0_5] : memref<256x128xbf16, #tpu.memory_space<vmem>>, vector<256x128xbf16>
    %cst = arith.constant dense<0.000000e+00> : vector<128x128xf32>
    %6 = tpu.matmul %4, %5, %cst {dimension_numbers = #tpu.dot_dimension_numbers<[1], [0], [0], [1], [0, 0, 1, 1], [], []>} : vector<128x256xbf16>, vector<256x128xbf16>, vector<128x128xf32> -> vector<128x128xf32>
    %7 = arith.addf %3, %6 : vector<128x128xf32>
    %c0_6 = arith.constant 0 : index
    %c0_7 = arith.constant 0 : index
    %8 = vector.load %arg7[%c0_6, %c0_7] : memref<128x128xf32, #tpu.memory_space<vmem>>, vector<128x128xf32>
    tpu.vector_store %arg7[%c0_6, %c0_7], %7 {strides = array<i32>} : memref<128x128xf32, #tpu.memory_space<vmem>>, vector<128x128xf32>,
    %c2_i32 = arith.constant 2 : i32
    %9 = arith.cmpi eq, %arg2, %c2_i32 : i32
    %10 = arith.extui %9 : i1 to i32
    %c0_i32_8 = arith.constant 0 : i32
    %11 = arith.cmpi ne, %10, %c0_i32_8 : i32
    scf.if %11 {
      %c0_9 = arith.constant 0 : index
      %c0_10 = arith.constant 0 : index
      %12 = vector.load %arg7[%c0_9, %c0_10] : memref<128x128xf32, #tpu.memory_space<vmem>>, vector<128x128xf32>
      %c0_11 = arith.constant 0 : index
      %c0_12 = arith.constant 0 : index
      %13 = vector.load %arg5[%c0_11, %c0_12] : memref<1x128xf32, #tpu.memory_space<vmem>>, vector<1x128xf32>
      %14 = vector.broadcast %13 : vector<1x128xf32> to vector<128x128xf32>
      %15 = arith.mulf %12, %14 : vector<128x128xf32>
      %c0_13 = arith.constant 0 : index
      %c0_14 = arith.constant 0 : index
      %16 = vector.load %arg6[%c0_13, %c0_14] : memref<1x128xf32, #tpu.memory_space<vmem>>, vector<1x128xf32>
      %17 = vector.broadcast %16 : vector<1x128xf32> to vector<128x128xf32>
      %18 = arith.addf %15, %17 : vector<128x128xf32>
      %cst_15 = arith.constant 0.000000e+00 : f32
      %19 = vector.broadcast %cst_15 : f32 to vector<128x128xf32>
      %20 = arith.maximumf %18, %19 : vector<128x128xf32>
      %c0_16 = arith.constant 0 : index
      %c0_17 = arith.constant 0 : index
      %21 = vector.load %arg7[%c0_16, %c0_17] : memref<128x128xf32, #tpu.memory_space<vmem>>, vector<128x128xf32>
      tpu.vector_store %arg7[%c0_16, %c0_17], %20 {strides = array<i32>} : memref<128x128xf32, #tpu.memory_space<vmem>>, vector<128x128xf32>,
    } else {
    }
    return
  }
  func.func @transform_0(%arg0: i32, %arg1: i32, %arg2: i32) -> (i32, i32) {
    %c0_i32 = arith.constant 0 : i32
    return %arg0, %arg2 : i32, i32
  }
  func.func @transform_1(%arg0: i32, %arg1: i32, %arg2: i32) -> (i32, i32) {
    %c0_i32 = arith.constant 0 : i32
    return %arg2, %arg1 : i32, i32
  }
  func.func @transform_2(%arg0: i32, %arg1: i32, %arg2: i32) -> (i32, i32) {
    %c0_i32 = arith.constant 0 : i32
    %c0_i32_0 = arith.constant 0 : i32
    return %c0_i32, %arg1 : i32, i32
  }
  func.func @transform_3(%arg0: i32, %arg1: i32, %arg2: i32) -> (i32, i32) {
    %c0_i32 = arith.constant 0 : i32
    %c0_i32_0 = arith.constant 0 : i32
    return %c0_i32, %arg1 : i32, i32
  }
  func.func @transform_4(%arg0: i32, %arg1: i32, %arg2: i32) -> (i32, i32) {
    %c0_i32 = arith.constant 0 : i32
    return %arg0, %arg1 : i32, i32
  }
}

module attributes {stable_mosaic.version = 11 : i64} {
  func.func @_mm_kernel(%arg0: i32, %arg1: i32, %arg2: i32, %arg3: memref<128x256xbf16, #tpu.memory_space<vmem>>, %arg4: memref<256x128xbf16, #tpu.memory_space<vmem>>, %arg5: memref<1x128xf32, #tpu.memory_space<vmem>>, %arg6: memref<1x128xf32, #tpu.memory_space<vmem>>, %arg7: memref<128x128xf32, #tpu.memory_space<vmem>>, %arg8: memref<128x128xf32, #tpu.memory_space<vmem>>) attributes {dimension_semantics = [#tpu.dimension_semantics<parallel>, #tpu.dimension_semantics<parallel>, #tpu.dimension_semantics<arbitrary>], iteration_bounds = array<i64: 1, 1, 3>, scalar_prefetch = 0 : i64, scratch_operands = 0 : i64, tpu.core_type = #tpu.core_type<tc>, window_params = [{transform_indices = @transform_0, window_bounds = array<i64: 128, 256>}, {transform_indices = @transform_1, window_bounds = array<i64: 256, 128>}, {transform_indices = @transform_2, window_bounds = array<i64: 1, 128>}, {transform_indices = @transform_3, window_bounds = array<i64: 1, 128>}, {transform_indices = @transform_4, window_bounds = array<i64: 128, 128>}, {transform_indices = @transform_5, window_bounds = array<i64: 128, 128>}]} {
    %c0_i32 = arith.constant 0 : i32
    %0 = arith.cmpi eq, %arg2, %c0_i32 : i32
    %1 = arith.extui %0 : i1 to i32
    %c0_i32_0 = arith.constant 0 : i32
    %2 = arith.cmpi ne, %1, %c0_i32_0 : i32
    scf.if %2 {
      %cst_9 = arith.constant 0.000000e+00 : f32
      %12 = vector.broadcast %cst_9 : f32 to vector<128x128xf32>
      %c0_10 = arith.constant 0 : index
      %c0_11 = arith.constant 0 : index
      %13 = vector.load %arg8[%c0_10, %c0_11] : memref<128x128xf32, #tpu.memory_space<vmem>>, vector<128x128xf32>
      tpu.vector_store %arg8[%c0_10, %c0_11], %12 {strides = array<i32>} : memref<128x128xf32, #tpu.memory_space<vmem>>, vector<128x128xf32>,
    } else {
    }
    %c0 = arith.constant 0 : index
    %c0_1 = arith.constant 0 : index
    %3 = vector.load %arg8[%c0, %c0_1] : memref<128x128xf32, #tpu.memory_space<vmem>>, vector<128x128xf32>
    %c0_2 = arith.constant 0 : index
    %c0_3 = arith.constant 0 : index
    %4 = vector.load %arg3[%c0_2, %c0_3] : memref<128x256xbf16, #tpu.memory_space<vmem>>, vector<128x256xbf16>
    %c0_4 = arith.constant 0 : index
    %c0_5 = arith.constant 0 : index
    %5 = vector.load %arg4[%c0_4, %c0_5] : memref<256x128xbf16, #tpu.memory_space<vmem>>, vector<256x128xbf16>
    %cst = arith.constant dense<0.000000e+00> : vector<128x128xf32>
    %6 = tpu.matmul %4, %5, %cst {dimension_numbers = #tpu.dot_dimension_numbers<[1], [0], [0], [1], [0, 0, 1, 1], [], []>} : vector<128x256xbf16>, vector<256x128xbf16>, vector<128x128xf32> -> vector<128x128xf32>
    %7 = arith.addf %3, %6 : vector<128x128xf32>
    %c0_6 = arith.constant 0 : index
    %c0_7 = arith.constant 0 : index
    %8 = vector.load %arg8[%c0_6, %c0_7] : memref<128x128xf32, #tpu.memory_space<vmem>>, vector<128x128xf32>
    tpu.vector_store %arg8[%c0_6, %c0_7], %7 {strides = array<i32>} : memref<128x128xf32, #tpu.memory_space<vmem>>, vector<128x128xf32>,
    %c2_i32 = arith.constant 2 : i32
    %9 = arith.cmpi eq, %arg2, %c2_i32 : i32
    %10 = arith.extui %9 : i1 to i32
    %c0_i32_8 = arith.constant 0 : i32
    %11 = arith.cmpi ne, %10, %c0_i32_8 : i32
    scf.if %11 {
      %c0_9 = arith.constant 0 : index
      %c0_10 = arith.constant 0 : index
      %12 = vector.load %arg8[%c0_9, %c0_10] : memref<128x128xf32, #tpu.memory_space<vmem>>, vector<128x128xf32>
      %c0_11 = arith.constant 0 : index
      %c0_12 = arith.constant 0 : index
      %13 = vector.load %arg5[%c0_11, %c0_12] : memref<1x128xf32, #tpu.memory_space<vmem>>, vector<1x128xf32>
      %14 = vector.broadcast %13 : vector<1x128xf32> to vector<128x128xf32>
      %15 = arith.mulf %12, %14 : vector<128x128xf32>
      %c0_13 = arith.constant 0 : index
      %c0_14 = arith.constant 0 : index
      %16 = vector.load %arg6[%c0_13, %c0_14] : memref<1x128xf32, #tpu.memory_space<vmem>>, vector<1x128xf32>
      %17 = vector.broadcast %16 : vector<1x128xf32> to vector<128x128xf32>
      %18 = arith.addf %15, %17 : vector<128x128xf32>
      %c0_15 = arith.constant 0 : index
      %c0_16 = arith.constant 0 : index
      %19 = vector.load %arg7[%c0_15, %c0_16] : memref<128x128xf32, #tpu.memory_space<vmem>>, vector<128x128xf32>
      %20 = arith.addf %18, %19 : vector<128x128xf32>
      %cst_17 = arith.constant 0.000000e+00 : f32
      %21 = vector.broadcast %cst_17 : f32 to vector<128x128xf32>
      %22 = arith.maximumf %20, %21 : vector<128x128xf32>
      %c0_18 = arith.constant 0 : index
      %c0_19 = arith.constant 0 : index
      %23 = vector.load %arg8[%c0_18, %c0_19] : memref<128x128xf32, #tpu.memory_space<vmem>>, vector<128x128xf32>
      tpu.vector_store %arg8[%c0_18, %c0_19], %22 {strides = array<i32>} : memref<128x128xf32, #tpu.memory_space<vmem>>, vector<128x128xf32>,
    } else {
    }
    return
  }
  func.func @transform_0(%arg0: i32, %arg1: i32, %arg2: i32) -> (i32, i32) {
    %c0_i32 = arith.constant 0 : i32
    return %arg0, %arg2 : i32, i32
  }
  func.func @transform_1(%arg0: i32, %arg1: i32, %arg2: i32) -> (i32, i32) {
    %c0_i32 = arith.constant 0 : i32
    return %arg2, %arg1 : i32, i32
  }
  func.func @transform_2(%arg0: i32, %arg1: i32, %arg2: i32) -> (i32, i32) {
    %c0_i32 = arith.constant 0 : i32
    %c0_i32_0 = arith.constant 0 : i32
    return %c0_i32, %arg1 : i32, i32
  }
  func.func @transform_3(%arg0: i32, %arg1: i32, %arg2: i32) -> (i32, i32) {
    %c0_i32 = arith.constant 0 : i32
    %c0_i32_0 = arith.constant 0 : i32
    return %c0_i32, %arg1 : i32, i32
  }
  func.func @transform_4(%arg0: i32, %arg1: i32, %arg2: i32) -> (i32, i32) {
    %c0_i32 = arith.constant 0 : i32
    return %arg0, %arg1 : i32, i32
  }
  func.func @transform_5(%arg0: i32, %arg1: i32, %arg2: i32) -> (i32, i32) {
    %c0_i32 = arith.constant 0 : i32
    return %arg0, %arg1 : i32, i32
  }
}

module attributes {stable_mosaic.version = 11 : i64} {
  func.func @_mm_kernel(%arg0: i32, %arg1: i32, %arg2: i32, %arg3: memref<32x256xbf16, #tpu.memory_space<vmem>>, %arg4: memref<256x128xbf16, #tpu.memory_space<vmem>>, %arg5: memref<1x128xf32, #tpu.memory_space<vmem>>, %arg6: memref<1x128xf32, #tpu.memory_space<vmem>>, %arg7: memref<32x128xf32, #tpu.memory_space<vmem>>) attributes {dimension_semantics = [#tpu.dimension_semantics<parallel>, #tpu.dimension_semantics<parallel>, #tpu.dimension_semantics<arbitrary>], iteration_bounds = array<i64: 1, 1, 3>, scalar_prefetch = 0 : i64, scratch_operands = 0 : i64, tpu.core_type = #tpu.core_type<tc>, window_params = [{transform_indices = @transform_0, window_bounds = array<i64: 32, 256>}, {transform_indices = @transform_1, window_bounds = array<i64: 256, 128>}, {transform_indices = @transform_2, window_bounds = array<i64: 1, 128>}, {transform_indices = @transform_3, window_bounds = array<i64: 1, 128>}, {transform_indices = @transform_4, window_bounds = array<i64: 32, 128>}]} {
    %c0_i32 = arith.constant 0 : i32
    %0 = arith.cmpi eq, %arg2, %c0_i32 : i32
    %1 = arith.extui %0 : i1 to i32
    %c0_i32_0 = arith.constant 0 : i32
    %2 = arith.cmpi ne, %1, %c0_i32_0 : i32
    scf.if %2 {
      %cst_9 = arith.constant 0.000000e+00 : f32
      %12 = vector.broadcast %cst_9 : f32 to vector<32x128xf32>
      %c0_10 = arith.constant 0 : index
      %c0_11 = arith.constant 0 : index
      %13 = vector.load %arg7[%c0_10, %c0_11] : memref<32x128xf32, #tpu.memory_space<vmem>>, vector<32x128xf32>
      tpu.vector_store %arg7[%c0_10, %c0_11], %12 {strides = array<i32>} : memref<32x128xf32, #tpu.memory_space<vmem>>, vector<32x128xf32>,
    } else {
    }
    %c0 = arith.constant 0 : index
    %c0_1 = arith.constant 0 : index
    %3 = vector.load %arg7[%c0, %c0_1] : memref<32x128xf32, #tpu.memory_space<vmem>>, vector<32x128xf32>
    %c0_2 = arith.constant 0 : index
    %c0_3 = arith.constant 0 : index
    %4 = vector.load %arg3[%c0_2, %c0_3] : memref<32x256xbf16, #tpu.memory_space<vmem>>, vector<32x256xbf16>
    %c0_4 = arith.constant 0 : index
    %c0_5 = arith.constant 0 : index
    %5 = vector.load %arg4[%c0_4, %c0_5] : memref<256x128xbf16, #tpu.memory_space<vmem>>, vector<256x128xbf16>
    %cst = arith.constant dense<0.000000e+00> : vector<32x128xf32>
    %6 = tpu.matmul %4, %5, %cst {dimension_numbers = #tpu.dot_dimension_numbers<[1], [0], [0], [1], [0, 0, 1, 1], [], []>} : vector<32x256xbf16>, vector<256x128xbf16>, vector<32x128xf32> -> vector<32x128xf32>
    %7 = arith.addf %3, %6 : vector<32x128xf32>
    %c0_6 = arith.constant 0 : index
    %c0_7 = arith.constant 0 : index
    %8 = vector.load %arg7[%c0_6, %c0_7] : memref<32x128xf32, #tpu.memory_space<vmem>>, vector<32x128xf32>
    tpu.vector_store %arg7[%c0_6, %c0_7], %7 {strides = array<i32>} : memref<32x128xf32, #tpu.memory_space<vmem>>, vector<32x128xf32>,
    %c2_i32 = arith.constant 2 : i32
    %9 = arith.cmpi eq, %arg2, %c2_i32 : i32
    %10 = arith.extui %9 : i1 to i32
    %c0_i32_8 = arith.constant 0 : i32
    %11 = arith.cmpi ne, %10, %c0_i32_8 : i32
    scf.if %11 {
      %c0_9 = arith.constant 0 : index
      %c0_10 = arith.constant 0 : index
      %12 = vector.load %arg7[%c0_9, %c0_10] : memref<32x128xf32, #tpu.memory_space<vmem>>, vector<32x128xf32>
      %c0_11 = arith.constant 0 : index
      %c0_12 = arith.constant 0 : index
      %13 = vector.load %arg5[%c0_11, %c0_12] : memref<1x128xf32, #tpu.memory_space<vmem>>, vector<1x128xf32>
      %14 = vector.broadcast %13 : vector<1x128xf32> to vector<32x128xf32>
      %15 = arith.mulf %12, %14 : vector<32x128xf32>
      %c0_13 = arith.constant 0 : index
      %c0_14 = arith.constant 0 : index
      %16 = vector.load %arg6[%c0_13, %c0_14] : memref<1x128xf32, #tpu.memory_space<vmem>>, vector<1x128xf32>
      %17 = vector.broadcast %16 : vector<1x128xf32> to vector<32x128xf32>
      %18 = arith.addf %15, %17 : vector<32x128xf32>
      %cst_15 = arith.constant 0.000000e+00 : f32
      %19 = vector.broadcast %cst_15 : f32 to vector<32x128xf32>
      %20 = arith.maximumf %18, %19 : vector<32x128xf32>
      %c0_16 = arith.constant 0 : index
      %c0_17 = arith.constant 0 : index
      %21 = vector.load %arg7[%c0_16, %c0_17] : memref<32x128xf32, #tpu.memory_space<vmem>>, vector<32x128xf32>
      tpu.vector_store %arg7[%c0_16, %c0_17], %20 {strides = array<i32>} : memref<32x128xf32, #tpu.memory_space<vmem>>, vector<32x128xf32>,
    } else {
    }
    return
  }
  func.func @transform_0(%arg0: i32, %arg1: i32, %arg2: i32) -> (i32, i32) {
    %c0_i32 = arith.constant 0 : i32
    return %arg0, %arg2 : i32, i32
  }
  func.func @transform_1(%arg0: i32, %arg1: i32, %arg2: i32) -> (i32, i32) {
    %c0_i32 = arith.constant 0 : i32
    return %arg2, %arg1 : i32, i32
  }
  func.func @transform_2(%arg0: i32, %arg1: i32, %arg2: i32) -> (i32, i32) {
    %c0_i32 = arith.constant 0 : i32
    %c0_i32_0 = arith.constant 0 : i32
    return %c0_i32, %arg1 : i32, i32
  }
  func.func @transform_3(%arg0: i32, %arg1: i32, %arg2: i32) -> (i32, i32) {
    %c0_i32 = arith.constant 0 : i32
    %c0_i32_0 = arith.constant 0 : i32
    return %c0_i32, %arg1 : i32, i32
  }
  func.func @transform_4(%arg0: i32, %arg1: i32, %arg2: i32) -> (i32, i32) {
    %c0_i32 = arith.constant 0 : i32
    return %arg0, %arg1 : i32, i32
  }
}

module attributes {stable_mosaic.version = 11 : i64} {
  func.func @_mm_kernel(%arg0: i32, %arg1: i32, %arg2: i32, %arg3: memref<32x128xbf16, #tpu.memory_space<vmem>>, %arg4: memref<128x128xbf16, #tpu.memory_space<vmem>>, %arg5: memref<1x128xf32, #tpu.memory_space<vmem>>, %arg6: memref<1x128xf32, #tpu.memory_space<vmem>>, %arg7: memref<32x128xf32, #tpu.memory_space<vmem>>) attributes {dimension_semantics = [#tpu.dimension_semantics<parallel>, #tpu.dimension_semantics<parallel>, #tpu.dimension_semantics<arbitrary>], iteration_bounds = array<i64: 1, 1, 1>, scalar_prefetch = 0 : i64, scratch_operands = 0 : i64, tpu.core_type = #tpu.core_type<tc>, window_params = [{transform_indices = @transform_0, window_bounds = array<i64: 32, 128>}, {transform_indices = @transform_1, window_bounds = array<i64: 128, 128>}, {transform_indices = @transform_2, window_bounds = array<i64: 1, 128>}, {transform_indices = @transform_3, window_bounds = array<i64: 1, 128>}, {transform_indices = @transform_4, window_bounds = array<i64: 32, 128>}]} {
    %c0_i32 = arith.constant 0 : i32
    %0 = arith.cmpi eq, %arg2, %c0_i32 : i32
    %1 = arith.extui %0 : i1 to i32
    %c0_i32_0 = arith.constant 0 : i32
    %2 = arith.cmpi ne, %1, %c0_i32_0 : i32
    scf.if %2 {
      %cst_10 = arith.constant 0.000000e+00 : f32
      %12 = vector.broadcast %cst_10 : f32 to vector<32x128xf32>
      %c0_11 = arith.constant 0 : index
      %c0_12 = arith.constant 0 : index
      %13 = vector.load %arg7[%c0_11, %c0_12] : memref<32x128xf32, #tpu.memory_space<vmem>>, vector<32x128xf32>
      tpu.vector_store %arg7[%c0_11, %c0_12], %12 {strides = array<i32>} : memref<32x128xf32, #tpu.memory_space<vmem>>, vector<32x128xf32>,
    } else {
    }
    %c0 = arith.constant 0 : index
    %c0_1 = arith.constant 0 : index
    %3 = vector.load %arg7[%c0, %c0_1] : memref<32x128xf32, #tpu.memory_space<vmem>>, vector<32x128xf32>
    %c0_2 = arith.constant 0 : index
    %c0_3 = arith.constant 0 : index
    %4 = vector.load %arg3[%c0_2, %c0_3] : memref<32x128xbf16, #tpu.memory_space<vmem>>, vector<32x128xbf16>
    %c0_4 = arith.constant 0 : index
    %c0_5 = arith.constant 0 : index
    %5 = vector.load %arg4[%c0_4, %c0_5] : memref<128x128xbf16, #tpu.memory_space<vmem>>, vector<128x128xbf16>
    %cst = arith.constant dense<0.000000e+00> : vector<32x128xf32>
    %6 = tpu.matmul %4, %5, %cst {dimension_numbers = #tpu.dot_dimension_numbers<[1], [0], [0], [1], [0, 0, 1, 1], [], []>} : vector<32x128xbf16>, vector<128x128xbf16>, vector<32x128xf32> -> vector<32x128xf32>
    %7 = arith.addf %3, %6 : vector<32x128xf32>
    %c0_6 = arith.constant 0 : index
    %c0_7 = arith.constant 0 : index
    %8 = vector.load %arg7[%c0_6, %c0_7] : memref<32x128xf32, #tpu.memory_space<vmem>>, vector<32x128xf32>
    tpu.vector_store %arg7[%c0_6, %c0_7], %7 {strides = array<i32>} : memref<32x128xf32, #tpu.memory_space<vmem>>, vector<32x128xf32>,
    %c0_i32_8 = arith.constant 0 : i32
    %9 = arith.cmpi eq, %arg2, %c0_i32_8 : i32
    %10 = arith.extui %9 : i1 to i32
    %c0_i32_9 = arith.constant 0 : i32
    %11 = arith.cmpi ne, %10, %c0_i32_9 : i32
    scf.if %11 {
      %c0_10 = arith.constant 0 : index
      %c0_11 = arith.constant 0 : index
      %12 = vector.load %arg7[%c0_10, %c0_11] : memref<32x128xf32, #tpu.memory_space<vmem>>, vector<32x128xf32>
      %c0_12 = arith.constant 0 : index
      %c0_13 = arith.constant 0 : index
      %13 = vector.load %arg5[%c0_12, %c0_13] : memref<1x128xf32, #tpu.memory_space<vmem>>, vector<1x128xf32>
      %14 = vector.broadcast %13 : vector<1x128xf32> to vector<32x128xf32>
      %15 = arith.mulf %12, %14 : vector<32x128xf32>
      %c0_14 = arith.constant 0 : index
      %c0_15 = arith.constant 0 : index
      %16 = vector.load %arg6[%c0_14, %c0_15] : memref<1x128xf32, #tpu.memory_space<vmem>>, vector<1x128xf32>
      %17 = vector.broadcast %16 : vector<1x128xf32> to vector<32x128xf32>
      %18 = arith.addf %15, %17 : vector<32x128xf32>
      %c0_16 = arith.constant 0 : index
      %c0_17 = arith.constant 0 : index
      %19 = vector.load %arg7[%c0_16, %c0_17] : memref<32x128xf32, #tpu.memory_space<vmem>>, vector<32x128xf32>
      tpu.vector_store %arg7[%c0_16, %c0_17], %18 {strides = array<i32>} : memref<32x128xf32, #tpu.memory_space<vmem>>, vector<32x128xf32>,
    } else {
    }
    return
  }
  func.func @transform_0(%arg0: i32, %arg1: i32, %arg2: i32) -> (i32, i32) {
    %c0_i32 = arith.constant 0 : i32
    return %arg0, %arg2 : i32, i32
  }
  func.func @transform_1(%arg0: i32, %arg1: i32, %arg2: i32) -> (i32, i32) {
    %c0_i32 = arith.constant 0 : i32
    return %arg2, %arg1 : i32, i32
  }
  func.func @transform_2(%arg0: i32, %arg1: i32, %arg2: i32) -> (i32, i32) {
    %c0_i32 = arith.constant 0 : i32
    %c0_i32_0 = arith.constant 0 : i32
    return %c0_i32, %arg1 : i32, i32
  }
  func.func @transform_3(%arg0: i32, %arg1: i32, %arg2: i32) -> (i32, i32) {
    %c0_i32 = arith.constant 0 : i32
    %c0_i32_0 = arith.constant 0 : i32
    return %c0_i32, %arg1 : i32, i32
  }
  func.func @transform_4(%arg0: i32, %arg1: i32, %arg2: i32) -> (i32, i32) {
    %c0_i32 = arith.constant 0 : i32
    return %arg0, %arg1 : i32, i32
  }
}

module attributes {stable_mosaic.version = 11 : i64} {
  func.func @_mm_kernel(%arg0: i32, %arg1: i32, %arg2: i32, %arg3: memref<32x256xbf16, #tpu.memory_space<vmem>>, %arg4: memref<256x128xbf16, #tpu.memory_space<vmem>>, %arg5: memref<1x128xf32, #tpu.memory_space<vmem>>, %arg6: memref<1x128xf32, #tpu.memory_space<vmem>>, %arg7: memref<32x128xf32, #tpu.memory_space<vmem>>, %arg8: memref<32x128xf32, #tpu.memory_space<vmem>>) attributes {dimension_semantics = [#tpu.dimension_semantics<parallel>, #tpu.dimension_semantics<parallel>, #tpu.dimension_semantics<arbitrary>], iteration_bounds = array<i64: 1, 1, 5>, scalar_prefetch = 0 : i64, scratch_operands = 0 : i64, tpu.core_type = #tpu.core_type<tc>, window_params = [{transform_indices = @transform_0, window_bounds = array<i64: 32, 256>}, {transform_indices = @transform_1, window_bounds = array<i64: 256, 128>}, {transform_indices = @transform_2, window_bounds = array<i64: 1, 128>}, {transform_indices = @transform_3, window_bounds = array<i64: 1, 128>}, {transform_indices = @transform_4, window_bounds = array<i64: 32, 128>}, {transform_indices = @transform_5, window_bounds = array<i64: 32, 128>}]} {
    %c0_i32 = arith.constant 0 : i32
    %0 = arith.cmpi eq, %arg2, %c0_i32 : i32
    %1 = arith.extui %0 : i1 to i32
    %c0_i32_0 = arith.constant 0 : i32
    %2 = arith.cmpi ne, %1, %c0_i32_0 : i32
    scf.if %2 {
      %cst_9 = arith.constant 0.000000e+00 : f32
      %12 = vector.broadcast %cst_9 : f32 to vector<32x128xf32>
      %c0_10 = arith.constant 0 : index
      %c0_11 = arith.constant 0 : index
      %13 = vector.load %arg8[%c0_10, %c0_11] : memref<32x128xf32, #tpu.memory_space<vmem>>, vector<32x128xf32>
      tpu.vector_store %arg8[%c0_10, %c0_11], %12 {strides = array<i32>} : memref<32x128xf32, #tpu.memory_space<vmem>>, vector<32x128xf32>,
    } else {
    }
    %c0 = arith.constant 0 : index
    %c0_1 = arith.constant 0 : index
    %3 = vector.load %arg8[%c0, %c0_1] : memref<32x128xf32, #tpu.memory_space<vmem>>, vector<32x128xf32>
    %c0_2 = arith.constant 0 : index
    %c0_3 = arith.constant 0 : index
    %4 = vector.load %arg3[%c0_2, %c0_3] : memref<32x256xbf16, #tpu.memory_space<vmem>>, vector<32x256xbf16>
    %c0_4 = arith.constant 0 : index
    %c0_5 = arith.constant 0 : index
    %5 = vector.load %arg4[%c0_4, %c0_5] : memref<256x128xbf16, #tpu.memory_space<vmem>>, vector<256x128xbf16>
    %cst = arith.constant dense<0.000000e+00> : vector<32x128xf32>
    %6 = tpu.matmul %4, %5, %cst {dimension_numbers = #tpu.dot_dimension_numbers<[1], [0], [0], [1], [0, 0, 1, 1], [], []>} : vector<32x256xbf16>, vector<256x128xbf16>, vector<32x128xf32> -> vector<32x128xf32>
    %7 = arith.addf %3, %6 : vector<32x128xf32>
    %c0_6 = arith.constant 0 : index
    %c0_7 = arith.constant 0 : index
    %8 = vector.load %arg8[%c0_6, %c0_7] : memref<32x128xf32, #tpu.memory_space<vmem>>, vector<32x128xf32>
    tpu.vector_store %arg8[%c0_6, %c0_7], %7 {strides = array<i32>} : memref<32x128xf32, #tpu.memory_space<vmem>>, vector<32x128xf32>,
    %c4_i32 = arith.constant 4 : i32
    %9 = arith.cmpi eq, %arg2, %c4_i32 : i32
    %10 = arith.extui %9 : i1 to i32
    %c0_i32_8 = arith.constant 0 : i32
    %11 = arith.cmpi ne, %10, %c0_i32_8 : i32
    scf.if %11 {
      %c0_9 = arith.constant 0 : index
      %c0_10 = arith.constant 0 : index
      %12 = vector.load %arg8[%c0_9, %c0_10] : memref<32x128xf32, #tpu.memory_space<vmem>>, vector<32x128xf32>
      %c0_11 = arith.constant 0 : index
      %c0_12 = arith.constant 0 : index
      %13 = vector.load %arg5[%c0_11, %c0_12] : memref<1x128xf32, #tpu.memory_space<vmem>>, vector<1x128xf32>
      %14 = vector.broadcast %13 : vector<1x128xf32> to vector<32x128xf32>
      %15 = arith.mulf %12, %14 : vector<32x128xf32>
      %c0_13 = arith.constant 0 : index
      %c0_14 = arith.constant 0 : index
      %16 = vector.load %arg6[%c0_13, %c0_14] : memref<1x128xf32, #tpu.memory_space<vmem>>, vector<1x128xf32>
      %17 = vector.broadcast %16 : vector<1x128xf32> to vector<32x128xf32>
      %18 = arith.addf %15, %17 : vector<32x128xf32>
      %c0_15 = arith.constant 0 : index
      %c0_16 = arith.constant 0 : index
      %19 = vector.load %arg7[%c0_15, %c0_16] : memref<32x128xf32, #tpu.memory_space<vmem>>, vector<32x128xf32>
      %20 = arith.addf %18, %19 : vector<32x128xf32>
      %cst_17 = arith.constant 0.000000e+00 : f32
      %21 = vector.broadcast %cst_17 : f32 to vector<32x128xf32>
      %22 = arith.maximumf %20, %21 : vector<32x128xf32>
      %c0_18 = arith.constant 0 : index
      %c0_19 = arith.constant 0 : index
      %23 = vector.load %arg8[%c0_18, %c0_19] : memref<32x128xf32, #tpu.memory_space<vmem>>, vector<32x128xf32>
      tpu.vector_store %arg8[%c0_18, %c0_19], %22 {strides = array<i32>} : memref<32x128xf32, #tpu.memory_space<vmem>>, vector<32x128xf32>,
    } else {
    }
    return
  }
  func.func @transform_0(%arg0: i32, %arg1: i32, %arg2: i32) -> (i32, i32) {
    %c0_i32 = arith.constant 0 : i32
    return %arg0, %arg2 : i32, i32
  }
  func.func @transform_1(%arg0: i32, %arg1: i32, %arg2: i32) -> (i32, i32) {
    %c0_i32 = arith.constant 0 : i32
    return %arg2, %arg1 : i32, i32
  }
  func.func @transform_2(%arg0: i32, %arg1: i32, %arg2: i32) -> (i32, i32) {
    %c0_i32 = arith.constant 0 : i32
    %c0_i32_0 = arith.constant 0 : i32
    return %c0_i32, %arg1 : i32, i32
  }
  func.func @transform_3(%arg0: i32, %arg1: i32, %arg2: i32) -> (i32, i32) {
    %c0_i32 = arith.constant 0 : i32
    %c0_i32_0 = arith.constant 0 : i32
    return %c0_i32, %arg1 : i32, i32
  }
  func.func @transform_4(%arg0: i32, %arg1: i32, %arg2: i32) -> (i32, i32) {
    %c0_i32 = arith.constant 0 : i32
    return %arg0, %arg1 : i32, i32
  }
  func.func @transform_5(%arg0: i32, %arg1: i32, %arg2: i32) -> (i32, i32) {
    %c0_i32 = arith.constant 0 : i32
    return %arg0, %arg1 : i32, i32
  }
}

module attributes {stable_mosaic.version = 11 : i64} {
  func.func @_mm_kernel(%arg0: i32, %arg1: i32, %arg2: i32, %arg3: memref<32x256xbf16, #tpu.memory_space<vmem>>, %arg4: memref<256x128xbf16, #tpu.memory_space<vmem>>, %arg5: memref<1x128xf32, #tpu.memory_space<vmem>>, %arg6: memref<1x128xf32, #tpu.memory_space<vmem>>, %arg7: memref<32x128xf32, #tpu.memory_space<vmem>>) attributes {dimension_semantics = [#tpu.dimension_semantics<parallel>, #tpu.dimension_semantics<parallel>, #tpu.dimension_semantics<arbitrary>], iteration_bounds = array<i64: 1, 1, 5>, scalar_prefetch = 0 : i64, scratch_operands = 0 : i64, tpu.core_type = #tpu.core_type<tc>, window_params = [{transform_indices = @transform_0, window_bounds = array<i64: 32, 256>}, {transform_indices = @transform_1, window_bounds = array<i64: 256, 128>}, {transform_indices = @transform_2, window_bounds = array<i64: 1, 128>}, {transform_indices = @transform_3, window_bounds = array<i64: 1, 128>}, {transform_indices = @transform_4, window_bounds = array<i64: 32, 128>}]} {
    %c0_i32 = arith.constant 0 : i32
    %0 = arith.cmpi eq, %arg2, %c0_i32 : i32
    %1 = arith.extui %0 : i1 to i32
    %c0_i32_0 = arith.constant 0 : i32
    %2 = arith.cmpi ne, %1, %c0_i32_0 : i32
    scf.if %2 {
      %cst_9 = arith.constant 0.000000e+00 : f32
      %12 = vector.broadcast %cst_9 : f32 to vector<32x128xf32>
      %c0_10 = arith.constant 0 : index
      %c0_11 = arith.constant 0 : index
      %13 = vector.load %arg7[%c0_10, %c0_11] : memref<32x128xf32, #tpu.memory_space<vmem>>, vector<32x128xf32>
      tpu.vector_store %arg7[%c0_10, %c0_11], %12 {strides = array<i32>} : memref<32x128xf32, #tpu.memory_space<vmem>>, vector<32x128xf32>,
    } else {
    }
    %c0 = arith.constant 0 : index
    %c0_1 = arith.constant 0 : index
    %3 = vector.load %arg7[%c0, %c0_1] : memref<32x128xf32, #tpu.memory_space<vmem>>, vector<32x128xf32>
    %c0_2 = arith.constant 0 : index
    %c0_3 = arith.constant 0 : index
    %4 = vector.load %arg3[%c0_2, %c0_3] : memref<32x256xbf16, #tpu.memory_space<vmem>>, vector<32x256xbf16>
    %c0_4 = arith.constant 0 : index
    %c0_5 = arith.constant 0 : index
    %5 = vector.load %arg4[%c0_4, %c0_5] : memref<256x128xbf16, #tpu.memory_space<vmem>>, vector<256x128xbf16>
    %cst = arith.constant dense<0.000000e+00> : vector<32x128xf32>
    %6 = tpu.matmul %4, %5, %cst {dimension_numbers = #tpu.dot_dimension_numbers<[1], [0], [0], [1], [0, 0, 1, 1], [], []>} : vector<32x256xbf16>, vector<256x128xbf16>, vector<32x128xf32> -> vector<32x128xf32>
    %7 = arith.addf %3, %6 : vector<32x128xf32>
    %c0_6 = arith.constant 0 : index
    %c0_7 = arith.constant 0 : index
    %8 = vector.load %arg7[%c0_6, %c0_7] : memref<32x128xf32, #tpu.memory_space<vmem>>, vector<32x128xf32>
    tpu.vector_store %arg7[%c0_6, %c0_7], %7 {strides = array<i32>} : memref<32x128xf32, #tpu.memory_space<vmem>>, vector<32x128xf32>,
    %c4_i32 = arith.constant 4 : i32
    %9 = arith.cmpi eq, %arg2, %c4_i32 : i32
    %10 = arith.extui %9 : i1 to i32
    %c0_i32_8 = arith.constant 0 : i32
    %11 = arith.cmpi ne, %10, %c0_i32_8 : i32
    scf.if %11 {
      %c0_9 = arith.constant 0 : index
      %c0_10 = arith.constant 0 : index
      %12 = vector.load %arg7[%c0_9, %c0_10] : memref<32x128xf32, #tpu.memory_space<vmem>>, vector<32x128xf32>
      %c0_11 = arith.constant 0 : index
      %c0_12 = arith.constant 0 : index
      %13 = vector.load %arg5[%c0_11, %c0_12] : memref<1x128xf32, #tpu.memory_space<vmem>>, vector<1x128xf32>
      %14 = vector.broadcast %13 : vector<1x128xf32> to vector<32x128xf32>
      %15 = arith.mulf %12, %14 : vector<32x128xf32>
      %c0_13 = arith.constant 0 : index
      %c0_14 = arith.constant 0 : index
      %16 = vector.load %arg6[%c0_13, %c0_14] : memref<1x128xf32, #tpu.memory_space<vmem>>, vector<1x128xf32>
      %17 = vector.broadcast %16 : vector<1x128xf32> to vector<32x128xf32>
      %18 = arith.addf %15, %17 : vector<32x128xf32>
      %cst_15 = arith.constant 0.000000e+00 : f32
      %19 = vector.broadcast %cst_15 : f32 to vector<32x128xf32>
      %20 = arith.maximumf %18, %19 : vector<32x128xf32>
      %c0_16 = arith.constant 0 : index
      %c0_17 = arith.constant 0 : index
      %21 = vector.load %arg7[%c0_16, %c0_17] : memref<32x128xf32, #tpu.memory_space<vmem>>, vector<32x128xf32>
      tpu.vector_store %arg7[%c0_16, %c0_17], %20 {strides = array<i32>} : memref<32x128xf32, #tpu.memory_space<vmem>>, vector<32x128xf32>,
    } else {
    }
    return
  }
  func.func @transform_0(%arg0: i32, %arg1: i32, %arg2: i32) -> (i32, i32) {
    %c0_i32 = arith.constant 0 : i32
    return %arg0, %arg2 : i32, i32
  }
  func.func @transform_1(%arg0: i32, %arg1: i32, %arg2: i32) -> (i32, i32) {
    %c0_i32 = arith.constant 0 : i32
    return %arg2, %arg1 : i32, i32
  }
  func.func @transform_2(%arg0: i32, %arg1: i32, %arg2: i32) -> (i32, i32) {
    %c0_i32 = arith.constant 0 : i32
    %c0_i32_0 = arith.constant 0 : i32
    return %c0_i32, %arg1 : i32, i32
  }
  func.func @transform_3(%arg0: i32, %arg1: i32, %arg2: i32) -> (i32, i32) {
    %c0_i32 = arith.constant 0 : i32
    %c0_i32_0 = arith.constant 0 : i32
    return %c0_i32, %arg1 : i32, i32
  }
  func.func @transform_4(%arg0: i32, %arg1: i32, %arg2: i32) -> (i32, i32) {
    %c0_i32 = arith.constant 0 : i32
    return %arg0, %arg1 : i32, i32
  }
}

module attributes {stable_mosaic.version = 11 : i64} {
  func.func @_mm_kernel(%arg0: i32, %arg1: i32, %arg2: i32, %arg3: memref<16x256xbf16, #tpu.memory_space<vmem>>, %arg4: memref<256x256xbf16, #tpu.memory_space<vmem>>, %arg5: memref<1x256xf32, #tpu.memory_space<vmem>>, %arg6: memref<1x256xf32, #tpu.memory_space<vmem>>, %arg7: memref<16x256xf32, #tpu.memory_space<vmem>>) attributes {dimension_semantics = [#tpu.dimension_semantics<parallel>, #tpu.dimension_semantics<parallel>, #tpu.dimension_semantics<arbitrary>], iteration_bounds = array<i64: 1, 1, 5>, scalar_prefetch = 0 : i64, scratch_operands = 0 : i64, tpu.core_type = #tpu.core_type<tc>, window_params = [{transform_indices = @transform_0, window_bounds = array<i64: 16, 256>}, {transform_indices = @transform_1, window_bounds = array<i64: 256, 256>}, {transform_indices = @transform_2, window_bounds = array<i64: 1, 256>}, {transform_indices = @transform_3, window_bounds = array<i64: 1, 256>}, {transform_indices = @transform_4, window_bounds = array<i64: 16, 256>}]} {
    %c0_i32 = arith.constant 0 : i32
    %0 = arith.cmpi eq, %arg2, %c0_i32 : i32
    %1 = arith.extui %0 : i1 to i32
    %c0_i32_0 = arith.constant 0 : i32
    %2 = arith.cmpi ne, %1, %c0_i32_0 : i32
    scf.if %2 {
      %cst_9 = arith.constant 0.000000e+00 : f32
      %12 = vector.broadcast %cst_9 : f32 to vector<16x256xf32>
      %c0_10 = arith.constant 0 : index
      %c0_11 = arith.constant 0 : index
      %13 = vector.load %arg7[%c0_10, %c0_11] : memref<16x256xf32, #tpu.memory_space<vmem>>, vector<16x256xf32>
      tpu.vector_store %arg7[%c0_10, %c0_11], %12 {strides = array<i32>} : memref<16x256xf32, #tpu.memory_space<vmem>>, vector<16x256xf32>,
    } else {
    }
    %c0 = arith.constant 0 : index
    %c0_1 = arith.constant 0 : index
    %3 = vector.load %arg7[%c0, %c0_1] : memref<16x256xf32, #tpu.memory_space<vmem>>, vector<16x256xf32>
    %c0_2 = arith.constant 0 : index
    %c0_3 = arith.constant 0 : index
    %4 = vector.load %arg3[%c0_2, %c0_3] : memref<16x256xbf16, #tpu.memory_space<vmem>>, vector<16x256xbf16>
    %c0_4 = arith.constant 0 : index
    %c0_5 = arith.constant 0 : index
    %5 = vector.load %arg4[%c0_4, %c0_5] : memref<256x256xbf16, #tpu.memory_space<vmem>>, vector<256x256xbf16>
    %cst = arith.constant dense<0.000000e+00> : vector<16x256xf32>
    %6 = tpu.matmul %4, %5, %cst {dimension_numbers = #tpu.dot_dimension_numbers<[1], [0], [0], [1], [0, 0, 1, 1], [], []>} : vector<16x256xbf16>, vector<256x256xbf16>, vector<16x256xf32> -> vector<16x256xf32>
    %7 = arith.addf %3, %6 : vector<16x256xf32>
    %c0_6 = arith.constant 0 : index
    %c0_7 = arith.constant 0 : index
    %8 = vector.load %arg7[%c0_6, %c0_7] : memref<16x256xf32, #tpu.memory_space<vmem>>, vector<16x256xf32>
    tpu.vector_store %arg7[%c0_6, %c0_7], %7 {strides = array<i32>} : memref<16x256xf32, #tpu.memory_space<vmem>>, vector<16x256xf32>,
    %c4_i32 = arith.constant 4 : i32
    %9 = arith.cmpi eq, %arg2, %c4_i32 : i32
    %10 = arith.extui %9 : i1 to i32
    %c0_i32_8 = arith.constant 0 : i32
    %11 = arith.cmpi ne, %10, %c0_i32_8 : i32
    scf.if %11 {
      %c0_9 = arith.constant 0 : index
      %c0_10 = arith.constant 0 : index
      %12 = vector.load %arg7[%c0_9, %c0_10] : memref<16x256xf32, #tpu.memory_space<vmem>>, vector<16x256xf32>
      %c0_11 = arith.constant 0 : index
      %c0_12 = arith.constant 0 : index
      %13 = vector.load %arg5[%c0_11, %c0_12] : memref<1x256xf32, #tpu.memory_space<vmem>>, vector<1x256xf32>
      %14 = vector.broadcast %13 : vector<1x256xf32> to vector<16x256xf32>
      %15 = arith.mulf %12, %14 : vector<16x256xf32>
      %c0_13 = arith.constant 0 : index
      %c0_14 = arith.constant 0 : index
      %16 = vector.load %arg6[%c0_13, %c0_14] : memref<1x256xf32, #tpu.memory_space<vmem>>, vector<1x256xf32>
      %17 = vector.broadcast %16 : vector<1x256xf32> to vector<16x256xf32>
      %18 = arith.addf %15, %17 : vector<16x256xf32>
      %cst_15 = arith.constant 0.000000e+00 : f32
      %19 = vector.broadcast %cst_15 : f32 to vector<16x256xf32>
      %20 = arith.maximumf %18, %19 : vector<16x256xf32>
      %c0_16 = arith.constant 0 : index
      %c0_17 = arith.constant 0 : index
      %21 = vector.load %arg7[%c0_16, %c0_17] : memref<16x256xf32, #tpu.memory_space<vmem>>, vector<16x256xf32>
      tpu.vector_store %arg7[%c0_16, %c0_17], %20 {strides = array<i32>} : memref<16x256xf32, #tpu.memory_space<vmem>>, vector<16x256xf32>,
    } else {
    }
    return
  }
  func.func @transform_0(%arg0: i32, %arg1: i32, %arg2: i32) -> (i32, i32) {
    %c0_i32 = arith.constant 0 : i32
    return %arg0, %arg2 : i32, i32
  }
  func.func @transform_1(%arg0: i32, %arg1: i32, %arg2: i32) -> (i32, i32) {
    %c0_i32 = arith.constant 0 : i32
    return %arg2, %arg1 : i32, i32
  }
  func.func @transform_2(%arg0: i32, %arg1: i32, %arg2: i32) -> (i32, i32) {
    %c0_i32 = arith.constant 0 : i32
    %c0_i32_0 = arith.constant 0 : i32
    return %c0_i32, %arg1 : i32, i32
  }
  func.func @transform_3(%arg0: i32, %arg1: i32, %arg2: i32) -> (i32, i32) {
    %c0_i32 = arith.constant 0 : i32
    %c0_i32_0 = arith.constant 0 : i32
    return %c0_i32, %arg1 : i32, i32
  }
  func.func @transform_4(%arg0: i32, %arg1: i32, %arg2: i32) -> (i32, i32) {
    %c0_i32 = arith.constant 0 : i32
    return %arg0, %arg1 : i32, i32
  }
}

module attributes {stable_mosaic.version = 11 : i64} {
  func.func @_mm_kernel(%arg0: i32, %arg1: i32, %arg2: i32, %arg3: memref<16x128xbf16, #tpu.memory_space<vmem>>, %arg4: memref<128x256xbf16, #tpu.memory_space<vmem>>, %arg5: memref<1x256xf32, #tpu.memory_space<vmem>>, %arg6: memref<1x256xf32, #tpu.memory_space<vmem>>, %arg7: memref<16x256xf32, #tpu.memory_space<vmem>>) attributes {dimension_semantics = [#tpu.dimension_semantics<parallel>, #tpu.dimension_semantics<parallel>, #tpu.dimension_semantics<arbitrary>], iteration_bounds = array<i64: 1, 1, 1>, scalar_prefetch = 0 : i64, scratch_operands = 0 : i64, tpu.core_type = #tpu.core_type<tc>, window_params = [{transform_indices = @transform_0, window_bounds = array<i64: 16, 128>}, {transform_indices = @transform_1, window_bounds = array<i64: 128, 256>}, {transform_indices = @transform_2, window_bounds = array<i64: 1, 256>}, {transform_indices = @transform_3, window_bounds = array<i64: 1, 256>}, {transform_indices = @transform_4, window_bounds = array<i64: 16, 256>}]} {
    %c0_i32 = arith.constant 0 : i32
    %0 = arith.cmpi eq, %arg2, %c0_i32 : i32
    %1 = arith.extui %0 : i1 to i32
    %c0_i32_0 = arith.constant 0 : i32
    %2 = arith.cmpi ne, %1, %c0_i32_0 : i32
    scf.if %2 {
      %cst_10 = arith.constant 0.000000e+00 : f32
      %12 = vector.broadcast %cst_10 : f32 to vector<16x256xf32>
      %c0_11 = arith.constant 0 : index
      %c0_12 = arith.constant 0 : index
      %13 = vector.load %arg7[%c0_11, %c0_12] : memref<16x256xf32, #tpu.memory_space<vmem>>, vector<16x256xf32>
      tpu.vector_store %arg7[%c0_11, %c0_12], %12 {strides = array<i32>} : memref<16x256xf32, #tpu.memory_space<vmem>>, vector<16x256xf32>,
    } else {
    }
    %c0 = arith.constant 0 : index
    %c0_1 = arith.constant 0 : index
    %3 = vector.load %arg7[%c0, %c0_1] : memref<16x256xf32, #tpu.memory_space<vmem>>, vector<16x256xf32>
    %c0_2 = arith.constant 0 : index
    %c0_3 = arith.constant 0 : index
    %4 = vector.load %arg3[%c0_2, %c0_3] : memref<16x128xbf16, #tpu.memory_space<vmem>>, vector<16x128xbf16>
    %c0_4 = arith.constant 0 : index
    %c0_5 = arith.constant 0 : index
    %5 = vector.load %arg4[%c0_4, %c0_5] : memref<128x256xbf16, #tpu.memory_space<vmem>>, vector<128x256xbf16>
    %cst = arith.constant dense<0.000000e+00> : vector<16x256xf32>
    %6 = tpu.matmul %4, %5, %cst {dimension_numbers = #tpu.dot_dimension_numbers<[1], [0], [0], [1], [0, 0, 1, 1], [], []>} : vector<16x128xbf16>, vector<128x256xbf16>, vector<16x256xf32> -> vector<16x256xf32>
    %7 = arith.addf %3, %6 : vector<16x256xf32>
    %c0_6 = arith.constant 0 : index
    %c0_7 = arith.constant 0 : index
    %8 = vector.load %arg7[%c0_6, %c0_7] : memref<16x256xf32, #tpu.memory_space<vmem>>, vector<16x256xf32>
    tpu.vector_store %arg7[%c0_6, %c0_7], %7 {strides = array<i32>} : memref<16x256xf32, #tpu.memory_space<vmem>>, vector<16x256xf32>,
    %c0_i32_8 = arith.constant 0 : i32
    %9 = arith.cmpi eq, %arg2, %c0_i32_8 : i32
    %10 = arith.extui %9 : i1 to i32
    %c0_i32_9 = arith.constant 0 : i32
    %11 = arith.cmpi ne, %10, %c0_i32_9 : i32
    scf.if %11 {
      %c0_10 = arith.constant 0 : index
      %c0_11 = arith.constant 0 : index
      %12 = vector.load %arg7[%c0_10, %c0_11] : memref<16x256xf32, #tpu.memory_space<vmem>>, vector<16x256xf32>
      %c0_12 = arith.constant 0 : index
      %c0_13 = arith.constant 0 : index
      %13 = vector.load %arg5[%c0_12, %c0_13] : memref<1x256xf32, #tpu.memory_space<vmem>>, vector<1x256xf32>
      %14 = vector.broadcast %13 : vector<1x256xf32> to vector<16x256xf32>
      %15 = arith.mulf %12, %14 : vector<16x256xf32>
      %c0_14 = arith.constant 0 : index
      %c0_15 = arith.constant 0 : index
      %16 = vector.load %arg6[%c0_14, %c0_15] : memref<1x256xf32, #tpu.memory_space<vmem>>, vector<1x256xf32>
      %17 = vector.broadcast %16 : vector<1x256xf32> to vector<16x256xf32>
      %18 = arith.addf %15, %17 : vector<16x256xf32>
      %c0_16 = arith.constant 0 : index
      %c0_17 = arith.constant 0 : index
      %19 = vector.load %arg7[%c0_16, %c0_17] : memref<16x256xf32, #tpu.memory_space<vmem>>, vector<16x256xf32>
      tpu.vector_store %arg7[%c0_16, %c0_17], %18 {strides = array<i32>} : memref<16x256xf32, #tpu.memory_space<vmem>>, vector<16x256xf32>,
    } else {
    }
    return
  }
  func.func @transform_0(%arg0: i32, %arg1: i32, %arg2: i32) -> (i32, i32) {
    %c0_i32 = arith.constant 0 : i32
    return %arg0, %arg2 : i32, i32
  }
  func.func @transform_1(%arg0: i32, %arg1: i32, %arg2: i32) -> (i32, i32) {
    %c0_i32 = arith.constant 0 : i32
    return %arg2, %arg1 : i32, i32
  }
  func.func @transform_2(%arg0: i32, %arg1: i32, %arg2: i32) -> (i32, i32) {
    %c0_i32 = arith.constant 0 : i32
    %c0_i32_0 = arith.constant 0 : i32
    return %c0_i32, %arg1 : i32, i32
  }
  func.func @transform_3(%arg0: i32, %arg1: i32, %arg2: i32) -> (i32, i32) {
    %c0_i32 = arith.constant 0 : i32
    %c0_i32_0 = arith.constant 0 : i32
    return %c0_i32, %arg1 : i32, i32
  }
  func.func @transform_4(%arg0: i32, %arg1: i32, %arg2: i32) -> (i32, i32) {
    %c0_i32 = arith.constant 0 : i32
    return %arg0, %arg1 : i32, i32
  }
}

module attributes {stable_mosaic.version = 11 : i64} {
  func.func @_mm_kernel(%arg0: i32, %arg1: i32, %arg2: i32, %arg3: memref<16x256xbf16, #tpu.memory_space<vmem>>, %arg4: memref<256x256xbf16, #tpu.memory_space<vmem>>, %arg5: memref<1x256xf32, #tpu.memory_space<vmem>>, %arg6: memref<1x256xf32, #tpu.memory_space<vmem>>, %arg7: memref<16x256xf32, #tpu.memory_space<vmem>>, %arg8: memref<16x256xf32, #tpu.memory_space<vmem>>) attributes {dimension_semantics = [#tpu.dimension_semantics<parallel>, #tpu.dimension_semantics<parallel>, #tpu.dimension_semantics<arbitrary>], iteration_bounds = array<i64: 1, 1, 9>, scalar_prefetch = 0 : i64, scratch_operands = 0 : i64, tpu.core_type = #tpu.core_type<tc>, window_params = [{transform_indices = @transform_0, window_bounds = array<i64: 16, 256>}, {transform_indices = @transform_1, window_bounds = array<i64: 256, 256>}, {transform_indices = @transform_2, window_bounds = array<i64: 1, 256>}, {transform_indices = @transform_3, window_bounds = array<i64: 1, 256>}, {transform_indices = @transform_4, window_bounds = array<i64: 16, 256>}, {transform_indices = @transform_5, window_bounds = array<i64: 16, 256>}]} {
    %c0_i32 = arith.constant 0 : i32
    %0 = arith.cmpi eq, %arg2, %c0_i32 : i32
    %1 = arith.extui %0 : i1 to i32
    %c0_i32_0 = arith.constant 0 : i32
    %2 = arith.cmpi ne, %1, %c0_i32_0 : i32
    scf.if %2 {
      %cst_9 = arith.constant 0.000000e+00 : f32
      %12 = vector.broadcast %cst_9 : f32 to vector<16x256xf32>
      %c0_10 = arith.constant 0 : index
      %c0_11 = arith.constant 0 : index
      %13 = vector.load %arg8[%c0_10, %c0_11] : memref<16x256xf32, #tpu.memory_space<vmem>>, vector<16x256xf32>
      tpu.vector_store %arg8[%c0_10, %c0_11], %12 {strides = array<i32>} : memref<16x256xf32, #tpu.memory_space<vmem>>, vector<16x256xf32>,
    } else {
    }
    %c0 = arith.constant 0 : index
    %c0_1 = arith.constant 0 : index
    %3 = vector.load %arg8[%c0, %c0_1] : memref<16x256xf32, #tpu.memory_space<vmem>>, vector<16x256xf32>
    %c0_2 = arith.constant 0 : index
    %c0_3 = arith.constant 0 : index
    %4 = vector.load %arg3[%c0_2, %c0_3] : memref<16x256xbf16, #tpu.memory_space<vmem>>, vector<16x256xbf16>
    %c0_4 = arith.constant 0 : index
    %c0_5 = arith.constant 0 : index
    %5 = vector.load %arg4[%c0_4, %c0_5] : memref<256x256xbf16, #tpu.memory_space<vmem>>, vector<256x256xbf16>
    %cst = arith.constant dense<0.000000e+00> : vector<16x256xf32>
    %6 = tpu.matmul %4, %5, %cst {dimension_numbers = #tpu.dot_dimension_numbers<[1], [0], [0], [1], [0, 0, 1, 1], [], []>} : vector<16x256xbf16>, vector<256x256xbf16>, vector<16x256xf32> -> vector<16x256xf32>
    %7 = arith.addf %3, %6 : vector<16x256xf32>
    %c0_6 = arith.constant 0 : index
    %c0_7 = arith.constant 0 : index
    %8 = vector.load %arg8[%c0_6, %c0_7] : memref<16x256xf32, #tpu.memory_space<vmem>>, vector<16x256xf32>
    tpu.vector_store %arg8[%c0_6, %c0_7], %7 {strides = array<i32>} : memref<16x256xf32, #tpu.memory_space<vmem>>, vector<16x256xf32>,
    %c8_i32 = arith.constant 8 : i32
    %9 = arith.cmpi eq, %arg2, %c8_i32 : i32
    %10 = arith.extui %9 : i1 to i32
    %c0_i32_8 = arith.constant 0 : i32
    %11 = arith.cmpi ne, %10, %c0_i32_8 : i32
    scf.if %11 {
      %c0_9 = arith.constant 0 : index
      %c0_10 = arith.constant 0 : index
      %12 = vector.load %arg8[%c0_9, %c0_10] : memref<16x256xf32, #tpu.memory_space<vmem>>, vector<16x256xf32>
      %c0_11 = arith.constant 0 : index
      %c0_12 = arith.constant 0 : index
      %13 = vector.load %arg5[%c0_11, %c0_12] : memref<1x256xf32, #tpu.memory_space<vmem>>, vector<1x256xf32>
      %14 = vector.broadcast %13 : vector<1x256xf32> to vector<16x256xf32>
      %15 = arith.mulf %12, %14 : vector<16x256xf32>
      %c0_13 = arith.constant 0 : index
      %c0_14 = arith.constant 0 : index
      %16 = vector.load %arg6[%c0_13, %c0_14] : memref<1x256xf32, #tpu.memory_space<vmem>>, vector<1x256xf32>
      %17 = vector.broadcast %16 : vector<1x256xf32> to vector<16x256xf32>
      %18 = arith.addf %15, %17 : vector<16x256xf32>
      %c0_15 = arith.constant 0 : index
      %c0_16 = arith.constant 0 : index
      %19 = vector.load %arg7[%c0_15, %c0_16] : memref<16x256xf32, #tpu.memory_space<vmem>>, vector<16x256xf32>
      %20 = arith.addf %18, %19 : vector<16x256xf32>
      %cst_17 = arith.constant 0.000000e+00 : f32
      %21 = vector.broadcast %cst_17 : f32 to vector<16x256xf32>
      %22 = arith.maximumf %20, %21 : vector<16x256xf32>
      %c0_18 = arith.constant 0 : index
      %c0_19 = arith.constant 0 : index
      %23 = vector.load %arg8[%c0_18, %c0_19] : memref<16x256xf32, #tpu.memory_space<vmem>>, vector<16x256xf32>
      tpu.vector_store %arg8[%c0_18, %c0_19], %22 {strides = array<i32>} : memref<16x256xf32, #tpu.memory_space<vmem>>, vector<16x256xf32>,
    } else {
    }
    return
  }
  func.func @transform_0(%arg0: i32, %arg1: i32, %arg2: i32) -> (i32, i32) {
    %c0_i32 = arith.constant 0 : i32
    return %arg0, %arg2 : i32, i32
  }
  func.func @transform_1(%arg0: i32, %arg1: i32, %arg2: i32) -> (i32, i32) {
    %c0_i32 = arith.constant 0 : i32
    return %arg2, %arg1 : i32, i32
  }
  func.func @transform_2(%arg0: i32, %arg1: i32, %arg2: i32) -> (i32, i32) {
    %c0_i32 = arith.constant 0 : i32
    %c0_i32_0 = arith.constant 0 : i32
    return %c0_i32, %arg1 : i32, i32
  }
  func.func @transform_3(%arg0: i32, %arg1: i32, %arg2: i32) -> (i32, i32) {
    %c0_i32 = arith.constant 0 : i32
    %c0_i32_0 = arith.constant 0 : i32
    return %c0_i32, %arg1 : i32, i32
  }
  func.func @transform_4(%arg0: i32, %arg1: i32, %arg2: i32) -> (i32, i32) {
    %c0_i32 = arith.constant 0 : i32
    return %arg0, %arg1 : i32, i32
  }
  func.func @transform_5(%arg0: i32, %arg1: i32, %arg2: i32) -> (i32, i32) {
    %c0_i32 = arith.constant 0 : i32
    return %arg0, %arg1 : i32, i32
  }
}

module attributes {stable_mosaic.version = 11 : i64} {
  func.func @_mm_kernel(%arg0: i32, %arg1: i32, %arg2: i32, %arg3: memref<16x256xbf16, #tpu.memory_space<vmem>>, %arg4: memref<256x256xbf16, #tpu.memory_space<vmem>>, %arg5: memref<1x256xf32, #tpu.memory_space<vmem>>, %arg6: memref<1x256xf32, #tpu.memory_space<vmem>>, %arg7: memref<16x256xf32, #tpu.memory_space<vmem>>) attributes {dimension_semantics = [#tpu.dimension_semantics<parallel>, #tpu.dimension_semantics<parallel>, #tpu.dimension_semantics<arbitrary>], iteration_bounds = array<i64: 1, 1, 9>, scalar_prefetch = 0 : i64, scratch_operands = 0 : i64, tpu.core_type = #tpu.core_type<tc>, window_params = [{transform_indices = @transform_0, window_bounds = array<i64: 16, 256>}, {transform_indices = @transform_1, window_bounds = array<i64: 256, 256>}, {transform_indices = @transform_2, window_bounds = array<i64: 1, 256>}, {transform_indices = @transform_3, window_bounds = array<i64: 1, 256>}, {transform_indices = @transform_4, window_bounds = array<i64: 16, 256>}]} {
    %c0_i32 = arith.constant 0 : i32
    %0 = arith.cmpi eq, %arg2, %c0_i32 : i32
    %1 = arith.extui %0 : i1 to i32
    %c0_i32_0 = arith.constant 0 : i32
    %2 = arith.cmpi ne, %1, %c0_i32_0 : i32
    scf.if %2 {
      %cst_9 = arith.constant 0.000000e+00 : f32
      %12 = vector.broadcast %cst_9 : f32 to vector<16x256xf32>
      %c0_10 = arith.constant 0 : index
      %c0_11 = arith.constant 0 : index
      %13 = vector.load %arg7[%c0_10, %c0_11] : memref<16x256xf32, #tpu.memory_space<vmem>>, vector<16x256xf32>
      tpu.vector_store %arg7[%c0_10, %c0_11], %12 {strides = array<i32>} : memref<16x256xf32, #tpu.memory_space<vmem>>, vector<16x256xf32>,
    } else {
    }
    %c0 = arith.constant 0 : index
    %c0_1 = arith.constant 0 : index
    %3 = vector.load %arg7[%c0, %c0_1] : memref<16x256xf32, #tpu.memory_space<vmem>>, vector<16x256xf32>
    %c0_2 = arith.constant 0 : index
    %c0_3 = arith.constant 0 : index
    %4 = vector.load %arg3[%c0_2, %c0_3] : memref<16x256xbf16, #tpu.memory_space<vmem>>, vector<16x256xbf16>
    %c0_4 = arith.constant 0 : index
    %c0_5 = arith.constant 0 : index
    %5 = vector.load %arg4[%c0_4, %c0_5] : memref<256x256xbf16, #tpu.memory_space<vmem>>, vector<256x256xbf16>
    %cst = arith.constant dense<0.000000e+00> : vector<16x256xf32>
    %6 = tpu.matmul %4, %5, %cst {dimension_numbers = #tpu.dot_dimension_numbers<[1], [0], [0], [1], [0, 0, 1, 1], [], []>} : vector<16x256xbf16>, vector<256x256xbf16>, vector<16x256xf32> -> vector<16x256xf32>
    %7 = arith.addf %3, %6 : vector<16x256xf32>
    %c0_6 = arith.constant 0 : index
    %c0_7 = arith.constant 0 : index
    %8 = vector.load %arg7[%c0_6, %c0_7] : memref<16x256xf32, #tpu.memory_space<vmem>>, vector<16x256xf32>
    tpu.vector_store %arg7[%c0_6, %c0_7], %7 {strides = array<i32>} : memref<16x256xf32, #tpu.memory_space<vmem>>, vector<16x256xf32>,
    %c8_i32 = arith.constant 8 : i32
    %9 = arith.cmpi eq, %arg2, %c8_i32 : i32
    %10 = arith.extui %9 : i1 to i32
    %c0_i32_8 = arith.constant 0 : i32
    %11 = arith.cmpi ne, %10, %c0_i32_8 : i32
    scf.if %11 {
      %c0_9 = arith.constant 0 : index
      %c0_10 = arith.constant 0 : index
      %12 = vector.load %arg7[%c0_9, %c0_10] : memref<16x256xf32, #tpu.memory_space<vmem>>, vector<16x256xf32>
      %c0_11 = arith.constant 0 : index
      %c0_12 = arith.constant 0 : index
      %13 = vector.load %arg5[%c0_11, %c0_12] : memref<1x256xf32, #tpu.memory_space<vmem>>, vector<1x256xf32>
      %14 = vector.broadcast %13 : vector<1x256xf32> to vector<16x256xf32>
      %15 = arith.mulf %12, %14 : vector<16x256xf32>
      %c0_13 = arith.constant 0 : index
      %c0_14 = arith.constant 0 : index
      %16 = vector.load %arg6[%c0_13, %c0_14] : memref<1x256xf32, #tpu.memory_space<vmem>>, vector<1x256xf32>
      %17 = vector.broadcast %16 : vector<1x256xf32> to vector<16x256xf32>
      %18 = arith.addf %15, %17 : vector<16x256xf32>
      %cst_15 = arith.constant 0.000000e+00 : f32
      %19 = vector.broadcast %cst_15 : f32 to vector<16x256xf32>
      %20 = arith.maximumf %18, %19 : vector<16x256xf32>
      %c0_16 = arith.constant 0 : index
      %c0_17 = arith.constant 0 : index
      %21 = vector.load %arg7[%c0_16, %c0_17] : memref<16x256xf32, #tpu.memory_space<vmem>>, vector<16x256xf32>
      tpu.vector_store %arg7[%c0_16, %c0_17], %20 {strides = array<i32>} : memref<16x256xf32, #tpu.memory_space<vmem>>, vector<16x256xf32>,
    } else {
    }
    return
  }
  func.func @transform_0(%arg0: i32, %arg1: i32, %arg2: i32) -> (i32, i32) {
    %c0_i32 = arith.constant 0 : i32
    return %arg0, %arg2 : i32, i32
  }
  func.func @transform_1(%arg0: i32, %arg1: i32, %arg2: i32) -> (i32, i32) {
    %c0_i32 = arith.constant 0 : i32
    return %arg2, %arg1 : i32, i32
  }
  func.func @transform_2(%arg0: i32, %arg1: i32, %arg2: i32) -> (i32, i32) {
    %c0_i32 = arith.constant 0 : i32
    %c0_i32_0 = arith.constant 0 : i32
    return %c0_i32, %arg1 : i32, i32
  }
  func.func @transform_3(%arg0: i32, %arg1: i32, %arg2: i32) -> (i32, i32) {
    %c0_i32 = arith.constant 0 : i32
    %c0_i32_0 = arith.constant 0 : i32
    return %c0_i32, %arg1 : i32, i32
  }
  func.func @transform_4(%arg0: i32, %arg1: i32, %arg2: i32) -> (i32, i32) {
    %c0_i32 = arith.constant 0 : i32
    return %arg0, %arg1 : i32, i32
  }
}

module attributes {stable_mosaic.version = 11 : i64} {
  func.func @_mm_kernel(%arg0: i32, %arg1: i32, %arg2: i32, %arg3: memref<16x256xbf16, #tpu.memory_space<vmem>>, %arg4: memref<256x256xbf16, #tpu.memory_space<vmem>>, %arg5: memref<1x256xf32, #tpu.memory_space<vmem>>, %arg6: memref<1x256xf32, #tpu.memory_space<vmem>>, %arg7: memref<16x256xf32, #tpu.memory_space<vmem>>) attributes {dimension_semantics = [#tpu.dimension_semantics<parallel>, #tpu.dimension_semantics<parallel>, #tpu.dimension_semantics<arbitrary>], iteration_bounds = array<i64: 1, 2, 9>, scalar_prefetch = 0 : i64, scratch_operands = 0 : i64, tpu.core_type = #tpu.core_type<tc>, window_params = [{transform_indices = @transform_0, window_bounds = array<i64: 16, 256>}, {transform_indices = @transform_1, window_bounds = array<i64: 256, 256>}, {transform_indices = @transform_2, window_bounds = array<i64: 1, 256>}, {transform_indices = @transform_3, window_bounds = array<i64: 1, 256>}, {transform_indices = @transform_4, window_bounds = array<i64: 16, 256>}]} {
    %c0_i32 = arith.constant 0 : i32
    %0 = arith.cmpi eq, %arg2, %c0_i32 : i32
    %1 = arith.extui %0 : i1 to i32
    %c0_i32_0 = arith.constant 0 : i32
    %2 = arith.cmpi ne, %1, %c0_i32_0 : i32
    scf.if %2 {
      %cst_9 = arith.constant 0.000000e+00 : f32
      %12 = vector.broadcast %cst_9 : f32 to vector<16x256xf32>
      %c0_10 = arith.constant 0 : index
      %c0_11 = arith.constant 0 : index
      %13 = vector.load %arg7[%c0_10, %c0_11] : memref<16x256xf32, #tpu.memory_space<vmem>>, vector<16x256xf32>
      tpu.vector_store %arg7[%c0_10, %c0_11], %12 {strides = array<i32>} : memref<16x256xf32, #tpu.memory_space<vmem>>, vector<16x256xf32>,
    } else {
    }
    %c0 = arith.constant 0 : index
    %c0_1 = arith.constant 0 : index
    %3 = vector.load %arg7[%c0, %c0_1] : memref<16x256xf32, #tpu.memory_space<vmem>>, vector<16x256xf32>
    %c0_2 = arith.constant 0 : index
    %c0_3 = arith.constant 0 : index
    %4 = vector.load %arg3[%c0_2, %c0_3] : memref<16x256xbf16, #tpu.memory_space<vmem>>, vector<16x256xbf16>
    %c0_4 = arith.constant 0 : index
    %c0_5 = arith.constant 0 : index
    %5 = vector.load %arg4[%c0_4, %c0_5] : memref<256x256xbf16, #tpu.memory_space<vmem>>, vector<256x256xbf16>
    %cst = arith.constant dense<0.000000e+00> : vector<16x256xf32>
    %6 = tpu.matmul %4, %5, %cst {dimension_numbers = #tpu.dot_dimension_numbers<[1], [0], [0], [1], [0, 0, 1, 1], [], []>} : vector<16x256xbf16>, vector<256x256xbf16>, vector<16x256xf32> -> vector<16x256xf32>
    %7 = arith.addf %3, %6 : vector<16x256xf32>
    %c0_6 = arith.constant 0 : index
    %c0_7 = arith.constant 0 : index
    %8 = vector.load %arg7[%c0_6, %c0_7] : memref<16x256xf32, #tpu.memory_space<vmem>>, vector<16x256xf32>
    tpu.vector_store %arg7[%c0_6, %c0_7], %7 {strides = array<i32>} : memref<16x256xf32, #tpu.memory_space<vmem>>, vector<16x256xf32>,
    %c8_i32 = arith.constant 8 : i32
    %9 = arith.cmpi eq, %arg2, %c8_i32 : i32
    %10 = arith.extui %9 : i1 to i32
    %c0_i32_8 = arith.constant 0 : i32
    %11 = arith.cmpi ne, %10, %c0_i32_8 : i32
    scf.if %11 {
      %c0_9 = arith.constant 0 : index
      %c0_10 = arith.constant 0 : index
      %12 = vector.load %arg7[%c0_9, %c0_10] : memref<16x256xf32, #tpu.memory_space<vmem>>, vector<16x256xf32>
      %c0_11 = arith.constant 0 : index
      %c0_12 = arith.constant 0 : index
      %13 = vector.load %arg5[%c0_11, %c0_12] : memref<1x256xf32, #tpu.memory_space<vmem>>, vector<1x256xf32>
      %14 = vector.broadcast %13 : vector<1x256xf32> to vector<16x256xf32>
      %15 = arith.mulf %12, %14 : vector<16x256xf32>
      %c0_13 = arith.constant 0 : index
      %c0_14 = arith.constant 0 : index
      %16 = vector.load %arg6[%c0_13, %c0_14] : memref<1x256xf32, #tpu.memory_space<vmem>>, vector<1x256xf32>
      %17 = vector.broadcast %16 : vector<1x256xf32> to vector<16x256xf32>
      %18 = arith.addf %15, %17 : vector<16x256xf32>
      %cst_15 = arith.constant 0.000000e+00 : f32
      %19 = vector.broadcast %cst_15 : f32 to vector<16x256xf32>
      %20 = arith.maximumf %18, %19 : vector<16x256xf32>
      %c0_16 = arith.constant 0 : index
      %c0_17 = arith.constant 0 : index
      %21 = vector.load %arg7[%c0_16, %c0_17] : memref<16x256xf32, #tpu.memory_space<vmem>>, vector<16x256xf32>
      tpu.vector_store %arg7[%c0_16, %c0_17], %20 {strides = array<i32>} : memref<16x256xf32, #tpu.memory_space<vmem>>, vector<16x256xf32>,
    } else {
    }
    return
  }
  func.func @transform_0(%arg0: i32, %arg1: i32, %arg2: i32) -> (i32, i32) {
    %c0_i32 = arith.constant 0 : i32
    return %arg0, %arg2 : i32, i32
  }
  func.func @transform_1(%arg0: i32, %arg1: i32, %arg2: i32) -> (i32, i32) {
    %c0_i32 = arith.constant 0 : i32
    return %arg2, %arg1 : i32, i32
  }
  func.func @transform_2(%arg0: i32, %arg1: i32, %arg2: i32) -> (i32, i32) {
    %c0_i32 = arith.constant 0 : i32
    %c0_i32_0 = arith.constant 0 : i32
    return %c0_i32, %arg1 : i32, i32
  }
  func.func @transform_3(%arg0: i32, %arg1: i32, %arg2: i32) -> (i32, i32) {
    %c0_i32 = arith.constant 0 : i32
    %c0_i32_0 = arith.constant 0 : i32
    return %c0_i32, %arg1 : i32, i32
  }
  func.func @transform_4(%arg0: i32, %arg1: i32, %arg2: i32) -> (i32, i32) {
    %c0_i32 = arith.constant 0 : i32
    return %arg0, %arg1 : i32, i32
  }
}

module attributes {stable_mosaic.version = 11 : i64} {
  func.func @_mm_kernel(%arg0: i32, %arg1: i32, %arg2: i32, %arg3: memref<16x256xbf16, #tpu.memory_space<vmem>>, %arg4: memref<256x256xbf16, #tpu.memory_space<vmem>>, %arg5: memref<1x256xf32, #tpu.memory_space<vmem>>, %arg6: memref<1x256xf32, #tpu.memory_space<vmem>>, %arg7: memref<16x256xf32, #tpu.memory_space<vmem>>) attributes {dimension_semantics = [#tpu.dimension_semantics<parallel>, #tpu.dimension_semantics<parallel>, #tpu.dimension_semantics<arbitrary>], iteration_bounds = array<i64: 1, 2, 1>, scalar_prefetch = 0 : i64, scratch_operands = 0 : i64, tpu.core_type = #tpu.core_type<tc>, window_params = [{transform_indices = @transform_0, window_bounds = array<i64: 16, 256>}, {transform_indices = @transform_1, window_bounds = array<i64: 256, 256>}, {transform_indices = @transform_2, window_bounds = array<i64: 1, 256>}, {transform_indices = @transform_3, window_bounds = array<i64: 1, 256>}, {transform_indices = @transform_4, window_bounds = array<i64: 16, 256>}]} {
    %c0_i32 = arith.constant 0 : i32
    %0 = arith.cmpi eq, %arg2, %c0_i32 : i32
    %1 = arith.extui %0 : i1 to i32
    %c0_i32_0 = arith.constant 0 : i32
    %2 = arith.cmpi ne, %1, %c0_i32_0 : i32
    scf.if %2 {
      %cst_10 = arith.constant 0.000000e+00 : f32
      %12 = vector.broadcast %cst_10 : f32 to vector<16x256xf32>
      %c0_11 = arith.constant 0 : index
      %c0_12 = arith.constant 0 : index
      %13 = vector.load %arg7[%c0_11, %c0_12] : memref<16x256xf32, #tpu.memory_space<vmem>>, vector<16x256xf32>
      tpu.vector_store %arg7[%c0_11, %c0_12], %12 {strides = array<i32>} : memref<16x256xf32, #tpu.memory_space<vmem>>, vector<16x256xf32>,
    } else {
    }
    %c0 = arith.constant 0 : index
    %c0_1 = arith.constant 0 : index
    %3 = vector.load %arg7[%c0, %c0_1] : memref<16x256xf32, #tpu.memory_space<vmem>>, vector<16x256xf32>
    %c0_2 = arith.constant 0 : index
    %c0_3 = arith.constant 0 : index
    %4 = vector.load %arg3[%c0_2, %c0_3] : memref<16x256xbf16, #tpu.memory_space<vmem>>, vector<16x256xbf16>
    %c0_4 = arith.constant 0 : index
    %c0_5 = arith.constant 0 : index
    %5 = vector.load %arg4[%c0_4, %c0_5] : memref<256x256xbf16, #tpu.memory_space<vmem>>, vector<256x256xbf16>
    %cst = arith.constant dense<0.000000e+00> : vector<16x256xf32>
    %6 = tpu.matmul %4, %5, %cst {dimension_numbers = #tpu.dot_dimension_numbers<[1], [0], [0], [1], [0, 0, 1, 1], [], []>} : vector<16x256xbf16>, vector<256x256xbf16>, vector<16x256xf32> -> vector<16x256xf32>
    %7 = arith.addf %3, %6 : vector<16x256xf32>
    %c0_6 = arith.constant 0 : index
    %c0_7 = arith.constant 0 : index
    %8 = vector.load %arg7[%c0_6, %c0_7] : memref<16x256xf32, #tpu.memory_space<vmem>>, vector<16x256xf32>
    tpu.vector_store %arg7[%c0_6, %c0_7], %7 {strides = array<i32>} : memref<16x256xf32, #tpu.memory_space<vmem>>, vector<16x256xf32>,
    %c0_i32_8 = arith.constant 0 : i32
    %9 = arith.cmpi eq, %arg2, %c0_i32_8 : i32
    %10 = arith.extui %9 : i1 to i32
    %c0_i32_9 = arith.constant 0 : i32
    %11 = arith.cmpi ne, %10, %c0_i32_9 : i32
    scf.if %11 {
      %c0_10 = arith.constant 0 : index
      %c0_11 = arith.constant 0 : index
      %12 = vector.load %arg7[%c0_10, %c0_11] : memref<16x256xf32, #tpu.memory_space<vmem>>, vector<16x256xf32>
      %c0_12 = arith.constant 0 : index
      %c0_13 = arith.constant 0 : index
      %13 = vector.load %arg5[%c0_12, %c0_13] : memref<1x256xf32, #tpu.memory_space<vmem>>, vector<1x256xf32>
      %14 = vector.broadcast %13 : vector<1x256xf32> to vector<16x256xf32>
      %15 = arith.mulf %12, %14 : vector<16x256xf32>
      %c0_14 = arith.constant 0 : index
      %c0_15 = arith.constant 0 : index
      %16 = vector.load %arg6[%c0_14, %c0_15] : memref<1x256xf32, #tpu.memory_space<vmem>>, vector<1x256xf32>
      %17 = vector.broadcast %16 : vector<1x256xf32> to vector<16x256xf32>
      %18 = arith.addf %15, %17 : vector<16x256xf32>
      %c0_16 = arith.constant 0 : index
      %c0_17 = arith.constant 0 : index
      %19 = vector.load %arg7[%c0_16, %c0_17] : memref<16x256xf32, #tpu.memory_space<vmem>>, vector<16x256xf32>
      tpu.vector_store %arg7[%c0_16, %c0_17], %18 {strides = array<i32>} : memref<16x256xf32, #tpu.memory_space<vmem>>, vector<16x256xf32>,
    } else {
    }
    return
  }
  func.func @transform_0(%arg0: i32, %arg1: i32, %arg2: i32) -> (i32, i32) {
    %c0_i32 = arith.constant 0 : i32
    return %arg0, %arg2 : i32, i32
  }
  func.func @transform_1(%arg0: i32, %arg1: i32, %arg2: i32) -> (i32, i32) {
    %c0_i32 = arith.constant 0 : i32
    return %arg2, %arg1 : i32, i32
  }
  func.func @transform_2(%arg0: i32, %arg1: i32, %arg2: i32) -> (i32, i32) {
    %c0_i32 = arith.constant 0 : i32
    %c0_i32_0 = arith.constant 0 : i32
    return %c0_i32, %arg1 : i32, i32
  }
  func.func @transform_3(%arg0: i32, %arg1: i32, %arg2: i32) -> (i32, i32) {
    %c0_i32 = arith.constant 0 : i32
    %c0_i32_0 = arith.constant 0 : i32
    return %c0_i32, %arg1 : i32, i32
  }
  func.func @transform_4(%arg0: i32, %arg1: i32, %arg2: i32) -> (i32, i32) {
    %c0_i32 = arith.constant 0 : i32
    return %arg0, %arg1 : i32, i32
  }
}

module attributes {stable_mosaic.version = 11 : i64} {
  func.func @_mm_kernel(%arg0: i32, %arg1: i32, %arg2: i32, %arg3: memref<16x256xbf16, #tpu.memory_space<vmem>>, %arg4: memref<256x256xbf16, #tpu.memory_space<vmem>>, %arg5: memref<1x256xf32, #tpu.memory_space<vmem>>, %arg6: memref<1x256xf32, #tpu.memory_space<vmem>>, %arg7: memref<16x256xf32, #tpu.memory_space<vmem>>, %arg8: memref<16x256xf32, #tpu.memory_space<vmem>>) attributes {dimension_semantics = [#tpu.dimension_semantics<parallel>, #tpu.dimension_semantics<parallel>, #tpu.dimension_semantics<arbitrary>], iteration_bounds = array<i64: 1, 2, 18>, scalar_prefetch = 0 : i64, scratch_operands = 0 : i64, tpu.core_type = #tpu.core_type<tc>, window_params = [{transform_indices = @transform_0, window_bounds = array<i64: 16, 256>}, {transform_indices = @transform_1, window_bounds = array<i64: 256, 256>}, {transform_indices = @transform_2, window_bounds = array<i64: 1, 256>}, {transform_indices = @transform_3, window_bounds = array<i64: 1, 256>}, {transform_indices = @transform_4, window_bounds = array<i64: 16, 256>}, {transform_indices = @transform_5, window_bounds = array<i64: 16, 256>}]} {
    %c0_i32 = arith.constant 0 : i32
    %0 = arith.cmpi eq, %arg2, %c0_i32 : i32
    %1 = arith.extui %0 : i1 to i32
    %c0_i32_0 = arith.constant 0 : i32
    %2 = arith.cmpi ne, %1, %c0_i32_0 : i32
    scf.if %2 {
      %cst_9 = arith.constant 0.000000e+00 : f32
      %12 = vector.broadcast %cst_9 : f32 to vector<16x256xf32>
      %c0_10 = arith.constant 0 : index
      %c0_11 = arith.constant 0 : index
      %13 = vector.load %arg8[%c0_10, %c0_11] : memref<16x256xf32, #tpu.memory_space<vmem>>, vector<16x256xf32>
      tpu.vector_store %arg8[%c0_10, %c0_11], %12 {strides = array<i32>} : memref<16x256xf32, #tpu.memory_space<vmem>>, vector<16x256xf32>,
    } else {
    }
    %c0 = arith.constant 0 : index
    %c0_1 = arith.constant 0 : index
    %3 = vector.load %arg8[%c0, %c0_1] : memref<16x256xf32, #tpu.memory_space<vmem>>, vector<16x256xf32>
    %c0_2 = arith.constant 0 : index
    %c0_3 = arith.constant 0 : index
    %4 = vector.load %arg3[%c0_2, %c0_3] : memref<16x256xbf16, #tpu.memory_space<vmem>>, vector<16x256xbf16>
    %c0_4 = arith.constant 0 : index
    %c0_5 = arith.constant 0 : index
    %5 = vector.load %arg4[%c0_4, %c0_5] : memref<256x256xbf16, #tpu.memory_space<vmem>>, vector<256x256xbf16>
    %cst = arith.constant dense<0.000000e+00> : vector<16x256xf32>
    %6 = tpu.matmul %4, %5, %cst {dimension_numbers = #tpu.dot_dimension_numbers<[1], [0], [0], [1], [0, 0, 1, 1], [], []>} : vector<16x256xbf16>, vector<256x256xbf16>, vector<16x256xf32> -> vector<16x256xf32>
    %7 = arith.addf %3, %6 : vector<16x256xf32>
    %c0_6 = arith.constant 0 : index
    %c0_7 = arith.constant 0 : index
    %8 = vector.load %arg8[%c0_6, %c0_7] : memref<16x256xf32, #tpu.memory_space<vmem>>, vector<16x256xf32>
    tpu.vector_store %arg8[%c0_6, %c0_7], %7 {strides = array<i32>} : memref<16x256xf32, #tpu.memory_space<vmem>>, vector<16x256xf32>,
    %c17_i32 = arith.constant 17 : i32
    %9 = arith.cmpi eq, %arg2, %c17_i32 : i32
    %10 = arith.extui %9 : i1 to i32
    %c0_i32_8 = arith.constant 0 : i32
    %11 = arith.cmpi ne, %10, %c0_i32_8 : i32
    scf.if %11 {
      %c0_9 = arith.constant 0 : index
      %c0_10 = arith.constant 0 : index
      %12 = vector.load %arg8[%c0_9, %c0_10] : memref<16x256xf32, #tpu.memory_space<vmem>>, vector<16x256xf32>
      %c0_11 = arith.constant 0 : index
      %c0_12 = arith.constant 0 : index
      %13 = vector.load %arg5[%c0_11, %c0_12] : memref<1x256xf32, #tpu.memory_space<vmem>>, vector<1x256xf32>
      %14 = vector.broadcast %13 : vector<1x256xf32> to vector<16x256xf32>
      %15 = arith.mulf %12, %14 : vector<16x256xf32>
      %c0_13 = arith.constant 0 : index
      %c0_14 = arith.constant 0 : index
      %16 = vector.load %arg6[%c0_13, %c0_14] : memref<1x256xf32, #tpu.memory_space<vmem>>, vector<1x256xf32>
      %17 = vector.broadcast %16 : vector<1x256xf32> to vector<16x256xf32>
      %18 = arith.addf %15, %17 : vector<16x256xf32>
      %c0_15 = arith.constant 0 : index
      %c0_16 = arith.constant 0 : index
      %19 = vector.load %arg7[%c0_15, %c0_16] : memref<16x256xf32, #tpu.memory_space<vmem>>, vector<16x256xf32>
      %20 = arith.addf %18, %19 : vector<16x256xf32>
      %cst_17 = arith.constant 0.000000e+00 : f32
      %21 = vector.broadcast %cst_17 : f32 to vector<16x256xf32>
      %22 = arith.maximumf %20, %21 : vector<16x256xf32>
      %c0_18 = arith.constant 0 : index
      %c0_19 = arith.constant 0 : index
      %23 = vector.load %arg8[%c0_18, %c0_19] : memref<16x256xf32, #tpu.memory_space<vmem>>, vector<16x256xf32>
      tpu.vector_store %arg8[%c0_18, %c0_19], %22 {strides = array<i32>} : memref<16x256xf32, #tpu.memory_space<vmem>>, vector<16x256xf32>,
    } else {
    }
    return
  }
  func.func @transform_0(%arg0: i32, %arg1: i32, %arg2: i32) -> (i32, i32) {
    %c0_i32 = arith.constant 0 : i32
    return %arg0, %arg2 : i32, i32
  }
  func.func @transform_1(%arg0: i32, %arg1: i32, %arg2: i32) -> (i32, i32) {
    %c0_i32 = arith.constant 0 : i32
    return %arg2, %arg1 : i32, i32
  }
  func.func @transform_2(%arg0: i32, %arg1: i32, %arg2: i32) -> (i32, i32) {
    %c0_i32 = arith.constant 0 : i32
    %c0_i32_0 = arith.constant 0 : i32
    return %c0_i32, %arg1 : i32, i32
  }
  func.func @transform_3(%arg0: i32, %arg1: i32, %arg2: i32) -> (i32, i32) {
    %c0_i32 = arith.constant 0 : i32
    %c0_i32_0 = arith.constant 0 : i32
    return %c0_i32, %arg1 : i32, i32
  }
  func.func @transform_4(%arg0: i32, %arg1: i32, %arg2: i32) -> (i32, i32) {
    %c0_i32 = arith.constant 0 : i32
    return %arg0, %arg1 : i32, i32
  }
  func.func @transform_5(%arg0: i32, %arg1: i32, %arg2: i32) -> (i32, i32) {
    %c0_i32 = arith.constant 0 : i32
    return %arg0, %arg1 : i32, i32
  }
}

module attributes {stable_mosaic.version = 11 : i64} {
  func.func @_mm_kernel(%arg0: i32, %arg1: i32, %arg2: i32, %arg3: memref<16x256xbf16, #tpu.memory_space<vmem>>, %arg4: memref<256x256xbf16, #tpu.memory_space<vmem>>, %arg5: memref<1x256xf32, #tpu.memory_space<vmem>>, %arg6: memref<1x256xf32, #tpu.memory_space<vmem>>, %arg7: memref<16x256xf32, #tpu.memory_space<vmem>>) attributes {dimension_semantics = [#tpu.dimension_semantics<parallel>, #tpu.dimension_semantics<parallel>, #tpu.dimension_semantics<arbitrary>], iteration_bounds = array<i64: 1, 2, 18>, scalar_prefetch = 0 : i64, scratch_operands = 0 : i64, tpu.core_type = #tpu.core_type<tc>, window_params = [{transform_indices = @transform_0, window_bounds = array<i64: 16, 256>}, {transform_indices = @transform_1, window_bounds = array<i64: 256, 256>}, {transform_indices = @transform_2, window_bounds = array<i64: 1, 256>}, {transform_indices = @transform_3, window_bounds = array<i64: 1, 256>}, {transform_indices = @transform_4, window_bounds = array<i64: 16, 256>}]} {
    %c0_i32 = arith.constant 0 : i32
    %0 = arith.cmpi eq, %arg2, %c0_i32 : i32
    %1 = arith.extui %0 : i1 to i32
    %c0_i32_0 = arith.constant 0 : i32
    %2 = arith.cmpi ne, %1, %c0_i32_0 : i32
    scf.if %2 {
      %cst_9 = arith.constant 0.000000e+00 : f32
      %12 = vector.broadcast %cst_9 : f32 to vector<16x256xf32>
      %c0_10 = arith.constant 0 : index
      %c0_11 = arith.constant 0 : index
      %13 = vector.load %arg7[%c0_10, %c0_11] : memref<16x256xf32, #tpu.memory_space<vmem>>, vector<16x256xf32>
      tpu.vector_store %arg7[%c0_10, %c0_11], %12 {strides = array<i32>} : memref<16x256xf32, #tpu.memory_space<vmem>>, vector<16x256xf32>,
    } else {
    }
    %c0 = arith.constant 0 : index
    %c0_1 = arith.constant 0 : index
    %3 = vector.load %arg7[%c0, %c0_1] : memref<16x256xf32, #tpu.memory_space<vmem>>, vector<16x256xf32>
    %c0_2 = arith.constant 0 : index
    %c0_3 = arith.constant 0 : index
    %4 = vector.load %arg3[%c0_2, %c0_3] : memref<16x256xbf16, #tpu.memory_space<vmem>>, vector<16x256xbf16>
    %c0_4 = arith.constant 0 : index
    %c0_5 = arith.constant 0 : index
    %5 = vector.load %arg4[%c0_4, %c0_5] : memref<256x256xbf16, #tpu.memory_space<vmem>>, vector<256x256xbf16>
    %cst = arith.constant dense<0.000000e+00> : vector<16x256xf32>
    %6 = tpu.matmul %4, %5, %cst {dimension_numbers = #tpu.dot_dimension_numbers<[1], [0], [0], [1], [0, 0, 1, 1], [], []>} : vector<16x256xbf16>, vector<256x256xbf16>, vector<16x256xf32> -> vector<16x256xf32>
    %7 = arith.addf %3, %6 : vector<16x256xf32>
    %c0_6 = arith.constant 0 : index
    %c0_7 = arith.constant 0 : index
    %8 = vector.load %arg7[%c0_6, %c0_7] : memref<16x256xf32, #tpu.memory_space<vmem>>, vector<16x256xf32>
    tpu.vector_store %arg7[%c0_6, %c0_7], %7 {strides = array<i32>} : memref<16x256xf32, #tpu.memory_space<vmem>>, vector<16x256xf32>,
    %c17_i32 = arith.constant 17 : i32
    %9 = arith.cmpi eq, %arg2, %c17_i32 : i32
    %10 = arith.extui %9 : i1 to i32
    %c0_i32_8 = arith.constant 0 : i32
    %11 = arith.cmpi ne, %10, %c0_i32_8 : i32
    scf.if %11 {
      %c0_9 = arith.constant 0 : index
      %c0_10 = arith.constant 0 : index
      %12 = vector.load %arg7[%c0_9, %c0_10] : memref<16x256xf32, #tpu.memory_space<vmem>>, vector<16x256xf32>
      %c0_11 = arith.constant 0 : index
      %c0_12 = arith.constant 0 : index
      %13 = vector.load %arg5[%c0_11, %c0_12] : memref<1x256xf32, #tpu.memory_space<vmem>>, vector<1x256xf32>
      %14 = vector.broadcast %13 : vector<1x256xf32> to vector<16x256xf32>
      %15 = arith.mulf %12, %14 : vector<16x256xf32>
      %c0_13 = arith.constant 0 : index
      %c0_14 = arith.constant 0 : index
      %16 = vector.load %arg6[%c0_13, %c0_14] : memref<1x256xf32, #tpu.memory_space<vmem>>, vector<1x256xf32>
      %17 = vector.broadcast %16 : vector<1x256xf32> to vector<16x256xf32>
      %18 = arith.addf %15, %17 : vector<16x256xf32>
      %cst_15 = arith.constant 0.000000e+00 : f32
      %19 = vector.broadcast %cst_15 : f32 to vector<16x256xf32>
      %20 = arith.maximumf %18, %19 : vector<16x256xf32>
      %c0_16 = arith.constant 0 : index
      %c0_17 = arith.constant 0 : index
      %21 = vector.load %arg7[%c0_16, %c0_17] : memref<16x256xf32, #tpu.memory_space<vmem>>, vector<16x256xf32>
      tpu.vector_store %arg7[%c0_16, %c0_17], %20 {strides = array<i32>} : memref<16x256xf32, #tpu.memory_space<vmem>>, vector<16x256xf32>,
    } else {
    }
    return
  }
  func.func @transform_0(%arg0: i32, %arg1: i32, %arg2: i32) -> (i32, i32) {
    %c0_i32 = arith.constant 0 : i32
    return %arg0, %arg2 : i32, i32
  }
  func.func @transform_1(%arg0: i32, %arg1: i32, %arg2: i32) -> (i32, i32) {
    %c0_i32 = arith.constant 0 : i32
    return %arg2, %arg1 : i32, i32
  }
  func.func @transform_2(%arg0: i32, %arg1: i32, %arg2: i32) -> (i32, i32) {
    %c0_i32 = arith.constant 0 : i32
    %c0_i32_0 = arith.constant 0 : i32
    return %c0_i32, %arg1 : i32, i32
  }
  func.func @transform_3(%arg0: i32, %arg1: i32, %arg2: i32) -> (i32, i32) {
    %c0_i32 = arith.constant 0 : i32
    %c0_i32_0 = arith.constant 0 : i32
    return %c0_i32, %arg1 : i32, i32
  }
  func.func @transform_4(%arg0: i32, %arg1: i32, %arg2: i32) -> (i32, i32) {
    %c0_i32 = arith.constant 0 : i32
    return %arg0, %arg1 : i32, i32
  }
}

module attributes {stable_mosaic.version = 11 : i64} {
  func.func @_gap_kernel(%arg0: i32, %arg1: memref<1x1x512xf32, #tpu.memory_space<vmem>>, %arg2: memref<1x1x512xf32, #tpu.memory_space<vmem>>) attributes {dimension_semantics = [#tpu.dimension_semantics<parallel>], iteration_bounds = array<i64: 2>, scalar_prefetch = 0 : i64, scratch_operands = 0 : i64, tpu.core_type = #tpu.core_type<tc>, window_params = [{transform_indices = @transform_0, window_bounds = array<i64: 1, 1, 512>}, {transform_indices = @transform_1, window_bounds = array<i64: 1, 1, 512>}]} {
    %c0 = arith.constant 0 : index
    %c0_0 = arith.constant 0 : index
    %c0_1 = arith.constant 0 : index
    %0 = vector.load %arg1[%c0, %c0_0, %c0_1] : memref<1x1x512xf32, #tpu.memory_space<vmem>>, vector<1x1x512xf32>
    %cst = arith.constant dense<0.000000e+00> : vector<1x512xf32>
    %1 = vector.multi_reduction <add>, %0, %cst [1] : vector<1x1x512xf32> to vector<1x512xf32>
    %2 = vector.shape_cast %1 : vector<1x512xf32> to vector<1x1x512xf32>
    %cst_2 = arith.constant 1.000000e+00 : f32
    %3 = vector.broadcast %cst_2 : f32 to vector<1x1x512xf32>
    %4 = arith.divf %2, %3 : vector<1x1x512xf32>
    %c0_3 = arith.constant 0 : index
    %c0_4 = arith.constant 0 : index
    %c0_5 = arith.constant 0 : index
    %5 = vector.load %arg2[%c0_3, %c0_4, %c0_5] : memref<1x1x512xf32, #tpu.memory_space<vmem>>, vector<1x1x512xf32>
    tpu.vector_store %arg2[%c0_3, %c0_4, %c0_5], %4 {strides = array<i32>} : memref<1x1x512xf32, #tpu.memory_space<vmem>>, vector<1x1x512xf32>,
    return
  }
  func.func @transform_0(%arg0: i32) -> (i32, i32, i32) {
    %c0_i32 = arith.constant 0 : i32
    %c0_i32_0 = arith.constant 0 : i32
    %c0_i32_1 = arith.constant 0 : i32
    return %arg0, %c0_i32, %c0_i32_0 : i32, i32, i32
  }
  func.func @transform_1(%arg0: i32) -> (i32, i32, i32) {
    %c0_i32 = arith.constant 0 : i32
    %c0_i32_0 = arith.constant 0 : i32
    %c0_i32_1 = arith.constant 0 : i32
    return %arg0, %c0_i32, %c0_i32_0 : i32, i32, i32
  }
}

module attributes {stable_mosaic.version = 11 : i64} {
  func.func @_mm_kernel(%arg0: i32, %arg1: i32, %arg2: i32, %arg3: memref<16x256xbf16, #tpu.memory_space<vmem>>, %arg4: memref<256x128xbf16, #tpu.memory_space<vmem>>, %arg5: memref<1x128xf32, #tpu.memory_space<vmem>>, %arg6: memref<1x128xf32, #tpu.memory_space<vmem>>, %arg7: memref<16x128xf32, #tpu.memory_space<vmem>>) attributes {dimension_semantics = [#tpu.dimension_semantics<parallel>, #tpu.dimension_semantics<parallel>, #tpu.dimension_semantics<arbitrary>], iteration_bounds = array<i64: 1, 1, 2>, scalar_prefetch = 0 : i64, scratch_operands = 0 : i64, tpu.core_type = #tpu.core_type<tc>, window_params = [{transform_indices = @transform_0, window_bounds = array<i64: 16, 256>}, {transform_indices = @transform_1, window_bounds = array<i64: 256, 128>}, {transform_indices = @transform_2, window_bounds = array<i64: 1, 128>}, {transform_indices = @transform_3, window_bounds = array<i64: 1, 128>}, {transform_indices = @transform_4, window_bounds = array<i64: 16, 128>}]} {
    %c0_i32 = arith.constant 0 : i32
    %0 = arith.cmpi eq, %arg2, %c0_i32 : i32
    %1 = arith.extui %0 : i1 to i32
    %c0_i32_0 = arith.constant 0 : i32
    %2 = arith.cmpi ne, %1, %c0_i32_0 : i32
    scf.if %2 {
      %cst_9 = arith.constant 0.000000e+00 : f32
      %12 = vector.broadcast %cst_9 : f32 to vector<16x128xf32>
      %c0_10 = arith.constant 0 : index
      %c0_11 = arith.constant 0 : index
      %13 = vector.load %arg7[%c0_10, %c0_11] : memref<16x128xf32, #tpu.memory_space<vmem>>, vector<16x128xf32>
      tpu.vector_store %arg7[%c0_10, %c0_11], %12 {strides = array<i32>} : memref<16x128xf32, #tpu.memory_space<vmem>>, vector<16x128xf32>,
    } else {
    }
    %c0 = arith.constant 0 : index
    %c0_1 = arith.constant 0 : index
    %3 = vector.load %arg7[%c0, %c0_1] : memref<16x128xf32, #tpu.memory_space<vmem>>, vector<16x128xf32>
    %c0_2 = arith.constant 0 : index
    %c0_3 = arith.constant 0 : index
    %4 = vector.load %arg3[%c0_2, %c0_3] : memref<16x256xbf16, #tpu.memory_space<vmem>>, vector<16x256xbf16>
    %c0_4 = arith.constant 0 : index
    %c0_5 = arith.constant 0 : index
    %5 = vector.load %arg4[%c0_4, %c0_5] : memref<256x128xbf16, #tpu.memory_space<vmem>>, vector<256x128xbf16>
    %cst = arith.constant dense<0.000000e+00> : vector<16x128xf32>
    %6 = tpu.matmul %4, %5, %cst {dimension_numbers = #tpu.dot_dimension_numbers<[1], [0], [0], [1], [0, 0, 1, 1], [], []>} : vector<16x256xbf16>, vector<256x128xbf16>, vector<16x128xf32> -> vector<16x128xf32>
    %7 = arith.addf %3, %6 : vector<16x128xf32>
    %c0_6 = arith.constant 0 : index
    %c0_7 = arith.constant 0 : index
    %8 = vector.load %arg7[%c0_6, %c0_7] : memref<16x128xf32, #tpu.memory_space<vmem>>, vector<16x128xf32>
    tpu.vector_store %arg7[%c0_6, %c0_7], %7 {strides = array<i32>} : memref<16x128xf32, #tpu.memory_space<vmem>>, vector<16x128xf32>,
    %c1_i32 = arith.constant 1 : i32
    %9 = arith.cmpi eq, %arg2, %c1_i32 : i32
    %10 = arith.extui %9 : i1 to i32
    %c0_i32_8 = arith.constant 0 : i32
    %11 = arith.cmpi ne, %10, %c0_i32_8 : i32
    scf.if %11 {
      %c0_9 = arith.constant 0 : index
      %c0_10 = arith.constant 0 : index
      %12 = vector.load %arg7[%c0_9, %c0_10] : memref<16x128xf32, #tpu.memory_space<vmem>>, vector<16x128xf32>
      %c0_11 = arith.constant 0 : index
      %c0_12 = arith.constant 0 : index
      %13 = vector.load %arg5[%c0_11, %c0_12] : memref<1x128xf32, #tpu.memory_space<vmem>>, vector<1x128xf32>
      %14 = vector.broadcast %13 : vector<1x128xf32> to vector<16x128xf32>
      %15 = arith.mulf %12, %14 : vector<16x128xf32>
      %c0_13 = arith.constant 0 : index
      %c0_14 = arith.constant 0 : index
      %16 = vector.load %arg6[%c0_13, %c0_14] : memref<1x128xf32, #tpu.memory_space<vmem>>, vector<1x128xf32>
      %17 = vector.broadcast %16 : vector<1x128xf32> to vector<16x128xf32>
      %18 = arith.addf %15, %17 : vector<16x128xf32>
      %19 = arith.negf %18 : vector<16x128xf32>
      %20 = math.exp %19 : vector<16x128xf32>
      %cst_15 = arith.constant 1.000000e+00 : f32
      %21 = vector.broadcast %cst_15 : f32 to vector<16x128xf32>
      %22 = arith.addf %21, %20 : vector<16x128xf32>
      %23 = arith.divf %21, %22 : vector<16x128xf32>
      %c0_16 = arith.constant 0 : index
      %c0_17 = arith.constant 0 : index
      %24 = vector.load %arg7[%c0_16, %c0_17] : memref<16x128xf32, #tpu.memory_space<vmem>>, vector<16x128xf32>
      tpu.vector_store %arg7[%c0_16, %c0_17], %23 {strides = array<i32>} : memref<16x128xf32, #tpu.memory_space<vmem>>, vector<16x128xf32>,
    } else {
    }
    return
  }
  func.func @transform_0(%arg0: i32, %arg1: i32, %arg2: i32) -> (i32, i32) {
    %c0_i32 = arith.constant 0 : i32
    return %arg0, %arg2 : i32, i32
  }
  func.func @transform_1(%arg0: i32, %arg1: i32, %arg2: i32) -> (i32, i32) {
    %c0_i32 = arith.constant 0 : i32
    return %arg2, %arg1 : i32, i32
  }
  func.func @transform_2(%arg0: i32, %arg1: i32, %arg2: i32) -> (i32, i32) {
    %c0_i32 = arith.constant 0 : i32
    %c0_i32_0 = arith.constant 0 : i32
    return %c0_i32, %arg1 : i32, i32
  }
  func.func @transform_3(%arg0: i32, %arg1: i32, %arg2: i32) -> (i32, i32) {
    %c0_i32 = arith.constant 0 : i32
    %c0_i32_0 = arith.constant 0 : i32
    return %c0_i32, %arg1 : i32, i32
  }
  func.func @transform_4(%arg0: i32, %arg1: i32, %arg2: i32) -> (i32, i32) {
    %c0_i32 = arith.constant 0 : i32
    return %arg0, %arg1 : i32, i32
  }
}

</mosaic_0001>

<bundles_post_ra>
// kernel: resnet_proto_forward.22
= control target key start
LH: loop header
LB: loop body
LE: loop exit
PB: predicated region body
PF: predicated region fallthrough
CT: control target
= control target key end

     0   :  { %9 = vsyncpa [#allocation3], 0  ;;  %s1660_s0 = inlined_call_operand.vmem [shape: bf16[512,128], index: 0, kind: input, shape index: {}]   ;;  %s1661_s1 = inlined_call_operand.hbm [shape: bf16[128,128], index: 1, kind: input, shape index: {}]   ;;  %s1662_s2 = inlined_call_operand.hbm [shape: f32[1,128], index: 2, kind: input, shape index: {}]   ;;  %s1663_s3 = inlined_call_operand.hbm [shape: f32[1,128], index: 3, kind: input, shape index: {}]   ;;  %s1664_s4 = inlined_call_operand.vmem [shape: f32[512,128], index: 4, kind: output, shape index: {}]  }
   0x1   :  { %10 = vsyncpa [#allocation5], 0  ;;  %s1441_s15 = smov 0   ;;  %s1443_s16 = smov 0  }
   0x2   :  { %s1445_s17 = smov 0  }
   0x3 LB: > { %s1411_s18 = smov [#allocation4]   ;;  %s1088_s20 = sadd.s32 4294967295, %s1409_s17   ;;  %s1409_s17 = sphi %s1445_s17, %s16_s17   ;;  %s1405_s16 = sphi %s1443_s16, %s1670_s16   ;;  %s1401_s15 = sphi %s1441_s15, %s1669_s15  }
   0x4   : > { %s208_s19 = sshll.u32 %s1411_s18, 4  ;;  %p1090_p0 = scmp.ge.s32.totalorder %s1409_s17, 1  ;;  %s209_s19 = int_to_ptr.vmem [resolvable:$true] %s208_s19 }
   0x5   : > { %p176_p1 = scmp.lt.s32.totalorder %s1409_s17, 3  ;;  %p1459_p2 = scmp.eq.s32.totalorder %s1088_s20, 0 }
   0x6   : > { %s35_s23 = sadd.s32 1, %s1405_s16  ;;  %s1412_s26 = smov [#allocation2]  }
   0x7   : > { %p1463_p3 = pnand %p1090_p0, %p176_p1  ;;  %p1476_p6 = scmp.ge.s32.totalorder %s35_s23, 2 }
   0x8   : > { %s192_s27 = sshll.u32 %s1412_s26, 4  ;;  %s1312_s28 = scalar_lea.vmem %s209_s19, 16  ;;  %s193_s27 = int_to_ptr.vmem [resolvable:$true] %s192_s27 }
   0x9   : > { %p1231_p4 = pneg %p1463_p3  ;;  %p1313_p8 = scmp.ne.s32.totalorder %s209_s19, %s1312_s28 }
   0xa   : > { %s1319_s29 = scalar_lea.vmem %s209_s19, 32  ;;  %p1320_p11 = scmp.lt.s32.totalorder %s209_s19, %s209_s19 }
   0xb   : > { %p1472_p5 = pnand %p1459_p2, %p1231_p4  ;;  %p1321_p12 = scmp.lt.s32.totalorder %s1319_s29, %s1312_s28 }
   0xd   : > { %p1303_p7 = pneg %p1472_p5  ;;  %p1322_p13 = por %p1321_p12, %p1320_p11 }
   0xf   : > { %p1315_p9 = pnand %p1313_p8, %p1303_p7 }
  0x11   : > { %p1316_p10 = pneg %p1315_p9 }
  0x13   : > { %p1323_p0 = pnand %p1322_p13, %p1316_p10 }
  0x15   : > { %1326 = shalt.err (!%p1323_p0)
}
  0x16   : > { %1237 = dma.hbm_to_vmem [thread:$0]  (!%p1472_p5), %s1662_s2, 16, %s209_s19, [#allocation5]  }
  0x17   : > { %s1672_s23 = smov (%p1476_p6, %s35_s23), 0  ;;  %s1338_s6 = scalar_lea.vmem %s193_s27, 1024 }
  0x18   : > { %p1339_p1 = scmp.ne.s32.totalorder %s193_s27, %s1338_s6  ;;  %p1346_p9 = scmp.lt.s32.totalorder %s193_s27, %s193_s27 }
  0x19   : > { %p1347_p10 = scmp.lt.s32.totalorder %s1338_s6, %s1338_s6 }
  0x1a   : > { %p1341_p4 = pnand %p1339_p1, %p1303_p7 }
  0x1b   : > { %p1348_p11 = por %p1347_p10, %p1346_p9 }
  0x1c   : > { %p1342_p8 = pneg %p1341_p4 }
  0x1e   : > { %p1349_p12 = pnand %p1348_p11, %p1342_p8 }
  0x20   : > { %1352 = shalt.err (!%p1349_p12)
}
  0x21   : > { %s1413_s7 = smov 64   ;;  %s1414_s8 = smov 4  }
  0x22   : > { %1234 = dma.hbm_to_vmem [thread:$0]  (!%p1472_p5), %s1661_s1, 1024, %s193_s27, [#allocation3], %s1413_s7, %s1413_s7, %s1414_s8  }
  0x23   : > { %s1415_s11 = smov [#allocation6]  }
  0x24   : > { %s221_s12 = sshll.u32 %s1415_s11, 4  ;;  %s222_s12 = int_to_ptr.vmem [resolvable:$true] %s221_s12 }
  0x25   : > { %s1364_s13 = scalar_lea.vmem %s222_s12, 16  ;;  %s1371_s14 = scalar_lea.vmem %s222_s12, 32 }
  0x26   : > { %p1365_p6 = scmp.ne.s32.totalorder %s222_s12, %s1364_s13  ;;  %p1372_p1 = scmp.lt.s32.totalorder %s222_s12, %s222_s12 }
  0x27   : > { %p1373_p4 = scmp.lt.s32.totalorder %s1371_s14, %s1364_s13 }
  0x28   : > { %p1367_p13 = pnand %p1365_p6, %p1303_p7 }
  0x29   : > { %p1374_p8 = por %p1373_p4, %p1372_p1 }
  0x2a   : > { %p1368_p0 = pneg %p1367_p13 }
  0x2c   : > { %p1375_p9 = pnand %p1374_p8, %p1368_p0 }
  0x2e   : > { %1378 = shalt.err (!%p1375_p9)
}
  0x2f   : > { %1240 = dma.hbm_to_vmem [thread:$0]  (!%p1472_p5), %s1663_s3, 16, %s222_s12, [#allocation5]  }
  0x30   : > { %246 = sbr.rel (%p1463_p3) target bundleno = 319 (0x13f), region = 36 }
  0x35   : > { %1392 = dma.done.wait (%p1459_p2), [#allocation3], 1024  }
  0x36   : > { %1394 = vsyncadd (%p1459_p2), [#allocation3], 4294966272 }
  0x37   : > { %1396 = dma.done.wait (%p1459_p2), [#allocation5], 32  }
  0x38   : > { %1398 = vsyncadd (%p1459_p2), [#allocation5], 4294967264  ;;  %s1099_s20 = sshll.u32 %s1401_s15, 5  ;;  %v1277_v0 = vld [vmem:[#allocation2 + $0x38] sm:$0xff]   ;;  %v1278_v1 = vld [vmem:[#allocation2 + $0x30] sm:$0xff]  }
  0x39   : > { %p287_p7 = scmp.lt.s32.totalorder %s1099_s20, 63  ;;  %1155 = vmatprep.subr.bf16.mxu0 %v1277_v0  ;;  %1203 = vmatprep.subr.bf16.mxu1 %v1277_v0  ;;  %v1279_v2 = vld [vmem:[#allocation2 + $0x28] sm:$0xff]   ;;  %v1280_v3 = vld [vmem:[#allocation2 + $0x20] sm:$0xff]   ;;  %v1281_v6 = vld [vmem:[#allocation2 + $0x18] sm:$0xff]  }
  0x3a   : > { %1156 = vmatpush3.bf16.msra.mxu0 %v1277_v0  ;;  %1211 = vmatpush3.bf16.msra.mxu1 %v1277_v0  ;;  %v1282_v7 = vld [vmem:[#allocation2 + $0x10] sm:$0xff]   ;;  %v1283_v8 = vld [vmem:[#allocation2 + $0x8] sm:$0xff]   ;;  %v1284_v9 = vld [vmem:[#allocation2] sm:$0xff]  }
  0x3b   : > { %s1674_s20 = smov (!%p287_p7, %s1099_s20), 63  ;;  %1157 = vmatprep.subr.bf16.mxu0 %v1278_v1  ;;  %1204 = vmatprep.subr.bf16.mxu1 %v1278_v1  ;;  %v1545_v25 = vld [vmem:[#allocation4] ss:$0 sm:$0xff]  ;;  %v1547_v27 = vld [vmem:[#allocation6] ss:$0 sm:$0xff] }
  0x3c   : > { %s1100_s22 = sshll.u32 %s1674_s20, 2  ;;  %s1102_s15 = sshll.u32 %s1674_s20, 3 }
  0x3d   : > { %s1527_s21 = scalar_lea.vmem %s1660_s0, %s1100_s22  ;;  %s1559_s28 = scalar_lea.vmem %s1664_s4, %s1102_s15 }
  0x3e   : > { %1158 = vmatpush3.bf16.msra.mxu0 %v1278_v1  ;;  %1212 = vmatpush3.bf16.msra.mxu1 %v1278_v1  ;;  %v1285_v4 = vld [vmem:[%s1527_s21] sm:$0xff]   ;;  %v1287_v10 = vld [vmem:[%s1527_s21 + $0x8] sm:$0xff]   ;;  %v1289_v12 = vld [vmem:[%s1527_s21 + $0x10] sm:$0xff]  }
  0x3f   : > { %1159 = vmatprep.subr.bf16.mxu0 %v1279_v2  ;;  %1205 = vmatprep.subr.bf16.mxu1 %v1279_v2  ;;  %v1286_v5 = vld [vmem:[%s1527_s21 + $0x40] sm:$0xff]   ;;  %v1288_v11 = vld [vmem:[%s1527_s21 + $0x48] sm:$0xff]   ;;  %v1290_v13 = vld [vmem:[%s1527_s21 + $0x50] sm:$0xff]  }
  0x40   : > { %1171 = vmatprep.mubr.bf16.mxu0 %v1285_v4  ;;  %1187 = vmatprep.mubr.bf16.mxu1 %v1286_v5  ;;  %v1291_v14 = vld [vmem:[%s1527_s21 + $0x18] sm:$0xff]   ;;  %v1293_v16 = vld [vmem:[%s1527_s21 + $0x20] sm:$0xff]   ;;  %v1295_v18 = vld [vmem:[%s1527_s21 + $0x28] sm:$0xff]  }
  0x41   : > { %v1292_v15 = vld [vmem:[%s1527_s21 + $0x58] sm:$0xff]   ;;  %v1294_v17 = vld [vmem:[%s1527_s21 + $0x60] sm:$0xff]   ;;  %v1296_v19 = vld [vmem:[%s1527_s21 + $0x68] sm:$0xff]  }
  0x42   : > { %1160 = vmatpush3.bf16.msra.mxu0 %v1279_v2  ;;  %1213 = vmatpush3.bf16.msra.mxu1 %v1279_v2  ;;  %v1297_v20 = vld [vmem:[%s1527_s21 + $0x30] sm:$0xff]   ;;  %v1299_v22 = vld [vmem:[%s1527_s21 + $0x38] sm:$0xff]  }
  0x43   : > { %1161 = vmatprep.subr.bf16.mxu0 %v1280_v3  ;;  %1206 = vmatprep.subr.bf16.mxu1 %v1280_v3  ;;  %v1298_v21 = vld [vmem:[%s1527_s21 + $0x70] sm:$0xff]   ;;  %v1300_v23 = vld [vmem:[%s1527_s21 + $0x78] sm:$0xff]  }
  0x46   : > { %1162 = vmatpush3.bf16.msra.mxu0 %v1280_v3  ;;  %1214 = vmatpush3.bf16.msra.mxu1 %v1280_v3 }
  0x47   : > { %1163 = vmatprep.subr.bf16.mxu0 %v1281_v6  ;;  %1207 = vmatprep.subr.bf16.mxu1 %v1281_v6 }
  0x4a   : > { %1164 = vmatpush3.bf16.msra.mxu0 %v1281_v6  ;;  %1215 = vmatpush3.bf16.msra.mxu1 %v1281_v6 }
  0x4b   : > { %1165 = vmatprep.subr.bf16.mxu0 %v1282_v7  ;;  %1208 = vmatprep.subr.bf16.mxu1 %v1282_v7 }
  0x4e   : > { %1166 = vmatpush3.bf16.msra.mxu0 %v1282_v7  ;;  %1216 = vmatpush3.bf16.msra.mxu1 %v1282_v7 }
  0x4f   : > { %1167 = vmatprep.subr.bf16.mxu0 %v1283_v8  ;;  %1209 = vmatprep.subr.bf16.mxu1 %v1283_v8 }
  0x52   : > { %1168 = vmatpush3.bf16.msra.mxu0 %v1283_v8  ;;  %1217 = vmatpush3.bf16.msra.mxu1 %v1283_v8 }
  0x53   : > { %1169 = vmatprep.subr.bf16.mxu0 %v1284_v9  ;;  %1210 = vmatprep.subr.bf16.mxu1 %v1284_v9 }
  0x56   : > { %1170 = vmatpush3.bf16.msra.mxu0 %v1284_v9  ;;  %1218 = vmatpush3.bf16.msra.mxu1 %v1284_v9 }
  0x59   : > { %1172 = vmatmul.mubr.bf16.vlgmr.msra.gmra.mxu0 %v1287_v10  ;;  %1188 = vmatmul.mubr.bf16.vlgmr.msra.gmra.mxu1 %v1288_v11 }
  0x5a   : > { %1175 = vmatprep.mubr.bf16.mxu0 %v1289_v12  ;;  %1191 = vmatprep.mubr.bf16.mxu1 %v1290_v13 }
  0x61   : > { %1176 = vmatmul.mubr.bf16.gmra.mxu0 %v1291_v14  ;;  %1192 = vmatmul.mubr.bf16.gmra.mxu1 %v1292_v15 }
  0x62   : > { %1179 = vmatprep.mubr.bf16.mxu0 %v1293_v16  ;;  %1195 = vmatprep.mubr.bf16.mxu1 %v1294_v17 }
  0x69   : > { %1180 = vmatmul.mubr.bf16.gmra.mxu0 %v1295_v18  ;;  %1196 = vmatmul.mubr.bf16.gmra.mxu1 %v1296_v19 }
  0x6a   : > { %1183 = vmatprep.mubr.bf16.mxu0 %v1297_v20  ;;  %1199 = vmatprep.mubr.bf16.mxu1 %v1298_v21 }
  0x71   : > { %1184 = vmatmul.mubr.bf16.gmra.mxu0 %v1299_v22  ;;  %1200 = vmatmul.mubr.bf16.gmra.mxu1 %v1300_v23 }
 0x119   : > { %v1173_v24 = vpop.f32.mrf.mxu0  ;;  %v1189_v26 = vpop.f32.mrf.mxu1 }
 0x11a   : > { %v835_v30 = vmul.f32 %v1173_v24, %v1545_v25  ;;  %v851_v31 = vmul.f32 %v1189_v26, %v1545_v25 }
 0x11b   : > { %v600_v28 = vpop.f32.mrf.mxu0  ;;  %v664_v29 = vpop.f32.mrf.mxu1 }
 0x11c   : > { %v874_v34 = vadd.f32 %v1547_v27, %v835_v30  ;;  %v890_v35 = vadd.f32 %v1547_v27, %v851_v31  ;;  %v833_v36 = vmul.f32 %v1545_v25, %v600_v28  ;;  %v849_v37 = vmul.f32 %v1545_v25, %v664_v29 }
 0x11d   : > { %v1174_v32 = vpop.f32.mrf.mxu0  ;;  %v1190_v33 = vpop.f32.mrf.mxu1 }
 0x11e   : > { %v906_v40 = vmax.f32 %v874_v34, 0.0  ;;  %v922_v41 = vmax.f32 %v890_v35, 0.0  ;;  %v872_v42 = vadd.f32 %v1547_v27, %v833_v36  ;;  %v888_v43 = vadd.f32 %v1547_v27, %v849_v37 }
 0x11f   : > { %v603_v38 = vpop.f32.mrf.mxu0  ;;  %v667_v39 = vpop.f32.mrf.mxu1  ;;  %v836_v44 = vmul.f32 %v1174_v32, %v1545_v25  ;;  %v852_v45 = vmul.f32 %v1190_v33, %v1545_v25 }
 0x120   : > { %938 = vst [vmem:[%s1559_s28 + $0x10] sm:$0xff] %v906_v40  ;;  %954 = vst [vmem:[%s1559_s28 + $0x90] sm:$0xff] %v922_v41  ;;  %v904_v48 = vmax.f32 %v872_v42, 0.0  ;;  %v920_v49 = vmax.f32 %v888_v43, 0.0  ;;  %v834_v52 = vmul.f32 %v1545_v25, %v603_v38  ;;  %v850_v53 = vmul.f32 %v1545_v25, %v667_v39 }
 0x121   : > { %v1177_v46 = vpop.f32.mrf.mxu0  ;;  %v1193_v47 = vpop.f32.mrf.mxu1  ;;  %v875_v50 = vadd.f32 %v1547_v27, %v836_v44  ;;  %v891_v51 = vadd.f32 %v1547_v27, %v852_v45 }
 0x122   : > { %936 = vst [vmem:[%s1559_s28] sm:$0xff] %v904_v48  ;;  %952 = vst [vmem:[%s1559_s28 + $0x80] sm:$0xff] %v920_v49  ;;  %v839_v56 = vmul.f32 %v1177_v46, %v1545_v25  ;;  %v855_v57 = vmul.f32 %v1193_v47, %v1545_v25  ;;  %v873_v60 = vadd.f32 %v1547_v27, %v834_v52 }
 0x123   : > { %v616_v54 = vpop.f32.mrf.mxu0  ;;  %v680_v55 = vpop.f32.mrf.mxu1  ;;  %v907_v58 = vmax.f32 %v875_v50, 0.0  ;;  %v923_v59 = vmax.f32 %v891_v51, 0.0  ;;  %v889_v61 = vadd.f32 %v1547_v27, %v850_v53 }
 0x124   : > { %v878_v0 = vadd.f32 %v1547_v27, %v839_v56  ;;  %v894_v1 = vadd.f32 %v1547_v27, %v855_v57  ;;  %v837_v2 = vmul.f32 %v1545_v25, %v616_v54  ;;  %v853_v3 = vmul.f32 %v1545_v25, %v680_v55 }
 0x125   : > { %v1178_v62 = vpop.f32.mrf.mxu0  ;;  %v1194_v63 = vpop.f32.mrf.mxu1  ;;  %939 = vst [vmem:[%s1559_s28 + $0x18] sm:$0xff] %v907_v58  ;;  %955 = vst [vmem:[%s1559_s28 + $0x98] sm:$0xff] %v923_v59  ;;  %v905_v4 = vmax.f32 %v873_v60, 0.0  ;;  %v921_v5 = vmax.f32 %v889_v61, 0.0 }
 0x126   : > { %v910_v8 = vmax.f32 %v878_v0, 0.0  ;;  %v926_v9 = vmax.f32 %v894_v1, 0.0  ;;  %v876_v10 = vadd.f32 %v1547_v27, %v837_v2  ;;  %v892_v11 = vadd.f32 %v1547_v27, %v853_v3 }
 0x127   : > { %v619_v6 = vpop.f32.mrf.mxu0  ;;  %v683_v7 = vpop.f32.mrf.mxu1  ;;  %937 = vst [vmem:[%s1559_s28 + $0x8] sm:$0xff] %v905_v4  ;;  %953 = vst [vmem:[%s1559_s28 + $0x88] sm:$0xff] %v921_v5  ;;  %v840_v12 = vmul.f32 %v1178_v62, %v1545_v25  ;;  %v856_v13 = vmul.f32 %v1194_v63, %v1545_v25 }
 0x128   : > { %942 = vst [vmem:[%s1559_s28 + $0x30] sm:$0xff] %v910_v8  ;;  %958 = vst [vmem:[%s1559_s28 + $0xb0] sm:$0xff] %v926_v9  ;;  %v908_v16 = vmax.f32 %v876_v10, 0.0  ;;  %v924_v17 = vmax.f32 %v892_v11, 0.0  ;;  %v838_v20 = vmul.f32 %v1545_v25, %v619_v6  ;;  %v854_v21 = vmul.f32 %v1545_v25, %v683_v7 }
 0x129   : > { %v1181_v14 = vpop.f32.mrf.mxu0  ;;  %v1197_v15 = vpop.f32.mrf.mxu1  ;;  %v879_v18 = vadd.f32 %v1547_v27, %v840_v12  ;;  %v895_v19 = vadd.f32 %v1547_v27, %v856_v13 }
 0x12a   : > { %940 = vst [vmem:[%s1559_s28 + $0x20] sm:$0xff] %v908_v16  ;;  %956 = vst [vmem:[%s1559_s28 + $0xa0] sm:$0xff] %v924_v17  ;;  %v843_v24 = vmul.f32 %v1181_v14, %v1545_v25  ;;  %v859_v26 = vmul.f32 %v1197_v15, %v1545_v25  ;;  %v877_v30 = vadd.f32 %v1547_v27, %v838_v20 }
 0x12b   : > { %v632_v22 = vpop.f32.mrf.mxu0  ;;  %v696_v23 = vpop.f32.mrf.mxu1  ;;  %v911_v28 = vmax.f32 %v879_v18, 0.0  ;;  %v927_v29 = vmax.f32 %v895_v19, 0.0  ;;  %v893_v31 = vadd.f32 %v1547_v27, %v854_v21 }
 0x12c   : > { %v882_v34 = vadd.f32 %v1547_v27, %v843_v24  ;;  %v898_v35 = vadd.f32 %v1547_v27, %v859_v26  ;;  %v841_v36 = vmul.f32 %v1545_v25, %v632_v22  ;;  %v857_v37 = vmul.f32 %v1545_v25, %v696_v23 }
 0x12d   : > { %v1182_v32 = vpop.f32.mrf.mxu0  ;;  %v1198_v33 = vpop.f32.mrf.mxu1  ;;  %943 = vst [vmem:[%s1559_s28 + $0x38] sm:$0xff] %v911_v28  ;;  %959 = vst [vmem:[%s1559_s28 + $0xb8] sm:$0xff] %v927_v29  ;;  %v909_v38 = vmax.f32 %v877_v30, 0.0  ;;  %v925_v39 = vmax.f32 %v893_v31, 0.0 }
 0x12e   : > { %v914_v42 = vmax.f32 %v882_v34, 0.0  ;;  %v930_v43 = vmax.f32 %v898_v35, 0.0  ;;  %v880_v44 = vadd.f32 %v1547_v27, %v841_v36  ;;  %v896_v45 = vadd.f32 %v1547_v27, %v857_v37 }
 0x12f   : > { %v635_v40 = vpop.f32.mrf.mxu0  ;;  %v699_v41 = vpop.f32.mrf.mxu1  ;;  %941 = vst [vmem:[%s1559_s28 + $0x28] sm:$0xff] %v909_v38  ;;  %957 = vst [vmem:[%s1559_s28 + $0xa8] sm:$0xff] %v925_v39  ;;  %v844_v46 = vmul.f32 %v1182_v32, %v1545_v25  ;;  %v860_v47 = vmul.f32 %v1198_v33, %v1545_v25 }
 0x130   : > { %946 = vst [vmem:[%s1559_s28 + $0x50] sm:$0xff] %v914_v42  ;;  %962 = vst [vmem:[%s1559_s28 + $0xd0] sm:$0xff] %v930_v43  ;;  %v912_v50 = vmax.f32 %v880_v44, 0.0  ;;  %v928_v51 = vmax.f32 %v896_v45, 0.0  ;;  %v842_v54 = vmul.f32 %v1545_v25, %v635_v40  ;;  %v858_v55 = vmul.f32 %v1545_v25, %v699_v41 }
 0x131   : > { %v1185_v48 = vpop.f32.mrf.mxu0  ;;  %v1201_v49 = vpop.f32.mrf.mxu1  ;;  %v883_v52 = vadd.f32 %v1547_v27, %v844_v46  ;;  %v899_v53 = vadd.f32 %v1547_v27, %v860_v47 }
 0x132   : > { %944 = vst [vmem:[%s1559_s28 + $0x40] sm:$0xff] %v912_v50  ;;  %960 = vst [vmem:[%s1559_s28 + $0xc0] sm:$0xff] %v928_v51  ;;  %v847_v58 = vmul.f32 %v1185_v48, %v1545_v25  ;;  %v863_v59 = vmul.f32 %v1201_v49, %v1545_v25  ;;  %v881_v62 = vadd.f32 %v1547_v27, %v842_v54 }
 0x133   : > { %v648_v56 = vpop.f32.mrf.mxu0  ;;  %v712_v57 = vpop.f32.mrf.mxu1  ;;  %v915_v60 = vmax.f32 %v883_v52, 0.0  ;;  %v931_v61 = vmax.f32 %v899_v53, 0.0  ;;  %v897_v63 = vadd.f32 %v1547_v27, %v858_v55 }
 0x134   : > { %v886_v2 = vadd.f32 %v1547_v27, %v847_v58  ;;  %v902_v3 = vadd.f32 %v1547_v27, %v863_v59  ;;  %v845_v4 = vmul.f32 %v1545_v25, %v648_v56  ;;  %v861_v5 = vmul.f32 %v1545_v25, %v712_v57 }
 0x135   : > { %v1186_v0 = vpop.f32.mrf.mxu0  ;;  %v1202_v1 = vpop.f32.mrf.mxu1  ;;  %947 = vst [vmem:[%s1559_s28 + $0x58] sm:$0xff] %v915_v60  ;;  %963 = vst [vmem:[%s1559_s28 + $0xd8] sm:$0xff] %v931_v61  ;;  %v913_v6 = vmax.f32 %v881_v62, 0.0  ;;  %v929_v7 = vmax.f32 %v897_v63, 0.0 }
 0x136   : > { %v918_v10 = vmax.f32 %v886_v2, 0.0  ;;  %v934_v11 = vmax.f32 %v902_v3, 0.0  ;;  %v884_v12 = vadd.f32 %v1547_v27, %v845_v4  ;;  %v900_v13 = vadd.f32 %v1547_v27, %v861_v5 }
 0x137   : > { %v651_v8 = vpop.f32.mrf.mxu0  ;;  %v715_v9 = vpop.f32.mrf.mxu1  ;;  %945 = vst [vmem:[%s1559_s28 + $0x48] sm:$0xff] %v913_v6  ;;  %961 = vst [vmem:[%s1559_s28 + $0xc8] sm:$0xff] %v929_v7  ;;  %v848_v14 = vmul.f32 %v1186_v0, %v1545_v25  ;;  %v864_v15 = vmul.f32 %v1202_v1, %v1545_v25 }
 0x138   : > { %950 = vst [vmem:[%s1559_s28 + $0x70] sm:$0xff] %v918_v10  ;;  %966 = vst [vmem:[%s1559_s28 + $0xf0] sm:$0xff] %v934_v11  ;;  %v916_v16 = vmax.f32 %v884_v12, 0.0  ;;  %v932_v17 = vmax.f32 %v900_v13, 0.0  ;;  %v846_v20 = vmul.f32 %v1545_v25, %v651_v8  ;;  %v862_v21 = vmul.f32 %v1545_v25, %v715_v9 }
 0x139   : > { %v887_v18 = vadd.f32 %v1547_v27, %v848_v14  ;;  %v903_v19 = vadd.f32 %v1547_v27, %v864_v15 }
 0x13a   : > { %948 = vst [vmem:[%s1559_s28 + $0x60] sm:$0xff] %v916_v16  ;;  %964 = vst [vmem:[%s1559_s28 + $0xe0] sm:$0xff] %v932_v17  ;;  %v885_v24 = vadd.f32 %v1547_v27, %v846_v20  ;;  %v901_v26 = vadd.f32 %v1547_v27, %v862_v21 }
 0x13b   : > { %v919_v22 = vmax.f32 %v887_v18, 0.0  ;;  %v935_v23 = vmax.f32 %v903_v19, 0.0 }
 0x13c   : > { %v917_v28 = vmax.f32 %v885_v24, 0.0  ;;  %v933_v29 = vmax.f32 %v901_v26, 0.0 }
 0x13d   : > { %951 = vst [vmem:[%s1559_s28 + $0x78] sm:$0xff] %v919_v22  ;;  %967 = vst [vmem:[%s1559_s28 + $0xf8] sm:$0xff] %v935_v23 }
 0x13e   : > { %949 = vst [vmem:[%s1559_s28 + $0x68] sm:$0xff] %v917_v28  ;;  %965 = vst [vmem:[%s1559_s28 + $0xe8] sm:$0xff] %v933_v29 }
 0x13f PF: > { %s16_s17 = sadd.s32 1, %s1409_s17   ;;  %s1669_s15 = smov %s1405_s16 }
 0x140   : > { %p13_p2 = scmp.ge.s32.totalorder %s16_s17, 4   ;;  %s1670_s16 = smov %s1672_s23 }
 0x142   :  { %15 = sbr.rel (!%p13_p2) target bundleno = 3 (0x3), region = 90 }
 0x147   :  { %996 = vsyncpa [#allocation3], 1 }
 0x148   :  { %998 = vsyncpa [#allocation3 + $0x1], 1 }
 0x149   :  { %999 = vsyncpa [#allocation5], 1 }

// kernel: resnet_proto_forward.23
= control target key start
LH: loop header
LB: loop body
LE: loop exit
PB: predicated region body
PF: predicated region fallthrough
CT: control target
= control target key end

     0   :  { %s1281_s15 = smov 0   ;;  %s1283_s16 = smov 0   ;;  %s1666_s0 = inlined_call_operand.vmem [shape: bf16[128,768], index: 0, kind: input, shape index: {}]   ;;  %s1667_s1 = inlined_call_operand.vmem [shape: bf16[768,128], index: 1, kind: input, shape index: {}]   ;;  %s1668_s2 = inlined_call_operand.vmem [shape: f32[1,128], index: 2, kind: input, shape index: {}]   ;;  %s1669_s3 = inlined_call_operand.vmem [shape: f32[1,128], index: 3, kind: input, shape index: {}]   ;;  %s1670_s4 = inlined_call_operand.vmem [shape: f32[128,128], index: 4, kind: output, shape index: {}]  }
   0x1   :  { %s1285_s17 = smov 0   ;;  %s1287_s18 = smov 0  }
   0x2   :  { %s1289_s19 = smov 0  }
   0x3 LB: > { %s26_s20 = sadd.s32 1, %s1249_s18  ;;  %p49_p1 = scmp.ne.s32.totalorder %s1241_s16, %s1237_s15  ;;  %s1253_s19 = sphi %s1289_s19, %s14_s19   ;;  %s1249_s18 = sphi %s1287_s18, %s1674_s18   ;;  %s1245_s17 = sphi %s1285_s17, %s1673_s17   ;;  %s1241_s16 = sphi %s1283_s16, %s1672_s16   ;;  %s1237_s15 = sphi %s1281_s15, %s1671_s15  }
   0x4   : > { %p27_p0 = scmp.ge.s32.totalorder %s26_s20, 3  ;;  %p50_p2 = scmp.eq.s32.totalorder %s1253_s19, 0 }
   0x5   : > { %s42_s22 = sadd.s32 1, %s1241_s16  ;;  %p1005_p5 = scmp.ge.s32.totalorder %s1253_s19, 3 }
   0x6   : > { %s1676_s20 = smov (%p27_p0, %s26_s20), 0  ;;  %p51_p3 = por %p50_p2, %p49_p1 }
   0x7   : > { %s38_s21 = ssub.s32 %s1249_s18, %s1676_s20  ;;  %195 = sbr.rel (%p1005_p5) target bundleno = 24 (0x18), region = 24 }
   0x8   : > { %p40_p4 = scmp.eq.s32.totalorder %s38_s21, 0 }
   0xa   : > { %s1316_s23 = scalar_select %p40_p4, %s1241_s16, %s42_s22  }
   0xc   : > { %198 = sbr.rel (!%p51_p3) target bundleno = 24 (0x18), region = 28  ;;  %s200_s24 = sand.u32 (%p51_p3), 1, %s1241_s16  }
   0xd   : > { %s1053_s25 = sshll.u32 (%p51_p3), %s1249_s18, 3  ;;  %s1006_s26 = sshll.u32 (%p51_p3), %s200_s24, 7 }
   0xe   : > { %s1324_s29 = scalar_lea.vmem (%p51_p3), %s1666_s0, %s1053_s25  ;;  %s202_s30 = scalar_lea.vmem (%p51_p3), [#allocation2], %s1006_s26 }
   0xf   : > { %v267_v0 = vld [vmem:[%s1324_s29] sm:$0xff] (%p51_p3)  ;;  %v269_v1 = vld [vmem:[%s1324_s29 + $0x18] sm:$0xff] (%p51_p3)  ;;  %v271_v2 = vld [vmem:[%s1324_s29 + $0x30] sm:$0xff] (%p51_p3) }
  0x10   : > { %268 = vst [vmem:[%s202_s30] sm:$0xff] (%p51_p3), %v267_v0  ;;  %270 = vst [vmem:[%s202_s30 + $0x8] sm:$0xff] (%p51_p3), %v269_v1  ;;  %v273_v3 = vld [vmem:[%s1324_s29 + $0x48] sm:$0xff] (%p51_p3)  ;;  %v275_v4 = vld [vmem:[%s1324_s29 + $0x60] sm:$0xff] (%p51_p3) }
  0x11   : > { %272 = vst [vmem:[%s202_s30 + $0x10] sm:$0xff] %v271_v2  ;;  %v277_v5 = vld [vmem:[%s1324_s29 + $0x78] sm:$0xff]  ;;  %274 = vst [vmem:[%s202_s30 + $0x18] sm:$0xff] %v273_v3  ;;  %v279_v6 = vld [vmem:[%s1324_s29 + $0x90] sm:$0xff] }
  0x12   : > { %276 = vst [vmem:[%s202_s30 + $0x20] sm:$0xff] %v275_v4  ;;  %278 = vst [vmem:[%s202_s30 + $0x28] sm:$0xff] %v277_v5  ;;  %v281_v7 = vld [vmem:[%s1324_s29 + $0xa8] sm:$0xff]  ;;  %v283_v8 = vld [vmem:[%s1324_s29 + $0xc0] sm:$0xff] }
  0x13   : > { %280 = vst [vmem:[%s202_s30 + $0x30] sm:$0xff] %v279_v6  ;;  %282 = vst [vmem:[%s202_s30 + $0x38] sm:$0xff] %v281_v7  ;;  %v285_v9 = vld [vmem:[%s1324_s29 + $0xd8] sm:$0xff]  ;;  %v287_v10 = vld [vmem:[%s1324_s29 + $0xf0] sm:$0xff] }
  0x14   : > { %284 = vst [vmem:[%s202_s30 + $0x40] sm:$0xff] %v283_v8  ;;  %v289_v11 = vld [vmem:[%s1324_s29 + $0x108] sm:$0xff]  ;;  %286 = vst [vmem:[%s202_s30 + $0x48] sm:$0xff] %v285_v9  ;;  %v291_v12 = vld [vmem:[%s1324_s29 + $0x120] sm:$0xff] }
  0x15   : > { %288 = vst [vmem:[%s202_s30 + $0x50] sm:$0xff] %v287_v10  ;;  %290 = vst [vmem:[%s202_s30 + $0x58] sm:$0xff] %v289_v11  ;;  %v293_v13 = vld [vmem:[%s1324_s29 + $0x138] sm:$0xff]  ;;  %v295_v14 = vld [vmem:[%s1324_s29 + $0x150] sm:$0xff] }
  0x16   : > { %292 = vst [vmem:[%s202_s30 + $0x60] sm:$0xff] %v291_v12  ;;  %294 = vst [vmem:[%s202_s30 + $0x68] sm:$0xff] %v293_v13  ;;  %v297_v15 = vld [vmem:[%s1324_s29 + $0x168] sm:$0xff] }
  0x17   : > { %296 = vst [vmem:[%s202_s30 + $0x70] sm:$0xff] %v295_v14  ;;  %298 = vst [vmem:[%s202_s30 + $0x78] sm:$0xff] %v297_v15 }
  0x18 PF: > { %p1009_p6 = scmp.ge.s32.totalorder %s1253_s19, 1  ;;  %p315_p7 = scmp.lt.s32.totalorder %s1253_s19, 4 }
  0x1a   : > { %p316_p8 = pnand %p1009_p6, %p315_p7 }
  0x1b   : > { %s322_s5 = sand.u32 (!%p316_p8), 1, %s1237_s15   ;;  %s1011_s6 = sshll.u32 (!%p316_p8), %s1245_s17, 5 }
  0x1c   : > { %319 = sbr.rel (%p316_p8) target bundleno = 326 (0x146), region = 70  ;;  %s1010_s7 = sshll.u32 (!%p316_p8), %s322_s5, 7 }
  0x1d   : > { %p367_p9 = scmp.lt.s32.totalorder (!%p316_p8), %s1011_s6, 95  ;;  %s1351_s12 = scalar_lea.vmem (!%p316_p8), [#allocation2], %s1010_s7 }
  0x1e   : > { %p1013_p10 = scmp.ne.s32.totalorder (!%p316_p8), %s1245_s17, 0 }
  0x21   : > { %s1678_s6 = smov (!%p367_p9, %s1011_s6), 95  ;;  %394 = sbr.rel (%p1013_p10) target bundleno = 47 (0x2f), region = 78 }
  0x22   : > { %s1012_s8 = sshll.u32 %s1678_s6, 2 }
  0x23   : > { %s1349_s11 = scalar_lea.vmem %s1667_s1, %s1012_s8 }
  0x26   : > { %v1255_v16 = vmov 0.0  }
  0x27   : > { %395 = vst [vmem:[%s1670_s4] sm:$0xff] %v1255_v16  ;;  %396 = vst [vmem:[%s1670_s4 + $0x8] sm:$0xff] %v1255_v16 }
  0x28   : > { %397 = vst [vmem:[%s1670_s4 + $0x10] sm:$0xff] %v1255_v16  ;;  %398 = vst [vmem:[%s1670_s4 + $0x18] sm:$0xff] %v1255_v16 }
  0x29   : > { %399 = vst [vmem:[%s1670_s4 + $0x20] sm:$0xff] %v1255_v16  ;;  %400 = vst [vmem:[%s1670_s4 + $0x28] sm:$0xff] %v1255_v16 }
  0x2a   : > { %401 = vst [vmem:[%s1670_s4 + $0x30] sm:$0xff] %v1255_v16  ;;  %402 = vst [vmem:[%s1670_s4 + $0x38] sm:$0xff] %v1255_v16 }
  0x2b   : > { %403 = vst [vmem:[%s1670_s4 + $0x40] sm:$0xff] %v1255_v16  ;;  %404 = vst [vmem:[%s1670_s4 + $0x48] sm:$0xff] %v1255_v16 }
  0x2c   : > { %405 = vst [vmem:[%s1670_s4 + $0x50] sm:$0xff] %v1255_v16  ;;  %406 = vst [vmem:[%s1670_s4 + $0x58] sm:$0xff] %v1255_v16 }
  0x2d   : > { %407 = vst [vmem:[%s1670_s4 + $0x60] sm:$0xff] %v1255_v16  ;;  %408 = vst [vmem:[%s1670_s4 + $0x68] sm:$0xff] %v1255_v16 }
  0x2e   : > { %409 = vst [vmem:[%s1670_s4 + $0x70] sm:$0xff] %v1255_v16  ;;  %410 = vst [vmem:[%s1670_s4 + $0x78] sm:$0xff] %v1255_v16 }
  0x2f PF: > { %v1175_v17 = vld [vmem:[%s1349_s11 + $0x78] sm:$0xff]   ;;  %v1177_v19 = vld [vmem:[%s1349_s11 + $0x70] sm:$0xff]   ;;  %v1179_v21 = vld [vmem:[%s1349_s11 + $0x68] sm:$0xff]   ;;  %p1046_p11 = scmp.ne.s32.totalorder %s1245_s17, 2 }
  0x30   : > { %v1176_v18 = vld [vmem:[%s1349_s11 + $0x38] sm:$0xff]   ;;  %1054 = vmatprep.subr.bf16.mxu0 %v1175_v17  ;;  %1118 = vmatprep.subr.bf16.mxu1 %v1175_v17  ;;  %v1178_v20 = vld [vmem:[%s1349_s11 + $0x30] sm:$0xff]   ;;  %v1180_v22 = vld [vmem:[%s1349_s11 + $0x28] sm:$0xff]  }
  0x31   : > { %1055 = vmatpush3.bf16.msra.mxu0 %v1176_v18  ;;  %1126 = vmatpush3.bf16.msra.mxu1 %v1176_v18  ;;  %v1181_v23 = vld [vmem:[%s1349_s11 + $0x60] sm:$0xff]   ;;  %v1183_v25 = vld [vmem:[%s1349_s11 + $0x58] sm:$0xff]   ;;  %v1185_v27 = vld [vmem:[%s1349_s11 + $0x50] sm:$0xff]  }
  0x32   : > { %1056 = vmatprep.subr.bf16.mxu0 %v1177_v19  ;;  %1119 = vmatprep.subr.bf16.mxu1 %v1177_v19  ;;  %v1182_v24 = vld [vmem:[%s1349_s11 + $0x20] sm:$0xff]   ;;  %v1184_v26 = vld [vmem:[%s1349_s11 + $0x18] sm:$0xff]   ;;  %v1186_v30 = vld [vmem:[%s1349_s11 + $0x10] sm:$0xff]  }
  0x33   : > { %v1193_v28 = vld [vmem:[%s1351_s12 + $0x4] ss:$8 sps:$4 sm:$0xff]   ;;  %v1191_v35 = vld [vmem:[%s1351_s12] ss:$8 sps:$4 sm:$0xff]   ;;  %v1197_v37 = vld [vmem:[%s1351_s12 + $0x14] ss:$8 sps:$4 sm:$0xff]  }
  0x34   : > { %v1196_v29 = vld [vmem:[%s1351_s12 + $0x44] ss:$8 sps:$4 sm:$0xff]   ;;  %683 = vmatprep.mubr.bf16.mxu0 %v1193_v28  ;;  %v1194_v36 = vld [vmem:[%s1351_s12 + $0x40] ss:$8 sps:$4 sm:$0xff]   ;;  %v1199_v38 = vld [vmem:[%s1351_s12 + $0x54] ss:$8 sps:$4 sm:$0xff]  }
  0x35   : > { %1057 = vmatpush3.bf16.msra.mxu0 %v1178_v20  ;;  %1127 = vmatpush3.bf16.msra.mxu1 %v1178_v20  ;;  %v1187_v31 = vld [vmem:[%s1349_s11 + $0x48] sm:$0xff]   ;;  %v1189_v33 = vld [vmem:[%s1349_s11 + $0x40] sm:$0xff]   ;;  %v1201_v39 = vld [vmem:[%s1351_s12 + $0x10] ss:$8 sps:$4 sm:$0xff]  }
  0x36   : > { %1058 = vmatprep.subr.bf16.mxu0 %v1179_v21  ;;  %1120 = vmatprep.subr.bf16.mxu1 %v1179_v21  ;;  %v1188_v32 = vld [vmem:[%s1349_s11 + $0x8] sm:$0xff]   ;;  %v1190_v34 = vld [vmem:[%s1349_s11] sm:$0xff]   ;;  %v1202_v40 = vld [vmem:[%s1351_s12 + $0x50] ss:$8 sps:$4 sm:$0xff]  }
  0x37   : > { %715 = vmatprep.mubr.bf16.mxu1 %v1196_v29  ;;  %v1203_v41 = vld [vmem:[%s1351_s12 + $0x24] ss:$8 sps:$4 sm:$0xff]   ;;  %v1207_v43 = vld [vmem:[%s1351_s12 + $0x20] ss:$8 sps:$4 sm:$0xff]   ;;  %v1209_v45 = vld [vmem:[%s1351_s12 + $0x34] ss:$8 sps:$4 sm:$0xff]  }
  0x38   : > { %v1205_v42 = vld [vmem:[%s1351_s12 + $0x64] ss:$8 sps:$4 sm:$0xff]   ;;  %v1208_v44 = vld [vmem:[%s1351_s12 + $0x60] ss:$8 sps:$4 sm:$0xff]   ;;  %v1211_v46 = vld [vmem:[%s1351_s12 + $0x74] ss:$8 sps:$4 sm:$0xff]  }
  0x39   : > { %1059 = vmatpush3.bf16.msra.mxu0 %v1180_v22  ;;  %1128 = vmatpush3.bf16.msra.mxu1 %v1180_v22  ;;  %v1213_v47 = vld [vmem:[%s1351_s12 + $0x30] ss:$8 sps:$4 sm:$0xff]   ;;  %v411_v51 = vld [vmem:[%s1670_s4] sm:$0xff]  ;;  %v412_v61 = vld [vmem:[%s1670_s4 + $0x8] sm:$0xff] }
  0x3a   : > { %1060 = vmatprep.subr.bf16.mxu0 %v1181_v23  ;;  %1121 = vmatprep.subr.bf16.mxu1 %v1181_v23  ;;  %v1214_v48 = vld [vmem:[%s1351_s12 + $0x70] ss:$8 sps:$4 sm:$0xff]   ;;  %v419_v53 = vld [vmem:[%s1670_s4 + $0x40] sm:$0xff]  ;;  %v420_v63 = vld [vmem:[%s1670_s4 + $0x48] sm:$0xff] }
  0x3b   : > { %v413_v7 = vld [vmem:[%s1670_s4 + $0x10] sm:$0xff]  ;;  %v414_v17 = vld [vmem:[%s1670_s4 + $0x18] sm:$0xff]  ;;  %v423_v29 = vld [vmem:[%s1670_s4 + $0x60] sm:$0xff] }
  0x3c   : > { %v421_v9 = vld [vmem:[%s1670_s4 + $0x50] sm:$0xff]  ;;  %v422_v19 = vld [vmem:[%s1670_s4 + $0x58] sm:$0xff] }
  0x3d   : > { %1061 = vmatpush3.bf16.msra.mxu0 %v1182_v24  ;;  %1129 = vmatpush3.bf16.msra.mxu1 %v1182_v24 }
  0x3e   : > { %1062 = vmatprep.subr.bf16.mxu0 %v1183_v25  ;;  %1122 = vmatprep.subr.bf16.mxu1 %v1183_v25 }
  0x41   : > { %1063 = vmatpush3.bf16.msra.mxu0 %v1184_v26  ;;  %1130 = vmatpush3.bf16.msra.mxu1 %v1184_v26 }
  0x42   : > { %1064 = vmatprep.subr.bf16.mxu0 %v1185_v27  ;;  %1123 = vmatprep.subr.bf16.mxu1 %v1185_v27  ;;  %v415_v27 = vld [vmem:[%s1670_s4 + $0x20] sm:$0xff] }
  0x45   : > { %1065 = vmatpush3.bf16.msra.mxu0 %v1186_v30  ;;  %1131 = vmatpush3.bf16.msra.mxu1 %v1186_v30 }
  0x46   : > { %1066 = vmatprep.subr.bf16.mxu0 %v1187_v31  ;;  %1124 = vmatprep.subr.bf16.mxu1 %v1187_v31 }
  0x49   : > { %1067 = vmatpush3.bf16.msra.mxu0 %v1188_v32  ;;  %1132 = vmatpush3.bf16.msra.mxu1 %v1188_v32 }
  0x4a   : > { %1068 = vmatprep.subr.bf16.mxu0 %v1189_v33  ;;  %1125 = vmatprep.subr.bf16.mxu1 %v1189_v33 }
  0x4d   : > { %1069 = vmatpush3.bf16.msra.mxu0 %v1190_v34  ;;  %1133 = vmatpush3.bf16.msra.mxu1 %v1190_v34 }
  0x50   : > { %684 = vmatmul.mubr.bf16.vlgmr.msra.gmra.mxu0 %v1191_v35  ;;  %716 = vmatmul.mubr.bf16.vlgmr.msra.gmra.mxu1 %v1194_v36 }
  0x51   : > { %691 = vmatprep.mubr.bf16.mxu0 %v1197_v37  ;;  %723 = vmatprep.mubr.bf16.mxu1 %v1199_v38  ;;  %v416_v37 = vld [vmem:[%s1670_s4 + $0x28] sm:$0xff] }
  0x58   : > { %692 = vmatmul.mubr.bf16.gmra.mxu0 %v1201_v39  ;;  %724 = vmatmul.mubr.bf16.gmra.mxu1 %v1202_v40  ;;  %v424_v39 = vld [vmem:[%s1670_s4 + $0x68] sm:$0xff] }
  0x59   : > { %699 = vmatprep.mubr.bf16.mxu0 %v1203_v41  ;;  %731 = vmatprep.mubr.bf16.mxu1 %v1205_v42 }
  0x60   : > { %700 = vmatmul.mubr.bf16.gmra.mxu0 %v1207_v43  ;;  %732 = vmatmul.mubr.bf16.gmra.mxu1 %v1208_v44 }
  0x61   : > { %707 = vmatprep.mubr.bf16.mxu0 %v1209_v45  ;;  %739 = vmatprep.mubr.bf16.mxu1 %v1211_v46 }
  0x68   : > { %708 = vmatmul.mubr.bf16.gmra.mxu0 %v1213_v47  ;;  %740 = vmatmul.mubr.bf16.gmra.mxu1 %v1214_v48  ;;  %v417_v47 = vld [vmem:[%s1670_s4 + $0x30] sm:$0xff] }
 0x110   : > { %v1070_v49 = vpop.f32.mrf.mxu0  ;;  %v1094_v50 = vpop.f32.mrf.mxu1 }
 0x112   : > { %v1071_v52 = vpop.f32.mrf.mxu0  ;;  %v1095_v54 = vpop.f32.mrf.mxu1 }
 0x113   : > { %v1072_v55 = vadd.f32 %v1071_v52, %v1070_v49  ;;  %v1096_v56 = vadd.f32 %v1095_v54, %v1094_v50  ;;  %v425_v49 = vld [vmem:[%s1670_s4 + $0x70] sm:$0xff] }
 0x114   : > { %v1073_v57 = vpop.f32.mrf.mxu0  ;;  %v1097_v58 = vpop.f32.mrf.mxu1 }
 0x115   : > { %v748_v59 = vadd.f32 %v1072_v55, %v411_v51  ;;  %v756_v60 = vadd.f32 %v1096_v56, %v419_v53 }
 0x116   : > { %v1074_v62 = vpop.f32.mrf.mxu0  ;;  %v1098_v0 = vpop.f32.mrf.mxu1 }
 0x117   : > { %764 = vst [vmem:[%s1670_s4] sm:$0xff] %v748_v59  ;;  %772 = vst [vmem:[%s1670_s4 + $0x40] sm:$0xff] %v756_v60  ;;  %v1075_v1 = vadd.f32 %v1074_v62, %v1073_v57  ;;  %v1099_v2 = vadd.f32 %v1098_v0, %v1097_v58  ;;  %v418_v57 = vld [vmem:[%s1670_s4 + $0x38] sm:$0xff] }
 0x118   : > { %v1076_v3 = vpop.f32.mrf.mxu0  ;;  %v1100_v4 = vpop.f32.mrf.mxu1  ;;  %v426_v59 = vld [vmem:[%s1670_s4 + $0x78] sm:$0xff] }
 0x119   : > { %v749_v5 = vadd.f32 %v1075_v1, %v412_v61  ;;  %v757_v6 = vadd.f32 %v1099_v2, %v420_v63 }
 0x11a   : > { %v1077_v8 = vpop.f32.mrf.mxu0  ;;  %v1101_v10 = vpop.f32.mrf.mxu1 }
 0x11b   : > { %765 = vst [vmem:[%s1670_s4 + $0x8] sm:$0xff] %v749_v5  ;;  %773 = vst [vmem:[%s1670_s4 + $0x48] sm:$0xff] %v757_v6  ;;  %v1078_v11 = vadd.f32 %v1077_v8, %v1076_v3  ;;  %v1102_v12 = vadd.f32 %v1101_v10, %v1100_v4 }
 0x11c   : > { %v1079_v13 = vpop.f32.mrf.mxu0  ;;  %v1103_v14 = vpop.f32.mrf.mxu1 }
 0x11d   : > { %v750_v15 = vadd.f32 %v1078_v11, %v413_v7  ;;  %v758_v16 = vadd.f32 %v1102_v12, %v421_v9 }
 0x11e   : > { %v1080_v18 = vpop.f32.mrf.mxu0  ;;  %v1104_v20 = vpop.f32.mrf.mxu1 }
 0x11f   : > { %766 = vst [vmem:[%s1670_s4 + $0x10] sm:$0xff] %v750_v15  ;;  %774 = vst [vmem:[%s1670_s4 + $0x50] sm:$0xff] %v758_v16  ;;  %v1081_v21 = vadd.f32 %v1080_v18, %v1079_v13  ;;  %v1105_v22 = vadd.f32 %v1104_v20, %v1103_v14 }
 0x120   : > { %v1082_v23 = vpop.f32.mrf.mxu0  ;;  %v1106_v24 = vpop.f32.mrf.mxu1 }
 0x121   : > { %v751_v25 = vadd.f32 %v1081_v21, %v414_v17  ;;  %v759_v26 = vadd.f32 %v1105_v22, %v422_v19 }
 0x122   : > { %v1083_v28 = vpop.f32.mrf.mxu0  ;;  %v1107_v30 = vpop.f32.mrf.mxu1 }
 0x123   : > { %767 = vst [vmem:[%s1670_s4 + $0x18] sm:$0xff] %v751_v25  ;;  %775 = vst [vmem:[%s1670_s4 + $0x58] sm:$0xff] %v759_v26  ;;  %v1084_v31 = vadd.f32 %v1083_v28, %v1082_v23  ;;  %v1108_v32 = vadd.f32 %v1107_v30, %v1106_v24 }
 0x124   : > { %v1085_v33 = vpop.f32.mrf.mxu0  ;;  %v1109_v34 = vpop.f32.mrf.mxu1 }
 0x125   : > { %v752_v35 = vadd.f32 %v1084_v31, %v415_v27  ;;  %v760_v36 = vadd.f32 %v1108_v32, %v423_v29 }
 0x126   : > { %v1086_v38 = vpop.f32.mrf.mxu0  ;;  %v1110_v40 = vpop.f32.mrf.mxu1 }
 0x127   : > { %768 = vst [vmem:[%s1670_s4 + $0x20] sm:$0xff] %v752_v35  ;;  %776 = vst [vmem:[%s1670_s4 + $0x60] sm:$0xff] %v760_v36  ;;  %v1087_v41 = vadd.f32 %v1086_v38, %v1085_v33  ;;  %v1111_v42 = vadd.f32 %v1110_v40, %v1109_v34 }
 0x128   : > { %v1088_v43 = vpop.f32.mrf.mxu0  ;;  %v1112_v44 = vpop.f32.mrf.mxu1 }
 0x129   : > { %v753_v45 = vadd.f32 %v1087_v41, %v416_v37  ;;  %v761_v46 = vadd.f32 %v1111_v42, %v424_v39 }
 0x12a   : > { %v1089_v48 = vpop.f32.mrf.mxu0  ;;  %v1113_v50 = vpop.f32.mrf.mxu1 }
 0x12b   : > { %769 = vst [vmem:[%s1670_s4 + $0x28] sm:$0xff] %v753_v45  ;;  %777 = vst [vmem:[%s1670_s4 + $0x68] sm:$0xff] %v761_v46  ;;  %v1090_v51 = vadd.f32 %v1089_v48, %v1088_v43  ;;  %v1114_v52 = vadd.f32 %v1113_v50, %v1112_v44 }
 0x12c   : > { %v1091_v53 = vpop.f32.mrf.mxu0  ;;  %v1115_v54 = vpop.f32.mrf.mxu1 }
 0x12d   : > { %v754_v55 = vadd.f32 %v1090_v51, %v417_v47  ;;  %v762_v56 = vadd.f32 %v1114_v52, %v425_v49 }
 0x12e   : > { %v1092_v58 = vpop.f32.mrf.mxu0  ;;  %v1116_v60 = vpop.f32.mrf.mxu1 }
 0x12f   : > { %770 = vst [vmem:[%s1670_s4 + $0x30] sm:$0xff] %v754_v55  ;;  %778 = vst [vmem:[%s1670_s4 + $0x70] sm:$0xff] %v762_v56  ;;  %v1093_v61 = vadd.f32 %v1092_v58, %v1091_v53  ;;  %v1117_v62 = vadd.f32 %v1116_v60, %v1115_v54  ;;  %783 = sbr.rel (%p1046_p11) target bundleno = 326 (0x146), region = 82 }
 0x131   : > { %v755_v63 = vadd.f32 %v1093_v61, %v418_v57  ;;  %v763_v0 = vadd.f32 %v1117_v62, %v426_v59 }
 0x133   : > { %771 = vst [vmem:[%s1670_s4 + $0x38] sm:$0xff] %v755_v63  ;;  %779 = vst [vmem:[%s1670_s4 + $0x78] sm:$0xff] %v763_v0 }
 0x134   : > { %v784_v1 = vld [vmem:[%s1670_s4] sm:$0xff]  ;;  %v785_v5 = vld [vmem:[%s1670_s4 + $0x8] sm:$0xff]  ;;  %v786_v6 = vld [vmem:[%s1670_s4 + $0x10] sm:$0xff] }
 0x135   : > { %v1047_v2 = vld [vmem:[%s1668_s2] ss:$0 sm:$0xff]  ;;  %v787_v7 = vld [vmem:[%s1670_s4 + $0x18] sm:$0xff]  ;;  %v789_v12 = vld [vmem:[%s1670_s4 + $0x28] sm:$0xff] }
 0x136   : > { %v1540_v3 = vld [vmem:[%s1669_s3] ss:$0 sm:$0xff]  ;;  %v807_v4 = vmul.f32 %v1047_v2, %v784_v1  ;;  %v808_v8 = vmul.f32 %v1047_v2, %v785_v5  ;;  %v809_v9 = vmul.f32 %v1047_v2, %v786_v6  ;;  %v810_v10 = vmul.f32 %v1047_v2, %v787_v7  ;;  %v790_v13 = vld [vmem:[%s1670_s4 + $0x30] sm:$0xff]  ;;  %v793_v28 = vld [vmem:[%s1670_s4 + $0x48] sm:$0xff] }
 0x137   : > { %v788_v11 = vld [vmem:[%s1670_s4 + $0x20] sm:$0xff]  ;;  %v812_v16 = vmul.f32 %v1047_v2, %v789_v12  ;;  %v813_v17 = vmul.f32 %v1047_v2, %v790_v13  ;;  %v794_v29 = vld [vmem:[%s1670_s4 + $0x50] sm:$0xff]  ;;  %v795_v30 = vld [vmem:[%s1670_s4 + $0x58] sm:$0xff]  ;;  %v816_v44 = vmul.f32 %v1047_v2, %v793_v28 }
 0x138   : > { %v830_v14 = vadd.f32 %v1540_v3, %v807_v4  ;;  %v811_v15 = vmul.f32 %v1047_v2, %v788_v11  ;;  %v831_v19 = vadd.f32 %v1540_v3, %v808_v8  ;;  %v832_v20 = vadd.f32 %v1540_v3, %v809_v9  ;;  %v792_v23 = vld [vmem:[%s1670_s4 + $0x40] sm:$0xff]  ;;  %v797_v36 = vld [vmem:[%s1670_s4 + $0x68] sm:$0xff]  ;;  %v798_v37 = vld [vmem:[%s1670_s4 + $0x70] sm:$0xff] }
 0x139   : > { %v833_v21 = vadd.f32 %v1540_v3, %v810_v10  ;;  %v835_v26 = vadd.f32 %v1540_v3, %v812_v16  ;;  %v836_v27 = vadd.f32 %v1540_v3, %v813_v17  ;;  %v796_v35 = vld [vmem:[%s1670_s4 + $0x60] sm:$0xff]  ;;  %v815_v41 = vmul.f32 %v1047_v2, %v792_v23 }
 0x13a   : > { %v791_v18 = vld [vmem:[%s1670_s4 + $0x38] sm:$0xff]  ;;  %v846_v24 = vmax.f32 %v830_v14, 0.0  ;;  %v834_v25 = vadd.f32 %v1540_v3, %v811_v15  ;;  %v847_v31 = vmax.f32 %v831_v19, 0.0  ;;  %v848_v32 = vmax.f32 %v832_v20, 0.0 }
 0x13b   : > { %v814_v22 = vmul.f32 %v1047_v2, %v791_v18  ;;  %v849_v33 = vmax.f32 %v833_v21, 0.0  ;;  %v851_v39 = vmax.f32 %v835_v26, 0.0  ;;  %v852_v40 = vmax.f32 %v836_v27, 0.0  ;;  %v799_v42 = vld [vmem:[%s1670_s4 + $0x78] sm:$0xff] }
 0x13c   : > { %862 = vst [vmem:[%s1670_s4] sm:$0xff] %v846_v24  ;;  %v850_v38 = vmax.f32 %v834_v25, 0.0  ;;  %863 = vst [vmem:[%s1670_s4 + $0x8] sm:$0xff] %v847_v31  ;;  %v817_v45 = vmul.f32 %v1047_v2, %v794_v29  ;;  %v818_v46 = vmul.f32 %v1047_v2, %v795_v30  ;;  %v838_v47 = vadd.f32 %v1540_v3, %v815_v41 }
 0x13d   : > { %v837_v34 = vadd.f32 %v1540_v3, %v814_v22  ;;  %864 = vst [vmem:[%s1670_s4 + $0x10] sm:$0xff] %v848_v32  ;;  %865 = vst [vmem:[%s1670_s4 + $0x18] sm:$0xff] %v849_v33  ;;  %v819_v48 = vmul.f32 %v1047_v2, %v796_v35  ;;  %v820_v49 = vmul.f32 %v1047_v2, %v797_v36 }
 0x13e   : > { %866 = vst [vmem:[%s1670_s4 + $0x20] sm:$0xff] %v850_v38  ;;  %867 = vst [vmem:[%s1670_s4 + $0x28] sm:$0xff] %v851_v39  ;;  %v821_v50 = vmul.f32 %v1047_v2, %v798_v37  ;;  %v839_v51 = vadd.f32 %v1540_v3, %v816_v44  ;;  %v840_v52 = vadd.f32 %v1540_v3, %v817_v45  ;;  %v854_v55 = vmax.f32 %v838_v47, 0.0 }
 0x13f   : > { %v853_v43 = vmax.f32 %v837_v34, 0.0  ;;  %868 = vst [vmem:[%s1670_s4 + $0x30] sm:$0xff] %v852_v40  ;;  %v841_v53 = vadd.f32 %v1540_v3, %v818_v46  ;;  %v822_v54 = vmul.f32 %v1047_v2, %v799_v42  ;;  %v842_v56 = vadd.f32 %v1540_v3, %v819_v48 }
 0x140   : > { %v843_v57 = vadd.f32 %v1540_v3, %v820_v49  ;;  %v844_v58 = vadd.f32 %v1540_v3, %v821_v50  ;;  %v855_v59 = vmax.f32 %v839_v51, 0.0  ;;  %v856_v60 = vmax.f32 %v840_v52, 0.0  ;;  %870 = vst [vmem:[%s1670_s4 + $0x40] sm:$0xff] %v854_v55 }
 0x141   : > { %869 = vst [vmem:[%s1670_s4 + $0x38] sm:$0xff] %v853_v43  ;;  %v857_v61 = vmax.f32 %v841_v53, 0.0  ;;  %v845_v62 = vadd.f32 %v1540_v3, %v822_v54  ;;  %v858_v63 = vmax.f32 %v842_v56, 0.0 }
 0x142   : > { %v859_v0 = vmax.f32 %v843_v57, 0.0  ;;  %v860_v1 = vmax.f32 %v844_v58, 0.0  ;;  %871 = vst [vmem:[%s1670_s4 + $0x48] sm:$0xff] %v855_v59  ;;  %872 = vst [vmem:[%s1670_s4 + $0x50] sm:$0xff] %v856_v60 }
 0x143   : > { %873 = vst [vmem:[%s1670_s4 + $0x58] sm:$0xff] %v857_v61  ;;  %v861_v2 = vmax.f32 %v845_v62, 0.0  ;;  %874 = vst [vmem:[%s1670_s4 + $0x60] sm:$0xff] %v858_v63 }
 0x144   : > { %875 = vst [vmem:[%s1670_s4 + $0x68] sm:$0xff] %v859_v0  ;;  %876 = vst [vmem:[%s1670_s4 + $0x70] sm:$0xff] %v860_v1 }
 0x145   : > { %877 = vst [vmem:[%s1670_s4 + $0x78] sm:$0xff] %v861_v2 }
 0x146 PF: > { %s14_s19 = sadd.s32 1, %s1253_s19   ;;  %s1671_s15 = smov %s1241_s16 }
 0x147   : > { %p11_p12 = scmp.ge.s32.totalorder %s14_s19, 5   ;;  %s1672_s16 = smov %s1316_s23 }
 0x148   : > { %s1673_s17 = smov %s1249_s18  ;;  %s1674_s18 = smov %s1676_s20 }
 0x149   :  { %13 = sbr.rel (!%p11_p12) target bundleno = 3 (0x3), region = 126 }

// kernel: resnet_proto_forward.24
= control target key start
LH: loop header
LB: loop body
LE: loop exit
PB: predicated region body
PF: predicated region fallthrough
CT: control target
= control target key end

     0   :  { %s1397_s18 = smov 0   ;;  %s1399_s19 = smov 0   ;;  %s1848_s0 = inlined_call_operand.vmem [shape: bf16[128,768], index: 0, kind: input, shape index: {}]   ;;  %s1849_s1 = inlined_call_operand.vmem [shape: bf16[768,128], index: 1, kind: input, shape index: {}]   ;;  %s1850_s2 = inlined_call_operand.vmem [shape: f32[1,128], index: 2, kind: input, shape index: {}]   ;;  %s1851_s3 = inlined_call_operand.vmem [shape: f32[1,128], index: 3, kind: input, shape index: {}]   ;;  %s1852_s4 = inlined_call_operand.vmem [shape: f32[128,128], index: 4, kind: input, shape index: {}]   ;;  %s1853_s5 = inlined_call_operand.vmem [shape: f32[128,128], index: 5, kind: output, shape index: {}]  }
   0x1   :  { %s1401_s20 = smov 0   ;;  %s1403_s21 = smov 0  }
   0x2   :  { %s1405_s22 = smov 0  }
   0x3 LB: > { %s27_s23 = sadd.s32 1, %s1360_s21  ;;  %p50_p1 = scmp.ne.s32.totalorder %s1352_s19, %s1348_s18  ;;  %s1364_s22 = sphi %s1405_s22, %s15_s22   ;;  %s1360_s21 = sphi %s1403_s21, %s1857_s21   ;;  %s1356_s20 = sphi %s1401_s20, %s1856_s20   ;;  %s1352_s19 = sphi %s1399_s19, %s1855_s19   ;;  %s1348_s18 = sphi %s1397_s18, %s1854_s18  }
   0x4   : > { %p28_p0 = scmp.ge.s32.totalorder %s27_s23, 3  ;;  %p51_p2 = scmp.eq.s32.totalorder %s1364_s22, 0 }
   0x5   : > { %s43_s25 = sadd.s32 1, %s1352_s19  ;;  %p1116_p5 = scmp.ge.s32.totalorder %s1364_s22, 3 }
   0x6   : > { %s1859_s23 = smov (%p28_p0, %s27_s23), 0  ;;  %p52_p3 = por %p51_p2, %p50_p1 }
   0x7   : > { %s39_s24 = ssub.s32 %s1360_s21, %s1859_s23  ;;  %236 = sbr.rel (%p1116_p5) target bundleno = 24 (0x18), region = 28 }
   0x8   : > { %p41_p4 = scmp.eq.s32.totalorder %s39_s24, 0 }
   0xa   : > { %s1432_s26 = scalar_select %p41_p4, %s1352_s19, %s43_s25  }
   0xc   : > { %239 = sbr.rel (!%p52_p3) target bundleno = 24 (0x18), region = 32  ;;  %s241_s27 = sand.u32 (%p52_p3), 1, %s1352_s19  }
   0xd   : > { %s1164_s28 = sshll.u32 (%p52_p3), %s1360_s21, 3  ;;  %s1117_s29 = sshll.u32 (%p52_p3), %s241_s27, 7 }
   0xe   : > { %s1440_s7 = scalar_lea.vmem (%p52_p3), %s1848_s0, %s1164_s28  ;;  %s243_s8 = scalar_lea.vmem (%p52_p3), [#allocation2], %s1117_s29 }
   0xf   : > { %v308_v0 = vld [vmem:[%s1440_s7] sm:$0xff] (%p52_p3)  ;;  %v310_v1 = vld [vmem:[%s1440_s7 + $0x18] sm:$0xff] (%p52_p3)  ;;  %v312_v2 = vld [vmem:[%s1440_s7 + $0x30] sm:$0xff] (%p52_p3) }
  0x10   : > { %309 = vst [vmem:[%s243_s8] sm:$0xff] (%p52_p3), %v308_v0  ;;  %311 = vst [vmem:[%s243_s8 + $0x8] sm:$0xff] (%p52_p3), %v310_v1  ;;  %v314_v3 = vld [vmem:[%s1440_s7 + $0x48] sm:$0xff] (%p52_p3)  ;;  %v316_v4 = vld [vmem:[%s1440_s7 + $0x60] sm:$0xff] (%p52_p3) }
  0x11   : > { %313 = vst [vmem:[%s243_s8 + $0x10] sm:$0xff] %v312_v2  ;;  %v318_v5 = vld [vmem:[%s1440_s7 + $0x78] sm:$0xff]  ;;  %315 = vst [vmem:[%s243_s8 + $0x18] sm:$0xff] %v314_v3  ;;  %v320_v6 = vld [vmem:[%s1440_s7 + $0x90] sm:$0xff] }
  0x12   : > { %317 = vst [vmem:[%s243_s8 + $0x20] sm:$0xff] %v316_v4  ;;  %319 = vst [vmem:[%s243_s8 + $0x28] sm:$0xff] %v318_v5  ;;  %v322_v7 = vld [vmem:[%s1440_s7 + $0xa8] sm:$0xff]  ;;  %v324_v8 = vld [vmem:[%s1440_s7 + $0xc0] sm:$0xff] }
  0x13   : > { %321 = vst [vmem:[%s243_s8 + $0x30] sm:$0xff] %v320_v6  ;;  %323 = vst [vmem:[%s243_s8 + $0x38] sm:$0xff] %v322_v7  ;;  %v326_v9 = vld [vmem:[%s1440_s7 + $0xd8] sm:$0xff]  ;;  %v328_v10 = vld [vmem:[%s1440_s7 + $0xf0] sm:$0xff] }
  0x14   : > { %325 = vst [vmem:[%s243_s8 + $0x40] sm:$0xff] %v324_v8  ;;  %v330_v11 = vld [vmem:[%s1440_s7 + $0x108] sm:$0xff]  ;;  %327 = vst [vmem:[%s243_s8 + $0x48] sm:$0xff] %v326_v9  ;;  %v332_v12 = vld [vmem:[%s1440_s7 + $0x120] sm:$0xff] }
  0x15   : > { %329 = vst [vmem:[%s243_s8 + $0x50] sm:$0xff] %v328_v10  ;;  %331 = vst [vmem:[%s243_s8 + $0x58] sm:$0xff] %v330_v11  ;;  %v334_v13 = vld [vmem:[%s1440_s7 + $0x138] sm:$0xff]  ;;  %v336_v14 = vld [vmem:[%s1440_s7 + $0x150] sm:$0xff] }
  0x16   : > { %333 = vst [vmem:[%s243_s8 + $0x60] sm:$0xff] %v332_v12  ;;  %335 = vst [vmem:[%s243_s8 + $0x68] sm:$0xff] %v334_v13  ;;  %v338_v15 = vld [vmem:[%s1440_s7 + $0x168] sm:$0xff] }
  0x17   : > { %337 = vst [vmem:[%s243_s8 + $0x70] sm:$0xff] %v336_v14  ;;  %339 = vst [vmem:[%s243_s8 + $0x78] sm:$0xff] %v338_v15 }
  0x18 PF: > { %p1120_p6 = scmp.ge.s32.totalorder %s1364_s22, 1  ;;  %p356_p7 = scmp.lt.s32.totalorder %s1364_s22, 4 }
  0x1a   : > { %p357_p8 = pnand %p1120_p6, %p356_p7 }
  0x1b   : > { %s363_s9 = sand.u32 (!%p357_p8), 1, %s1348_s18   ;;  %s1122_s10 = sshll.u32 (!%p357_p8), %s1356_s20, 5 }
  0x1c   : > { %360 = sbr.rel (%p357_p8) target bundleno = 332 (0x14c), region = 74  ;;  %s1121_s11 = sshll.u32 (!%p357_p8), %s363_s9, 7 }
  0x1d   : > { %p418_p9 = scmp.lt.s32.totalorder (!%p357_p8), %s1122_s10, 95  ;;  %s1467_s16 = scalar_lea.vmem (!%p357_p8), [#allocation2], %s1121_s11 }
  0x1e   : > { %p1124_p10 = scmp.ne.s32.totalorder (!%p357_p8), %s1356_s20, 0 }
  0x21   : > { %s1861_s10 = smov (!%p418_p9, %s1122_s10), 95  ;;  %454 = sbr.rel (%p1124_p10) target bundleno = 47 (0x2f), region = 82 }
  0x22   : > { %s1123_s12 = sshll.u32 %s1861_s10, 2 }
  0x23   : > { %s1465_s15 = scalar_lea.vmem %s1849_s1, %s1123_s12 }
  0x26   : > { %v1366_v16 = vmov 0.0  }
  0x27   : > { %455 = vst [vmem:[%s1853_s5] sm:$0xff] %v1366_v16  ;;  %456 = vst [vmem:[%s1853_s5 + $0x8] sm:$0xff] %v1366_v16 }
  0x28   : > { %457 = vst [vmem:[%s1853_s5 + $0x10] sm:$0xff] %v1366_v16  ;;  %458 = vst [vmem:[%s1853_s5 + $0x18] sm:$0xff] %v1366_v16 }
  0x29   : > { %459 = vst [vmem:[%s1853_s5 + $0x20] sm:$0xff] %v1366_v16  ;;  %460 = vst [vmem:[%s1853_s5 + $0x28] sm:$0xff] %v1366_v16 }
  0x2a   : > { %461 = vst [vmem:[%s1853_s5 + $0x30] sm:$0xff] %v1366_v16  ;;  %462 = vst [vmem:[%s1853_s5 + $0x38] sm:$0xff] %v1366_v16 }
  0x2b   : > { %463 = vst [vmem:[%s1853_s5 + $0x40] sm:$0xff] %v1366_v16  ;;  %464 = vst [vmem:[%s1853_s5 + $0x48] sm:$0xff] %v1366_v16 }
  0x2c   : > { %465 = vst [vmem:[%s1853_s5 + $0x50] sm:$0xff] %v1366_v16  ;;  %466 = vst [vmem:[%s1853_s5 + $0x58] sm:$0xff] %v1366_v16 }
  0x2d   : > { %467 = vst [vmem:[%s1853_s5 + $0x60] sm:$0xff] %v1366_v16  ;;  %468 = vst [vmem:[%s1853_s5 + $0x68] sm:$0xff] %v1366_v16 }
  0x2e   : > { %469 = vst [vmem:[%s1853_s5 + $0x70] sm:$0xff] %v1366_v16  ;;  %470 = vst [vmem:[%s1853_s5 + $0x78] sm:$0xff] %v1366_v16 }
  0x2f PF: > { %v1286_v17 = vld [vmem:[%s1465_s15 + $0x78] sm:$0xff]   ;;  %v1288_v19 = vld [vmem:[%s1465_s15 + $0x70] sm:$0xff]   ;;  %v1290_v21 = vld [vmem:[%s1465_s15 + $0x68] sm:$0xff]   ;;  %p1157_p11 = scmp.ne.s32.totalorder %s1356_s20, 2 }
  0x30   : > { %v1287_v18 = vld [vmem:[%s1465_s15 + $0x38] sm:$0xff]   ;;  %1165 = vmatprep.subr.bf16.mxu0 %v1286_v17  ;;  %1229 = vmatprep.subr.bf16.mxu1 %v1286_v17  ;;  %v1289_v20 = vld [vmem:[%s1465_s15 + $0x30] sm:$0xff]   ;;  %v1291_v22 = vld [vmem:[%s1465_s15 + $0x28] sm:$0xff]  }
  0x31   : > { %1166 = vmatpush3.bf16.msra.mxu0 %v1287_v18  ;;  %1237 = vmatpush3.bf16.msra.mxu1 %v1287_v18  ;;  %v1292_v23 = vld [vmem:[%s1465_s15 + $0x60] sm:$0xff]   ;;  %v1294_v25 = vld [vmem:[%s1465_s15 + $0x58] sm:$0xff]   ;;  %v1296_v27 = vld [vmem:[%s1465_s15 + $0x50] sm:$0xff]  }
  0x32   : > { %1167 = vmatprep.subr.bf16.mxu0 %v1288_v19  ;;  %1230 = vmatprep.subr.bf16.mxu1 %v1288_v19  ;;  %v1293_v24 = vld [vmem:[%s1465_s15 + $0x20] sm:$0xff]   ;;  %v1295_v26 = vld [vmem:[%s1465_s15 + $0x18] sm:$0xff]   ;;  %v1297_v30 = vld [vmem:[%s1465_s15 + $0x10] sm:$0xff]  }
  0x33   : > { %v1304_v28 = vld [vmem:[%s1467_s16 + $0x4] ss:$8 sps:$4 sm:$0xff]   ;;  %v1302_v35 = vld [vmem:[%s1467_s16] ss:$8 sps:$4 sm:$0xff]   ;;  %v1308_v37 = vld [vmem:[%s1467_s16 + $0x14] ss:$8 sps:$4 sm:$0xff]  }
  0x34   : > { %v1307_v29 = vld [vmem:[%s1467_s16 + $0x44] ss:$8 sps:$4 sm:$0xff]   ;;  %743 = vmatprep.mubr.bf16.mxu0 %v1304_v28  ;;  %v1305_v36 = vld [vmem:[%s1467_s16 + $0x40] ss:$8 sps:$4 sm:$0xff]   ;;  %v1310_v38 = vld [vmem:[%s1467_s16 + $0x54] ss:$8 sps:$4 sm:$0xff]  }
  0x35   : > { %1168 = vmatpush3.bf16.msra.mxu0 %v1289_v20  ;;  %1238 = vmatpush3.bf16.msra.mxu1 %v1289_v20  ;;  %v1298_v31 = vld [vmem:[%s1465_s15 + $0x48] sm:$0xff]   ;;  %v1300_v33 = vld [vmem:[%s1465_s15 + $0x40] sm:$0xff]   ;;  %v1312_v39 = vld [vmem:[%s1467_s16 + $0x10] ss:$8 sps:$4 sm:$0xff]  }
  0x36   : > { %1169 = vmatprep.subr.bf16.mxu0 %v1290_v21  ;;  %1231 = vmatprep.subr.bf16.mxu1 %v1290_v21  ;;  %v1299_v32 = vld [vmem:[%s1465_s15 + $0x8] sm:$0xff]   ;;  %v1301_v34 = vld [vmem:[%s1465_s15] sm:$0xff]   ;;  %v1313_v40 = vld [vmem:[%s1467_s16 + $0x50] ss:$8 sps:$4 sm:$0xff]  }
  0x37   : > { %775 = vmatprep.mubr.bf16.mxu1 %v1307_v29  ;;  %v1314_v41 = vld [vmem:[%s1467_s16 + $0x24] ss:$8 sps:$4 sm:$0xff]   ;;  %v1318_v43 = vld [vmem:[%s1467_s16 + $0x20] ss:$8 sps:$4 sm:$0xff]   ;;  %v1320_v45 = vld [vmem:[%s1467_s16 + $0x34] ss:$8 sps:$4 sm:$0xff]  }
  0x38   : > { %v1316_v42 = vld [vmem:[%s1467_s16 + $0x64] ss:$8 sps:$4 sm:$0xff]   ;;  %v1319_v44 = vld [vmem:[%s1467_s16 + $0x60] ss:$8 sps:$4 sm:$0xff]   ;;  %v1322_v46 = vld [vmem:[%s1467_s16 + $0x74] ss:$8 sps:$4 sm:$0xff]  }
  0x39   : > { %1170 = vmatpush3.bf16.msra.mxu0 %v1291_v22  ;;  %1239 = vmatpush3.bf16.msra.mxu1 %v1291_v22  ;;  %v1324_v47 = vld [vmem:[%s1467_s16 + $0x30] ss:$8 sps:$4 sm:$0xff]   ;;  %v471_v51 = vld [vmem:[%s1853_s5] sm:$0xff]  ;;  %v472_v61 = vld [vmem:[%s1853_s5 + $0x8] sm:$0xff] }
  0x3a   : > { %1171 = vmatprep.subr.bf16.mxu0 %v1292_v23  ;;  %1232 = vmatprep.subr.bf16.mxu1 %v1292_v23  ;;  %v1325_v48 = vld [vmem:[%s1467_s16 + $0x70] ss:$8 sps:$4 sm:$0xff]   ;;  %v479_v53 = vld [vmem:[%s1853_s5 + $0x40] sm:$0xff]  ;;  %v480_v63 = vld [vmem:[%s1853_s5 + $0x48] sm:$0xff] }
  0x3b   : > { %v473_v7 = vld [vmem:[%s1853_s5 + $0x10] sm:$0xff]  ;;  %v474_v17 = vld [vmem:[%s1853_s5 + $0x18] sm:$0xff]  ;;  %v483_v29 = vld [vmem:[%s1853_s5 + $0x60] sm:$0xff] }
  0x3c   : > { %v481_v9 = vld [vmem:[%s1853_s5 + $0x50] sm:$0xff]  ;;  %v482_v19 = vld [vmem:[%s1853_s5 + $0x58] sm:$0xff] }
  0x3d   : > { %1172 = vmatpush3.bf16.msra.mxu0 %v1293_v24  ;;  %1240 = vmatpush3.bf16.msra.mxu1 %v1293_v24 }
  0x3e   : > { %1173 = vmatprep.subr.bf16.mxu0 %v1294_v25  ;;  %1233 = vmatprep.subr.bf16.mxu1 %v1294_v25 }
  0x41   : > { %1174 = vmatpush3.bf16.msra.mxu0 %v1295_v26  ;;  %1241 = vmatpush3.bf16.msra.mxu1 %v1295_v26 }
  0x42   : > { %1175 = vmatprep.subr.bf16.mxu0 %v1296_v27  ;;  %1234 = vmatprep.subr.bf16.mxu1 %v1296_v27  ;;  %v475_v27 = vld [vmem:[%s1853_s5 + $0x20] sm:$0xff] }
  0x45   : > { %1176 = vmatpush3.bf16.msra.mxu0 %v1297_v30  ;;  %1242 = vmatpush3.bf16.msra.mxu1 %v1297_v30 }
  0x46   : > { %1177 = vmatprep.subr.bf16.mxu0 %v1298_v31  ;;  %1235 = vmatprep.subr.bf16.mxu1 %v1298_v31 }
  0x49   : > { %1178 = vmatpush3.bf16.msra.mxu0 %v1299_v32  ;;  %1243 = vmatpush3.bf16.msra.mxu1 %v1299_v32 }
  0x4a   : > { %1179 = vmatprep.subr.bf16.mxu0 %v1300_v33  ;;  %1236 = vmatprep.subr.bf16.mxu1 %v1300_v33 }
  0x4d   : > { %1180 = vmatpush3.bf16.msra.mxu0 %v1301_v34  ;;  %1244 = vmatpush3.bf16.msra.mxu1 %v1301_v34 }
  0x50   : > { %744 = vmatmul.mubr.bf16.vlgmr.msra.gmra.mxu0 %v1302_v35  ;;  %776 = vmatmul.mubr.bf16.vlgmr.msra.gmra.mxu1 %v1305_v36 }
  0x51   : > { %751 = vmatprep.mubr.bf16.mxu0 %v1308_v37  ;;  %783 = vmatprep.mubr.bf16.mxu1 %v1310_v38  ;;  %v476_v37 = vld [vmem:[%s1853_s5 + $0x28] sm:$0xff] }
  0x58   : > { %752 = vmatmul.mubr.bf16.gmra.mxu0 %v1312_v39  ;;  %784 = vmatmul.mubr.bf16.gmra.mxu1 %v1313_v40  ;;  %v484_v39 = vld [vmem:[%s1853_s5 + $0x68] sm:$0xff] }
  0x59   : > { %759 = vmatprep.mubr.bf16.mxu0 %v1314_v41  ;;  %791 = vmatprep.mubr.bf16.mxu1 %v1316_v42 }
  0x60   : > { %760 = vmatmul.mubr.bf16.gmra.mxu0 %v1318_v43  ;;  %792 = vmatmul.mubr.bf16.gmra.mxu1 %v1319_v44 }
  0x61   : > { %767 = vmatprep.mubr.bf16.mxu0 %v1320_v45  ;;  %799 = vmatprep.mubr.bf16.mxu1 %v1322_v46 }
  0x68   : > { %768 = vmatmul.mubr.bf16.gmra.mxu0 %v1324_v47  ;;  %800 = vmatmul.mubr.bf16.gmra.mxu1 %v1325_v48  ;;  %v477_v47 = vld [vmem:[%s1853_s5 + $0x30] sm:$0xff] }
 0x110   : > { %v1181_v49 = vpop.f32.mrf.mxu0  ;;  %v1205_v50 = vpop.f32.mrf.mxu1 }
 0x112   : > { %v1182_v52 = vpop.f32.mrf.mxu0  ;;  %v1206_v54 = vpop.f32.mrf.mxu1 }
 0x113   : > { %v1183_v55 = vadd.f32 %v1182_v52, %v1181_v49  ;;  %v1207_v56 = vadd.f32 %v1206_v54, %v1205_v50  ;;  %v485_v49 = vld [vmem:[%s1853_s5 + $0x70] sm:$0xff] }
 0x114   : > { %v1184_v57 = vpop.f32.mrf.mxu0  ;;  %v1208_v58 = vpop.f32.mrf.mxu1 }
 0x115   : > { %v808_v59 = vadd.f32 %v1183_v55, %v471_v51  ;;  %v816_v60 = vadd.f32 %v1207_v56, %v479_v53 }
 0x116   : > { %v1185_v62 = vpop.f32.mrf.mxu0  ;;  %v1209_v0 = vpop.f32.mrf.mxu1 }
 0x117   : > { %824 = vst [vmem:[%s1853_s5] sm:$0xff] %v808_v59  ;;  %832 = vst [vmem:[%s1853_s5 + $0x40] sm:$0xff] %v816_v60  ;;  %v1186_v1 = vadd.f32 %v1185_v62, %v1184_v57  ;;  %v1210_v2 = vadd.f32 %v1209_v0, %v1208_v58  ;;  %v478_v57 = vld [vmem:[%s1853_s5 + $0x38] sm:$0xff] }
 0x118   : > { %v1187_v3 = vpop.f32.mrf.mxu0  ;;  %v1211_v4 = vpop.f32.mrf.mxu1  ;;  %v486_v59 = vld [vmem:[%s1853_s5 + $0x78] sm:$0xff] }
 0x119   : > { %v809_v5 = vadd.f32 %v1186_v1, %v472_v61  ;;  %v817_v6 = vadd.f32 %v1210_v2, %v480_v63 }
 0x11a   : > { %v1188_v8 = vpop.f32.mrf.mxu0  ;;  %v1212_v10 = vpop.f32.mrf.mxu1 }
 0x11b   : > { %825 = vst [vmem:[%s1853_s5 + $0x8] sm:$0xff] %v809_v5  ;;  %833 = vst [vmem:[%s1853_s5 + $0x48] sm:$0xff] %v817_v6  ;;  %v1189_v11 = vadd.f32 %v1188_v8, %v1187_v3  ;;  %v1213_v12 = vadd.f32 %v1212_v10, %v1211_v4 }
 0x11c   : > { %v1190_v13 = vpop.f32.mrf.mxu0  ;;  %v1214_v14 = vpop.f32.mrf.mxu1 }
 0x11d   : > { %v810_v15 = vadd.f32 %v1189_v11, %v473_v7  ;;  %v818_v16 = vadd.f32 %v1213_v12, %v481_v9 }
 0x11e   : > { %v1191_v18 = vpop.f32.mrf.mxu0  ;;  %v1215_v20 = vpop.f32.mrf.mxu1 }
 0x11f   : > { %826 = vst [vmem:[%s1853_s5 + $0x10] sm:$0xff] %v810_v15  ;;  %834 = vst [vmem:[%s1853_s5 + $0x50] sm:$0xff] %v818_v16  ;;  %v1192_v21 = vadd.f32 %v1191_v18, %v1190_v13  ;;  %v1216_v22 = vadd.f32 %v1215_v20, %v1214_v14 }
 0x120   : > { %v1193_v23 = vpop.f32.mrf.mxu0  ;;  %v1217_v24 = vpop.f32.mrf.mxu1 }
 0x121   : > { %v811_v25 = vadd.f32 %v1192_v21, %v474_v17  ;;  %v819_v26 = vadd.f32 %v1216_v22, %v482_v19 }
 0x122   : > { %v1194_v28 = vpop.f32.mrf.mxu0  ;;  %v1218_v30 = vpop.f32.mrf.mxu1 }
 0x123   : > { %827 = vst [vmem:[%s1853_s5 + $0x18] sm:$0xff] %v811_v25  ;;  %835 = vst [vmem:[%s1853_s5 + $0x58] sm:$0xff] %v819_v26  ;;  %v1195_v31 = vadd.f32 %v1194_v28, %v1193_v23  ;;  %v1219_v32 = vadd.f32 %v1218_v30, %v1217_v24 }
 0x124   : > { %v1196_v33 = vpop.f32.mrf.mxu0  ;;  %v1220_v34 = vpop.f32.mrf.mxu1 }
 0x125   : > { %v812_v35 = vadd.f32 %v1195_v31, %v475_v27  ;;  %v820_v36 = vadd.f32 %v1219_v32, %v483_v29 }
 0x126   : > { %v1197_v38 = vpop.f32.mrf.mxu0  ;;  %v1221_v40 = vpop.f32.mrf.mxu1 }
 0x127   : > { %828 = vst [vmem:[%s1853_s5 + $0x20] sm:$0xff] %v812_v35  ;;  %836 = vst [vmem:[%s1853_s5 + $0x60] sm:$0xff] %v820_v36  ;;  %v1198_v41 = vadd.f32 %v1197_v38, %v1196_v33  ;;  %v1222_v42 = vadd.f32 %v1221_v40, %v1220_v34 }
 0x128   : > { %v1199_v43 = vpop.f32.mrf.mxu0  ;;  %v1223_v44 = vpop.f32.mrf.mxu1 }
 0x129   : > { %v813_v45 = vadd.f32 %v1198_v41, %v476_v37  ;;  %v821_v46 = vadd.f32 %v1222_v42, %v484_v39 }
 0x12a   : > { %v1200_v48 = vpop.f32.mrf.mxu0  ;;  %v1224_v50 = vpop.f32.mrf.mxu1 }
 0x12b   : > { %829 = vst [vmem:[%s1853_s5 + $0x28] sm:$0xff] %v813_v45  ;;  %837 = vst [vmem:[%s1853_s5 + $0x68] sm:$0xff] %v821_v46  ;;  %v1201_v51 = vadd.f32 %v1200_v48, %v1199_v43  ;;  %v1225_v52 = vadd.f32 %v1224_v50, %v1223_v44 }
 0x12c   : > { %v1202_v53 = vpop.f32.mrf.mxu0  ;;  %v1226_v54 = vpop.f32.mrf.mxu1 }
 0x12d   : > { %v814_v55 = vadd.f32 %v1201_v51, %v477_v47  ;;  %v822_v56 = vadd.f32 %v1225_v52, %v485_v49 }
 0x12e   : > { %v1203_v58 = vpop.f32.mrf.mxu0  ;;  %v1227_v60 = vpop.f32.mrf.mxu1 }
 0x12f   : > { %830 = vst [vmem:[%s1853_s5 + $0x30] sm:$0xff] %v814_v55  ;;  %838 = vst [vmem:[%s1853_s5 + $0x70] sm:$0xff] %v822_v56  ;;  %v1204_v61 = vadd.f32 %v1203_v58, %v1202_v53  ;;  %v1228_v62 = vadd.f32 %v1227_v60, %v1226_v54  ;;  %843 = sbr.rel (%p1157_p11) target bundleno = 332 (0x14c), region = 86 }
 0x131   : > { %v815_v63 = vadd.f32 %v1204_v61, %v478_v57  ;;  %v823_v0 = vadd.f32 %v1228_v62, %v486_v59 }
 0x133   : > { %831 = vst [vmem:[%s1853_s5 + $0x38] sm:$0xff] %v815_v63  ;;  %839 = vst [vmem:[%s1853_s5 + $0x78] sm:$0xff] %v823_v0 }
 0x134   : > { %v844_v1 = vld [vmem:[%s1853_s5] sm:$0xff]  ;;  %v845_v5 = vld [vmem:[%s1853_s5 + $0x8] sm:$0xff]  ;;  %v846_v8 = vld [vmem:[%s1853_s5 + $0x10] sm:$0xff] }
 0x135   : > { %v1653_v2 = vld [vmem:[%s1850_s2] ss:$0 sm:$0xff]  ;;  %v847_v9 = vld [vmem:[%s1853_s5 + $0x18] sm:$0xff]  ;;  %v907_v11 = vld [vmem:[%s1852_s4 + $0x8] sm:$0xff] }
 0x136   : > { %v1658_v3 = vld [vmem:[%s1851_s3] ss:$0 sm:$0xff]  ;;  %v867_v4 = vmul.f32 %v1653_v2, %v844_v1  ;;  %v868_v7 = vmul.f32 %v1653_v2, %v845_v5  ;;  %v869_v12 = vmul.f32 %v1653_v2, %v846_v8  ;;  %v908_v13 = vld [vmem:[%s1852_s4 + $0x10] sm:$0xff]  ;;  %v870_v14 = vmul.f32 %v1653_v2, %v847_v9  ;;  %v909_v17 = vld [vmem:[%s1852_s4 + $0x18] sm:$0xff] }
 0x137   : > { %v906_v6 = vld [vmem:[%s1852_s4] sm:$0xff]  ;;  %v849_v19 = vld [vmem:[%s1853_s5 + $0x28] sm:$0xff]  ;;  %v850_v20 = vld [vmem:[%s1853_s5 + $0x30] sm:$0xff] }
 0x138   : > { %v890_v10 = vadd.f32 %v1658_v3, %v867_v4  ;;  %v848_v15 = vld [vmem:[%s1853_s5 + $0x20] sm:$0xff]  ;;  %v891_v16 = vadd.f32 %v1658_v3, %v868_v7  ;;  %v892_v22 = vadd.f32 %v1658_v3, %v869_v12  ;;  %v893_v23 = vadd.f32 %v1658_v3, %v870_v14  ;;  %v911_v29 = vld [vmem:[%s1852_s4 + $0x28] sm:$0xff]  ;;  %v912_v37 = vld [vmem:[%s1852_s4 + $0x30] sm:$0xff] }
 0x139   : > { %v871_v18 = vmul.f32 %v1653_v2, %v848_v15  ;;  %v910_v24 = vld [vmem:[%s1852_s4 + $0x20] sm:$0xff]  ;;  %v872_v25 = vmul.f32 %v1653_v2, %v849_v19  ;;  %v873_v30 = vmul.f32 %v1653_v2, %v850_v20  ;;  %v913_v38 = vld [vmem:[%s1852_s4 + $0x38] sm:$0xff]  ;;  %v853_v39 = vld [vmem:[%s1853_s5 + $0x48] sm:$0xff] }
 0x13a   : > { %v922_v21 = vadd.f32 %v906_v6, %v890_v10  ;;  %v851_v26 = vld [vmem:[%s1853_s5 + $0x38] sm:$0xff]  ;;  %v923_v27 = vadd.f32 %v907_v11, %v891_v16  ;;  %v852_v32 = vld [vmem:[%s1853_s5 + $0x40] sm:$0xff]  ;;  %v924_v34 = vadd.f32 %v908_v13, %v892_v22  ;;  %v925_v35 = vadd.f32 %v909_v17, %v893_v23  ;;  %v854_v44 = vld [vmem:[%s1853_s5 + $0x50] sm:$0xff] }
 0x13b   : > { %v894_v28 = vadd.f32 %v1658_v3, %v871_v18  ;;  %v874_v31 = vmul.f32 %v1653_v2, %v851_v26  ;;  %v895_v36 = vadd.f32 %v1658_v3, %v872_v25  ;;  %v896_v42 = vadd.f32 %v1658_v3, %v873_v30  ;;  %v855_v45 = vld [vmem:[%s1853_s5 + $0x58] sm:$0xff]  ;;  %v856_v50 = vld [vmem:[%s1853_s5 + $0x60] sm:$0xff]  ;;  %v857_v56 = vld [vmem:[%s1853_s5 + $0x68] sm:$0xff] }
 0x13c   : > { %v938_v33 = vmax.f32 %v922_v21, 0.0  ;;  %v939_v40 = vmax.f32 %v923_v27, 0.0  ;;  %v940_v46 = vmax.f32 %v924_v34, 0.0  ;;  %v941_v47 = vmax.f32 %v925_v35, 0.0  ;;  %v914_v54 = vld [vmem:[%s1852_s4 + $0x40] sm:$0xff]  ;;  %v915_v59 = vld [vmem:[%s1852_s4 + $0x48] sm:$0xff] }
 0x13d   : > { %v926_v41 = vadd.f32 %v910_v24, %v894_v28  ;;  %v897_v43 = vadd.f32 %v1658_v3, %v874_v31  ;;  %v927_v48 = vadd.f32 %v911_v29, %v895_v36  ;;  %v875_v49 = vmul.f32 %v1653_v2, %v852_v32  ;;  %v858_v62 = vld [vmem:[%s1853_s5 + $0x70] sm:$0xff]  ;;  %v859_v63 = vld [vmem:[%s1853_s5 + $0x78] sm:$0xff]  ;;  %v918_v11 = vld [vmem:[%s1852_s4 + $0x60] sm:$0xff] }
 0x13e   : > { %954 = vst [vmem:[%s1853_s5] sm:$0xff] %v938_v33  ;;  %955 = vst [vmem:[%s1853_s5 + $0x8] sm:$0xff] %v939_v40  ;;  %v928_v52 = vadd.f32 %v912_v37, %v896_v42  ;;  %v876_v55 = vmul.f32 %v1653_v2, %v853_v39  ;;  %v877_v60 = vmul.f32 %v1653_v2, %v854_v44  ;;  %v916_v5 = vld [vmem:[%s1852_s4 + $0x50] sm:$0xff]  ;;  %v917_v6 = vld [vmem:[%s1852_s4 + $0x58] sm:$0xff] }
 0x13f   : > { %v942_v51 = vmax.f32 %v926_v41, 0.0  ;;  %v929_v53 = vadd.f32 %v913_v38, %v897_v43  ;;  %956 = vst [vmem:[%s1853_s5 + $0x10] sm:$0xff] %v940_v46  ;;  %957 = vst [vmem:[%s1853_s5 + $0x18] sm:$0xff] %v941_v47  ;;  %v943_v57 = vmax.f32 %v927_v48, 0.0  ;;  %v898_v58 = vadd.f32 %v1658_v3, %v875_v49  ;;  %v919_v15 = vld [vmem:[%s1852_s4 + $0x68] sm:$0xff]  ;;  %v920_v22 = vld [vmem:[%s1852_s4 + $0x70] sm:$0xff] }
 0x140   : > { %v878_v61 = vmul.f32 %v1653_v2, %v855_v45  ;;  %v944_v0 = vmax.f32 %v928_v52, 0.0  ;;  %v899_v4 = vadd.f32 %v1658_v3, %v876_v55  ;;  %v879_v7 = vmul.f32 %v1653_v2, %v856_v50  ;;  %v921_v23 = vld [vmem:[%s1852_s4 + $0x78] sm:$0xff] }
 0x141   : > { %958 = vst [vmem:[%s1853_s5 + $0x20] sm:$0xff] %v942_v51  ;;  %v945_v1 = vmax.f32 %v929_v53, 0.0  ;;  %959 = vst [vmem:[%s1853_s5 + $0x28] sm:$0xff] %v943_v57  ;;  %v930_v8 = vadd.f32 %v914_v54, %v898_v58  ;;  %v900_v9 = vadd.f32 %v1658_v3, %v877_v60  ;;  %v880_v12 = vmul.f32 %v1653_v2, %v857_v56 }
 0x142   : > { %v901_v10 = vadd.f32 %v1658_v3, %v878_v61  ;;  %960 = vst [vmem:[%s1853_s5 + $0x30] sm:$0xff] %v944_v0  ;;  %v931_v13 = vadd.f32 %v915_v59, %v899_v4  ;;  %v902_v14 = vadd.f32 %v1658_v3, %v879_v7  ;;  %v881_v16 = vmul.f32 %v1653_v2, %v858_v62 }
 0x143   : > { %961 = vst [vmem:[%s1853_s5 + $0x38] sm:$0xff] %v945_v1  ;;  %v882_v17 = vmul.f32 %v1653_v2, %v859_v63  ;;  %v946_v18 = vmax.f32 %v930_v8, 0.0  ;;  %v932_v19 = vadd.f32 %v916_v5, %v900_v9  ;;  %v903_v21 = vadd.f32 %v1658_v3, %v880_v12 }
 0x144   : > { %v933_v20 = vadd.f32 %v917_v6, %v901_v10  ;;  %v947_v24 = vmax.f32 %v931_v13, 0.0  ;;  %v934_v25 = vadd.f32 %v918_v11, %v902_v14  ;;  %v904_v26 = vadd.f32 %v1658_v3, %v881_v16 }
 0x145   : > { %v905_v27 = vadd.f32 %v1658_v3, %v882_v17  ;;  %962 = vst [vmem:[%s1853_s5 + $0x40] sm:$0xff] %v946_v18  ;;  %v948_v2 = vmax.f32 %v932_v19, 0.0  ;;  %v935_v29 = vadd.f32 %v919_v15, %v903_v21 }
 0x146   : > { %v949_v28 = vmax.f32 %v933_v20, 0.0  ;;  %963 = vst [vmem:[%s1853_s5 + $0x48] sm:$0xff] %v947_v24  ;;  %v950_v30 = vmax.f32 %v934_v25, 0.0  ;;  %v936_v31 = vadd.f32 %v920_v22, %v904_v26 }
 0x147   : > { %v937_v32 = vadd.f32 %v921_v23, %v905_v27  ;;  %964 = vst [vmem:[%s1853_s5 + $0x50] sm:$0xff] %v948_v2  ;;  %v951_v3 = vmax.f32 %v935_v29, 0.0 }
 0x148   : > { %965 = vst [vmem:[%s1853_s5 + $0x58] sm:$0xff] %v949_v28  ;;  %966 = vst [vmem:[%s1853_s5 + $0x60] sm:$0xff] %v950_v30  ;;  %v952_v33 = vmax.f32 %v936_v31, 0.0 }
 0x149   : > { %v953_v34 = vmax.f32 %v937_v32, 0.0  ;;  %967 = vst [vmem:[%s1853_s5 + $0x68] sm:$0xff] %v951_v3 }
 0x14a   : > { %968 = vst [vmem:[%s1853_s5 + $0x70] sm:$0xff] %v952_v33 }
 0x14b   : > { %969 = vst [vmem:[%s1853_s5 + $0x78] sm:$0xff] %v953_v34 }
 0x14c PF: > { %s15_s22 = sadd.s32 1, %s1364_s22   ;;  %s1854_s18 = smov %s1352_s19 }
 0x14d   : > { %p12_p12 = scmp.ge.s32.totalorder %s15_s22, 5   ;;  %s1855_s19 = smov %s1432_s26 }
 0x14e   : > { %s1856_s20 = smov %s1360_s21  ;;  %s1857_s21 = smov %s1859_s23 }
 0x14f   :  { %14 = sbr.rel (!%p12_p12) target bundleno = 3 (0x3), region = 133 }

// kernel: resnet_proto_forward.27
= control target key start
LH: loop header
LB: loop body
LE: loop exit
PB: predicated region body
PF: predicated region fallthrough
CT: control target
= control target key end

     0   :  { %s939_s15 = smov 0   ;;  %s941_s16 = smov 0   ;;  %s1096_s0 = inlined_call_operand.vmem [shape: bf16[32,768], index: 0, kind: input, shape index: {}]   ;;  %s1097_s1 = inlined_call_operand.vmem [shape: bf16[768,128], index: 1, kind: input, shape index: {}]   ;;  %s1098_s2 = inlined_call_operand.vmem [shape: f32[1,128], index: 2, kind: input, shape index: {}]   ;;  %s1099_s3 = inlined_call_operand.vmem [shape: f32[1,128], index: 3, kind: input, shape index: {}]   ;;  %s1100_s4 = inlined_call_operand.vmem [shape: f32[32,128], index: 4, kind: output, shape index: {}]  }
   0x1   :  { %s943_s17 = smov 0   ;;  %s945_s18 = smov 0  }
   0x2   :  { %s947_s19 = smov 0  }
   0x3 LB: > { %s26_s20 = sadd.s32 1, %s907_s18  ;;  %p49_p1 = scmp.ne.s32.totalorder %s899_s16, %s895_s15  ;;  %s911_s19 = sphi %s947_s19, %s14_s19   ;;  %s907_s18 = sphi %s945_s18, %s1104_s18   ;;  %s903_s17 = sphi %s943_s17, %s1103_s17   ;;  %s899_s16 = sphi %s941_s16, %s1102_s16   ;;  %s895_s15 = sphi %s939_s15, %s1101_s15  }
   0x4   : > { %p27_p0 = scmp.ge.s32.totalorder %s26_s20, 3  ;;  %p50_p2 = scmp.eq.s32.totalorder %s911_s19, 0 }
   0x5   : > { %s42_s22 = sadd.s32 1, %s899_s16  ;;  %p729_p5 = scmp.ge.s32.totalorder %s911_s19, 3 }
   0x6   : > { %s1106_s20 = smov (%p27_p0, %s26_s20), 0  ;;  %p51_p3 = por %p50_p2, %p49_p1 }
   0x7   : > { %s38_s21 = ssub.s32 %s907_s18, %s1106_s20  ;;  %195 = sbr.rel (%p729_p5) target bundleno = 18 (0x12), region = 24 }
   0x8   : > { %p40_p4 = scmp.eq.s32.totalorder %s38_s21, 0 }
   0xa   : > { %s974_s23 = scalar_select %p40_p4, %s899_s16, %s42_s22  }
   0xc   : > { %198 = sbr.rel (!%p51_p3) target bundleno = 18 (0x12), region = 28  ;;  %s200_s24 = sand.u32 (%p51_p3), 1, %s899_s16  }
   0xd   : > { %s765_s25 = sshll.u32 (%p51_p3), %s907_s18, 3  ;;  %s730_s26 = sshll.u32 (%p51_p3), %s200_s24, 5 }
   0xe   : > { %s208_s29 = scalar_lea.vmem (%p51_p3), %s1096_s0, %s765_s25  ;;  %s202_s30 = scalar_lea.vmem (%p51_p3), [#allocation2], %s730_s26 }
   0xf   : > { %v243_v0 = vld [vmem:[%s208_s29] sm:$0xff] (%p51_p3)  ;;  %v245_v1 = vld [vmem:[%s208_s29 + $0x18] sm:$0xff] (%p51_p3)  ;;  %v247_v2 = vld [vmem:[%s208_s29 + $0x30] sm:$0xff] (%p51_p3) }
  0x10   : > { %244 = vst [vmem:[%s202_s30] sm:$0xff] (%p51_p3), %v243_v0  ;;  %246 = vst [vmem:[%s202_s30 + $0x8] sm:$0xff] (%p51_p3), %v245_v1  ;;  %v249_v3 = vld [vmem:[%s208_s29 + $0x48] sm:$0xff] (%p51_p3) }
  0x11   : > { %248 = vst [vmem:[%s202_s30 + $0x10] sm:$0xff] %v247_v2  ;;  %250 = vst [vmem:[%s202_s30 + $0x18] sm:$0xff] %v249_v3 }
  0x12 PF: > { %p733_p6 = scmp.ge.s32.totalorder %s911_s19, 1  ;;  %p267_p7 = scmp.lt.s32.totalorder %s911_s19, 4 }
  0x14   : > { %p268_p8 = pnand %p733_p6, %p267_p7 }
  0x15   : > { %s274_s5 = sand.u32 (!%p268_p8), 1, %s895_s15   ;;  %s735_s6 = sshll.u32 (!%p268_p8), %s903_s17, 5 }
  0x16   : > { %271 = sbr.rel (%p268_p8) target bundleno = 286 (0x11e), region = 70  ;;  %s734_s7 = sshll.u32 (!%p268_p8), %s274_s5, 5 }
  0x17   : > { %p319_p9 = scmp.lt.s32.totalorder (!%p268_p8), %s735_s6, 95  ;;  %s991_s12 = scalar_lea.vmem (!%p268_p8), [#allocation2], %s734_s7 }
  0x18   : > { %p737_p10 = scmp.ne.s32.totalorder (!%p268_p8), %s903_s17, 0 }
  0x1b   : > { %s1108_s6 = smov (!%p319_p9, %s735_s6), 95  ;;  %346 = sbr.rel (%p737_p10) target bundleno = 35 (0x23), region = 78 }
  0x1c   : > { %s736_s8 = sshll.u32 %s1108_s6, 2 }
  0x1d   : > { %s989_s11 = scalar_lea.vmem %s1097_s1, %s736_s8 }
  0x20   : > { %v913_v4 = vmov 0.0  }
  0x21   : > { %347 = vst [vmem:[%s1100_s4] sm:$0xff] %v913_v4  ;;  %348 = vst [vmem:[%s1100_s4 + $0x8] sm:$0xff] %v913_v4 }
  0x22   : > { %349 = vst [vmem:[%s1100_s4 + $0x10] sm:$0xff] %v913_v4  ;;  %350 = vst [vmem:[%s1100_s4 + $0x18] sm:$0xff] %v913_v4 }
  0x23 PF: > { %v851_v5 = vld [vmem:[%s989_s11 + $0x78] sm:$0xff]   ;;  %v853_v7 = vld [vmem:[%s989_s11 + $0x70] sm:$0xff]   ;;  %v855_v9 = vld [vmem:[%s989_s11 + $0x68] sm:$0xff]   ;;  %p758_p11 = scmp.ne.s32.totalorder %s903_s17, 2 }
  0x24   : > { %v852_v6 = vld [vmem:[%s989_s11 + $0x38] sm:$0xff]   ;;  %766 = vmatprep.subr.bf16.mxu0 %v851_v5  ;;  %794 = vmatprep.subr.bf16.mxu1 %v851_v5  ;;  %v854_v8 = vld [vmem:[%s989_s11 + $0x30] sm:$0xff]   ;;  %v856_v10 = vld [vmem:[%s989_s11 + $0x28] sm:$0xff]  }
  0x25   : > { %767 = vmatpush3.bf16.msra.mxu0 %v852_v6  ;;  %802 = vmatpush3.bf16.msra.mxu1 %v852_v6  ;;  %v857_v11 = vld [vmem:[%s989_s11 + $0x60] sm:$0xff]   ;;  %v859_v13 = vld [vmem:[%s989_s11 + $0x58] sm:$0xff]   ;;  %v861_v15 = vld [vmem:[%s989_s11 + $0x50] sm:$0xff]  }
  0x26   : > { %768 = vmatprep.subr.bf16.mxu0 %v853_v7  ;;  %795 = vmatprep.subr.bf16.mxu1 %v853_v7  ;;  %v858_v12 = vld [vmem:[%s989_s11 + $0x20] sm:$0xff]   ;;  %v860_v14 = vld [vmem:[%s989_s11 + $0x18] sm:$0xff]   ;;  %v862_v18 = vld [vmem:[%s989_s11 + $0x10] sm:$0xff]  }
  0x27   : > { %v869_v16 = vld [vmem:[%s991_s12 + $0x4] ss:$8 sps:$4 sm:$0xff]   ;;  %v872_v17 = vld [vmem:[%s991_s12 + $0x14] ss:$8 sps:$4 sm:$0xff]   ;;  %v867_v23 = vld [vmem:[%s991_s12] ss:$8 sps:$4 sm:$0xff]  }
  0x28   : > { %v863_v19 = vld [vmem:[%s989_s11 + $0x48] sm:$0xff]   ;;  %539 = vmatprep.mubr.bf16.mxu0 %v869_v16  ;;  %547 = vmatprep.mubr.bf16.mxu1 %v872_v17  ;;  %v865_v21 = vld [vmem:[%s989_s11 + $0x40] sm:$0xff]   ;;  %v870_v24 = vld [vmem:[%s991_s12 + $0x10] ss:$8 sps:$4 sm:$0xff]  }
  0x29   : > { %769 = vmatpush3.bf16.msra.mxu0 %v854_v8  ;;  %803 = vmatpush3.bf16.msra.mxu1 %v854_v8  ;;  %v864_v20 = vld [vmem:[%s989_s11 + $0x8] sm:$0xff]   ;;  %v866_v22 = vld [vmem:[%s989_s11] sm:$0xff]   ;;  %v353_v29 = vld [vmem:[%s1100_s4 + $0x10] sm:$0xff] }
  0x2a   : > { %770 = vmatprep.subr.bf16.mxu0 %v855_v9  ;;  %796 = vmatprep.subr.bf16.mxu1 %v855_v9  ;;  %v351_v27 = vld [vmem:[%s1100_s4] sm:$0xff]  ;;  %v352_v37 = vld [vmem:[%s1100_s4 + $0x8] sm:$0xff]  ;;  %v354_v39 = vld [vmem:[%s1100_s4 + $0x18] sm:$0xff] }
  0x2d   : > { %771 = vmatpush3.bf16.msra.mxu0 %v856_v10  ;;  %804 = vmatpush3.bf16.msra.mxu1 %v856_v10 }
  0x2e   : > { %772 = vmatprep.subr.bf16.mxu0 %v857_v11  ;;  %797 = vmatprep.subr.bf16.mxu1 %v857_v11 }
  0x31   : > { %773 = vmatpush3.bf16.msra.mxu0 %v858_v12  ;;  %805 = vmatpush3.bf16.msra.mxu1 %v858_v12 }
  0x32   : > { %774 = vmatprep.subr.bf16.mxu0 %v859_v13  ;;  %798 = vmatprep.subr.bf16.mxu1 %v859_v13 }
  0x35   : > { %775 = vmatpush3.bf16.msra.mxu0 %v860_v14  ;;  %806 = vmatpush3.bf16.msra.mxu1 %v860_v14 }
  0x36   : > { %776 = vmatprep.subr.bf16.mxu0 %v861_v15  ;;  %799 = vmatprep.subr.bf16.mxu1 %v861_v15 }
  0x39   : > { %777 = vmatpush3.bf16.msra.mxu0 %v862_v18  ;;  %807 = vmatpush3.bf16.msra.mxu1 %v862_v18 }
  0x3a   : > { %778 = vmatprep.subr.bf16.mxu0 %v863_v19  ;;  %800 = vmatprep.subr.bf16.mxu1 %v863_v19 }
  0x3d   : > { %779 = vmatpush3.bf16.msra.mxu0 %v864_v20  ;;  %808 = vmatpush3.bf16.msra.mxu1 %v864_v20 }
  0x3e   : > { %780 = vmatprep.subr.bf16.mxu0 %v865_v21  ;;  %801 = vmatprep.subr.bf16.mxu1 %v865_v21 }
  0x41   : > { %781 = vmatpush3.bf16.msra.mxu0 %v866_v22  ;;  %809 = vmatpush3.bf16.msra.mxu1 %v866_v22 }
  0x44   : > { %540 = vmatmul.mubr.bf16.vlgmr.msra.gmra.mxu0 %v867_v23  ;;  %548 = vmatmul.mubr.bf16.vlgmr.msra.gmra.mxu1 %v870_v24 }
 0x104   : > { %v782_v25 = vpop.f32.mrf.mxu0  ;;  %v788_v26 = vpop.f32.mrf.mxu1 }
 0x106   : > { %v783_v28 = vpop.f32.mrf.mxu0  ;;  %v789_v30 = vpop.f32.mrf.mxu1 }
 0x107   : > { %v784_v31 = vadd.f32 %v783_v28, %v782_v25  ;;  %v790_v32 = vadd.f32 %v789_v30, %v788_v26 }
 0x108   : > { %v785_v33 = vpop.f32.mrf.mxu0  ;;  %v791_v34 = vpop.f32.mrf.mxu1 }
 0x109   : > { %v556_v35 = vadd.f32 %v784_v31, %v351_v27  ;;  %v558_v36 = vadd.f32 %v790_v32, %v353_v29 }
 0x10a   : > { %v786_v38 = vpop.f32.mrf.mxu0  ;;  %v792_v40 = vpop.f32.mrf.mxu1 }
 0x10b   : > { %560 = vst [vmem:[%s1100_s4] sm:$0xff] %v556_v35  ;;  %562 = vst [vmem:[%s1100_s4 + $0x10] sm:$0xff] %v558_v36  ;;  %v787_v41 = vadd.f32 %v786_v38, %v785_v33  ;;  %v793_v42 = vadd.f32 %v792_v40, %v791_v34  ;;  %567 = sbr.rel (%p758_p11) target bundleno = 286 (0x11e), region = 82 }
 0x10d   : > { %v557_v43 = vadd.f32 %v787_v41, %v352_v37  ;;  %v559_v44 = vadd.f32 %v793_v42, %v354_v39 }
 0x10f   : > { %561 = vst [vmem:[%s1100_s4 + $0x8] sm:$0xff] %v557_v43  ;;  %563 = vst [vmem:[%s1100_s4 + $0x18] sm:$0xff] %v559_v44 }
 0x110   : > { %v759_v46 = vld [vmem:[%s1098_s2] ss:$0 sm:$0xff] }
 0x111   : > { %v760_v47 = vld [vmem:[%s1099_s3] ss:$0 sm:$0xff] }
 0x112   : > { %v568_v45 = vld [vmem:[%s1100_s4] sm:$0xff]  ;;  %v570_v50 = vld [vmem:[%s1100_s4 + $0x10] sm:$0xff] }
 0x113   : > { %v579_v48 = vmul.f32 %v759_v46, %v568_v45  ;;  %v581_v53 = vmul.f32 %v759_v46, %v570_v50 }
 0x115   : > { %v590_v55 = vadd.f32 %v760_v47, %v579_v48  ;;  %v592_v57 = vadd.f32 %v760_v47, %v581_v53 }
 0x116   : > { %v569_v49 = vld [vmem:[%s1100_s4 + $0x8] sm:$0xff]  ;;  %v571_v51 = vld [vmem:[%s1100_s4 + $0x18] sm:$0xff] }
 0x117   : > { %v580_v52 = vmul.f32 %v759_v46, %v569_v49  ;;  %v582_v54 = vmul.f32 %v759_v46, %v571_v51  ;;  %v594_v59 = vmax.f32 %v590_v55, 0.0  ;;  %v596_v61 = vmax.f32 %v592_v57, 0.0 }
 0x119   : > { %v591_v56 = vadd.f32 %v760_v47, %v580_v52  ;;  %v593_v58 = vadd.f32 %v760_v47, %v582_v54  ;;  %598 = vst [vmem:[%s1100_s4] sm:$0xff] %v594_v59  ;;  %600 = vst [vmem:[%s1100_s4 + $0x10] sm:$0xff] %v596_v61 }
 0x11b   : > { %v595_v60 = vmax.f32 %v591_v56, 0.0  ;;  %v597_v62 = vmax.f32 %v593_v58, 0.0 }
 0x11d   : > { %599 = vst [vmem:[%s1100_s4 + $0x8] sm:$0xff] %v595_v60  ;;  %601 = vst [vmem:[%s1100_s4 + $0x18] sm:$0xff] %v597_v62 }
 0x11e PF: > { %s14_s19 = sadd.s32 1, %s911_s19   ;;  %s1101_s15 = smov %s899_s16 }
 0x11f   : > { %p11_p12 = scmp.ge.s32.totalorder %s14_s19, 5   ;;  %s1102_s16 = smov %s974_s23 }
 0x120   : > { %s1103_s17 = smov %s907_s18  ;;  %s1104_s18 = smov %s1106_s20 }
 0x121   :  { %13 = sbr.rel (!%p11_p12) target bundleno = 3 (0x3), region = 126 }

// kernel: resnet_proto_forward.28
= control target key start
LH: loop header
LB: loop body
LE: loop exit
PB: predicated region body
PF: predicated region fallthrough
CT: control target
= control target key end

     0   :  { %s330_s1 = inlined_call_operand.vmem [shape: bf16[128,128], index: 1, kind: input, shape index: {}]   ;;  %s331_s0 = inlined_call_operand.vmem [shape: bf16[32,128], index: 0, kind: input, shape index: {}]   ;;  %s332_s2 = inlined_call_operand.vmem [shape: f32[1,128], index: 2, kind: input, shape index: {}]   ;;  %s333_s3 = inlined_call_operand.vmem [shape: f32[1,128], index: 3, kind: input, shape index: {}]   ;;  %s334_s4 = inlined_call_operand.vmem [shape: f32[32,128], index: 4, kind: output, shape index: {}]  }
   0x1   :  { %v247_v0 = vld [vmem:[%s330_s1 + $0x38] sm:$0xff]   ;;  %v248_v1 = vld [vmem:[%s330_s1 + $0x30] sm:$0xff]   ;;  %v249_v2 = vld [vmem:[%s330_s1 + $0x28] sm:$0xff]  }
   0x2   :  { %226 = vmatprep.subr.bf16.mxu0 %v247_v0  ;;  %v250_v3 = vld [vmem:[%s330_s1 + $0x20] sm:$0xff]   ;;  %v251_v5 = vld [vmem:[%s330_s1 + $0x18] sm:$0xff]   ;;  %v252_v6 = vld [vmem:[%s330_s1 + $0x10] sm:$0xff]  }
   0x3   :  { %227 = vmatpush3.bf16.msra.mxu0 %v247_v0  ;;  %v255_v4 = vld [vmem:[%s331_s0] sm:$0xff]   ;;  %v253_v7 = vld [vmem:[%s330_s1 + $0x8] sm:$0xff]  }
   0x4   :  { %228 = vmatprep.subr.bf16.mxu0 %v248_v1  ;;  %242 = vmatprep.mubr.bf16.mxu0 %v255_v4  ;;  %v254_v8 = vld [vmem:[%s330_s1] sm:$0xff]   ;;  %v256_v9 = vld [vmem:[%s331_s0 + $0x8] sm:$0xff]  }
   0x5   :  { %v214_v11 = vld [vmem:[%s332_s2] ss:$0 sm:$0xff] }
   0x6   :  { %v215_v12 = vld [vmem:[%s333_s3] ss:$0 sm:$0xff] }
   0x7   :  { %229 = vmatpush3.bf16.msra.mxu0 %v248_v1 }
   0x8   :  { %230 = vmatprep.subr.bf16.mxu0 %v249_v2 }
   0xb   :  { %231 = vmatpush3.bf16.msra.mxu0 %v249_v2 }
   0xc   :  { %232 = vmatprep.subr.bf16.mxu0 %v250_v3 }
   0xf   :  { %233 = vmatpush3.bf16.msra.mxu0 %v250_v3 }
  0x10   :  { %234 = vmatprep.subr.bf16.mxu0 %v251_v5 }
  0x13   :  { %235 = vmatpush3.bf16.msra.mxu0 %v251_v5 }
  0x14   :  { %236 = vmatprep.subr.bf16.mxu0 %v252_v6 }
  0x17   :  { %237 = vmatpush3.bf16.msra.mxu0 %v252_v6 }
  0x18   :  { %238 = vmatprep.subr.bf16.mxu0 %v253_v7 }
  0x1b   :  { %239 = vmatpush3.bf16.msra.mxu0 %v253_v7 }
  0x1c   :  { %240 = vmatprep.subr.bf16.mxu0 %v254_v8 }
  0x1f   :  { %241 = vmatpush3.bf16.msra.mxu0 %v254_v8 }
  0x22   :  { %243 = vmatmul.mubr.bf16.vlgmr.msra.gmra.mxu0 %v256_v9 }
  0xe2   :  { %v244_v10 = vpop.f32.mrf.mxu0 }
  0xe3   :  { %v183_v14 = vmul.f32 %v244_v10, %v214_v11 }
  0xe4   :  { %v144_v13 = vpop.f32.mrf.mxu0 }
  0xe5   :  { %v194_v16 = vadd.f32 %v215_v12, %v183_v14  ;;  %v181_v17 = vmul.f32 %v214_v11, %v144_v13 }
  0xe6   :  { %v245_v15 = vpop.f32.mrf.mxu0 }
  0xe7   :  { %198 = vst [vmem:[%s334_s4 + $0x10] sm:$0xff] %v194_v16  ;;  %v192_v19 = vadd.f32 %v215_v12, %v181_v17  ;;  %v184_v20 = vmul.f32 %v245_v15, %v214_v11 }
  0xe8   :  { %v147_v18 = vpop.f32.mrf.mxu0 }
  0xe9   :  { %196 = vst [vmem:[%s334_s4] sm:$0xff] %v192_v19  ;;  %v195_v21 = vadd.f32 %v215_v12, %v184_v20  ;;  %v182_v22 = vmul.f32 %v214_v11, %v147_v18 }
  0xeb   :  { %199 = vst [vmem:[%s334_s4 + $0x18] sm:$0xff] %v195_v21  ;;  %v193_v23 = vadd.f32 %v215_v12, %v182_v22 }
  0xed   :  { %197 = vst [vmem:[%s334_s4 + $0x8] sm:$0xff] %v193_v23 }

// kernel: resnet_proto_forward.29
= control target key start
LH: loop header
LB: loop body
LE: loop exit
PB: predicated region body
PF: predicated region fallthrough
CT: control target
= control target key end

     0   :  { %s1031_s18 = smov 0   ;;  %s1033_s19 = smov 0   ;;  %s1200_s0 = inlined_call_operand.vmem [shape: bf16[32,1280], index: 0, kind: input, shape index: {}]   ;;  %s1201_s1 = inlined_call_operand.vmem [shape: bf16[1280,128], index: 1, kind: input, shape index: {}]   ;;  %s1202_s2 = inlined_call_operand.vmem [shape: f32[1,128], index: 2, kind: input, shape index: {}]   ;;  %s1203_s3 = inlined_call_operand.vmem [shape: f32[1,128], index: 3, kind: input, shape index: {}]   ;;  %s1204_s4 = inlined_call_operand.vmem [shape: f32[32,128], index: 4, kind: input, shape index: {}]   ;;  %s1205_s5 = inlined_call_operand.vmem [shape: f32[32,128], index: 5, kind: output, shape index: {}]  }
   0x1   :  { %s1035_s20 = smov 0   ;;  %s1037_s21 = smov 0  }
   0x2   :  { %s1039_s22 = smov 0  }
   0x3 LB: > { %s27_s23 = sadd.s32 1, %s994_s21  ;;  %p50_p1 = scmp.ne.s32.totalorder %s986_s19, %s982_s18  ;;  %s998_s22 = sphi %s1039_s22, %s15_s22   ;;  %s994_s21 = sphi %s1037_s21, %s1209_s21   ;;  %s990_s20 = sphi %s1035_s20, %s1208_s20   ;;  %s986_s19 = sphi %s1033_s19, %s1207_s19   ;;  %s982_s18 = sphi %s1031_s18, %s1206_s18  }
   0x4   : > { %p28_p0 = scmp.ge.s32.totalorder %s27_s23, 5  ;;  %p51_p2 = scmp.eq.s32.totalorder %s998_s22, 0 }
   0x5   : > { %s43_s25 = sadd.s32 1, %s986_s19  ;;  %p816_p5 = scmp.ge.s32.totalorder %s998_s22, 5 }
   0x6   : > { %s1211_s23 = smov (%p28_p0, %s27_s23), 0  ;;  %p52_p3 = por %p51_p2, %p50_p1 }
   0x7   : > { %s39_s24 = ssub.s32 %s994_s21, %s1211_s23  ;;  %236 = sbr.rel (%p816_p5) target bundleno = 18 (0x12), region = 28 }
   0x8   : > { %p41_p4 = scmp.eq.s32.totalorder %s39_s24, 0 }
   0xa   : > { %s1066_s26 = scalar_select %p41_p4, %s986_s19, %s43_s25  }
   0xc   : > { %239 = sbr.rel (!%p52_p3) target bundleno = 18 (0x12), region = 32  ;;  %s241_s27 = sand.u32 (%p52_p3), 1, %s986_s19  }
   0xd   : > { %s852_s28 = sshll.u32 (%p52_p3), %s994_s21, 3  ;;  %s817_s29 = sshll.u32 (%p52_p3), %s241_s27, 5 }
   0xe   : > { %s249_s7 = scalar_lea.vmem (%p52_p3), %s1200_s0, %s852_s28  ;;  %s243_s8 = scalar_lea.vmem (%p52_p3), [#allocation2], %s817_s29 }
   0xf   : > { %v284_v0 = vld [vmem:[%s249_s7] sm:$0xff] (%p52_p3)  ;;  %v286_v1 = vld [vmem:[%s249_s7 + $0x28] sm:$0xff] (%p52_p3)  ;;  %v288_v2 = vld [vmem:[%s249_s7 + $0x50] sm:$0xff] (%p52_p3) }
  0x10   : > { %285 = vst [vmem:[%s243_s8] sm:$0xff] (%p52_p3), %v284_v0  ;;  %287 = vst [vmem:[%s243_s8 + $0x8] sm:$0xff] (%p52_p3), %v286_v1  ;;  %v290_v3 = vld [vmem:[%s249_s7 + $0x78] sm:$0xff] (%p52_p3) }
  0x11   : > { %289 = vst [vmem:[%s243_s8 + $0x10] sm:$0xff] %v288_v2  ;;  %291 = vst [vmem:[%s243_s8 + $0x18] sm:$0xff] %v290_v3 }
  0x12 PF: > { %p820_p6 = scmp.ge.s32.totalorder %s998_s22, 1  ;;  %p308_p7 = scmp.lt.s32.totalorder %s998_s22, 6 }
  0x14   : > { %p309_p8 = pnand %p820_p6, %p308_p7 }
  0x15   : > { %s315_s9 = sand.u32 (!%p309_p8), 1, %s982_s18   ;;  %s822_s10 = sshll.u32 (!%p309_p8), %s990_s20, 5 }
  0x16   : > { %312 = sbr.rel (%p309_p8) target bundleno = 288 (0x120), region = 74  ;;  %s821_s11 = sshll.u32 (!%p309_p8), %s315_s9, 5 }
  0x17   : > { %p370_p9 = scmp.lt.s32.totalorder (!%p309_p8), %s822_s10, 159  ;;  %s1083_s16 = scalar_lea.vmem (!%p309_p8), [#allocation2], %s821_s11 }
  0x18   : > { %p824_p10 = scmp.ne.s32.totalorder (!%p309_p8), %s990_s20, 0 }
  0x1b   : > { %s1213_s10 = smov (!%p370_p9, %s822_s10), 159  ;;  %406 = sbr.rel (%p824_p10) target bundleno = 35 (0x23), region = 82 }
  0x1c   : > { %s823_s12 = sshll.u32 %s1213_s10, 2 }
  0x1d   : > { %s1081_s15 = scalar_lea.vmem %s1201_s1, %s823_s12 }
  0x20   : > { %v1000_v4 = vmov 0.0  }
  0x21   : > { %407 = vst [vmem:[%s1205_s5] sm:$0xff] %v1000_v4  ;;  %408 = vst [vmem:[%s1205_s5 + $0x8] sm:$0xff] %v1000_v4 }
  0x22   : > { %409 = vst [vmem:[%s1205_s5 + $0x10] sm:$0xff] %v1000_v4  ;;  %410 = vst [vmem:[%s1205_s5 + $0x18] sm:$0xff] %v1000_v4 }
  0x23 PF: > { %v938_v5 = vld [vmem:[%s1081_s15 + $0x78] sm:$0xff]   ;;  %v940_v7 = vld [vmem:[%s1081_s15 + $0x70] sm:$0xff]   ;;  %v942_v9 = vld [vmem:[%s1081_s15 + $0x68] sm:$0xff]   ;;  %p845_p11 = scmp.ne.s32.totalorder %s990_s20, 4 }
  0x24   : > { %v939_v6 = vld [vmem:[%s1081_s15 + $0x38] sm:$0xff]   ;;  %853 = vmatprep.subr.bf16.mxu0 %v938_v5  ;;  %881 = vmatprep.subr.bf16.mxu1 %v938_v5  ;;  %v941_v8 = vld [vmem:[%s1081_s15 + $0x30] sm:$0xff]   ;;  %v943_v10 = vld [vmem:[%s1081_s15 + $0x28] sm:$0xff]  }
  0x25   : > { %854 = vmatpush3.bf16.msra.mxu0 %v939_v6  ;;  %889 = vmatpush3.bf16.msra.mxu1 %v939_v6  ;;  %v944_v11 = vld [vmem:[%s1081_s15 + $0x60] sm:$0xff]   ;;  %v946_v13 = vld [vmem:[%s1081_s15 + $0x58] sm:$0xff]   ;;  %v948_v15 = vld [vmem:[%s1081_s15 + $0x50] sm:$0xff]  }
  0x26   : > { %855 = vmatprep.subr.bf16.mxu0 %v940_v7  ;;  %882 = vmatprep.subr.bf16.mxu1 %v940_v7  ;;  %v945_v12 = vld [vmem:[%s1081_s15 + $0x20] sm:$0xff]   ;;  %v947_v14 = vld [vmem:[%s1081_s15 + $0x18] sm:$0xff]   ;;  %v949_v18 = vld [vmem:[%s1081_s15 + $0x10] sm:$0xff]  }
  0x27   : > { %v956_v16 = vld [vmem:[%s1083_s16 + $0x4] ss:$8 sps:$4 sm:$0xff]   ;;  %v959_v17 = vld [vmem:[%s1083_s16 + $0x14] ss:$8 sps:$4 sm:$0xff]   ;;  %v954_v23 = vld [vmem:[%s1083_s16] ss:$8 sps:$4 sm:$0xff]  }
  0x28   : > { %v950_v19 = vld [vmem:[%s1081_s15 + $0x48] sm:$0xff]   ;;  %599 = vmatprep.mubr.bf16.mxu0 %v956_v16  ;;  %607 = vmatprep.mubr.bf16.mxu1 %v959_v17  ;;  %v952_v21 = vld [vmem:[%s1081_s15 + $0x40] sm:$0xff]   ;;  %v957_v24 = vld [vmem:[%s1083_s16 + $0x10] ss:$8 sps:$4 sm:$0xff]  }
  0x29   : > { %856 = vmatpush3.bf16.msra.mxu0 %v941_v8  ;;  %890 = vmatpush3.bf16.msra.mxu1 %v941_v8  ;;  %v951_v20 = vld [vmem:[%s1081_s15 + $0x8] sm:$0xff]   ;;  %v953_v22 = vld [vmem:[%s1081_s15] sm:$0xff]   ;;  %v413_v29 = vld [vmem:[%s1205_s5 + $0x10] sm:$0xff] }
  0x2a   : > { %857 = vmatprep.subr.bf16.mxu0 %v942_v9  ;;  %883 = vmatprep.subr.bf16.mxu1 %v942_v9  ;;  %v411_v27 = vld [vmem:[%s1205_s5] sm:$0xff]  ;;  %v412_v37 = vld [vmem:[%s1205_s5 + $0x8] sm:$0xff]  ;;  %v414_v39 = vld [vmem:[%s1205_s5 + $0x18] sm:$0xff] }
  0x2d   : > { %858 = vmatpush3.bf16.msra.mxu0 %v943_v10  ;;  %891 = vmatpush3.bf16.msra.mxu1 %v943_v10 }
  0x2e   : > { %859 = vmatprep.subr.bf16.mxu0 %v944_v11  ;;  %884 = vmatprep.subr.bf16.mxu1 %v944_v11 }
  0x31   : > { %860 = vmatpush3.bf16.msra.mxu0 %v945_v12  ;;  %892 = vmatpush3.bf16.msra.mxu1 %v945_v12 }
  0x32   : > { %861 = vmatprep.subr.bf16.mxu0 %v946_v13  ;;  %885 = vmatprep.subr.bf16.mxu1 %v946_v13 }
  0x35   : > { %862 = vmatpush3.bf16.msra.mxu0 %v947_v14  ;;  %893 = vmatpush3.bf16.msra.mxu1 %v947_v14 }
  0x36   : > { %863 = vmatprep.subr.bf16.mxu0 %v948_v15  ;;  %886 = vmatprep.subr.bf16.mxu1 %v948_v15 }
  0x39   : > { %864 = vmatpush3.bf16.msra.mxu0 %v949_v18  ;;  %894 = vmatpush3.bf16.msra.mxu1 %v949_v18 }
  0x3a   : > { %865 = vmatprep.subr.bf16.mxu0 %v950_v19  ;;  %887 = vmatprep.subr.bf16.mxu1 %v950_v19 }
  0x3d   : > { %866 = vmatpush3.bf16.msra.mxu0 %v951_v20  ;;  %895 = vmatpush3.bf16.msra.mxu1 %v951_v20 }
  0x3e   : > { %867 = vmatprep.subr.bf16.mxu0 %v952_v21  ;;  %888 = vmatprep.subr.bf16.mxu1 %v952_v21 }
  0x41   : > { %868 = vmatpush3.bf16.msra.mxu0 %v953_v22  ;;  %896 = vmatpush3.bf16.msra.mxu1 %v953_v22 }
  0x44   : > { %600 = vmatmul.mubr.bf16.vlgmr.msra.gmra.mxu0 %v954_v23  ;;  %608 = vmatmul.mubr.bf16.vlgmr.msra.gmra.mxu1 %v957_v24 }
 0x104   : > { %v869_v25 = vpop.f32.mrf.mxu0  ;;  %v875_v26 = vpop.f32.mrf.mxu1 }
 0x106   : > { %v870_v28 = vpop.f32.mrf.mxu0  ;;  %v876_v30 = vpop.f32.mrf.mxu1 }
 0x107   : > { %v871_v31 = vadd.f32 %v870_v28, %v869_v25  ;;  %v877_v32 = vadd.f32 %v876_v30, %v875_v26 }
 0x108   : > { %v872_v33 = vpop.f32.mrf.mxu0  ;;  %v878_v34 = vpop.f32.mrf.mxu1 }
 0x109   : > { %v616_v35 = vadd.f32 %v871_v31, %v411_v27  ;;  %v618_v36 = vadd.f32 %v877_v32, %v413_v29 }
 0x10a   : > { %v873_v38 = vpop.f32.mrf.mxu0  ;;  %v879_v40 = vpop.f32.mrf.mxu1 }
 0x10b   : > { %620 = vst [vmem:[%s1205_s5] sm:$0xff] %v616_v35  ;;  %622 = vst [vmem:[%s1205_s5 + $0x10] sm:$0xff] %v618_v36  ;;  %v874_v41 = vadd.f32 %v873_v38, %v872_v33  ;;  %v880_v42 = vadd.f32 %v879_v40, %v878_v34  ;;  %627 = sbr.rel (%p845_p11) target bundleno = 288 (0x120), region = 86 }
 0x10d   : > { %v617_v43 = vadd.f32 %v874_v41, %v412_v37  ;;  %v619_v44 = vadd.f32 %v880_v42, %v414_v39 }
 0x10f   : > { %621 = vst [vmem:[%s1205_s5 + $0x8] sm:$0xff] %v617_v43  ;;  %623 = vst [vmem:[%s1205_s5 + $0x18] sm:$0xff] %v619_v44 }
 0x110   : > { %v846_v46 = vld [vmem:[%s1202_s2] ss:$0 sm:$0xff]  ;;  %v655_v55 = vld [vmem:[%s1204_s4 + $0x8] sm:$0xff]  ;;  %v656_v59 = vld [vmem:[%s1204_s4 + $0x10] sm:$0xff] }
 0x111   : > { %v847_v47 = vld [vmem:[%s1203_s3] ss:$0 sm:$0xff]  ;;  %v657_v60 = vld [vmem:[%s1204_s4 + $0x18] sm:$0xff] }
 0x112   : > { %v628_v45 = vld [vmem:[%s1205_s5] sm:$0xff]  ;;  %v630_v52 = vld [vmem:[%s1205_s5 + $0x10] sm:$0xff] }
 0x113   : > { %v639_v48 = vmul.f32 %v846_v46, %v628_v45  ;;  %v654_v50 = vld [vmem:[%s1204_s4] sm:$0xff]  ;;  %v641_v56 = vmul.f32 %v846_v46, %v630_v52 }
 0x115   : > { %v650_v54 = vadd.f32 %v847_v47, %v639_v48  ;;  %v652_v62 = vadd.f32 %v847_v47, %v641_v56 }
 0x116   : > { %v629_v49 = vld [vmem:[%s1205_s5 + $0x8] sm:$0xff]  ;;  %v631_v53 = vld [vmem:[%s1205_s5 + $0x18] sm:$0xff] }
 0x117   : > { %v640_v51 = vmul.f32 %v846_v46, %v629_v49  ;;  %v642_v57 = vmul.f32 %v846_v46, %v631_v53  ;;  %v658_v61 = vadd.f32 %v654_v50, %v650_v54  ;;  %v660_v2 = vadd.f32 %v656_v59, %v652_v62 }
 0x119   : > { %v651_v58 = vadd.f32 %v847_v47, %v640_v51  ;;  %v653_v63 = vadd.f32 %v847_v47, %v642_v57  ;;  %v662_v1 = vmax.f32 %v658_v61, 0.0  ;;  %v664_v5 = vmax.f32 %v660_v2, 0.0 }
 0x11b   : > { %v659_v0 = vadd.f32 %v655_v55, %v651_v58  ;;  %v661_v3 = vadd.f32 %v657_v60, %v653_v63  ;;  %666 = vst [vmem:[%s1205_s5] sm:$0xff] %v662_v1  ;;  %668 = vst [vmem:[%s1205_s5 + $0x10] sm:$0xff] %v664_v5 }
 0x11d   : > { %v663_v4 = vmax.f32 %v659_v0, 0.0  ;;  %v665_v6 = vmax.f32 %v661_v3, 0.0 }
 0x11f   : > { %667 = vst [vmem:[%s1205_s5 + $0x8] sm:$0xff] %v663_v4  ;;  %669 = vst [vmem:[%s1205_s5 + $0x18] sm:$0xff] %v665_v6 }
 0x120 PF: > { %s15_s22 = sadd.s32 1, %s998_s22   ;;  %s1206_s18 = smov %s986_s19 }
 0x121   : > { %p12_p12 = scmp.ge.s32.totalorder %s15_s22, 7   ;;  %s1207_s19 = smov %s1066_s26 }
 0x122   : > { %s1208_s20 = smov %s994_s21  ;;  %s1209_s21 = smov %s1211_s23 }
 0x123   :  { %14 = sbr.rel (!%p12_p12) target bundleno = 3 (0x3), region = 133 }

// kernel: resnet_proto_forward.30
= control target key start
LH: loop header
LB: loop body
LE: loop exit
PB: predicated region body
PF: predicated region fallthrough
CT: control target
= control target key end

     0   :  { %s939_s15 = smov 0   ;;  %s941_s16 = smov 0   ;;  %s1096_s0 = inlined_call_operand.vmem [shape: bf16[32,1280], index: 0, kind: input, shape index: {}]   ;;  %s1097_s1 = inlined_call_operand.vmem [shape: bf16[1280,128], index: 1, kind: input, shape index: {}]   ;;  %s1098_s2 = inlined_call_operand.vmem [shape: f32[1,128], index: 2, kind: input, shape index: {}]   ;;  %s1099_s3 = inlined_call_operand.vmem [shape: f32[1,128], index: 3, kind: input, shape index: {}]   ;;  %s1100_s4 = inlined_call_operand.vmem [shape: f32[32,128], index: 4, kind: output, shape index: {}]  }
   0x1   :  { %s943_s17 = smov 0   ;;  %s945_s18 = smov 0  }
   0x2   :  { %s947_s19 = smov 0  }
   0x3 LB: > { %s26_s20 = sadd.s32 1, %s907_s18  ;;  %p49_p1 = scmp.ne.s32.totalorder %s899_s16, %s895_s15  ;;  %s911_s19 = sphi %s947_s19, %s14_s19   ;;  %s907_s18 = sphi %s945_s18, %s1104_s18   ;;  %s903_s17 = sphi %s943_s17, %s1103_s17   ;;  %s899_s16 = sphi %s941_s16, %s1102_s16   ;;  %s895_s15 = sphi %s939_s15, %s1101_s15  }
   0x4   : > { %p27_p0 = scmp.ge.s32.totalorder %s26_s20, 5  ;;  %p50_p2 = scmp.eq.s32.totalorder %s911_s19, 0 }
   0x5   : > { %s42_s22 = sadd.s32 1, %s899_s16  ;;  %p729_p5 = scmp.ge.s32.totalorder %s911_s19, 5 }
   0x6   : > { %s1106_s20 = smov (%p27_p0, %s26_s20), 0  ;;  %p51_p3 = por %p50_p2, %p49_p1 }
   0x7   : > { %s38_s21 = ssub.s32 %s907_s18, %s1106_s20  ;;  %195 = sbr.rel (%p729_p5) target bundleno = 18 (0x12), region = 24 }
   0x8   : > { %p40_p4 = scmp.eq.s32.totalorder %s38_s21, 0 }
   0xa   : > { %s974_s23 = scalar_select %p40_p4, %s899_s16, %s42_s22  }
   0xc   : > { %198 = sbr.rel (!%p51_p3) target bundleno = 18 (0x12), region = 28  ;;  %s200_s24 = sand.u32 (%p51_p3), 1, %s899_s16  }
   0xd   : > { %s765_s25 = sshll.u32 (%p51_p3), %s907_s18, 3  ;;  %s730_s26 = sshll.u32 (%p51_p3), %s200_s24, 5 }
   0xe   : > { %s208_s29 = scalar_lea.vmem (%p51_p3), %s1096_s0, %s765_s25  ;;  %s202_s30 = scalar_lea.vmem (%p51_p3), [#allocation2], %s730_s26 }
   0xf   : > { %v243_v0 = vld [vmem:[%s208_s29] sm:$0xff] (%p51_p3)  ;;  %v245_v1 = vld [vmem:[%s208_s29 + $0x28] sm:$0xff] (%p51_p3)  ;;  %v247_v2 = vld [vmem:[%s208_s29 + $0x50] sm:$0xff] (%p51_p3) }
  0x10   : > { %244 = vst [vmem:[%s202_s30] sm:$0xff] (%p51_p3), %v243_v0  ;;  %246 = vst [vmem:[%s202_s30 + $0x8] sm:$0xff] (%p51_p3), %v245_v1  ;;  %v249_v3 = vld [vmem:[%s208_s29 + $0x78] sm:$0xff] (%p51_p3) }
  0x11   : > { %248 = vst [vmem:[%s202_s30 + $0x10] sm:$0xff] %v247_v2  ;;  %250 = vst [vmem:[%s202_s30 + $0x18] sm:$0xff] %v249_v3 }
  0x12 PF: > { %p733_p6 = scmp.ge.s32.totalorder %s911_s19, 1  ;;  %p267_p7 = scmp.lt.s32.totalorder %s911_s19, 6 }
  0x14   : > { %p268_p8 = pnand %p733_p6, %p267_p7 }
  0x15   : > { %s274_s5 = sand.u32 (!%p268_p8), 1, %s895_s15   ;;  %s735_s6 = sshll.u32 (!%p268_p8), %s903_s17, 5 }
  0x16   : > { %271 = sbr.rel (%p268_p8) target bundleno = 286 (0x11e), region = 70  ;;  %s734_s7 = sshll.u32 (!%p268_p8), %s274_s5, 5 }
  0x17   : > { %p319_p9 = scmp.lt.s32.totalorder (!%p268_p8), %s735_s6, 159  ;;  %s991_s12 = scalar_lea.vmem (!%p268_p8), [#allocation2], %s734_s7 }
  0x18   : > { %p737_p10 = scmp.ne.s32.totalorder (!%p268_p8), %s903_s17, 0 }
  0x1b   : > { %s1108_s6 = smov (!%p319_p9, %s735_s6), 159  ;;  %346 = sbr.rel (%p737_p10) target bundleno = 35 (0x23), region = 78 }
  0x1c   : > { %s736_s8 = sshll.u32 %s1108_s6, 2 }
  0x1d   : > { %s989_s11 = scalar_lea.vmem %s1097_s1, %s736_s8 }
  0x20   : > { %v913_v4 = vmov 0.0  }
  0x21   : > { %347 = vst [vmem:[%s1100_s4] sm:$0xff] %v913_v4  ;;  %348 = vst [vmem:[%s1100_s4 + $0x8] sm:$0xff] %v913_v4 }
  0x22   : > { %349 = vst [vmem:[%s1100_s4 + $0x10] sm:$0xff] %v913_v4  ;;  %350 = vst [vmem:[%s1100_s4 + $0x18] sm:$0xff] %v913_v4 }
  0x23 PF: > { %v851_v5 = vld [vmem:[%s989_s11 + $0x78] sm:$0xff]   ;;  %v853_v7 = vld [vmem:[%s989_s11 + $0x70] sm:$0xff]   ;;  %v855_v9 = vld [vmem:[%s989_s11 + $0x68] sm:$0xff]   ;;  %p758_p11 = scmp.ne.s32.totalorder %s903_s17, 4 }
  0x24   : > { %v852_v6 = vld [vmem:[%s989_s11 + $0x38] sm:$0xff]   ;;  %766 = vmatprep.subr.bf16.mxu0 %v851_v5  ;;  %794 = vmatprep.subr.bf16.mxu1 %v851_v5  ;;  %v854_v8 = vld [vmem:[%s989_s11 + $0x30] sm:$0xff]   ;;  %v856_v10 = vld [vmem:[%s989_s11 + $0x28] sm:$0xff]  }
  0x25   : > { %767 = vmatpush3.bf16.msra.mxu0 %v852_v6  ;;  %802 = vmatpush3.bf16.msra.mxu1 %v852_v6  ;;  %v857_v11 = vld [vmem:[%s989_s11 + $0x60] sm:$0xff]   ;;  %v859_v13 = vld [vmem:[%s989_s11 + $0x58] sm:$0xff]   ;;  %v861_v15 = vld [vmem:[%s989_s11 + $0x50] sm:$0xff]  }
  0x26   : > { %768 = vmatprep.subr.bf16.mxu0 %v853_v7  ;;  %795 = vmatprep.subr.bf16.mxu1 %v853_v7  ;;  %v858_v12 = vld [vmem:[%s989_s11 + $0x20] sm:$0xff]   ;;  %v860_v14 = vld [vmem:[%s989_s11 + $0x18] sm:$0xff]   ;;  %v862_v18 = vld [vmem:[%s989_s11 + $0x10] sm:$0xff]  }
  0x27   : > { %v869_v16 = vld [vmem:[%s991_s12 + $0x4] ss:$8 sps:$4 sm:$0xff]   ;;  %v872_v17 = vld [vmem:[%s991_s12 + $0x14] ss:$8 sps:$4 sm:$0xff]   ;;  %v867_v23 = vld [vmem:[%s991_s12] ss:$8 sps:$4 sm:$0xff]  }
  0x28   : > { %v863_v19 = vld [vmem:[%s989_s11 + $0x48] sm:$0xff]   ;;  %539 = vmatprep.mubr.bf16.mxu0 %v869_v16  ;;  %547 = vmatprep.mubr.bf16.mxu1 %v872_v17  ;;  %v865_v21 = vld [vmem:[%s989_s11 + $0x40] sm:$0xff]   ;;  %v870_v24 = vld [vmem:[%s991_s12 + $0x10] ss:$8 sps:$4 sm:$0xff]  }
  0x29   : > { %769 = vmatpush3.bf16.msra.mxu0 %v854_v8  ;;  %803 = vmatpush3.bf16.msra.mxu1 %v854_v8  ;;  %v864_v20 = vld [vmem:[%s989_s11 + $0x8] sm:$0xff]   ;;  %v866_v22 = vld [vmem:[%s989_s11] sm:$0xff]   ;;  %v353_v29 = vld [vmem:[%s1100_s4 + $0x10] sm:$0xff] }
  0x2a   : > { %770 = vmatprep.subr.bf16.mxu0 %v855_v9  ;;  %796 = vmatprep.subr.bf16.mxu1 %v855_v9  ;;  %v351_v27 = vld [vmem:[%s1100_s4] sm:$0xff]  ;;  %v352_v37 = vld [vmem:[%s1100_s4 + $0x8] sm:$0xff]  ;;  %v354_v39 = vld [vmem:[%s1100_s4 + $0x18] sm:$0xff] }
  0x2d   : > { %771 = vmatpush3.bf16.msra.mxu0 %v856_v10  ;;  %804 = vmatpush3.bf16.msra.mxu1 %v856_v10 }
  0x2e   : > { %772 = vmatprep.subr.bf16.mxu0 %v857_v11  ;;  %797 = vmatprep.subr.bf16.mxu1 %v857_v11 }
  0x31   : > { %773 = vmatpush3.bf16.msra.mxu0 %v858_v12  ;;  %805 = vmatpush3.bf16.msra.mxu1 %v858_v12 }
  0x32   : > { %774 = vmatprep.subr.bf16.mxu0 %v859_v13  ;;  %798 = vmatprep.subr.bf16.mxu1 %v859_v13 }
  0x35   : > { %775 = vmatpush3.bf16.msra.mxu0 %v860_v14  ;;  %806 = vmatpush3.bf16.msra.mxu1 %v860_v14 }
  0x36   : > { %776 = vmatprep.subr.bf16.mxu0 %v861_v15  ;;  %799 = vmatprep.subr.bf16.mxu1 %v861_v15 }
  0x39   : > { %777 = vmatpush3.bf16.msra.mxu0 %v862_v18  ;;  %807 = vmatpush3.bf16.msra.mxu1 %v862_v18 }
  0x3a   : > { %778 = vmatprep.subr.bf16.mxu0 %v863_v19  ;;  %800 = vmatprep.subr.bf16.mxu1 %v863_v19 }
  0x3d   : > { %779 = vmatpush3.bf16.msra.mxu0 %v864_v20  ;;  %808 = vmatpush3.bf16.msra.mxu1 %v864_v20 }
  0x3e   : > { %780 = vmatprep.subr.bf16.mxu0 %v865_v21  ;;  %801 = vmatprep.subr.bf16.mxu1 %v865_v21 }
  0x41   : > { %781 = vmatpush3.bf16.msra.mxu0 %v866_v22  ;;  %809 = vmatpush3.bf16.msra.mxu1 %v866_v22 }
  0x44   : > { %540 = vmatmul.mubr.bf16.vlgmr.msra.gmra.mxu0 %v867_v23  ;;  %548 = vmatmul.mubr.bf16.vlgmr.msra.gmra.mxu1 %v870_v24 }
 0x104   : > { %v782_v25 = vpop.f32.mrf.mxu0  ;;  %v788_v26 = vpop.f32.mrf.mxu1 }
 0x106   : > { %v783_v28 = vpop.f32.mrf.mxu0  ;;  %v789_v30 = vpop.f32.mrf.mxu1 }
 0x107   : > { %v784_v31 = vadd.f32 %v783_v28, %v782_v25  ;;  %v790_v32 = vadd.f32 %v789_v30, %v788_v26 }
 0x108   : > { %v785_v33 = vpop.f32.mrf.mxu0  ;;  %v791_v34 = vpop.f32.mrf.mxu1 }
 0x109   : > { %v556_v35 = vadd.f32 %v784_v31, %v351_v27  ;;  %v558_v36 = vadd.f32 %v790_v32, %v353_v29 }
 0x10a   : > { %v786_v38 = vpop.f32.mrf.mxu0  ;;  %v792_v40 = vpop.f32.mrf.mxu1 }
 0x10b   : > { %560 = vst [vmem:[%s1100_s4] sm:$0xff] %v556_v35  ;;  %562 = vst [vmem:[%s1100_s4 + $0x10] sm:$0xff] %v558_v36  ;;  %v787_v41 = vadd.f32 %v786_v38, %v785_v33  ;;  %v793_v42 = vadd.f32 %v792_v40, %v791_v34  ;;  %567 = sbr.rel (%p758_p11) target bundleno = 286 (0x11e), region = 82 }
 0x10d   : > { %v557_v43 = vadd.f32 %v787_v41, %v352_v37  ;;  %v559_v44 = vadd.f32 %v793_v42, %v354_v39 }
 0x10f   : > { %561 = vst [vmem:[%s1100_s4 + $0x8] sm:$0xff] %v557_v43  ;;  %563 = vst [vmem:[%s1100_s4 + $0x18] sm:$0xff] %v559_v44 }
 0x110   : > { %v759_v46 = vld [vmem:[%s1098_s2] ss:$0 sm:$0xff] }
 0x111   : > { %v760_v47 = vld [vmem:[%s1099_s3] ss:$0 sm:$0xff] }
 0x112   : > { %v568_v45 = vld [vmem:[%s1100_s4] sm:$0xff]  ;;  %v570_v50 = vld [vmem:[%s1100_s4 + $0x10] sm:$0xff] }
 0x113   : > { %v579_v48 = vmul.f32 %v759_v46, %v568_v45  ;;  %v581_v53 = vmul.f32 %v759_v46, %v570_v50 }
 0x115   : > { %v590_v55 = vadd.f32 %v760_v47, %v579_v48  ;;  %v592_v57 = vadd.f32 %v760_v47, %v581_v53 }
 0x116   : > { %v569_v49 = vld [vmem:[%s1100_s4 + $0x8] sm:$0xff]  ;;  %v571_v51 = vld [vmem:[%s1100_s4 + $0x18] sm:$0xff] }
 0x117   : > { %v580_v52 = vmul.f32 %v759_v46, %v569_v49  ;;  %v582_v54 = vmul.f32 %v759_v46, %v571_v51  ;;  %v594_v59 = vmax.f32 %v590_v55, 0.0  ;;  %v596_v61 = vmax.f32 %v592_v57, 0.0 }
 0x119   : > { %v591_v56 = vadd.f32 %v760_v47, %v580_v52  ;;  %v593_v58 = vadd.f32 %v760_v47, %v582_v54  ;;  %598 = vst [vmem:[%s1100_s4] sm:$0xff] %v594_v59  ;;  %600 = vst [vmem:[%s1100_s4 + $0x10] sm:$0xff] %v596_v61 }
 0x11b   : > { %v595_v60 = vmax.f32 %v591_v56, 0.0  ;;  %v597_v62 = vmax.f32 %v593_v58, 0.0 }
 0x11d   : > { %599 = vst [vmem:[%s1100_s4 + $0x8] sm:$0xff] %v595_v60  ;;  %601 = vst [vmem:[%s1100_s4 + $0x18] sm:$0xff] %v597_v62 }
 0x11e PF: > { %s14_s19 = sadd.s32 1, %s911_s19   ;;  %s1101_s15 = smov %s899_s16 }
 0x11f   : > { %p11_p12 = scmp.ge.s32.totalorder %s14_s19, 7   ;;  %s1102_s16 = smov %s974_s23 }
 0x120   : > { %s1103_s17 = smov %s907_s18  ;;  %s1104_s18 = smov %s1106_s20 }
 0x121   :  { %13 = sbr.rel (!%p11_p12) target bundleno = 3 (0x3), region = 126 }

// kernel: resnet_proto_forward.32
= control target key start
LH: loop header
LB: loop body
LE: loop exit
PB: predicated region body
PF: predicated region fallthrough
CT: control target
= control target key end

     0   :  { %s1020_s15 = smov 0   ;;  %s1022_s16 = smov 0   ;;  %s1194_s0 = inlined_call_operand.vmem [shape: bf16[16,1280], index: 0, kind: input, shape index: {}]   ;;  %s1195_s1 = inlined_call_operand.vmem [shape: bf16[1280,256], index: 1, kind: input, shape index: {}]   ;;  %s1196_s2 = inlined_call_operand.vmem [shape: f32[1,256], index: 2, kind: input, shape index: {}]   ;;  %s1197_s3 = inlined_call_operand.vmem [shape: f32[1,256], index: 3, kind: input, shape index: {}]   ;;  %s1198_s4 = inlined_call_operand.vmem [shape: f32[16,256], index: 4, kind: output, shape index: {}]  }
   0x1   :  { %s1024_s17 = smov 0   ;;  %s1026_s18 = smov 0  }
   0x2   :  { %s1028_s19 = smov 0  }
   0x3 LB: > { %s26_s20 = sadd.s32 1, %s988_s18  ;;  %p49_p1 = scmp.ne.s32.totalorder %s980_s16, %s976_s15  ;;  %s992_s19 = sphi %s1028_s19, %s14_s19   ;;  %s988_s18 = sphi %s1026_s18, %s1202_s18   ;;  %s984_s17 = sphi %s1024_s17, %s1201_s17   ;;  %s980_s16 = sphi %s1022_s16, %s1200_s16   ;;  %s976_s15 = sphi %s1020_s15, %s1199_s15  }
   0x4   : > { %p27_p0 = scmp.ge.s32.totalorder %s26_s20, 5  ;;  %p50_p2 = scmp.eq.s32.totalorder %s992_s19, 0 }
   0x5   : > { %s42_s22 = sadd.s32 1, %s980_s16  ;;  %p811_p5 = scmp.ge.s32.totalorder %s992_s19, 5 }
   0x6   : > { %s1204_s20 = smov (%p27_p0, %s26_s20), 0  ;;  %p51_p3 = por %p50_p2, %p49_p1 }
   0x7   : > { %s38_s21 = ssub.s32 %s988_s18, %s1204_s20  ;;  %199 = sbr.rel (%p811_p5) target bundleno = 17 (0x11), region = 24 }
   0x8   : > { %p40_p4 = scmp.eq.s32.totalorder %s38_s21, 0 }
   0xa   : > { %s1055_s23 = scalar_select %p40_p4, %s980_s16, %s42_s22  }
   0xc   : > { %202 = sbr.rel (!%p51_p3) target bundleno = 17 (0x11), region = 28  ;;  %s204_s24 = sand.u32 (%p51_p3), 1, %s980_s16  }
   0xd   : > { %s860_s25 = sshll.u32 (%p51_p3), %s988_s18, 3  ;;  %s812_s26 = sshll.u32 (%p51_p3), %s204_s24, 4 }
   0xe   : > { %s212_s29 = scalar_lea.vmem (%p51_p3), %s1194_s0, %s860_s25  ;;  %s206_s30 = scalar_lea.vmem (%p51_p3), [#allocation2], %s812_s26 }
   0xf   : > { %v243_v0 = vld [vmem:[%s212_s29] sm:$0xff] (%p51_p3)  ;;  %v245_v1 = vld [vmem:[%s212_s29 + $0x28] sm:$0xff] (%p51_p3) }
  0x10   : > { %244 = vst [vmem:[%s206_s30] sm:$0xff] (%p51_p3), %v243_v0  ;;  %246 = vst [vmem:[%s206_s30 + $0x8] sm:$0xff] (%p51_p3), %v245_v1 }
  0x11 PF: > { %p815_p6 = scmp.ge.s32.totalorder %s992_s19, 1  ;;  %p266_p7 = scmp.lt.s32.totalorder %s992_s19, 6 }
  0x13   : > { %p267_p8 = pnand %p815_p6, %p266_p7 }
  0x14   : > { %s273_s5 = sand.u32 (!%p267_p8), 1, %s976_s15   ;;  %s817_s6 = sshll.u32 (!%p267_p8), %s984_s17, 5 }
  0x15   : > { %270 = sbr.rel (%p267_p8) target bundleno = 317 (0x13d), region = 70  ;;  %s1067_s7 = sshll.u32 (!%p267_p8), %s273_s5, 4 }
  0x16   : > { %p325_p9 = scmp.lt.s32.totalorder (!%p267_p8), %s817_s6, 159  ;;  %s275_s12 = scalar_lea.vmem (!%p267_p8), [#allocation2], %s1067_s7 }
  0x17   : > { %p820_p10 = scmp.ne.s32.totalorder (!%p267_p8), %s984_s17, 0 }
  0x1a   : > { %s1206_s6 = smov (!%p325_p9, %s817_s6), 159  ;;  %360 = sbr.rel (%p820_p10) target bundleno = 34 (0x22), region = 78 }
  0x1b   : > { %s861_s8 = sshll.u32 %s1206_s6, 3 }
  0x1c   : > { %s1072_s11 = scalar_lea.vmem %s1195_s1, %s861_s8 }
  0x1f   : > { %v994_v2 = vmov 0.0  }
  0x20   : > { %361 = vst [vmem:[%s1198_s4] sm:$0xff] %v994_v2  ;;  %362 = vst [vmem:[%s1198_s4 + $0x8] sm:$0xff] %v994_v2 }
  0x21   : > { %363 = vst [vmem:[%s1198_s4 + $0x10] sm:$0xff] %v994_v2  ;;  %364 = vst [vmem:[%s1198_s4 + $0x18] sm:$0xff] %v994_v2 }
  0x22 PF: > { %v903_v3 = vld [vmem:[%s1072_s11 + $0x74] ss:$8 sps:$4 sm:$0xff]   ;;  %v905_v4 = vld [vmem:[%s1072_s11 + $0x70] ss:$8 sps:$4 sm:$0xff]   ;;  %v906_v5 = vld [vmem:[%s1072_s11 + $0x64] ss:$8 sps:$4 sm:$0xff]  }
  0x23   : > { %573 = vmatprep.subr.bf16.mxu0 %v903_v3  ;;  %v908_v6 = vld [vmem:[%s1072_s11 + $0x60] ss:$8 sps:$4 sm:$0xff]   ;;  %v909_v7 = vld [vmem:[%s1072_s11 + $0x54] ss:$8 sps:$4 sm:$0xff]   ;;  %v911_v8 = vld [vmem:[%s1072_s11 + $0x50] ss:$8 sps:$4 sm:$0xff]  }
  0x24   : > { %574 = vmatpush1.bf16.msra.mxu0 %v905_v4  ;;  %v912_v9 = vld [vmem:[%s1072_s11 + $0x44] ss:$8 sps:$4 sm:$0xff]   ;;  %v914_v10 = vld [vmem:[%s1072_s11 + $0x40] ss:$8 sps:$4 sm:$0xff]   ;;  %v915_v11 = vld [vmem:[%s1072_s11 + $0x34] ss:$8 sps:$4 sm:$0xff]  }
  0x25   : > { %575 = vmatprep.subr.bf16.mxu0 %v906_v5  ;;  %v917_v12 = vld [vmem:[%s1072_s11 + $0x30] ss:$8 sps:$4 sm:$0xff]   ;;  %v918_v13 = vld [vmem:[%s1072_s11 + $0x24] ss:$8 sps:$4 sm:$0xff]   ;;  %v920_v14 = vld [vmem:[%s1072_s11 + $0x20] ss:$8 sps:$4 sm:$0xff]  }
  0x26   : > { %v921_v15 = vld [vmem:[%s1072_s11 + $0x14] ss:$8 sps:$4 sm:$0xff]   ;;  %v923_v17 = vld [vmem:[%s1072_s11 + $0x10] ss:$8 sps:$4 sm:$0xff]   ;;  %v924_v18 = vld [vmem:[%s1072_s11 + $0x4] ss:$8 sps:$4 sm:$0xff]  }
  0x27   : > { %v953_v16 = vld [vmem:[%s275_s12 + $0x4] ss:$8 sps:$4 sm:$0xff]   ;;  %v926_v19 = vld [vmem:[%s1072_s11] ss:$8 sps:$4 sm:$0xff]   ;;  %v929_v21 = vld [vmem:[%s1072_s11 + $0xf0] ss:$8 sps:$4 sm:$0xff]  }
  0x28   : > { %576 = vmatpush1.bf16.msra.mxu0 %v908_v6  ;;  %605 = vmatprep.mubr.bf16.mxu0 %v953_v16  ;;  %v927_v20 = vld [vmem:[%s1072_s11 + $0xf4] ss:$8 sps:$4 sm:$0xff]   ;;  %v930_v22 = vld [vmem:[%s1072_s11 + $0xe4] ss:$8 sps:$4 sm:$0xff]   ;;  %v932_v23 = vld [vmem:[%s1072_s11 + $0xe0] ss:$8 sps:$4 sm:$0xff]  }
  0x29   : > { %577 = vmatprep.subr.bf16.mxu0 %v909_v7  ;;  %v933_v24 = vld [vmem:[%s1072_s11 + $0xd4] ss:$8 sps:$4 sm:$0xff]   ;;  %v935_v25 = vld [vmem:[%s1072_s11 + $0xd0] ss:$8 sps:$4 sm:$0xff]   ;;  %v936_v26 = vld [vmem:[%s1072_s11 + $0xc4] ss:$8 sps:$4 sm:$0xff]  }
  0x2a   : > { %v938_v27 = vld [vmem:[%s1072_s11 + $0xc0] ss:$8 sps:$4 sm:$0xff]   ;;  %v939_v28 = vld [vmem:[%s1072_s11 + $0xb4] ss:$8 sps:$4 sm:$0xff]   ;;  %v941_v29 = vld [vmem:[%s1072_s11 + $0xb0] ss:$8 sps:$4 sm:$0xff]  }
  0x2b   : > { %v942_v30 = vld [vmem:[%s1072_s11 + $0xa4] ss:$8 sps:$4 sm:$0xff]   ;;  %v944_v31 = vld [vmem:[%s1072_s11 + $0xa0] ss:$8 sps:$4 sm:$0xff]   ;;  %v945_v32 = vld [vmem:[%s1072_s11 + $0x94] ss:$8 sps:$4 sm:$0xff]  }
  0x2c   : > { %578 = vmatpush1.bf16.msra.mxu0 %v911_v8  ;;  %v947_v33 = vld [vmem:[%s1072_s11 + $0x90] ss:$8 sps:$4 sm:$0xff]   ;;  %v948_v34 = vld [vmem:[%s1072_s11 + $0x84] ss:$8 sps:$4 sm:$0xff]   ;;  %v950_v35 = vld [vmem:[%s1072_s11 + $0x80] ss:$8 sps:$4 sm:$0xff]  }
  0x2d   : > { %579 = vmatprep.subr.bf16.mxu0 %v912_v9  ;;  %v951_v36 = vld [vmem:[%s275_s12] ss:$8 sps:$4 sm:$0xff]   ;;  %p855_p11 = scmp.ne.s32.totalorder %s984_s17, 4 }
  0x2e   : > { %v365_v37 = vld [vmem:[%s1198_s4] sm:$0xff]  ;;  %v366_v39 = vld [vmem:[%s1198_s4 + $0x8] sm:$0xff]  ;;  %v367_v42 = vld [vmem:[%s1198_s4 + $0x10] sm:$0xff] }
  0x2f   : > { %v368_v45 = vld [vmem:[%s1198_s4 + $0x18] sm:$0xff] }
  0x30   : > { %580 = vmatpush1.bf16.msra.mxu0 %v914_v10 }
  0x31   : > { %581 = vmatprep.subr.bf16.mxu0 %v915_v11 }
  0x34   : > { %582 = vmatpush1.bf16.msra.mxu0 %v917_v12 }
  0x35   : > { %583 = vmatprep.subr.bf16.mxu0 %v918_v13 }
  0x38   : > { %584 = vmatpush1.bf16.msra.mxu0 %v920_v14 }
  0x39   : > { %585 = vmatprep.subr.bf16.mxu0 %v921_v15 }
  0x3c   : > { %586 = vmatpush1.bf16.msra.mxu0 %v923_v17 }
  0x3d   : > { %587 = vmatprep.subr.bf16.mxu0 %v924_v18 }
  0x40   : > { %588 = vmatpush1.bf16.msra.mxu0 %v926_v19 }
  0x41   : > { %589 = vmatprep.subr.bf16.mxu0 %v927_v20 }
  0x44   : > { %590 = vmatpush2.bf16.msra.mxu0 %v929_v21 }
  0x45   : > { %591 = vmatprep.subr.bf16.mxu0 %v930_v22 }
  0x48   : > { %592 = vmatpush2.bf16.msra.mxu0 %v932_v23 }
  0x49   : > { %593 = vmatprep.subr.bf16.mxu0 %v933_v24 }
  0x4c   : > { %594 = vmatpush2.bf16.msra.mxu0 %v935_v25 }
  0x4d   : > { %595 = vmatprep.subr.bf16.mxu0 %v936_v26 }
  0x50   : > { %596 = vmatpush2.bf16.msra.mxu0 %v938_v27 }
  0x51   : > { %597 = vmatprep.subr.bf16.mxu0 %v939_v28 }
  0x54   : > { %598 = vmatpush2.bf16.msra.mxu0 %v941_v29 }
  0x55   : > { %599 = vmatprep.subr.bf16.mxu0 %v942_v30 }
  0x58   : > { %600 = vmatpush2.bf16.msra.mxu0 %v944_v31 }
  0x59   : > { %601 = vmatprep.subr.bf16.mxu0 %v945_v32 }
  0x5c   : > { %602 = vmatpush2.bf16.msra.mxu0 %v947_v33 }
  0x5d   : > { %603 = vmatprep.subr.bf16.mxu0 %v948_v34 }
  0x60   : > { %604 = vmatpush2.bf16.msra.mxu0 %v950_v35 }
  0x63   : > { %606 = vmatmul.mubr.bf16.vlgmr.msra.gmra.mxu0 %v951_v36 }
 0x123   : > { %v607_v38 = vpop.f32.mrf.mxu0 }
 0x124   : > { %v616_v40 = vadd.f32 %v607_v38, %v365_v37 }
 0x125   : > { %v609_v41 = vpop.f32.mrf.mxu0 }
 0x126   : > { %620 = vst [vmem:[%s1198_s4] sm:$0xff] %v616_v40  ;;  %v617_v43 = vadd.f32 %v609_v41, %v366_v39 }
 0x127   : > { %v611_v44 = vpop.f32.mrf.mxu0 }
 0x128   : > { %621 = vst [vmem:[%s1198_s4 + $0x8] sm:$0xff] %v617_v43  ;;  %v618_v46 = vadd.f32 %v611_v44, %v367_v42  ;;  %627 = sbr.rel (%p855_p11) target bundleno = 317 (0x13d), region = 82 }
 0x129   : > { %v613_v47 = vpop.f32.mrf.mxu0 }
 0x12a   : > { %622 = vst [vmem:[%s1198_s4 + $0x10] sm:$0xff] %v618_v46  ;;  %v619_v48 = vadd.f32 %v613_v47, %v368_v45 }
 0x12c   : > { %623 = vst [vmem:[%s1198_s4 + $0x18] sm:$0xff] %v619_v48 }
 0x12d   : > { %v634_v49 = vlaneseq  ;;  %v632_v51 = vld [vmem:[%s1196_s2] sm:$0x3] }
 0x12e   : > { %v648_v52 = vld [vmem:[%s1197_s3] sm:$0x3] }
 0x12f   : > { %v635_v50 = vshrl.u32 %v634_v49, 7  ;;  %v628_v53 = vld [vmem:[%s1198_s4] sm:$0xff]  ;;  %v629_v56 = vld [vmem:[%s1198_s4 + $0x8] sm:$0xff] }
 0x131   : > { %v636_v54 = vsub.s32 0, %v635_v50  ;;  %v640_v55 = vsub.s32 1, %v635_v50  ;;  %v630_v57 = vld [vmem:[%s1198_s4 + $0x10] sm:$0xff] }
 0x133   : > { %v631_v58 = vld [vmem:[%s1198_s4 + $0x18] sm:$0xff]  ;;  %v637_v59 = vrot.slane %v632_v51, %v636_v54  ;;  %v653_v60 = vrot.slane %v648_v52, %v636_v54  ;;  %v641_v61 = vrot.slane %v632_v51, %v640_v55  ;;  %v657_v62 = vrot.slane %v648_v52, %v640_v55 }
 0x135   : > { %v644_v63 = vmul.f32 %v637_v59, %v628_v53  ;;  %v645_v0 = vmul.f32 %v641_v61, %v629_v56  ;;  %v646_v1 = vmul.f32 %v637_v59, %v630_v57  ;;  %v647_v2 = vmul.f32 %v641_v61, %v631_v58 }
 0x137   : > { %v660_v3 = vadd.f32 %v653_v60, %v644_v63  ;;  %v661_v4 = vadd.f32 %v657_v62, %v645_v0  ;;  %v662_v5 = vadd.f32 %v653_v60, %v646_v1  ;;  %v663_v6 = vadd.f32 %v657_v62, %v647_v2 }
 0x139   : > { %v664_v7 = vmax.f32 %v660_v3, 0.0  ;;  %v665_v8 = vmax.f32 %v661_v4, 0.0  ;;  %v666_v9 = vmax.f32 %v662_v5, 0.0  ;;  %v667_v10 = vmax.f32 %v663_v6, 0.0 }
 0x13b   : > { %668 = vst [vmem:[%s1198_s4] sm:$0xff] %v664_v7  ;;  %669 = vst [vmem:[%s1198_s4 + $0x8] sm:$0xff] %v665_v8 }
 0x13c   : > { %670 = vst [vmem:[%s1198_s4 + $0x10] sm:$0xff] %v666_v9  ;;  %671 = vst [vmem:[%s1198_s4 + $0x18] sm:$0xff] %v667_v10 }
 0x13d PF: > { %s14_s19 = sadd.s32 1, %s992_s19   ;;  %s1199_s15 = smov %s980_s16 }
 0x13e   : > { %p11_p12 = scmp.ge.s32.totalorder %s14_s19, 7   ;;  %s1200_s16 = smov %s1055_s23 }
 0x13f   : > { %s1201_s17 = smov %s988_s18  ;;  %s1202_s18 = smov %s1204_s20 }
 0x140   :  { %13 = sbr.rel (!%p11_p12) target bundleno = 3 (0x3), region = 126 }

// kernel: resnet_proto_forward.33
= control target key start
LH: loop header
LB: loop body
LE: loop exit
PB: predicated region body
PF: predicated region fallthrough
CT: control target
= control target key end

     0   :  { %v276_v1 = vmov 0   ;;  %v194_v18 = vlaneseq  ;;  %s371_s1 = inlined_call_operand.vmem [shape: bf16[128,256], index: 1, kind: input, shape index: {}]   ;;  %s372_s0 = inlined_call_operand.vmem [shape: bf16[16,128], index: 0, kind: input, shape index: {}]   ;;  %s373_s2 = inlined_call_operand.vmem [shape: f32[1,256], index: 2, kind: input, shape index: {}]   ;;  %s374_s3 = inlined_call_operand.vmem [shape: f32[1,256], index: 3, kind: input, shape index: {}]   ;;  %s375_s4 = inlined_call_operand.vmem [shape: f32[16,256], index: 4, kind: output, shape index: {}]  }
   0x1   :  { %v251_v0 = vld [vmem:[%s371_s1 + $0x74] ss:$8 sps:$4 sm:$0xff]   ;;  %166 = vmatprep.mubr.bf16.mxu0 %v276_v1  ;;  %v253_v2 = vld [vmem:[%s371_s1 + $0x70] ss:$8 sps:$4 sm:$0xff]   ;;  %v254_v3 = vld [vmem:[%s371_s1 + $0x64] ss:$8 sps:$4 sm:$0xff]  }
   0x2   :  { %134 = vmatprep.subr.bf16.mxu0 %v251_v0  ;;  %v256_v4 = vld [vmem:[%s371_s1 + $0x60] ss:$8 sps:$4 sm:$0xff]   ;;  %v257_v5 = vld [vmem:[%s371_s1 + $0x54] ss:$8 sps:$4 sm:$0xff]   ;;  %v259_v6 = vld [vmem:[%s371_s1 + $0x50] ss:$8 sps:$4 sm:$0xff]  }
   0x3   :  { %135 = vmatpush1.bf16.msra.mxu0 %v253_v2  ;;  %v260_v7 = vld [vmem:[%s371_s1 + $0x44] ss:$8 sps:$4 sm:$0xff]   ;;  %v262_v8 = vld [vmem:[%s371_s1 + $0x40] ss:$8 sps:$4 sm:$0xff]   ;;  %v263_v9 = vld [vmem:[%s371_s1 + $0x34] ss:$8 sps:$4 sm:$0xff]  }
   0x4   :  { %136 = vmatprep.subr.bf16.mxu0 %v254_v3  ;;  %v265_v10 = vld [vmem:[%s371_s1 + $0x30] ss:$8 sps:$4 sm:$0xff]   ;;  %v266_v11 = vld [vmem:[%s371_s1 + $0x24] ss:$8 sps:$4 sm:$0xff]   ;;  %v268_v12 = vld [vmem:[%s371_s1 + $0x20] ss:$8 sps:$4 sm:$0xff]  }
   0x5   :  { %v269_v13 = vld [vmem:[%s371_s1 + $0x14] ss:$8 sps:$4 sm:$0xff]   ;;  %v271_v14 = vld [vmem:[%s371_s1 + $0x10] ss:$8 sps:$4 sm:$0xff]   ;;  %v272_v15 = vld [vmem:[%s371_s1 + $0x4] ss:$8 sps:$4 sm:$0xff]  }
   0x6   :  { %v274_v16 = vld [vmem:[%s371_s1] ss:$8 sps:$4 sm:$0xff]   ;;  %v195_v19 = vshrl.u32 %v194_v18, 7 }
   0x7   :  { %137 = vmatpush1.bf16.msra.mxu0 %v256_v4  ;;  %v275_v17 = vld [vmem:[%s372_s0] sm:$0xff]  }
   0x8   :  { %138 = vmatprep.subr.bf16.mxu0 %v257_v5  ;;  %v196_v20 = vsub.s32 0, %v195_v19  ;;  %v192_v21 = vld [vmem:[%s373_s2] sm:$0x3]  ;;  %v200_v22 = vsub.s32 1, %v195_v19 }
   0x9   :  { %v208_v23 = vld [vmem:[%s374_s3] sm:$0x3] }
   0xa   :  { %v197_v24 = vrot.slane %v192_v21, %v196_v20  ;;  %v213_v26 = vrot.slane %v208_v23, %v196_v20  ;;  %v201_v27 = vrot.slane %v192_v21, %v200_v22  ;;  %v217_v30 = vrot.slane %v208_v23, %v200_v22 }
   0xb   :  { %139 = vmatpush1.bf16.msra.mxu0 %v259_v6 }
   0xc   :  { %140 = vmatprep.subr.bf16.mxu0 %v260_v7 }
   0xf   :  { %141 = vmatpush1.bf16.msra.mxu0 %v262_v8 }
  0x10   :  { %142 = vmatprep.subr.bf16.mxu0 %v263_v9 }
  0x13   :  { %143 = vmatpush1.bf16.msra.mxu0 %v265_v10 }
  0x14   :  { %144 = vmatprep.subr.bf16.mxu0 %v266_v11 }
  0x17   :  { %145 = vmatpush1.bf16.msra.mxu0 %v268_v12 }
  0x18   :  { %146 = vmatprep.subr.bf16.mxu0 %v269_v13 }
  0x1b   :  { %147 = vmatpush1.bf16.msra.mxu0 %v271_v14 }
  0x1c   :  { %148 = vmatprep.subr.bf16.mxu0 %v272_v15 }
  0x1f   :  { %149 = vmatpush1.bf16.msra.mxu0 %v274_v16 }
  0x22   :  { %167 = vmatmul.mubr.bf16.vlgmr.msra.gmra.mxu0 %v275_v17 }
  0xe2   :  { %v168_v25 = vpop.f32.mrf.mxu0 }
  0xe3   :  { %v204_v29 = vmul.f32 %v197_v24, %v168_v25 }
  0xe4   :  { %v170_v28 = vpop.f32.mrf.mxu0 }
  0xe5   :  { %v220_v32 = vadd.f32 %v213_v26, %v204_v29  ;;  %v205_v33 = vmul.f32 %v201_v27, %v170_v28 }
  0xe6   :  { %v172_v31 = vpop.f32.mrf.mxu0 }
  0xe7   :  { %224 = vst [vmem:[%s375_s4] sm:$0xff] %v220_v32  ;;  %v221_v35 = vadd.f32 %v217_v30, %v205_v33  ;;  %v206_v36 = vmul.f32 %v197_v24, %v172_v31 }
  0xe8   :  { %v174_v34 = vpop.f32.mrf.mxu0 }
  0xe9   :  { %225 = vst [vmem:[%s375_s4 + $0x8] sm:$0xff] %v221_v35  ;;  %v222_v37 = vadd.f32 %v213_v26, %v206_v36  ;;  %v207_v38 = vmul.f32 %v201_v27, %v174_v34 }
  0xeb   :  { %226 = vst [vmem:[%s375_s4 + $0x10] sm:$0xff] %v222_v37  ;;  %v223_v39 = vadd.f32 %v217_v30, %v207_v38 }
  0xed   :  { %227 = vst [vmem:[%s375_s4 + $0x18] sm:$0xff] %v223_v39 }

// kernel: resnet_proto_forward.35
= control target key start
LH: loop header
LB: loop body
LE: loop exit
PB: predicated region body
PF: predicated region fallthrough
CT: control target
= control target key end

     0   :  { %s1020_s15 = smov 0   ;;  %s1022_s16 = smov 0   ;;  %s1194_s0 = inlined_call_operand.vmem [shape: bf16[16,2304], index: 0, kind: input, shape index: {}]   ;;  %s1195_s1 = inlined_call_operand.vmem [shape: bf16[2304,256], index: 1, kind: input, shape index: {}]   ;;  %s1196_s2 = inlined_call_operand.vmem [shape: f32[1,256], index: 2, kind: input, shape index: {}]   ;;  %s1197_s3 = inlined_call_operand.vmem [shape: f32[1,256], index: 3, kind: input, shape index: {}]   ;;  %s1198_s4 = inlined_call_operand.vmem [shape: f32[16,256], index: 4, kind: output, shape index: {}]  }
   0x1   :  { %s1024_s17 = smov 0   ;;  %s1026_s18 = smov 0  }
   0x2   :  { %s1028_s19 = smov 0  }
   0x3 LB: > { %s26_s20 = sadd.s32 1, %s988_s18  ;;  %p49_p1 = scmp.ne.s32.totalorder %s980_s16, %s976_s15  ;;  %s992_s19 = sphi %s1028_s19, %s14_s19   ;;  %s988_s18 = sphi %s1026_s18, %s1202_s18   ;;  %s984_s17 = sphi %s1024_s17, %s1201_s17   ;;  %s980_s16 = sphi %s1022_s16, %s1200_s16   ;;  %s976_s15 = sphi %s1020_s15, %s1199_s15  }
   0x4   : > { %p27_p0 = scmp.ge.s32.totalorder %s26_s20, 9  ;;  %p50_p2 = scmp.eq.s32.totalorder %s992_s19, 0 }
   0x5   : > { %s42_s22 = sadd.s32 1, %s980_s16  ;;  %p811_p5 = scmp.ge.s32.totalorder %s992_s19, 9 }
   0x6   : > { %s1204_s20 = smov (%p27_p0, %s26_s20), 0  ;;  %p51_p3 = por %p50_p2, %p49_p1 }
   0x7   : > { %s38_s21 = ssub.s32 %s988_s18, %s1204_s20  ;;  %199 = sbr.rel (%p811_p5) target bundleno = 17 (0x11), region = 24 }
   0x8   : > { %p40_p4 = scmp.eq.s32.totalorder %s38_s21, 0 }
   0xa   : > { %s1055_s23 = scalar_select %p40_p4, %s980_s16, %s42_s22  }
   0xc   : > { %202 = sbr.rel (!%p51_p3) target bundleno = 17 (0x11), region = 28  ;;  %s204_s24 = sand.u32 (%p51_p3), 1, %s980_s16  }
   0xd   : > { %s860_s25 = sshll.u32 (%p51_p3), %s988_s18, 3  ;;  %s812_s26 = sshll.u32 (%p51_p3), %s204_s24, 4 }
   0xe   : > { %s212_s29 = scalar_lea.vmem (%p51_p3), %s1194_s0, %s860_s25  ;;  %s206_s30 = scalar_lea.vmem (%p51_p3), [#allocation2], %s812_s26 }
   0xf   : > { %v243_v0 = vld [vmem:[%s212_s29] sm:$0xff] (%p51_p3)  ;;  %v245_v1 = vld [vmem:[%s212_s29 + $0x48] sm:$0xff] (%p51_p3) }
  0x10   : > { %244 = vst [vmem:[%s206_s30] sm:$0xff] (%p51_p3), %v243_v0  ;;  %246 = vst [vmem:[%s206_s30 + $0x8] sm:$0xff] (%p51_p3), %v245_v1 }
  0x11 PF: > { %p815_p6 = scmp.ge.s32.totalorder %s992_s19, 1  ;;  %p266_p7 = scmp.lt.s32.totalorder %s992_s19, 10 }
  0x13   : > { %p267_p8 = pnand %p815_p6, %p266_p7 }
  0x14   : > { %s273_s5 = sand.u32 (!%p267_p8), 1, %s976_s15   ;;  %s817_s6 = sshll.u32 (!%p267_p8), %s984_s17, 5 }
  0x15   : > { %270 = sbr.rel (%p267_p8) target bundleno = 317 (0x13d), region = 70  ;;  %s1067_s7 = sshll.u32 (!%p267_p8), %s273_s5, 4 }
  0x16   : > { %p325_p9 = scmp.lt.s32.totalorder (!%p267_p8), %s817_s6, 287  ;;  %s275_s12 = scalar_lea.vmem (!%p267_p8), [#allocation2], %s1067_s7 }
  0x17   : > { %p820_p10 = scmp.ne.s32.totalorder (!%p267_p8), %s984_s17, 0 }
  0x1a   : > { %s1206_s6 = smov (!%p325_p9, %s817_s6), 287  ;;  %360 = sbr.rel (%p820_p10) target bundleno = 34 (0x22), region = 78 }
  0x1b   : > { %s861_s8 = sshll.u32 %s1206_s6, 3 }
  0x1c   : > { %s1072_s11 = scalar_lea.vmem %s1195_s1, %s861_s8 }
  0x1f   : > { %v994_v2 = vmov 0.0  }
  0x20   : > { %361 = vst [vmem:[%s1198_s4] sm:$0xff] %v994_v2  ;;  %362 = vst [vmem:[%s1198_s4 + $0x8] sm:$0xff] %v994_v2 }
  0x21   : > { %363 = vst [vmem:[%s1198_s4 + $0x10] sm:$0xff] %v994_v2  ;;  %364 = vst [vmem:[%s1198_s4 + $0x18] sm:$0xff] %v994_v2 }
  0x22 PF: > { %v903_v3 = vld [vmem:[%s1072_s11 + $0x74] ss:$8 sps:$4 sm:$0xff]   ;;  %v905_v4 = vld [vmem:[%s1072_s11 + $0x70] ss:$8 sps:$4 sm:$0xff]   ;;  %v906_v5 = vld [vmem:[%s1072_s11 + $0x64] ss:$8 sps:$4 sm:$0xff]  }
  0x23   : > { %573 = vmatprep.subr.bf16.mxu0 %v903_v3  ;;  %v908_v6 = vld [vmem:[%s1072_s11 + $0x60] ss:$8 sps:$4 sm:$0xff]   ;;  %v909_v7 = vld [vmem:[%s1072_s11 + $0x54] ss:$8 sps:$4 sm:$0xff]   ;;  %v911_v8 = vld [vmem:[%s1072_s11 + $0x50] ss:$8 sps:$4 sm:$0xff]  }
  0x24   : > { %574 = vmatpush1.bf16.msra.mxu0 %v905_v4  ;;  %v912_v9 = vld [vmem:[%s1072_s11 + $0x44] ss:$8 sps:$4 sm:$0xff]   ;;  %v914_v10 = vld [vmem:[%s1072_s11 + $0x40] ss:$8 sps:$4 sm:$0xff]   ;;  %v915_v11 = vld [vmem:[%s1072_s11 + $0x34] ss:$8 sps:$4 sm:$0xff]  }
  0x25   : > { %575 = vmatprep.subr.bf16.mxu0 %v906_v5  ;;  %v917_v12 = vld [vmem:[%s1072_s11 + $0x30] ss:$8 sps:$4 sm:$0xff]   ;;  %v918_v13 = vld [vmem:[%s1072_s11 + $0x24] ss:$8 sps:$4 sm:$0xff]   ;;  %v920_v14 = vld [vmem:[%s1072_s11 + $0x20] ss:$8 sps:$4 sm:$0xff]  }
  0x26   : > { %v921_v15 = vld [vmem:[%s1072_s11 + $0x14] ss:$8 sps:$4 sm:$0xff]   ;;  %v923_v17 = vld [vmem:[%s1072_s11 + $0x10] ss:$8 sps:$4 sm:$0xff]   ;;  %v924_v18 = vld [vmem:[%s1072_s11 + $0x4] ss:$8 sps:$4 sm:$0xff]  }
  0x27   : > { %v953_v16 = vld [vmem:[%s275_s12 + $0x4] ss:$8 sps:$4 sm:$0xff]   ;;  %v926_v19 = vld [vmem:[%s1072_s11] ss:$8 sps:$4 sm:$0xff]   ;;  %v929_v21 = vld [vmem:[%s1072_s11 + $0xf0] ss:$8 sps:$4 sm:$0xff]  }
  0x28   : > { %576 = vmatpush1.bf16.msra.mxu0 %v908_v6  ;;  %605 = vmatprep.mubr.bf16.mxu0 %v953_v16  ;;  %v927_v20 = vld [vmem:[%s1072_s11 + $0xf4] ss:$8 sps:$4 sm:$0xff]   ;;  %v930_v22 = vld [vmem:[%s1072_s11 + $0xe4] ss:$8 sps:$4 sm:$0xff]   ;;  %v932_v23 = vld [vmem:[%s1072_s11 + $0xe0] ss:$8 sps:$4 sm:$0xff]  }
  0x29   : > { %577 = vmatprep.subr.bf16.mxu0 %v909_v7  ;;  %v933_v24 = vld [vmem:[%s1072_s11 + $0xd4] ss:$8 sps:$4 sm:$0xff]   ;;  %v935_v25 = vld [vmem:[%s1072_s11 + $0xd0] ss:$8 sps:$4 sm:$0xff]   ;;  %v936_v26 = vld [vmem:[%s1072_s11 + $0xc4] ss:$8 sps:$4 sm:$0xff]  }
  0x2a   : > { %v938_v27 = vld [vmem:[%s1072_s11 + $0xc0] ss:$8 sps:$4 sm:$0xff]   ;;  %v939_v28 = vld [vmem:[%s1072_s11 + $0xb4] ss:$8 sps:$4 sm:$0xff]   ;;  %v941_v29 = vld [vmem:[%s1072_s11 + $0xb0] ss:$8 sps:$4 sm:$0xff]  }
  0x2b   : > { %v942_v30 = vld [vmem:[%s1072_s11 + $0xa4] ss:$8 sps:$4 sm:$0xff]   ;;  %v944_v31 = vld [vmem:[%s1072_s11 + $0xa0] ss:$8 sps:$4 sm:$0xff]   ;;  %v945_v32 = vld [vmem:[%s1072_s11 + $0x94] ss:$8 sps:$4 sm:$0xff]  }
  0x2c   : > { %578 = vmatpush1.bf16.msra.mxu0 %v911_v8  ;;  %v947_v33 = vld [vmem:[%s1072_s11 + $0x90] ss:$8 sps:$4 sm:$0xff]   ;;  %v948_v34 = vld [vmem:[%s1072_s11 + $0x84] ss:$8 sps:$4 sm:$0xff]   ;;  %v950_v35 = vld [vmem:[%s1072_s11 + $0x80] ss:$8 sps:$4 sm:$0xff]  }
  0x2d   : > { %579 = vmatprep.subr.bf16.mxu0 %v912_v9  ;;  %v951_v36 = vld [vmem:[%s275_s12] ss:$8 sps:$4 sm:$0xff]   ;;  %p855_p11 = scmp.ne.s32.totalorder %s984_s17, 8 }
  0x2e   : > { %v365_v37 = vld [vmem:[%s1198_s4] sm:$0xff]  ;;  %v366_v39 = vld [vmem:[%s1198_s4 + $0x8] sm:$0xff]  ;;  %v367_v42 = vld [vmem:[%s1198_s4 + $0x10] sm:$0xff] }
  0x2f   : > { %v368_v45 = vld [vmem:[%s1198_s4 + $0x18] sm:$0xff] }
  0x30   : > { %580 = vmatpush1.bf16.msra.mxu0 %v914_v10 }
  0x31   : > { %581 = vmatprep.subr.bf16.mxu0 %v915_v11 }
  0x34   : > { %582 = vmatpush1.bf16.msra.mxu0 %v917_v12 }
  0x35   : > { %583 = vmatprep.subr.bf16.mxu0 %v918_v13 }
  0x38   : > { %584 = vmatpush1.bf16.msra.mxu0 %v920_v14 }
  0x39   : > { %585 = vmatprep.subr.bf16.mxu0 %v921_v15 }
  0x3c   : > { %586 = vmatpush1.bf16.msra.mxu0 %v923_v17 }
  0x3d   : > { %587 = vmatprep.subr.bf16.mxu0 %v924_v18 }
  0x40   : > { %588 = vmatpush1.bf16.msra.mxu0 %v926_v19 }
  0x41   : > { %589 = vmatprep.subr.bf16.mxu0 %v927_v20 }
  0x44   : > { %590 = vmatpush2.bf16.msra.mxu0 %v929_v21 }
  0x45   : > { %591 = vmatprep.subr.bf16.mxu0 %v930_v22 }
  0x48   : > { %592 = vmatpush2.bf16.msra.mxu0 %v932_v23 }
  0x49   : > { %593 = vmatprep.subr.bf16.mxu0 %v933_v24 }
  0x4c   : > { %594 = vmatpush2.bf16.msra.mxu0 %v935_v25 }
  0x4d   : > { %595 = vmatprep.subr.bf16.mxu0 %v936_v26 }
  0x50   : > { %596 = vmatpush2.bf16.msra.mxu0 %v938_v27 }
  0x51   : > { %597 = vmatprep.subr.bf16.mxu0 %v939_v28 }
  0x54   : > { %598 = vmatpush2.bf16.msra.mxu0 %v941_v29 }
  0x55   : > { %599 = vmatprep.subr.bf16.mxu0 %v942_v30 }
  0x58   : > { %600 = vmatpush2.bf16.msra.mxu0 %v944_v31 }
  0x59   : > { %601 = vmatprep.subr.bf16.mxu0 %v945_v32 }
  0x5c   : > { %602 = vmatpush2.bf16.msra.mxu0 %v947_v33 }
  0x5d   : > { %603 = vmatprep.subr.bf16.mxu0 %v948_v34 }
  0x60   : > { %604 = vmatpush2.bf16.msra.mxu0 %v950_v35 }
  0x63   : > { %606 = vmatmul.mubr.bf16.vlgmr.msra.gmra.mxu0 %v951_v36 }
 0x123   : > { %v607_v38 = vpop.f32.mrf.mxu0 }
 0x124   : > { %v616_v40 = vadd.f32 %v607_v38, %v365_v37 }
 0x125   : > { %v609_v41 = vpop.f32.mrf.mxu0 }
 0x126   : > { %620 = vst [vmem:[%s1198_s4] sm:$0xff] %v616_v40  ;;  %v617_v43 = vadd.f32 %v609_v41, %v366_v39 }
 0x127   : > { %v611_v44 = vpop.f32.mrf.mxu0 }
 0x128   : > { %621 = vst [vmem:[%s1198_s4 + $0x8] sm:$0xff] %v617_v43  ;;  %v618_v46 = vadd.f32 %v611_v44, %v367_v42  ;;  %627 = sbr.rel (%p855_p11) target bundleno = 317 (0x13d), region = 82 }
 0x129   : > { %v613_v47 = vpop.f32.mrf.mxu0 }
 0x12a   : > { %622 = vst [vmem:[%s1198_s4 + $0x10] sm:$0xff] %v618_v46  ;;  %v619_v48 = vadd.f32 %v613_v47, %v368_v45 }
 0x12c   : > { %623 = vst [vmem:[%s1198_s4 + $0x18] sm:$0xff] %v619_v48 }
 0x12d   : > { %v634_v49 = vlaneseq  ;;  %v632_v51 = vld [vmem:[%s1196_s2] sm:$0x3] }
 0x12e   : > { %v648_v52 = vld [vmem:[%s1197_s3] sm:$0x3] }
 0x12f   : > { %v635_v50 = vshrl.u32 %v634_v49, 7  ;;  %v628_v53 = vld [vmem:[%s1198_s4] sm:$0xff]  ;;  %v629_v56 = vld [vmem:[%s1198_s4 + $0x8] sm:$0xff] }
 0x131   : > { %v636_v54 = vsub.s32 0, %v635_v50  ;;  %v640_v55 = vsub.s32 1, %v635_v50  ;;  %v630_v57 = vld [vmem:[%s1198_s4 + $0x10] sm:$0xff] }
 0x133   : > { %v631_v58 = vld [vmem:[%s1198_s4 + $0x18] sm:$0xff]  ;;  %v637_v59 = vrot.slane %v632_v51, %v636_v54  ;;  %v653_v60 = vrot.slane %v648_v52, %v636_v54  ;;  %v641_v61 = vrot.slane %v632_v51, %v640_v55  ;;  %v657_v62 = vrot.slane %v648_v52, %v640_v55 }
 0x135   : > { %v644_v63 = vmul.f32 %v637_v59, %v628_v53  ;;  %v645_v0 = vmul.f32 %v641_v61, %v629_v56  ;;  %v646_v1 = vmul.f32 %v637_v59, %v630_v57  ;;  %v647_v2 = vmul.f32 %v641_v61, %v631_v58 }
 0x137   : > { %v660_v3 = vadd.f32 %v653_v60, %v644_v63  ;;  %v661_v4 = vadd.f32 %v657_v62, %v645_v0  ;;  %v662_v5 = vadd.f32 %v653_v60, %v646_v1  ;;  %v663_v6 = vadd.f32 %v657_v62, %v647_v2 }
 0x139   : > { %v664_v7 = vmax.f32 %v660_v3, 0.0  ;;  %v665_v8 = vmax.f32 %v661_v4, 0.0  ;;  %v666_v9 = vmax.f32 %v662_v5, 0.0  ;;  %v667_v10 = vmax.f32 %v663_v6, 0.0 }
 0x13b   : > { %668 = vst [vmem:[%s1198_s4] sm:$0xff] %v664_v7  ;;  %669 = vst [vmem:[%s1198_s4 + $0x8] sm:$0xff] %v665_v8 }
 0x13c   : > { %670 = vst [vmem:[%s1198_s4 + $0x10] sm:$0xff] %v666_v9  ;;  %671 = vst [vmem:[%s1198_s4 + $0x18] sm:$0xff] %v667_v10 }
 0x13d PF: > { %s14_s19 = sadd.s32 1, %s992_s19   ;;  %s1199_s15 = smov %s980_s16 }
 0x13e   : > { %p11_p12 = scmp.ge.s32.totalorder %s14_s19, 11   ;;  %s1200_s16 = smov %s1055_s23 }
 0x13f   : > { %s1201_s17 = smov %s988_s18  ;;  %s1202_s18 = smov %s1204_s20 }
 0x140   :  { %13 = sbr.rel (!%p11_p12) target bundleno = 3 (0x3), region = 126 }

// kernel: resnet_proto_forward.34
= control target key start
LH: loop header
LB: loop body
LE: loop exit
PB: predicated region body
PF: predicated region fallthrough
CT: control target
= control target key end

     0   :  { %s1123_s18 = smov 0   ;;  %s1125_s19 = smov 0   ;;  %s1309_s0 = inlined_call_operand.vmem [shape: bf16[16,2304], index: 0, kind: input, shape index: {}]   ;;  %s1310_s1 = inlined_call_operand.vmem [shape: bf16[2304,256], index: 1, kind: input, shape index: {}]   ;;  %s1311_s2 = inlined_call_operand.vmem [shape: f32[1,256], index: 2, kind: input, shape index: {}]   ;;  %s1312_s3 = inlined_call_operand.vmem [shape: f32[1,256], index: 3, kind: input, shape index: {}]   ;;  %s1313_s4 = inlined_call_operand.vmem [shape: f32[16,256], index: 4, kind: input, shape index: {}]   ;;  %s1314_s5 = inlined_call_operand.vmem [shape: f32[16,256], index: 5, kind: output, shape index: {}]  }
   0x1   :  { %s1127_s20 = smov 0   ;;  %s1129_s21 = smov 0  }
   0x2   :  { %s1131_s22 = smov 0  }
   0x3 LB: > { %s27_s23 = sadd.s32 1, %s1086_s21  ;;  %p50_p1 = scmp.ne.s32.totalorder %s1078_s19, %s1074_s18  ;;  %s1090_s22 = sphi %s1131_s22, %s15_s22   ;;  %s1086_s21 = sphi %s1129_s21, %s1318_s21   ;;  %s1082_s20 = sphi %s1127_s20, %s1317_s20   ;;  %s1078_s19 = sphi %s1125_s19, %s1316_s19   ;;  %s1074_s18 = sphi %s1123_s18, %s1315_s18  }
   0x4   : > { %p28_p0 = scmp.ge.s32.totalorder %s27_s23, 9  ;;  %p51_p2 = scmp.eq.s32.totalorder %s1090_s22, 0 }
   0x5   : > { %s43_s25 = sadd.s32 1, %s1078_s19  ;;  %p909_p5 = scmp.ge.s32.totalorder %s1090_s22, 9 }
   0x6   : > { %s1320_s23 = smov (%p28_p0, %s27_s23), 0  ;;  %p52_p3 = por %p51_p2, %p50_p1 }
   0x7   : > { %s39_s24 = ssub.s32 %s1086_s21, %s1320_s23  ;;  %243 = sbr.rel (%p909_p5) target bundleno = 17 (0x11), region = 28 }
   0x8   : > { %p41_p4 = scmp.eq.s32.totalorder %s39_s24, 0 }
   0xa   : > { %s1158_s26 = scalar_select %p41_p4, %s1078_s19, %s43_s25  }
   0xc   : > { %246 = sbr.rel (!%p52_p3) target bundleno = 17 (0x11), region = 32  ;;  %s248_s27 = sand.u32 (%p52_p3), 1, %s1078_s19  }
   0xd   : > { %s958_s28 = sshll.u32 (%p52_p3), %s1086_s21, 3  ;;  %s910_s29 = sshll.u32 (%p52_p3), %s248_s27, 4 }
   0xe   : > { %s256_s7 = scalar_lea.vmem (%p52_p3), %s1309_s0, %s958_s28  ;;  %s250_s8 = scalar_lea.vmem (%p52_p3), [#allocation2], %s910_s29 }
   0xf   : > { %v287_v0 = vld [vmem:[%s256_s7] sm:$0xff] (%p52_p3)  ;;  %v289_v1 = vld [vmem:[%s256_s7 + $0x48] sm:$0xff] (%p52_p3) }
  0x10   : > { %288 = vst [vmem:[%s250_s8] sm:$0xff] (%p52_p3), %v287_v0  ;;  %290 = vst [vmem:[%s250_s8 + $0x8] sm:$0xff] (%p52_p3), %v289_v1 }
  0x11 PF: > { %p913_p6 = scmp.ge.s32.totalorder %s1090_s22, 1  ;;  %p310_p7 = scmp.lt.s32.totalorder %s1090_s22, 10 }
  0x13   : > { %p311_p8 = pnand %p913_p6, %p310_p7 }
  0x14   : > { %s317_s9 = sand.u32 (!%p311_p8), 1, %s1074_s18   ;;  %s915_s10 = sshll.u32 (!%p311_p8), %s1082_s20, 5 }
  0x15   : > { %314 = sbr.rel (%p311_p8) target bundleno = 319 (0x13f), region = 74  ;;  %s1170_s11 = sshll.u32 (!%p311_p8), %s317_s9, 4 }
  0x16   : > { %p381_p9 = scmp.lt.s32.totalorder (!%p311_p8), %s915_s10, 287  ;;  %s319_s16 = scalar_lea.vmem (!%p311_p8), [#allocation2], %s1170_s11 }
  0x17   : > { %p918_p10 = scmp.ne.s32.totalorder (!%p311_p8), %s1082_s20, 0 }
  0x1a   : > { %s1322_s10 = smov (!%p381_p9, %s915_s10), 287  ;;  %428 = sbr.rel (%p918_p10) target bundleno = 34 (0x22), region = 82 }
  0x1b   : > { %s959_s12 = sshll.u32 %s1322_s10, 3 }
  0x1c   : > { %s1175_s15 = scalar_lea.vmem %s1310_s1, %s959_s12 }
  0x1f   : > { %v1092_v2 = vmov 0.0  }
  0x20   : > { %429 = vst [vmem:[%s1314_s5] sm:$0xff] %v1092_v2  ;;  %430 = vst [vmem:[%s1314_s5 + $0x8] sm:$0xff] %v1092_v2 }
  0x21   : > { %431 = vst [vmem:[%s1314_s5 + $0x10] sm:$0xff] %v1092_v2  ;;  %432 = vst [vmem:[%s1314_s5 + $0x18] sm:$0xff] %v1092_v2 }
  0x22 PF: > { %v1001_v3 = vld [vmem:[%s1175_s15 + $0x74] ss:$8 sps:$4 sm:$0xff]   ;;  %v1003_v4 = vld [vmem:[%s1175_s15 + $0x70] ss:$8 sps:$4 sm:$0xff]   ;;  %v1004_v5 = vld [vmem:[%s1175_s15 + $0x64] ss:$8 sps:$4 sm:$0xff]  }
  0x23   : > { %641 = vmatprep.subr.bf16.mxu0 %v1001_v3  ;;  %v1006_v6 = vld [vmem:[%s1175_s15 + $0x60] ss:$8 sps:$4 sm:$0xff]   ;;  %v1007_v7 = vld [vmem:[%s1175_s15 + $0x54] ss:$8 sps:$4 sm:$0xff]   ;;  %v1009_v8 = vld [vmem:[%s1175_s15 + $0x50] ss:$8 sps:$4 sm:$0xff]  }
  0x24   : > { %642 = vmatpush1.bf16.msra.mxu0 %v1003_v4  ;;  %v1010_v9 = vld [vmem:[%s1175_s15 + $0x44] ss:$8 sps:$4 sm:$0xff]   ;;  %v1012_v10 = vld [vmem:[%s1175_s15 + $0x40] ss:$8 sps:$4 sm:$0xff]   ;;  %v1013_v11 = vld [vmem:[%s1175_s15 + $0x34] ss:$8 sps:$4 sm:$0xff]  }
  0x25   : > { %643 = vmatprep.subr.bf16.mxu0 %v1004_v5  ;;  %v1015_v12 = vld [vmem:[%s1175_s15 + $0x30] ss:$8 sps:$4 sm:$0xff]   ;;  %v1016_v13 = vld [vmem:[%s1175_s15 + $0x24] ss:$8 sps:$4 sm:$0xff]   ;;  %v1018_v14 = vld [vmem:[%s1175_s15 + $0x20] ss:$8 sps:$4 sm:$0xff]  }
  0x26   : > { %v1019_v15 = vld [vmem:[%s1175_s15 + $0x14] ss:$8 sps:$4 sm:$0xff]   ;;  %v1021_v17 = vld [vmem:[%s1175_s15 + $0x10] ss:$8 sps:$4 sm:$0xff]   ;;  %v1022_v18 = vld [vmem:[%s1175_s15 + $0x4] ss:$8 sps:$4 sm:$0xff]  }
  0x27   : > { %v1051_v16 = vld [vmem:[%s319_s16 + $0x4] ss:$8 sps:$4 sm:$0xff]   ;;  %v1024_v19 = vld [vmem:[%s1175_s15] ss:$8 sps:$4 sm:$0xff]   ;;  %v1027_v21 = vld [vmem:[%s1175_s15 + $0xf0] ss:$8 sps:$4 sm:$0xff]  }
  0x28   : > { %644 = vmatpush1.bf16.msra.mxu0 %v1006_v6  ;;  %673 = vmatprep.mubr.bf16.mxu0 %v1051_v16  ;;  %v1025_v20 = vld [vmem:[%s1175_s15 + $0xf4] ss:$8 sps:$4 sm:$0xff]   ;;  %v1028_v22 = vld [vmem:[%s1175_s15 + $0xe4] ss:$8 sps:$4 sm:$0xff]   ;;  %v1030_v23 = vld [vmem:[%s1175_s15 + $0xe0] ss:$8 sps:$4 sm:$0xff]  }
  0x29   : > { %645 = vmatprep.subr.bf16.mxu0 %v1007_v7  ;;  %v1031_v24 = vld [vmem:[%s1175_s15 + $0xd4] ss:$8 sps:$4 sm:$0xff]   ;;  %v1033_v25 = vld [vmem:[%s1175_s15 + $0xd0] ss:$8 sps:$4 sm:$0xff]   ;;  %v1034_v26 = vld [vmem:[%s1175_s15 + $0xc4] ss:$8 sps:$4 sm:$0xff]  }
  0x2a   : > { %v1036_v27 = vld [vmem:[%s1175_s15 + $0xc0] ss:$8 sps:$4 sm:$0xff]   ;;  %v1037_v28 = vld [vmem:[%s1175_s15 + $0xb4] ss:$8 sps:$4 sm:$0xff]   ;;  %v1039_v29 = vld [vmem:[%s1175_s15 + $0xb0] ss:$8 sps:$4 sm:$0xff]  }
  0x2b   : > { %v1040_v30 = vld [vmem:[%s1175_s15 + $0xa4] ss:$8 sps:$4 sm:$0xff]   ;;  %v1042_v31 = vld [vmem:[%s1175_s15 + $0xa0] ss:$8 sps:$4 sm:$0xff]   ;;  %v1043_v32 = vld [vmem:[%s1175_s15 + $0x94] ss:$8 sps:$4 sm:$0xff]  }
  0x2c   : > { %646 = vmatpush1.bf16.msra.mxu0 %v1009_v8  ;;  %v1045_v33 = vld [vmem:[%s1175_s15 + $0x90] ss:$8 sps:$4 sm:$0xff]   ;;  %v1046_v34 = vld [vmem:[%s1175_s15 + $0x84] ss:$8 sps:$4 sm:$0xff]   ;;  %v1048_v35 = vld [vmem:[%s1175_s15 + $0x80] ss:$8 sps:$4 sm:$0xff]  }
  0x2d   : > { %647 = vmatprep.subr.bf16.mxu0 %v1010_v9  ;;  %v1049_v36 = vld [vmem:[%s319_s16] ss:$8 sps:$4 sm:$0xff]   ;;  %p953_p11 = scmp.ne.s32.totalorder %s1082_s20, 8 }
  0x2e   : > { %v433_v37 = vld [vmem:[%s1314_s5] sm:$0xff]  ;;  %v434_v39 = vld [vmem:[%s1314_s5 + $0x8] sm:$0xff]  ;;  %v435_v42 = vld [vmem:[%s1314_s5 + $0x10] sm:$0xff] }
  0x2f   : > { %v436_v45 = vld [vmem:[%s1314_s5 + $0x18] sm:$0xff] }
  0x30   : > { %648 = vmatpush1.bf16.msra.mxu0 %v1012_v10 }
  0x31   : > { %649 = vmatprep.subr.bf16.mxu0 %v1013_v11 }
  0x34   : > { %650 = vmatpush1.bf16.msra.mxu0 %v1015_v12 }
  0x35   : > { %651 = vmatprep.subr.bf16.mxu0 %v1016_v13 }
  0x38   : > { %652 = vmatpush1.bf16.msra.mxu0 %v1018_v14 }
  0x39   : > { %653 = vmatprep.subr.bf16.mxu0 %v1019_v15 }
  0x3c   : > { %654 = vmatpush1.bf16.msra.mxu0 %v1021_v17 }
  0x3d   : > { %655 = vmatprep.subr.bf16.mxu0 %v1022_v18 }
  0x40   : > { %656 = vmatpush1.bf16.msra.mxu0 %v1024_v19 }
  0x41   : > { %657 = vmatprep.subr.bf16.mxu0 %v1025_v20 }
  0x44   : > { %658 = vmatpush2.bf16.msra.mxu0 %v1027_v21 }
  0x45   : > { %659 = vmatprep.subr.bf16.mxu0 %v1028_v22 }
  0x48   : > { %660 = vmatpush2.bf16.msra.mxu0 %v1030_v23 }
  0x49   : > { %661 = vmatprep.subr.bf16.mxu0 %v1031_v24 }
  0x4c   : > { %662 = vmatpush2.bf16.msra.mxu0 %v1033_v25 }
  0x4d   : > { %663 = vmatprep.subr.bf16.mxu0 %v1034_v26 }
  0x50   : > { %664 = vmatpush2.bf16.msra.mxu0 %v1036_v27 }
  0x51   : > { %665 = vmatprep.subr.bf16.mxu0 %v1037_v28 }
  0x54   : > { %666 = vmatpush2.bf16.msra.mxu0 %v1039_v29 }
  0x55   : > { %667 = vmatprep.subr.bf16.mxu0 %v1040_v30 }
  0x58   : > { %668 = vmatpush2.bf16.msra.mxu0 %v1042_v31 }
  0x59   : > { %669 = vmatprep.subr.bf16.mxu0 %v1043_v32 }
  0x5c   : > { %670 = vmatpush2.bf16.msra.mxu0 %v1045_v33 }
  0x5d   : > { %671 = vmatprep.subr.bf16.mxu0 %v1046_v34 }
  0x60   : > { %672 = vmatpush2.bf16.msra.mxu0 %v1048_v35 }
  0x63   : > { %674 = vmatmul.mubr.bf16.vlgmr.msra.gmra.mxu0 %v1049_v36 }
 0x123   : > { %v675_v38 = vpop.f32.mrf.mxu0 }
 0x124   : > { %v684_v40 = vadd.f32 %v675_v38, %v433_v37 }
 0x125   : > { %v677_v41 = vpop.f32.mrf.mxu0 }
 0x126   : > { %688 = vst [vmem:[%s1314_s5] sm:$0xff] %v684_v40  ;;  %v685_v43 = vadd.f32 %v677_v41, %v434_v39 }
 0x127   : > { %v679_v44 = vpop.f32.mrf.mxu0 }
 0x128   : > { %689 = vst [vmem:[%s1314_s5 + $0x8] sm:$0xff] %v685_v43  ;;  %v686_v46 = vadd.f32 %v679_v44, %v435_v42  ;;  %695 = sbr.rel (%p953_p11) target bundleno = 319 (0x13f), region = 86 }
 0x129   : > { %v681_v47 = vpop.f32.mrf.mxu0 }
 0x12a   : > { %690 = vst [vmem:[%s1314_s5 + $0x10] sm:$0xff] %v686_v46  ;;  %v687_v48 = vadd.f32 %v681_v47, %v436_v45 }
 0x12c   : > { %691 = vst [vmem:[%s1314_s5 + $0x18] sm:$0xff] %v687_v48 }
 0x12d   : > { %v702_v49 = vlaneseq  ;;  %v700_v51 = vld [vmem:[%s1311_s2] sm:$0x3]  ;;  %v733_v4 = vld [vmem:[%s1313_s4 + $0x8] sm:$0xff]  ;;  %v734_v5 = vld [vmem:[%s1313_s4 + $0x10] sm:$0xff] }
 0x12e   : > { %v716_v52 = vld [vmem:[%s1312_s3] sm:$0x3]  ;;  %v735_v6 = vld [vmem:[%s1313_s4 + $0x18] sm:$0xff] }
 0x12f   : > { %v703_v50 = vshrl.u32 %v702_v49, 7  ;;  %v696_v53 = vld [vmem:[%s1314_s5] sm:$0xff]  ;;  %v697_v56 = vld [vmem:[%s1314_s5 + $0x8] sm:$0xff] }
 0x130   : > { %v732_v0 = vld [vmem:[%s1313_s4] sm:$0xff] }
 0x131   : > { %v704_v54 = vsub.s32 0, %v703_v50  ;;  %v708_v55 = vsub.s32 1, %v703_v50  ;;  %v698_v57 = vld [vmem:[%s1314_s5 + $0x10] sm:$0xff] }
 0x133   : > { %v699_v58 = vld [vmem:[%s1314_s5 + $0x18] sm:$0xff]  ;;  %v705_v59 = vrot.slane %v700_v51, %v704_v54  ;;  %v721_v60 = vrot.slane %v716_v52, %v704_v54  ;;  %v709_v61 = vrot.slane %v700_v51, %v708_v55  ;;  %v725_v62 = vrot.slane %v716_v52, %v708_v55 }
 0x135   : > { %v712_v63 = vmul.f32 %v705_v59, %v696_v53  ;;  %v713_v1 = vmul.f32 %v709_v61, %v697_v56  ;;  %v714_v2 = vmul.f32 %v705_v59, %v698_v57  ;;  %v715_v3 = vmul.f32 %v709_v61, %v699_v58 }
 0x137   : > { %v728_v7 = vadd.f32 %v721_v60, %v712_v63  ;;  %v729_v8 = vadd.f32 %v725_v62, %v713_v1  ;;  %v730_v9 = vadd.f32 %v721_v60, %v714_v2  ;;  %v731_v10 = vadd.f32 %v725_v62, %v715_v3 }
 0x139   : > { %v736_v11 = vadd.f32 %v732_v0, %v728_v7  ;;  %v737_v12 = vadd.f32 %v733_v4, %v729_v8  ;;  %v738_v13 = vadd.f32 %v734_v5, %v730_v9  ;;  %v739_v14 = vadd.f32 %v735_v6, %v731_v10 }
 0x13b   : > { %v740_v15 = vmax.f32 %v736_v11, 0.0  ;;  %v741_v16 = vmax.f32 %v737_v12, 0.0  ;;  %v742_v17 = vmax.f32 %v738_v13, 0.0  ;;  %v743_v18 = vmax.f32 %v739_v14, 0.0 }
 0x13d   : > { %744 = vst [vmem:[%s1314_s5] sm:$0xff] %v740_v15  ;;  %745 = vst [vmem:[%s1314_s5 + $0x8] sm:$0xff] %v741_v16 }
 0x13e   : > { %746 = vst [vmem:[%s1314_s5 + $0x10] sm:$0xff] %v742_v17  ;;  %747 = vst [vmem:[%s1314_s5 + $0x18] sm:$0xff] %v743_v18 }
 0x13f PF: > { %s15_s22 = sadd.s32 1, %s1090_s22   ;;  %s1315_s18 = smov %s1078_s19 }
 0x140   : > { %p12_p12 = scmp.ge.s32.totalorder %s15_s22, 11   ;;  %s1316_s19 = smov %s1158_s26 }
 0x141   : > { %s1317_s20 = smov %s1086_s21  ;;  %s1318_s21 = smov %s1320_s23 }
 0x142   :  { %14 = sbr.rel (!%p12_p12) target bundleno = 3 (0x3), region = 133 }

// kernel: resnet_proto_forward.37
= control target key start
LH: loop header
LB: loop body
LE: loop exit
PB: predicated region body
PF: predicated region fallthrough
CT: control target
= control target key end

     0   :  { %s1270_s15 = smov 0   ;;  %s1272_s16 = smov 0   ;;  %s1586_s0 = inlined_call_operand.vmem [shape: bf16[16,2304], index: 0, kind: input, shape index: {}]   ;;  %s1587_s1 = inlined_call_operand.vmem [shape: bf16[2304,512], index: 1, kind: input, shape index: {}]   ;;  %s1588_s2 = inlined_call_operand.vmem [shape: f32[1,512], index: 2, kind: input, shape index: {}]   ;;  %s1589_s3 = inlined_call_operand.vmem [shape: f32[1,512], index: 3, kind: input, shape index: {}]   ;;  %s1590_s4 = inlined_call_operand.vmem [shape: f32[16,512], index: 4, kind: output, shape index: {}]  }
   0x1   :  { %s1274_s17 = smov 0   ;;  %s1276_s18 = smov 0  }
   0x2   :  { %s1278_s19 = smov 0   ;;  %s1280_s20 = smov 0  }
   0x3   :  { %s1282_s21 = smov 0   ;;  %s1284_s22 = smov 0  }
   0x4   :  { %s1286_s23 = smov 0   ;;  %s1288_s24 = smov 0  }
   0x5   :  { %s1290_s25 = smov 0  }
   0x6 LB: > { %1594 = sst [smem:[#allocation5_spill]] %s1222_s20  ;;  %s954_s26 = sadd.s32 4294967295, %s1242_s25   ;;  %s1242_s25 = sphi %s1290_s25, %s14_s25   ;;  %s1238_s24 = sphi %s1288_s24, %s1612_s24   ;;  %s1234_s23 = sphi %s1286_s23, %s1611_s23   ;;  %s1230_s22 = sphi %s1284_s22, %s1610_s22   ;;  %s1226_s21 = sphi %s1282_s21, %s1609_s21   ;;  %s1222_s20 = sphi %s1280_s20, %s1602_s20   ;;  %s1218_s19 = sphi %s1278_s19, %s1601_s19   ;;  %s1214_s18 = sphi %s1276_s18, %s1608_s18   ;;  %s1210_s17 = sphi %s1274_s17, %s1607_s17   ;;  %s1206_s16 = sphi %s1272_s16, %s1606_s16   ;;  %s1202_s15 = sphi %s1270_s15, %s1605_s15  }
   0x7   : > { %s26_s27 = sadd.s32 1, %s1234_s23  ;;  %s29_s28 = sadd.s32 1, %s1238_s24 }
   0x8   : > { %p27_p0 = scmp.ge.s32.totalorder %s26_s27, 9  ;;  %s42_s29 = sadd.s32 1, %s1222_s20 }
   0x9   : > { %p49_p1 = scmp.ne.s32.totalorder %s1222_s20, %s1218_s19  ;;  %p50_p2 = scmp.eq.s32.totalorder %s1242_s25, 0 }
   0xa   : > { %s1614_s27 = smov (%p27_p0, %s26_s27), 0  ;;  %s1616_s28 = smov (!%p27_p0, %s29_s28), %s1238_s24 }
   0xb   : > { %1595 = sst [smem:[#allocation6_spill]] %s1614_s27  ;;  %s38_s30 = ssub.s32 %s1234_s23, %s1614_s27 }
   0xc   : > { %p31_p3 = scmp.ge.s32.totalorder %s1616_s28, 2  ;;  %p40_p4 = scmp.eq.s32.totalorder %s38_s30, 0 }
   0xd   : > { %p1337_p5 = por %p50_p2, %p49_p1  ;;  %s70_s6 = sadd.s32 1, %s1214_s18 }
   0xe   : > { %s1618_s28 = smov (%p31_p3, %s1616_s28), 0  ;;  %p77_p6 = scmp.ne.s32.totalorder %s1214_s18, %s1210_s17 }
   0xf   : > { %1597 = sst [smem:[#allocation7_spill]] %s1618_s28  ;;  %s66_s8 = ssub.s32 %s1238_s24, %s1618_s28 }
  0x10   : > { %s1345_s7 = scalar_select %p40_p4, %s1222_s20, %s42_s29  }
  0x11   : > { %s67_s9 = sor.u32 %s66_s8, %s38_s30  ;;  %p148_p7 = scmp.eq.s32.totalorder %s66_s8, 0 }
  0x12   : > { %1598 = sst [smem:[#allocation8_spill]] %s1345_s7  ;;  %p68_p8 = scmp.eq.s32.totalorder %s67_s9, 0 }
  0x13   : > { %p1351_p9 = por %p77_p6, %p50_p2  ;;  %s150_s11 = sadd.s32 1, %s1206_s16 }
  0x14   : > { %p160_p10 = scmp.ne.s32.totalorder %s1206_s16, %s1202_s15  ;;  %p161_p11 = scmp.eq.s32.totalorder %s954_s26, 17 }
  0x15   : > { %s1359_s12 = scalar_select %p68_p8, %s1214_s18, %s70_s6  }
  0x16   : > { %s1362_s13 = scalar_select %p148_p7, %s1206_s16, %s150_s11  }
  0x17   : > { %p1364_p12 = por %p161_p11, %p160_p10  ;;  %p957_p13 = scmp.ge.s32.totalorder %s1242_s25, 18 }
  0x19   : > { %183 = sbr.rel (%p957_p13) target bundleno = 58 (0x3a), region = 16 }
  0x1e   : > { %186 = sbr.rel (!%p1337_p5) target bundleno = 35 (0x23), region = 20  ;;  %s188_s29 = sand.u32 (%p1337_p5), 1, %s1222_s20  }
  0x1f   : > { %s1013_s30 = sshll.u32 (%p1337_p5), %s1234_s23, 3  ;;  %s958_s8 = sshll.u32 (%p1337_p5), %s188_s29, 4 }
  0x20   : > { %s196_s11 = scalar_lea.vmem (%p1337_p5), %s1586_s0, %s1013_s30  ;;  %s190_s26 = scalar_lea.vmem (%p1337_p5), [#allocation2], %s958_s8 }
  0x21   : > { %v227_v0 = vld [vmem:[%s196_s11] sm:$0xff] (%p1337_p5)  ;;  %v229_v1 = vld [vmem:[%s196_s11 + $0x48] sm:$0xff] (%p1337_p5) }
  0x22   : > { %228 = vst [vmem:[%s190_s26] sm:$0xff] (%p1337_p5), %v227_v0  ;;  %230 = vst [vmem:[%s190_s26 + $0x8] sm:$0xff] (%p1337_p5), %v229_v1 }
  0x23 PF: > { %236 = sbr.rel (!%p1351_p9) target bundleno = 58 (0x3a), region = 58  ;;  %s238_s5 = sand.u32 (%p1351_p9), 1, %s1214_s18  }
  0x24   : > { %s963_s28 = sshll.u32 (%p1351_p9), %s1238_s24, 1  ;;  %s961_s27 = sshll.u32 (%p1351_p9), %s238_s5, 8 }
  0x25   : > { %s1014_s29 = sshll.u32 (%p1351_p9), %s1234_s23, 7  ;;  %s1389_s10 = scalar_lea.vmem (%p1351_p9), [#allocation3], %s961_s27 }
  0x26   : > { %s244_s7 = sadd.s32 (%p1351_p9), %s1014_s29, %s963_s28 }
  0x27   : > { %s965_s20 = sshll.u32 (%p1351_p9), %s244_s7, 2 }
  0x28   : > { %s1384_s9 = scalar_lea.vmem %s1587_s1, %s965_s20 }
  0x29   : > { %v337_v2 = vld [vmem:[%s1384_s9] sm:$0xff]  ;;  %v339_v3 = vld [vmem:[%s1384_s9 + $0x10] sm:$0xff] }
  0x2a   : > { %v341_v4 = vld [vmem:[%s1384_s9 + $0x20] sm:$0xff]  ;;  %338 = vst [vmem:[%s1389_s10] sm:$0xff] %v337_v2  ;;  %340 = vst [vmem:[%s1389_s10 + $0x8] sm:$0xff] %v339_v3  ;;  %v343_v5 = vld [vmem:[%s1384_s9 + $0x30] sm:$0xff] }
  0x2b   : > { %342 = vst [vmem:[%s1389_s10 + $0x10] sm:$0xff] %v341_v4  ;;  %v345_v6 = vld [vmem:[%s1384_s9 + $0x40] sm:$0xff]  ;;  %v347_v7 = vld [vmem:[%s1384_s9 + $0x50] sm:$0xff]  ;;  %344 = vst [vmem:[%s1389_s10 + $0x18] sm:$0xff] %v343_v5 }
  0x2c   : > { %346 = vst [vmem:[%s1389_s10 + $0x20] sm:$0xff] %v345_v6  ;;  %348 = vst [vmem:[%s1389_s10 + $0x28] sm:$0xff] %v347_v7  ;;  %v349_v8 = vld [vmem:[%s1384_s9 + $0x60] sm:$0xff]  ;;  %v351_v9 = vld [vmem:[%s1384_s9 + $0x70] sm:$0xff] }
  0x2d   : > { %v353_v10 = vld [vmem:[%s1384_s9 + $0x80] sm:$0xff]  ;;  %350 = vst [vmem:[%s1389_s10 + $0x30] sm:$0xff] %v349_v8  ;;  %352 = vst [vmem:[%s1389_s10 + $0x38] sm:$0xff] %v351_v9  ;;  %v355_v11 = vld [vmem:[%s1384_s9 + $0x90] sm:$0xff] }
  0x2e   : > { %354 = vst [vmem:[%s1389_s10 + $0x40] sm:$0xff] %v353_v10  ;;  %v357_v12 = vld [vmem:[%s1384_s9 + $0xa0] sm:$0xff]  ;;  %v359_v13 = vld [vmem:[%s1384_s9 + $0xb0] sm:$0xff]  ;;  %356 = vst [vmem:[%s1389_s10 + $0x48] sm:$0xff] %v355_v11 }
  0x2f   : > { %358 = vst [vmem:[%s1389_s10 + $0x50] sm:$0xff] %v357_v12  ;;  %360 = vst [vmem:[%s1389_s10 + $0x58] sm:$0xff] %v359_v13  ;;  %v361_v14 = vld [vmem:[%s1384_s9 + $0xc0] sm:$0xff]  ;;  %v363_v15 = vld [vmem:[%s1384_s9 + $0xd0] sm:$0xff] }
  0x30   : > { %v365_v16 = vld [vmem:[%s1384_s9 + $0xe0] sm:$0xff]  ;;  %362 = vst [vmem:[%s1389_s10 + $0x60] sm:$0xff] %v361_v14  ;;  %364 = vst [vmem:[%s1389_s10 + $0x68] sm:$0xff] %v363_v15  ;;  %v367_v17 = vld [vmem:[%s1384_s9 + $0xf0] sm:$0xff] }
  0x31   : > { %366 = vst [vmem:[%s1389_s10 + $0x70] sm:$0xff] %v365_v16  ;;  %v369_v18 = vld [vmem:[%s1384_s9 + $0x100] sm:$0xff]  ;;  %v371_v19 = vld [vmem:[%s1384_s9 + $0x110] sm:$0xff]  ;;  %368 = vst [vmem:[%s1389_s10 + $0x78] sm:$0xff] %v367_v17 }
  0x32   : > { %370 = vst [vmem:[%s1389_s10 + $0x80] sm:$0xff] %v369_v18  ;;  %372 = vst [vmem:[%s1389_s10 + $0x88] sm:$0xff] %v371_v19  ;;  %v373_v20 = vld [vmem:[%s1384_s9 + $0x120] sm:$0xff]  ;;  %v375_v21 = vld [vmem:[%s1384_s9 + $0x130] sm:$0xff] }
  0x33   : > { %v377_v22 = vld [vmem:[%s1384_s9 + $0x140] sm:$0xff]  ;;  %374 = vst [vmem:[%s1389_s10 + $0x90] sm:$0xff] %v373_v20  ;;  %376 = vst [vmem:[%s1389_s10 + $0x98] sm:$0xff] %v375_v21  ;;  %v379_v23 = vld [vmem:[%s1384_s9 + $0x150] sm:$0xff] }
  0x34   : > { %378 = vst [vmem:[%s1389_s10 + $0xa0] sm:$0xff] %v377_v22  ;;  %v381_v24 = vld [vmem:[%s1384_s9 + $0x160] sm:$0xff]  ;;  %v383_v25 = vld [vmem:[%s1384_s9 + $0x170] sm:$0xff]  ;;  %380 = vst [vmem:[%s1389_s10 + $0xa8] sm:$0xff] %v379_v23 }
  0x35   : > { %382 = vst [vmem:[%s1389_s10 + $0xb0] sm:$0xff] %v381_v24  ;;  %384 = vst [vmem:[%s1389_s10 + $0xb8] sm:$0xff] %v383_v25  ;;  %v385_v26 = vld [vmem:[%s1384_s9 + $0x180] sm:$0xff]  ;;  %v387_v27 = vld [vmem:[%s1384_s9 + $0x190] sm:$0xff] }
  0x36   : > { %v389_v28 = vld [vmem:[%s1384_s9 + $0x1a0] sm:$0xff]  ;;  %386 = vst [vmem:[%s1389_s10 + $0xc0] sm:$0xff] %v385_v26  ;;  %388 = vst [vmem:[%s1389_s10 + $0xc8] sm:$0xff] %v387_v27  ;;  %v391_v29 = vld [vmem:[%s1384_s9 + $0x1b0] sm:$0xff] }
  0x37   : > { %390 = vst [vmem:[%s1389_s10 + $0xd0] sm:$0xff] %v389_v28  ;;  %v393_v30 = vld [vmem:[%s1384_s9 + $0x1c0] sm:$0xff]  ;;  %v395_v31 = vld [vmem:[%s1384_s9 + $0x1d0] sm:$0xff]  ;;  %392 = vst [vmem:[%s1389_s10 + $0xd8] sm:$0xff] %v391_v29 }
  0x38   : > { %394 = vst [vmem:[%s1389_s10 + $0xe0] sm:$0xff] %v393_v30  ;;  %396 = vst [vmem:[%s1389_s10 + $0xe8] sm:$0xff] %v395_v31  ;;  %v397_v32 = vld [vmem:[%s1384_s9 + $0x1e0] sm:$0xff]  ;;  %v399_v33 = vld [vmem:[%s1384_s9 + $0x1f0] sm:$0xff] }
  0x39   : > { %398 = vst [vmem:[%s1389_s10 + $0xf0] sm:$0xff] %v397_v32  ;;  %400 = vst [vmem:[%s1389_s10 + $0xf8] sm:$0xff] %v399_v33 }
  0x3a PF: > { %p966_p0 = scmp.ge.s32.totalorder %s1242_s25, 1  ;;  %p421_p1 = scmp.lt.s32.totalorder %s1242_s25, 19 }
  0x3c   : > { %p422_p2 = pnand %p966_p0, %p421_p1 }
  0x3d   : > { %s428_s20 = sand.u32 (!%p422_p2), 1, %s1218_s19   ;;  %s435_s27 = sand.u32 (!%p422_p2), 1, %s1210_s17  }
  0x3e   : > { %425 = sbr.rel (%p422_p2) target bundleno = 368 (0x170), region = 104  ;;  %s1456_s28 = sshll.u32 (!%p422_p2), %s428_s20, 4 }
  0x3f   : > { %s968_s7 = sshll.u32 (!%p422_p2), %s435_s27, 8  ;;  %s468_s8 = sand.u32 (!%p422_p2), 1, %s1202_s15  }
  0x40   : > { %s970_s11 = sshll.u32 (!%p422_p2), %s1230_s22, 1  ;;  %s969_s26 = sshll.u32 (!%p422_p2), %s468_s8, 5 }
  0x41   : > { %p476_p3 = scmp.lt.s32.totalorder (!%p422_p2), %s970_s11, 3  ;;  %s430_s19 = scalar_lea.vmem (!%p422_p2), [#allocation2], %s1456_s28 }
  0x42   : > { %s1471_s10 = scalar_lea.vmem (!%p422_p2), [#allocation3], %s968_s7  ;;  %s1473_s20 = scalar_lea.vmem (!%p422_p2), [#allocation4], %s969_s26 }
  0x43   : > { %s1620_s11 = smov (!%p476_p3, %s970_s11), 3  ;;  %p972_p4 = scmp.ne.s32.totalorder %s1226_s21, 0 }
  0x44   : > { %s478_s6 = scalar_lea.vmem %s1588_s2, %s1620_s11  ;;  %s483_s17 = scalar_lea.vmem %s1589_s3, %s1620_s11 }
  0x45   : > { %490 = sbr.rel (%p972_p4) target bundleno = 77 (0x4d), region = 116 }
  0x4a   : > { %v1244_v34 = vmov 0.0  }
  0x4b   : > { %491 = vst [vmem:[%s1473_s20] sm:$0xff] %v1244_v34  ;;  %492 = vst [vmem:[%s1473_s20 + $0x8] sm:$0xff] %v1244_v34 }
  0x4c   : > { %493 = vst [vmem:[%s1473_s20 + $0x10] sm:$0xff] %v1244_v34  ;;  %494 = vst [vmem:[%s1473_s20 + $0x18] sm:$0xff] %v1244_v34 }
  0x4d PF: > { %v1105_v35 = vld [vmem:[%s1471_s10 + $0x74] ss:$8 sps:$4 sm:$0xff]   ;;  %v1107_v36 = vld [vmem:[%s1471_s10 + $0x70] ss:$8 sps:$4 sm:$0xff]   ;;  %v1108_v37 = vld [vmem:[%s1471_s10 + $0x64] ss:$8 sps:$4 sm:$0xff]  }
  0x4e   : > { %703 = vmatprep.subr.bf16.mxu0 %v1105_v35  ;;  %v1110_v38 = vld [vmem:[%s1471_s10 + $0x60] ss:$8 sps:$4 sm:$0xff]   ;;  %v1111_v39 = vld [vmem:[%s1471_s10 + $0x54] ss:$8 sps:$4 sm:$0xff]   ;;  %v1113_v40 = vld [vmem:[%s1471_s10 + $0x50] ss:$8 sps:$4 sm:$0xff]  }
  0x4f   : > { %704 = vmatpush1.bf16.msra.mxu0 %v1107_v36  ;;  %v1114_v41 = vld [vmem:[%s1471_s10 + $0x44] ss:$8 sps:$4 sm:$0xff]   ;;  %v1116_v42 = vld [vmem:[%s1471_s10 + $0x40] ss:$8 sps:$4 sm:$0xff]   ;;  %v1117_v43 = vld [vmem:[%s1471_s10 + $0x34] ss:$8 sps:$4 sm:$0xff]  }
  0x50   : > { %705 = vmatprep.subr.bf16.mxu0 %v1108_v37  ;;  %v1119_v44 = vld [vmem:[%s1471_s10 + $0x30] ss:$8 sps:$4 sm:$0xff]   ;;  %v1120_v45 = vld [vmem:[%s1471_s10 + $0x24] ss:$8 sps:$4 sm:$0xff]   ;;  %v1122_v46 = vld [vmem:[%s1471_s10 + $0x20] ss:$8 sps:$4 sm:$0xff]  }
  0x51   : > { %v1123_v47 = vld [vmem:[%s1471_s10 + $0x14] ss:$8 sps:$4 sm:$0xff]   ;;  %v1125_v49 = vld [vmem:[%s1471_s10 + $0x10] ss:$8 sps:$4 sm:$0xff]   ;;  %v1126_v50 = vld [vmem:[%s1471_s10 + $0x4] ss:$8 sps:$4 sm:$0xff]  }
  0x52   : > { %v1155_v48 = vld [vmem:[%s430_s19 + $0x4] ss:$8 sps:$4 sm:$0xff]   ;;  %v1128_v51 = vld [vmem:[%s1471_s10] ss:$8 sps:$4 sm:$0xff]   ;;  %v1131_v53 = vld [vmem:[%s1471_s10 + $0xf0] ss:$8 sps:$4 sm:$0xff]  }
  0x53   : > { %706 = vmatpush1.bf16.msra.mxu0 %v1110_v38  ;;  %735 = vmatprep.mubr.bf16.mxu0 %v1155_v48  ;;  %v1129_v52 = vld [vmem:[%s1471_s10 + $0xf4] ss:$8 sps:$4 sm:$0xff]   ;;  %v1132_v54 = vld [vmem:[%s1471_s10 + $0xe4] ss:$8 sps:$4 sm:$0xff]   ;;  %v1134_v55 = vld [vmem:[%s1471_s10 + $0xe0] ss:$8 sps:$4 sm:$0xff]  }
  0x54   : > { %707 = vmatprep.subr.bf16.mxu0 %v1111_v39  ;;  %v1135_v56 = vld [vmem:[%s1471_s10 + $0xd4] ss:$8 sps:$4 sm:$0xff]   ;;  %v1137_v57 = vld [vmem:[%s1471_s10 + $0xd0] ss:$8 sps:$4 sm:$0xff]   ;;  %v1138_v58 = vld [vmem:[%s1471_s10 + $0xc4] ss:$8 sps:$4 sm:$0xff]  }
  0x55   : > { %v1140_v59 = vld [vmem:[%s1471_s10 + $0xc0] ss:$8 sps:$4 sm:$0xff]   ;;  %v1141_v60 = vld [vmem:[%s1471_s10 + $0xb4] ss:$8 sps:$4 sm:$0xff]   ;;  %v1143_v61 = vld [vmem:[%s1471_s10 + $0xb0] ss:$8 sps:$4 sm:$0xff]  }
  0x56   : > { %v1144_v62 = vld [vmem:[%s1471_s10 + $0xa4] ss:$8 sps:$4 sm:$0xff]   ;;  %v1146_v63 = vld [vmem:[%s1471_s10 + $0xa0] ss:$8 sps:$4 sm:$0xff]   ;;  %v1147_v0 = vld [vmem:[%s1471_s10 + $0x94] ss:$8 sps:$4 sm:$0xff]  }
  0x57   : > { %708 = vmatpush1.bf16.msra.mxu0 %v1113_v40  ;;  %v1149_v1 = vld [vmem:[%s1471_s10 + $0x90] ss:$8 sps:$4 sm:$0xff]   ;;  %v1150_v2 = vld [vmem:[%s1471_s10 + $0x84] ss:$8 sps:$4 sm:$0xff]   ;;  %v1152_v3 = vld [vmem:[%s1471_s10 + $0x80] ss:$8 sps:$4 sm:$0xff]  }
  0x58   : > { %709 = vmatprep.subr.bf16.mxu0 %v1114_v41  ;;  %v1153_v4 = vld [vmem:[%s430_s19] ss:$8 sps:$4 sm:$0xff]   ;;  %p1007_p5 = scmp.ne.s32.totalorder %s1226_s21, 8 }
  0x59   : > { %v495_v5 = vld [vmem:[%s1473_s20] sm:$0xff]  ;;  %v496_v7 = vld [vmem:[%s1473_s20 + $0x8] sm:$0xff]  ;;  %v497_v10 = vld [vmem:[%s1473_s20 + $0x10] sm:$0xff] }
  0x5a   : > { %v498_v13 = vld [vmem:[%s1473_s20 + $0x18] sm:$0xff] }
  0x5b   : > { %710 = vmatpush1.bf16.msra.mxu0 %v1116_v42 }
  0x5c   : > { %711 = vmatprep.subr.bf16.mxu0 %v1117_v43 }
  0x5f   : > { %712 = vmatpush1.bf16.msra.mxu0 %v1119_v44 }
  0x60   : > { %713 = vmatprep.subr.bf16.mxu0 %v1120_v45 }
  0x63   : > { %714 = vmatpush1.bf16.msra.mxu0 %v1122_v46 }
  0x64   : > { %715 = vmatprep.subr.bf16.mxu0 %v1123_v47 }
  0x67   : > { %716 = vmatpush1.bf16.msra.mxu0 %v1125_v49 }
  0x68   : > { %717 = vmatprep.subr.bf16.mxu0 %v1126_v50 }
  0x6b   : > { %718 = vmatpush1.bf16.msra.mxu0 %v1128_v51 }
  0x6c   : > { %719 = vmatprep.subr.bf16.mxu0 %v1129_v52 }
  0x6f   : > { %720 = vmatpush2.bf16.msra.mxu0 %v1131_v53 }
  0x70   : > { %721 = vmatprep.subr.bf16.mxu0 %v1132_v54 }
  0x73   : > { %722 = vmatpush2.bf16.msra.mxu0 %v1134_v55 }
  0x74   : > { %723 = vmatprep.subr.bf16.mxu0 %v1135_v56 }
  0x77   : > { %724 = vmatpush2.bf16.msra.mxu0 %v1137_v57 }
  0x78   : > { %725 = vmatprep.subr.bf16.mxu0 %v1138_v58 }
  0x7b   : > { %726 = vmatpush2.bf16.msra.mxu0 %v1140_v59 }
  0x7c   : > { %727 = vmatprep.subr.bf16.mxu0 %v1141_v60 }
  0x7f   : > { %728 = vmatpush2.bf16.msra.mxu0 %v1143_v61 }
  0x80   : > { %729 = vmatprep.subr.bf16.mxu0 %v1144_v62 }
  0x83   : > { %730 = vmatpush2.bf16.msra.mxu0 %v1146_v63 }
  0x84   : > { %731 = vmatprep.subr.bf16.mxu0 %v1147_v0 }
  0x87   : > { %732 = vmatpush2.bf16.msra.mxu0 %v1149_v1 }
  0x88   : > { %733 = vmatprep.subr.bf16.mxu0 %v1150_v2 }
  0x8b   : > { %734 = vmatpush2.bf16.msra.mxu0 %v1152_v3 }
  0x8e   : > { %736 = vmatmul.mubr.bf16.vlgmr.msra.gmra.mxu0 %v1153_v4 }
 0x14e   : > { %v737_v6 = vpop.f32.mrf.mxu0 }
 0x14f   : > { %v746_v8 = vadd.f32 %v737_v6, %v495_v5 }
 0x150   : > { %v739_v9 = vpop.f32.mrf.mxu0 }
 0x151   : > { %750 = vst [vmem:[%s1473_s20] sm:$0xff] %v746_v8  ;;  %v747_v11 = vadd.f32 %v739_v9, %v496_v7 }
 0x152   : > { %v741_v12 = vpop.f32.mrf.mxu0 }
 0x153   : > { %751 = vst [vmem:[%s1473_s20 + $0x8] sm:$0xff] %v747_v11  ;;  %v748_v14 = vadd.f32 %v741_v12, %v497_v10  ;;  %757 = sbr.rel (%p1007_p5) target bundleno = 360 (0x168), region = 120 }
 0x154   : > { %v743_v15 = vpop.f32.mrf.mxu0 }
 0x155   : > { %752 = vst [vmem:[%s1473_s20 + $0x10] sm:$0xff] %v748_v14  ;;  %v749_v16 = vadd.f32 %v743_v15, %v498_v13 }
 0x157   : > { %753 = vst [vmem:[%s1473_s20 + $0x18] sm:$0xff] %v749_v16 }
 0x158   : > { %v764_v17 = vlaneseq  ;;  %v762_v19 = vld [vmem:[%s478_s6] sm:$0x3] }
 0x159   : > { %v778_v20 = vld [vmem:[%s483_s17] sm:$0x3] }
 0x15a   : > { %v765_v18 = vshrl.u32 %v764_v17, 7  ;;  %v758_v21 = vld [vmem:[%s1473_s20] sm:$0xff]  ;;  %v759_v24 = vld [vmem:[%s1473_s20 + $0x8] sm:$0xff] }
 0x15c   : > { %v766_v22 = vsub.s32 0, %v765_v18  ;;  %v770_v23 = vsub.s32 1, %v765_v18  ;;  %v760_v25 = vld [vmem:[%s1473_s20 + $0x10] sm:$0xff] }
 0x15e   : > { %v761_v26 = vld [vmem:[%s1473_s20 + $0x18] sm:$0xff]  ;;  %v767_v27 = vrot.slane %v762_v19, %v766_v22  ;;  %v783_v28 = vrot.slane %v778_v20, %v766_v22  ;;  %v771_v29 = vrot.slane %v762_v19, %v770_v23  ;;  %v787_v30 = vrot.slane %v778_v20, %v770_v23 }
 0x160   : > { %v774_v31 = vmul.f32 %v767_v27, %v758_v21  ;;  %v775_v32 = vmul.f32 %v771_v29, %v759_v24  ;;  %v776_v33 = vmul.f32 %v767_v27, %v760_v25  ;;  %v777_v34 = vmul.f32 %v771_v29, %v761_v26 }
 0x162   : > { %v790_v35 = vadd.f32 %v783_v28, %v774_v31  ;;  %v791_v36 = vadd.f32 %v787_v30, %v775_v32  ;;  %v792_v37 = vadd.f32 %v783_v28, %v776_v33  ;;  %v793_v38 = vadd.f32 %v787_v30, %v777_v34 }
 0x164   : > { %v794_v39 = vmax.f32 %v790_v35, 0.0  ;;  %v795_v40 = vmax.f32 %v791_v36, 0.0  ;;  %v796_v41 = vmax.f32 %v792_v37, 0.0  ;;  %v797_v42 = vmax.f32 %v793_v38, 0.0 }
 0x166   : > { %798 = vst [vmem:[%s1473_s20] sm:$0xff] %v794_v39  ;;  %799 = vst [vmem:[%s1473_s20 + $0x8] sm:$0xff] %v795_v40 }
 0x167   : > { %800 = vst [vmem:[%s1473_s20 + $0x10] sm:$0xff] %v796_v41  ;;  %801 = vst [vmem:[%s1473_s20 + $0x18] sm:$0xff] %v797_v42 }
 0x168 PF: > { %808 = sbr.rel (!%p1364_p12) target bundleno = 368 (0x170), region = 124  ;;  %s1015_s21 = sshll.u32 (%p1364_p12), %s1230_s22, 4 }
 0x169   : > { %s814_s26 = scalar_lea.vmem (%p1364_p12), %s1590_s4, %s1015_s21 }
 0x16d   : > { %v827_v43 = vld [vmem:[%s1473_s20] sm:$0xff]  ;;  %v829_v44 = vld [vmem:[%s1473_s20 + $0x8] sm:$0xff] }
 0x16e   : > { %v831_v45 = vld [vmem:[%s1473_s20 + $0x10] sm:$0xff]  ;;  %v833_v46 = vld [vmem:[%s1473_s20 + $0x18] sm:$0xff]  ;;  %828 = vst [vmem:[%s814_s26] sm:$0xff] %v827_v43  ;;  %830 = vst [vmem:[%s814_s26 + $0x8] sm:$0xff] %v829_v44 }
 0x16f   : > { %832 = vst [vmem:[%s814_s26 + $0x20] sm:$0xff] %v831_v45  ;;  %834 = vst [vmem:[%s814_s26 + $0x28] sm:$0xff] %v833_v46 }
 0x170 PF: > { %s14_s25 = sadd.s32 1, %s1242_s25   ;;  %s1601_s19 = sld [smem:[#allocation5_spill]] }
 0x171   : > { %p11_p6 = scmp.ge.s32.totalorder %s14_s25, 20   ;;  %s1602_s20 = sld [smem:[#allocation8_spill]] }
 0x172   : > { %s1603_s14 = sld [smem:[#allocation6_spill]]  ;;  %s1605_s15 = smov %s1206_s16 }
 0x173   : > { %s1604_s5 = sld [smem:[#allocation7_spill]]  ;;  %s1606_s16 = smov %s1362_s13 }
 0x174   : > { %s1607_s17 = smov %s1214_s18  ;;  %s1608_s18 = smov %s1359_s12 }
 0x175   : > { %s1609_s21 = smov %s1234_s23  ;;  %s1610_s22 = smov %s1238_s24 }
 0x176   :  { %13 = sbr.rel (!%p11_p6) target bundleno = 6 (0x6), region = 192 }
 0x178   : > { %s1611_s23 = smov %s1603_s14 }
 0x179   : > { %s1612_s24 = smov %s1604_s5 }

// kernel: resnet_proto_forward.38
= control target key start
LH: loop header
LB: loop body
LE: loop exit
PB: predicated region body
PF: predicated region fallthrough
CT: control target
= control target key end

     0   :  { %s1131_s15 = smov 0   ;;  %s1133_s16 = smov 0   ;;  %s1322_s0 = inlined_call_operand.vmem [shape: bf16[16,256], index: 0, kind: input, shape index: {}]   ;;  %s1323_s1 = inlined_call_operand.vmem [shape: bf16[256,512], index: 1, kind: input, shape index: {}]   ;;  %s1324_s2 = inlined_call_operand.vmem [shape: f32[1,512], index: 2, kind: input, shape index: {}]   ;;  %s1325_s3 = inlined_call_operand.vmem [shape: f32[1,512], index: 3, kind: input, shape index: {}]   ;;  %s1326_s4 = inlined_call_operand.vmem [shape: f32[16,512], index: 4, kind: output, shape index: {}]  }
   0x1   :  { %s1135_s17 = smov 0   ;;  %s1137_s18 = smov 0  }
   0x2   :  { %s1139_s19 = smov 0  }
   0x3 LB: > { %s29_s20 = sadd.s32 1, %s1100_s18  ;;  %s920_s21 = sadd.s32 4294967295, %s1104_s19   ;;  %s1104_s19 = sphi %s1139_s19, %s14_s19   ;;  %s1100_s18 = sphi %s1137_s18, %s1331_s18   ;;  %s1096_s17 = sphi %s1135_s17, %s1330_s17   ;;  %s1092_s16 = sphi %s1133_s16, %s1329_s16   ;;  %s1088_s15 = sphi %s1131_s15, %s1328_s15  }
   0x4   : > { %p31_p0 = scmp.ge.s32.totalorder %s29_s20, 2  ;;  %p77_p1 = scmp.ne.s32.totalorder %s1092_s16, %s1088_s15 }
   0x5   : > { %p78_p2 = scmp.eq.s32.totalorder %s1104_s19, 0  ;;  %p161_p4 = scmp.eq.s32.totalorder %s920_s21, 1 }
   0x6   : > { %s1333_s20 = smov (%p31_p0, %s29_s20), 0  ;;  %s70_s23 = sadd.s32 1, %s1092_s16 }
   0x7   : > { %p79_p3 = por %p78_p2, %p77_p1  ;;  %s66_s22 = ssub.s32 %s1100_s18, %s1333_s20 }
   0x8   : > { %p68_p5 = scmp.eq.s32.totalorder %s66_s22, 0  ;;  %p1166_p6 = por %p161_p4, %p77_p1 }
   0x9   : > { %p924_p7 = scmp.ge.s32.totalorder %s1104_s19, 2 }
   0xa   : > { %s1171_s25 = scalar_select %p68_p5, %s1092_s16, %s70_s23  }
   0xb   : > { %198 = sbr.rel (%p924_p7) target bundleno = 36 (0x24), region = 20 }
  0x10   : > { %201 = sbr.rel (!%p79_p3) target bundleno = 36 (0x24), region = 24  ;;  %s203_s26 = sand.u32 (%p79_p3), 1, %s1092_s16  }
  0x11   : > { %s972_s27 = sshll.u32 (%p79_p3), %s1100_s18, 3  ;;  %s925_s28 = sshll.u32 (%p79_p3), %s203_s26, 8 }
  0x12   : > { %s1179_s5 = scalar_lea.vmem (%p79_p3), %s1323_s1, %s972_s27  ;;  %s1184_s6 = scalar_lea.vmem (%p79_p3), [#allocation2], %s925_s28 }
  0x13   : > { %v302_v0 = vld [vmem:[%s1179_s5] sm:$0xff] (%p79_p3)  ;;  %v304_v1 = vld [vmem:[%s1179_s5 + $0x10] sm:$0xff] (%p79_p3) }
  0x14   : > { %v306_v2 = vld [vmem:[%s1179_s5 + $0x20] sm:$0xff] (%p79_p3)  ;;  %303 = vst [vmem:[%s1184_s6] sm:$0xff] (%p79_p3), %v302_v0  ;;  %305 = vst [vmem:[%s1184_s6 + $0x8] sm:$0xff] (%p79_p3), %v304_v1  ;;  %v308_v3 = vld [vmem:[%s1179_s5 + $0x30] sm:$0xff] (%p79_p3) }
  0x15   : > { %307 = vst [vmem:[%s1184_s6 + $0x10] sm:$0xff] %v306_v2  ;;  %v310_v4 = vld [vmem:[%s1179_s5 + $0x40] sm:$0xff]  ;;  %v312_v5 = vld [vmem:[%s1179_s5 + $0x50] sm:$0xff]  ;;  %309 = vst [vmem:[%s1184_s6 + $0x18] sm:$0xff] %v308_v3 }
  0x16   : > { %311 = vst [vmem:[%s1184_s6 + $0x20] sm:$0xff] %v310_v4  ;;  %313 = vst [vmem:[%s1184_s6 + $0x28] sm:$0xff] %v312_v5  ;;  %v314_v6 = vld [vmem:[%s1179_s5 + $0x60] sm:$0xff]  ;;  %v316_v7 = vld [vmem:[%s1179_s5 + $0x70] sm:$0xff] }
  0x17   : > { %v318_v8 = vld [vmem:[%s1179_s5 + $0x80] sm:$0xff]  ;;  %315 = vst [vmem:[%s1184_s6 + $0x30] sm:$0xff] %v314_v6  ;;  %317 = vst [vmem:[%s1184_s6 + $0x38] sm:$0xff] %v316_v7  ;;  %v320_v9 = vld [vmem:[%s1179_s5 + $0x90] sm:$0xff] }
  0x18   : > { %319 = vst [vmem:[%s1184_s6 + $0x40] sm:$0xff] %v318_v8  ;;  %v322_v10 = vld [vmem:[%s1179_s5 + $0xa0] sm:$0xff]  ;;  %v324_v11 = vld [vmem:[%s1179_s5 + $0xb0] sm:$0xff]  ;;  %321 = vst [vmem:[%s1184_s6 + $0x48] sm:$0xff] %v320_v9 }
  0x19   : > { %323 = vst [vmem:[%s1184_s6 + $0x50] sm:$0xff] %v322_v10  ;;  %325 = vst [vmem:[%s1184_s6 + $0x58] sm:$0xff] %v324_v11  ;;  %v326_v12 = vld [vmem:[%s1179_s5 + $0xc0] sm:$0xff]  ;;  %v328_v13 = vld [vmem:[%s1179_s5 + $0xd0] sm:$0xff] }
  0x1a   : > { %v330_v14 = vld [vmem:[%s1179_s5 + $0xe0] sm:$0xff]  ;;  %327 = vst [vmem:[%s1184_s6 + $0x60] sm:$0xff] %v326_v12  ;;  %329 = vst [vmem:[%s1184_s6 + $0x68] sm:$0xff] %v328_v13  ;;  %v332_v15 = vld [vmem:[%s1179_s5 + $0xf0] sm:$0xff] }
  0x1b   : > { %331 = vst [vmem:[%s1184_s6 + $0x70] sm:$0xff] %v330_v14  ;;  %v334_v16 = vld [vmem:[%s1179_s5 + $0x100] sm:$0xff]  ;;  %v336_v17 = vld [vmem:[%s1179_s5 + $0x110] sm:$0xff]  ;;  %333 = vst [vmem:[%s1184_s6 + $0x78] sm:$0xff] %v332_v15 }
  0x1c   : > { %335 = vst [vmem:[%s1184_s6 + $0x80] sm:$0xff] %v334_v16  ;;  %337 = vst [vmem:[%s1184_s6 + $0x88] sm:$0xff] %v336_v17  ;;  %v338_v18 = vld [vmem:[%s1179_s5 + $0x120] sm:$0xff]  ;;  %v340_v19 = vld [vmem:[%s1179_s5 + $0x130] sm:$0xff] }
  0x1d   : > { %v342_v20 = vld [vmem:[%s1179_s5 + $0x140] sm:$0xff]  ;;  %339 = vst [vmem:[%s1184_s6 + $0x90] sm:$0xff] %v338_v18  ;;  %341 = vst [vmem:[%s1184_s6 + $0x98] sm:$0xff] %v340_v19  ;;  %v344_v21 = vld [vmem:[%s1179_s5 + $0x150] sm:$0xff] }
  0x1e   : > { %343 = vst [vmem:[%s1184_s6 + $0xa0] sm:$0xff] %v342_v20  ;;  %v346_v22 = vld [vmem:[%s1179_s5 + $0x160] sm:$0xff]  ;;  %v348_v23 = vld [vmem:[%s1179_s5 + $0x170] sm:$0xff]  ;;  %345 = vst [vmem:[%s1184_s6 + $0xa8] sm:$0xff] %v344_v21 }
  0x1f   : > { %347 = vst [vmem:[%s1184_s6 + $0xb0] sm:$0xff] %v346_v22  ;;  %349 = vst [vmem:[%s1184_s6 + $0xb8] sm:$0xff] %v348_v23  ;;  %v350_v24 = vld [vmem:[%s1179_s5 + $0x180] sm:$0xff]  ;;  %v352_v25 = vld [vmem:[%s1179_s5 + $0x190] sm:$0xff] }
  0x20   : > { %v354_v26 = vld [vmem:[%s1179_s5 + $0x1a0] sm:$0xff]  ;;  %351 = vst [vmem:[%s1184_s6 + $0xc0] sm:$0xff] %v350_v24  ;;  %353 = vst [vmem:[%s1184_s6 + $0xc8] sm:$0xff] %v352_v25  ;;  %v356_v27 = vld [vmem:[%s1179_s5 + $0x1b0] sm:$0xff] }
  0x21   : > { %355 = vst [vmem:[%s1184_s6 + $0xd0] sm:$0xff] %v354_v26  ;;  %v358_v28 = vld [vmem:[%s1179_s5 + $0x1c0] sm:$0xff]  ;;  %v360_v29 = vld [vmem:[%s1179_s5 + $0x1d0] sm:$0xff]  ;;  %357 = vst [vmem:[%s1184_s6 + $0xd8] sm:$0xff] %v356_v27 }
  0x22   : > { %359 = vst [vmem:[%s1184_s6 + $0xe0] sm:$0xff] %v358_v28  ;;  %361 = vst [vmem:[%s1184_s6 + $0xe8] sm:$0xff] %v360_v29  ;;  %v362_v30 = vld [vmem:[%s1179_s5 + $0x1e0] sm:$0xff]  ;;  %v364_v31 = vld [vmem:[%s1179_s5 + $0x1f0] sm:$0xff] }
  0x23   : > { %363 = vst [vmem:[%s1184_s6 + $0xf0] sm:$0xff] %v362_v30  ;;  %365 = vst [vmem:[%s1184_s6 + $0xf8] sm:$0xff] %v364_v31 }
  0x24 PF: > { %p928_p8 = scmp.ge.s32.totalorder %s1104_s19, 1  ;;  %p386_p9 = scmp.lt.s32.totalorder %s1104_s19, 3 }
  0x26   : > { %p387_p10 = pnand %p928_p8, %p386_p9 }
  0x27   : > { %s393_s7 = sand.u32 (!%p387_p10), 1, %s1088_s15   ;;  %s931_s14 = sshll.u32 (!%p387_p10), %s1096_s17, 1 }
  0x28   : > { %390 = sbr.rel (%p387_p10) target bundleno = 322 (0x142), region = 70  ;;  %s929_s8 = sshll.u32 (!%p387_p10), %s393_s7, 8 }
  0x29   : > { %s1255_s11 = scalar_lea.vmem (!%p387_p10), [#allocation2], %s929_s8  ;;  %p450_p11 = scmp.lt.s32.totalorder (!%p387_p10), %s931_s14, 3 }
  0x2a   : > { %s930_s29 = sshll.u32 (!%p387_p10), %s393_s7, 5 }
  0x2b   : > { %s434_s30 = scalar_lea.vmem (!%p387_p10), [#allocation3], %s930_s29 }
  0x2d   : > { %v1065_v32 = vld [vmem:[%s1322_s0 + $0x4] ss:$8 sps:$4 sm:$0xff]   ;;  %v1015_v33 = vld [vmem:[%s1255_s11 + $0x74] ss:$8 sps:$4 sm:$0xff]   ;;  %v1017_v34 = vld [vmem:[%s1255_s11 + $0x70] ss:$8 sps:$4 sm:$0xff]   ;;  %v737_v2 = vlaneseq }
  0x2e   : > { %709 = vmatprep.mubr.bf16.mxu0 %v1065_v32  ;;  %677 = vmatprep.subr.bf16.mxu0 %v1015_v33  ;;  %v1018_v35 = vld [vmem:[%s1255_s11 + $0x64] ss:$8 sps:$4 sm:$0xff]   ;;  %v1020_v36 = vld [vmem:[%s1255_s11 + $0x60] ss:$8 sps:$4 sm:$0xff]   ;;  %v1021_v37 = vld [vmem:[%s1255_s11 + $0x54] ss:$8 sps:$4 sm:$0xff]  }
  0x2f   : > { %678 = vmatpush1.bf16.msra.mxu0 %v1017_v34  ;;  %v1023_v38 = vld [vmem:[%s1255_s11 + $0x50] ss:$8 sps:$4 sm:$0xff]   ;;  %v1024_v39 = vld [vmem:[%s1255_s11 + $0x44] ss:$8 sps:$4 sm:$0xff]   ;;  %v1026_v40 = vld [vmem:[%s1255_s11 + $0x40] ss:$8 sps:$4 sm:$0xff]  }
  0x30   : > { %679 = vmatprep.subr.bf16.mxu0 %v1018_v35  ;;  %v1027_v41 = vld [vmem:[%s1255_s11 + $0x34] ss:$8 sps:$4 sm:$0xff]   ;;  %v1029_v42 = vld [vmem:[%s1255_s11 + $0x30] ss:$8 sps:$4 sm:$0xff]   ;;  %v1030_v43 = vld [vmem:[%s1255_s11 + $0x24] ss:$8 sps:$4 sm:$0xff]  }
  0x31   : > { %v1032_v44 = vld [vmem:[%s1255_s11 + $0x20] ss:$8 sps:$4 sm:$0xff]   ;;  %v1033_v45 = vld [vmem:[%s1255_s11 + $0x14] ss:$8 sps:$4 sm:$0xff]   ;;  %v1035_v46 = vld [vmem:[%s1255_s11 + $0x10] ss:$8 sps:$4 sm:$0xff]  }
  0x32   : > { %v1036_v47 = vld [vmem:[%s1255_s11 + $0x4] ss:$8 sps:$4 sm:$0xff]   ;;  %v1038_v48 = vld [vmem:[%s1255_s11] ss:$8 sps:$4 sm:$0xff]   ;;  %v1039_v49 = vld [vmem:[%s1255_s11 + $0xf4] ss:$8 sps:$4 sm:$0xff]  }
  0x33   : > { %680 = vmatpush1.bf16.msra.mxu0 %v1020_v36  ;;  %v1041_v50 = vld [vmem:[%s1255_s11 + $0xf0] ss:$8 sps:$4 sm:$0xff]   ;;  %v1042_v51 = vld [vmem:[%s1255_s11 + $0xe4] ss:$8 sps:$4 sm:$0xff]   ;;  %v1044_v52 = vld [vmem:[%s1255_s11 + $0xe0] ss:$8 sps:$4 sm:$0xff]  }
  0x34   : > { %681 = vmatprep.subr.bf16.mxu0 %v1021_v37  ;;  %v1045_v53 = vld [vmem:[%s1255_s11 + $0xd4] ss:$8 sps:$4 sm:$0xff]   ;;  %v1047_v54 = vld [vmem:[%s1255_s11 + $0xd0] ss:$8 sps:$4 sm:$0xff]   ;;  %v1048_v55 = vld [vmem:[%s1255_s11 + $0xc4] ss:$8 sps:$4 sm:$0xff]  }
  0x35   : > { %v1050_v56 = vld [vmem:[%s1255_s11 + $0xc0] ss:$8 sps:$4 sm:$0xff]   ;;  %v1051_v57 = vld [vmem:[%s1255_s11 + $0xb4] ss:$8 sps:$4 sm:$0xff]   ;;  %v1053_v58 = vld [vmem:[%s1255_s11 + $0xb0] ss:$8 sps:$4 sm:$0xff]  }
  0x36   : > { %v1054_v59 = vld [vmem:[%s1255_s11 + $0xa4] ss:$8 sps:$4 sm:$0xff]   ;;  %v1056_v60 = vld [vmem:[%s1255_s11 + $0xa0] ss:$8 sps:$4 sm:$0xff]   ;;  %v1057_v61 = vld [vmem:[%s1255_s11 + $0x94] ss:$8 sps:$4 sm:$0xff]  }
  0x37   : > { %682 = vmatpush1.bf16.msra.mxu0 %v1023_v38  ;;  %v1059_v62 = vld [vmem:[%s1255_s11 + $0x90] ss:$8 sps:$4 sm:$0xff]   ;;  %v1060_v63 = vld [vmem:[%s1255_s11 + $0x84] ss:$8 sps:$4 sm:$0xff]   ;;  %v1062_v0 = vld [vmem:[%s1255_s11 + $0x80] ss:$8 sps:$4 sm:$0xff]  }
  0x38   : > { %683 = vmatprep.subr.bf16.mxu0 %v1024_v39  ;;  %v1063_v1 = vld [vmem:[%s1322_s0] ss:$8 sps:$4 sm:$0xff]   ;;  %s1335_s14 = smov (!%p450_p11, %s931_s14), 3  ;;  %v738_v3 = vshrl.u32 %v737_v2, 7  ;;  %s973_s15 = sshll.u32 (%p1166_p6), %s1096_s17, 4 }
  0x39   : > { %s452_s23 = scalar_lea.vmem %s1324_s2, %s1335_s14  ;;  %s457_s28 = scalar_lea.vmem %s1325_s3, %s1335_s14 }
  0x3a   : > { %v739_v4 = vsub.s32 0, %v738_v3  ;;  %v735_v5 = vld [vmem:[%s452_s23] sm:$0x3]  ;;  %v743_v6 = vsub.s32 1, %v738_v3  ;;  %s783_s7 = scalar_lea.vmem (%p1166_p6), %s1326_s4, %s973_s15 }
  0x3b   : > { %684 = vmatpush1.bf16.msra.mxu0 %v1026_v40  ;;  %v751_v7 = vld [vmem:[%s457_s28] sm:$0x3] }
  0x3c   : > { %685 = vmatprep.subr.bf16.mxu0 %v1027_v41  ;;  %v740_v8 = vrot.slane %v735_v5, %v739_v4  ;;  %v756_v10 = vrot.slane %v751_v7, %v739_v4  ;;  %v744_v11 = vrot.slane %v735_v5, %v743_v6  ;;  %v760_v14 = vrot.slane %v751_v7, %v743_v6 }
  0x3f   : > { %686 = vmatpush1.bf16.msra.mxu0 %v1029_v42 }
  0x40   : > { %687 = vmatprep.subr.bf16.mxu0 %v1030_v43 }
  0x43   : > { %688 = vmatpush1.bf16.msra.mxu0 %v1032_v44 }
  0x44   : > { %689 = vmatprep.subr.bf16.mxu0 %v1033_v45 }
  0x47   : > { %690 = vmatpush1.bf16.msra.mxu0 %v1035_v46 }
  0x48   : > { %691 = vmatprep.subr.bf16.mxu0 %v1036_v47 }
  0x4b   : > { %692 = vmatpush1.bf16.msra.mxu0 %v1038_v48 }
  0x4c   : > { %693 = vmatprep.subr.bf16.mxu0 %v1039_v49 }
  0x4f   : > { %694 = vmatpush2.bf16.msra.mxu0 %v1041_v50 }
  0x50   : > { %695 = vmatprep.subr.bf16.mxu0 %v1042_v51 }
  0x53   : > { %696 = vmatpush2.bf16.msra.mxu0 %v1044_v52 }
  0x54   : > { %697 = vmatprep.subr.bf16.mxu0 %v1045_v53 }
  0x57   : > { %698 = vmatpush2.bf16.msra.mxu0 %v1047_v54 }
  0x58   : > { %699 = vmatprep.subr.bf16.mxu0 %v1048_v55 }
  0x5b   : > { %700 = vmatpush2.bf16.msra.mxu0 %v1050_v56 }
  0x5c   : > { %701 = vmatprep.subr.bf16.mxu0 %v1051_v57 }
  0x5f   : > { %702 = vmatpush2.bf16.msra.mxu0 %v1053_v58 }
  0x60   : > { %703 = vmatprep.subr.bf16.mxu0 %v1054_v59 }
  0x63   : > { %704 = vmatpush2.bf16.msra.mxu0 %v1056_v60 }
  0x64   : > { %705 = vmatprep.subr.bf16.mxu0 %v1057_v61 }
  0x67   : > { %706 = vmatpush2.bf16.msra.mxu0 %v1059_v62 }
  0x68   : > { %707 = vmatprep.subr.bf16.mxu0 %v1060_v63 }
  0x6b   : > { %708 = vmatpush2.bf16.msra.mxu0 %v1062_v0 }
  0x6e   : > { %710 = vmatmul.mubr.bf16.vlgmr.msra.gmra.mxu0 %v1063_v1 }
 0x12e   : > { %v711_v9 = vpop.f32.mrf.mxu0 }
 0x12f   : > { %v747_v13 = vmul.f32 %v740_v8, %v711_v9 }
 0x130   : > { %v713_v12 = vpop.f32.mrf.mxu0 }
 0x131   : > { %v763_v16 = vadd.f32 %v756_v10, %v747_v13  ;;  %v748_v17 = vmul.f32 %v744_v11, %v713_v12 }
 0x132   : > { %v715_v15 = vpop.f32.mrf.mxu0 }
 0x133   : > { %767 = vst [vmem:[%s434_s30] sm:$0xff] %v763_v16  ;;  %v764_v19 = vadd.f32 %v760_v14, %v748_v17  ;;  %v749_v20 = vmul.f32 %v740_v8, %v715_v15 }
 0x134   : > { %v717_v18 = vpop.f32.mrf.mxu0 }
 0x135   : > { %768 = vst [vmem:[%s434_s30 + $0x8] sm:$0xff] %v764_v19  ;;  %v765_v21 = vadd.f32 %v756_v10, %v749_v20  ;;  %v750_v22 = vmul.f32 %v744_v11, %v717_v18  ;;  %777 = sbr.rel (!%p1166_p6) target bundleno = 322 (0x142), region = 86 }
 0x137   : > { %769 = vst [vmem:[%s434_s30 + $0x10] sm:$0xff] %v765_v21  ;;  %v766_v23 = vadd.f32 %v760_v14, %v750_v22 }
 0x139   : > { %770 = vst [vmem:[%s434_s30 + $0x18] sm:$0xff] %v766_v23 }
 0x13a   : > { %v796_v24 = vld [vmem:[%s434_s30] sm:$0xff] }
 0x13b   : > { %797 = vst [vmem:[%s783_s7] sm:$0xff] %v796_v24 }
 0x13c   : > { %v798_v25 = vld [vmem:[%s434_s30 + $0x8] sm:$0xff] }
 0x13d   : > { %799 = vst [vmem:[%s783_s7 + $0x8] sm:$0xff] %v798_v25 }
 0x13e   : > { %v800_v26 = vld [vmem:[%s434_s30 + $0x10] sm:$0xff] }
 0x13f   : > { %801 = vst [vmem:[%s783_s7 + $0x20] sm:$0xff] %v800_v26 }
 0x140   : > { %v802_v27 = vld [vmem:[%s434_s30 + $0x18] sm:$0xff] }
 0x141   : > { %803 = vst [vmem:[%s783_s7 + $0x28] sm:$0xff] %v802_v27 }
 0x142 PF: > { %s14_s19 = sadd.s32 1, %s1104_s19   ;;  %s1328_s15 = smov %s1092_s16 }
 0x143   : > { %p11_p12 = scmp.ge.s32.totalorder %s14_s19, 4   ;;  %s1329_s16 = smov %s1171_s25 }
 0x144   : > { %s1330_s17 = smov %s1100_s18  ;;  %s1331_s18 = smov %s1333_s20 }
 0x145   :  { %13 = sbr.rel (!%p11_p12) target bundleno = 3 (0x3), region = 149 }

// kernel: resnet_proto_forward.39
= control target key start
LH: loop header
LB: loop body
LE: loop exit
PB: predicated region body
PF: predicated region fallthrough
CT: control target
= control target key end

     0   :  { %s1389_s18 = smov 0   ;;  %s1391_s19 = smov 0   ;;  %s1728_s0 = inlined_call_operand.vmem [shape: bf16[16,4608], index: 0, kind: input, shape index: {}]   ;;  %s1729_s1 = inlined_call_operand.vmem [shape: bf16[4608,512], index: 1, kind: input, shape index: {}]   ;;  %s1730_s2 = inlined_call_operand.vmem [shape: f32[1,512], index: 2, kind: input, shape index: {}]   ;;  %s1731_s3 = inlined_call_operand.vmem [shape: f32[1,512], index: 3, kind: input, shape index: {}]   ;;  %s1732_s4 = inlined_call_operand.vmem [shape: f32[16,512], index: 4, kind: input, shape index: {}]   ;;  %s1733_s5 = inlined_call_operand.vmem [shape: f32[16,512], index: 5, kind: output, shape index: {}]  }
   0x1   :  { %s1393_s20 = smov 0   ;;  %s1395_s21 = smov 0  }
   0x2   :  { %s1397_s22 = smov 0   ;;  %s1399_s23 = smov 0  }
   0x3   :  { %s1401_s24 = smov 0   ;;  %s1403_s25 = smov 0  }
   0x4   :  { %s1405_s26 = smov 0   ;;  %s1407_s27 = smov 0  }
   0x5   :  { %s1409_s28 = smov 0  }
   0x6 LB: > { %1737 = sst [smem:[#allocation6_spill]] %s1336_s23  ;;  %s1063_s29 = sadd.s32 4294967295, %s1356_s28   ;;  %s1356_s28 = sphi %s1409_s28, %s15_s28   ;;  %s1352_s27 = sphi %s1407_s27, %s1760_s27   ;;  %s1348_s26 = sphi %s1405_s26, %s1759_s26   ;;  %s1344_s25 = sphi %s1403_s25, %s1758_s25   ;;  %s1340_s24 = sphi %s1401_s24, %s1757_s24   ;;  %s1336_s23 = sphi %s1399_s23, %s1750_s23   ;;  %s1332_s22 = sphi %s1397_s22, %s1749_s22   ;;  %s1328_s21 = sphi %s1395_s21, %s1756_s21   ;;  %s1324_s20 = sphi %s1393_s20, %s1755_s20   ;;  %s1320_s19 = sphi %s1391_s19, %s1754_s19   ;;  %s1316_s18 = sphi %s1389_s18, %s1753_s18  }
   0x7   : > { %s27_s30 = sadd.s32 1, %s1348_s26  ;;  %s30_s6 = sadd.s32 1, %s1352_s27 }
   0x8   : > { %p28_p0 = scmp.ge.s32.totalorder %s27_s30, 18  ;;  %s43_s7 = sadd.s32 1, %s1336_s23 }
   0x9   : > { %p50_p1 = scmp.ne.s32.totalorder %s1336_s23, %s1332_s22  ;;  %p51_p2 = scmp.eq.s32.totalorder %s1356_s28, 0 }
   0xa   : > { %s1762_s30 = smov (%p28_p0, %s27_s30), 0  ;;  %s1764_s6 = smov (!%p28_p0, %s30_s6), %s1352_s27 }
   0xb   : > { %1738 = sst [smem:[#allocation7_spill]] %s1762_s30  ;;  %s39_s8 = ssub.s32 %s1348_s26, %s1762_s30 }
   0xc   : > { %p32_p3 = scmp.ge.s32.totalorder %s1764_s6, 2  ;;  %p41_p4 = scmp.eq.s32.totalorder %s39_s8, 0 }
   0xd   : > { %p1458_p5 = por %p51_p2, %p50_p1  ;;  %s71_s10 = sadd.s32 1, %s1328_s21 }
   0xe   : > { %s1766_s6 = smov (%p32_p3, %s1764_s6), 0  ;;  %p78_p6 = scmp.ne.s32.totalorder %s1328_s21, %s1324_s20 }
   0xf   : > { %1740 = sst [smem:[#allocation8_spill]] %s1766_s6  ;;  %s67_s12 = ssub.s32 %s1352_s27, %s1766_s6 }
  0x10   : > { %s1466_s11 = scalar_select %p41_p4, %s1336_s23, %s43_s7  }
  0x11   : > { %s68_s13 = sor.u32 %s67_s12, %s39_s8  ;;  %p149_p7 = scmp.eq.s32.totalorder %s67_s12, 0 }
  0x12   : > { %1741 = sst [smem:[#allocation9_spill]] %s1466_s11  ;;  %p69_p8 = scmp.eq.s32.totalorder %s68_s13, 0 }
  0x13   : > { %p1474_p9 = por %p78_p6, %p51_p2  ;;  %s151_s15 = sadd.s32 1, %s1320_s19 }
  0x14   : > { %p158_p10 = scmp.ne.s32.totalorder %s1320_s19, %s1316_s18  ;;  %p190_p12 = scmp.eq.s32.totalorder %s1063_s29, 35 }
  0x15   : > { %s1482_s16 = scalar_select %p69_p8, %s1328_s21, %s71_s10  }
  0x16   : > { %s1485_s17 = scalar_select %p149_p7, %s1320_s19, %s151_s15  }
  0x17   : > { %1743 = sst [smem:[#allocation10_spill]] %s1482_s16  ;;  %p1489_p11 = por %p158_p10, %p51_p2 }
  0x18   : > { %1744 = sst [smem:[#allocation11_spill]] %s1485_s17  ;;  %p1493_p13 = por %p190_p12, %p158_p10 }
  0x19   : > { %p1066_p0 = scmp.ge.s32.totalorder %s1356_s28, 36 }
  0x1b   : > { %212 = sbr.rel (%p1066_p0) target bundleno = 66 (0x42), region = 16 }
  0x20   : > { %215 = sbr.rel (!%p1458_p5) target bundleno = 37 (0x25), region = 20  ;;  %s217_s10 = sand.u32 (%p1458_p5), 1, %s1336_s23  }
  0x21   : > { %s1126_s12 = sshll.u32 (%p1458_p5), %s1348_s26, 3  ;;  %s1067_s13 = sshll.u32 (%p1458_p5), %s217_s10, 4 }
  0x22   : > { %s225_s30 = scalar_lea.vmem (%p1458_p5), %s1728_s0, %s1126_s12  ;;  %s219_s29 = scalar_lea.vmem (%p1458_p5), [#allocation2], %s1067_s13 }
  0x23   : > { %v256_v0 = vld [vmem:[%s225_s30] sm:$0xff] (%p1458_p5)  ;;  %v258_v1 = vld [vmem:[%s225_s30 + $0x90] sm:$0xff] (%p1458_p5) }
  0x24   : > { %257 = vst [vmem:[%s219_s29] sm:$0xff] (%p1458_p5), %v256_v0  ;;  %259 = vst [vmem:[%s219_s29 + $0x8] sm:$0xff] (%p1458_p5), %v258_v1 }
  0x25 PF: > { %265 = sbr.rel (!%p1474_p9) target bundleno = 60 (0x3c), region = 58  ;;  %s267_s9 = sand.u32 (%p1474_p9), 1, %s1328_s21  }
  0x26   : > { %s1072_s11 = sshll.u32 (%p1474_p9), %s1352_s27, 1  ;;  %s1070_s23 = sshll.u32 (%p1474_p9), %s267_s9, 8 }
  0x27   : > { %s1127_s10 = sshll.u32 (%p1474_p9), %s1348_s26, 7  ;;  %s1518_s14 = scalar_lea.vmem (%p1474_p9), [#allocation3], %s1070_s23 }
  0x28   : > { %s273_s16 = sadd.s32 (%p1474_p9), %s1127_s10, %s1072_s11 }
  0x29   : > { %s1074_s17 = sshll.u32 (%p1474_p9), %s273_s16, 2 }
  0x2a   : > { %s1513_s30 = scalar_lea.vmem %s1729_s1, %s1074_s17 }
  0x2b   : > { %v366_v2 = vld [vmem:[%s1513_s30] sm:$0xff]  ;;  %v368_v3 = vld [vmem:[%s1513_s30 + $0x10] sm:$0xff] }
  0x2c   : > { %v370_v4 = vld [vmem:[%s1513_s30 + $0x20] sm:$0xff]  ;;  %367 = vst [vmem:[%s1518_s14] sm:$0xff] %v366_v2  ;;  %369 = vst [vmem:[%s1518_s14 + $0x8] sm:$0xff] %v368_v3  ;;  %v372_v5 = vld [vmem:[%s1513_s30 + $0x30] sm:$0xff] }
  0x2d   : > { %371 = vst [vmem:[%s1518_s14 + $0x10] sm:$0xff] %v370_v4  ;;  %v374_v6 = vld [vmem:[%s1513_s30 + $0x40] sm:$0xff]  ;;  %v376_v7 = vld [vmem:[%s1513_s30 + $0x50] sm:$0xff]  ;;  %373 = vst [vmem:[%s1518_s14 + $0x18] sm:$0xff] %v372_v5 }
  0x2e   : > { %375 = vst [vmem:[%s1518_s14 + $0x20] sm:$0xff] %v374_v6  ;;  %377 = vst [vmem:[%s1518_s14 + $0x28] sm:$0xff] %v376_v7  ;;  %v378_v8 = vld [vmem:[%s1513_s30 + $0x60] sm:$0xff]  ;;  %v380_v9 = vld [vmem:[%s1513_s30 + $0x70] sm:$0xff] }
  0x2f   : > { %v382_v10 = vld [vmem:[%s1513_s30 + $0x80] sm:$0xff]  ;;  %379 = vst [vmem:[%s1518_s14 + $0x30] sm:$0xff] %v378_v8  ;;  %381 = vst [vmem:[%s1518_s14 + $0x38] sm:$0xff] %v380_v9  ;;  %v384_v11 = vld [vmem:[%s1513_s30 + $0x90] sm:$0xff] }
  0x30   : > { %383 = vst [vmem:[%s1518_s14 + $0x40] sm:$0xff] %v382_v10  ;;  %v386_v12 = vld [vmem:[%s1513_s30 + $0xa0] sm:$0xff]  ;;  %v388_v13 = vld [vmem:[%s1513_s30 + $0xb0] sm:$0xff]  ;;  %385 = vst [vmem:[%s1518_s14 + $0x48] sm:$0xff] %v384_v11 }
  0x31   : > { %387 = vst [vmem:[%s1518_s14 + $0x50] sm:$0xff] %v386_v12  ;;  %389 = vst [vmem:[%s1518_s14 + $0x58] sm:$0xff] %v388_v13  ;;  %v390_v14 = vld [vmem:[%s1513_s30 + $0xc0] sm:$0xff]  ;;  %v392_v15 = vld [vmem:[%s1513_s30 + $0xd0] sm:$0xff] }
  0x32   : > { %v394_v16 = vld [vmem:[%s1513_s30 + $0xe0] sm:$0xff]  ;;  %391 = vst [vmem:[%s1518_s14 + $0x60] sm:$0xff] %v390_v14  ;;  %393 = vst [vmem:[%s1518_s14 + $0x68] sm:$0xff] %v392_v15  ;;  %v396_v17 = vld [vmem:[%s1513_s30 + $0xf0] sm:$0xff] }
  0x33   : > { %395 = vst [vmem:[%s1518_s14 + $0x70] sm:$0xff] %v394_v16  ;;  %v398_v18 = vld [vmem:[%s1513_s30 + $0x100] sm:$0xff]  ;;  %v400_v19 = vld [vmem:[%s1513_s30 + $0x110] sm:$0xff]  ;;  %397 = vst [vmem:[%s1518_s14 + $0x78] sm:$0xff] %v396_v17 }
  0x34   : > { %399 = vst [vmem:[%s1518_s14 + $0x80] sm:$0xff] %v398_v18  ;;  %401 = vst [vmem:[%s1518_s14 + $0x88] sm:$0xff] %v400_v19  ;;  %v402_v20 = vld [vmem:[%s1513_s30 + $0x120] sm:$0xff]  ;;  %v404_v21 = vld [vmem:[%s1513_s30 + $0x130] sm:$0xff] }
  0x35   : > { %v406_v22 = vld [vmem:[%s1513_s30 + $0x140] sm:$0xff]  ;;  %403 = vst [vmem:[%s1518_s14 + $0x90] sm:$0xff] %v402_v20  ;;  %405 = vst [vmem:[%s1518_s14 + $0x98] sm:$0xff] %v404_v21  ;;  %v408_v23 = vld [vmem:[%s1513_s30 + $0x150] sm:$0xff] }
  0x36   : > { %407 = vst [vmem:[%s1518_s14 + $0xa0] sm:$0xff] %v406_v22  ;;  %v410_v24 = vld [vmem:[%s1513_s30 + $0x160] sm:$0xff]  ;;  %v412_v25 = vld [vmem:[%s1513_s30 + $0x170] sm:$0xff]  ;;  %409 = vst [vmem:[%s1518_s14 + $0xa8] sm:$0xff] %v408_v23 }
  0x37   : > { %411 = vst [vmem:[%s1518_s14 + $0xb0] sm:$0xff] %v410_v24  ;;  %413 = vst [vmem:[%s1518_s14 + $0xb8] sm:$0xff] %v412_v25  ;;  %v414_v26 = vld [vmem:[%s1513_s30 + $0x180] sm:$0xff]  ;;  %v416_v27 = vld [vmem:[%s1513_s30 + $0x190] sm:$0xff] }
  0x38   : > { %v418_v28 = vld [vmem:[%s1513_s30 + $0x1a0] sm:$0xff]  ;;  %415 = vst [vmem:[%s1518_s14 + $0xc0] sm:$0xff] %v414_v26  ;;  %417 = vst [vmem:[%s1518_s14 + $0xc8] sm:$0xff] %v416_v27  ;;  %v420_v29 = vld [vmem:[%s1513_s30 + $0x1b0] sm:$0xff] }
  0x39   : > { %419 = vst [vmem:[%s1518_s14 + $0xd0] sm:$0xff] %v418_v28  ;;  %v422_v30 = vld [vmem:[%s1513_s30 + $0x1c0] sm:$0xff]  ;;  %v424_v31 = vld [vmem:[%s1513_s30 + $0x1d0] sm:$0xff]  ;;  %421 = vst [vmem:[%s1518_s14 + $0xd8] sm:$0xff] %v420_v29 }
  0x3a   : > { %423 = vst [vmem:[%s1518_s14 + $0xe0] sm:$0xff] %v422_v30  ;;  %425 = vst [vmem:[%s1518_s14 + $0xe8] sm:$0xff] %v424_v31  ;;  %v426_v32 = vld [vmem:[%s1513_s30 + $0x1e0] sm:$0xff]  ;;  %v428_v33 = vld [vmem:[%s1513_s30 + $0x1f0] sm:$0xff] }
  0x3b   : > { %427 = vst [vmem:[%s1518_s14 + $0xf0] sm:$0xff] %v426_v32  ;;  %429 = vst [vmem:[%s1518_s14 + $0xf8] sm:$0xff] %v428_v33 }
  0x3c PF: > { %451 = sbr.rel (!%p1489_p11) target bundleno = 66 (0x42), region = 104  ;;  %s453_s23 = sand.u32 (%p1489_p11), 1, %s1320_s19  }
  0x3d   : > { %s1128_s11 = sshll.u32 (%p1489_p11), %s1352_s27, 4  ;;  %s1075_s16 = sshll.u32 (%p1489_p11), %s453_s23, 5 }
  0x3e   : > { %s461_s15 = scalar_lea.vmem (%p1489_p11), %s1732_s4, %s1128_s11  ;;  %s455_s29 = scalar_lea.vmem (%p1489_p11), [#allocation4], %s1075_s16 }
  0x3f   : > { %v474_v34 = vld [vmem:[%s461_s15] sm:$0xff] (%p1489_p11)  ;;  %v476_v35 = vld [vmem:[%s461_s15 + $0x8] sm:$0xff] (%p1489_p11) }
  0x40   : > { %v478_v36 = vld [vmem:[%s461_s15 + $0x20] sm:$0xff] (%p1489_p11)  ;;  %475 = vst [vmem:[%s455_s29] sm:$0xff] (%p1489_p11), %v474_v34  ;;  %477 = vst [vmem:[%s455_s29 + $0x8] sm:$0xff] (%p1489_p11), %v476_v35  ;;  %v480_v37 = vld [vmem:[%s461_s15 + $0x28] sm:$0xff] (%p1489_p11) }
  0x41   : > { %479 = vst [vmem:[%s455_s29 + $0x10] sm:$0xff] %v478_v36  ;;  %481 = vst [vmem:[%s455_s29 + $0x18] sm:$0xff] %v480_v37 }
  0x42 PF: > { %p1078_p1 = scmp.ge.s32.totalorder %s1356_s28, 1  ;;  %p486_p2 = scmp.lt.s32.totalorder %s1356_s28, 37 }
  0x44   : > { %p487_p3 = pnand %p1078_p1, %p486_p2 }
  0x45   : > { %s493_s7 = sand.u32 (!%p487_p3), 1, %s1332_s22   ;;  %s500_s9 = sand.u32 (!%p487_p3), 1, %s1324_s20  }
  0x46   : > { %490 = sbr.rel (%p487_p3) target bundleno = 380 (0x17c), region = 127  ;;  %s1592_s10 = sshll.u32 (!%p487_p3), %s493_s7, 4 }
  0x47   : > { %s1080_s6 = sshll.u32 (!%p487_p3), %s500_s9, 8  ;;  %s507_s12 = sand.u32 (!%p487_p3), 1, %s1316_s18  }
  0x48   : > { %s1083_s30 = sshll.u32 (!%p487_p3), %s1344_s25, 1  ;;  %s1081_s14 = sshll.u32 (!%p487_p3), %s507_s12, 5 }
  0x49   : > { %p554_p4 = scmp.lt.s32.totalorder (!%p487_p3), %s1083_s30, 3  ;;  %s495_s22 = scalar_lea.vmem (!%p487_p3), [#allocation2], %s1592_s10 }
  0x4a   : > { %s1607_s15 = scalar_lea.vmem (!%p487_p3), [#allocation3], %s1080_s6  ;;  %s1609_s29 = scalar_lea.vmem (!%p487_p3), [#allocation4], %s1081_s14 }
  0x4b   : > { %s1768_s30 = smov (!%p554_p4, %s1083_s30), 3  ;;  %s1611_s18 = scalar_lea.vmem [#allocation5], %s1081_s14 }
  0x4c   : > { %s556_s16 = scalar_lea.vmem %s1730_s2, %s1768_s30  ;;  %s561_s20 = scalar_lea.vmem %s1731_s3, %s1768_s30 }
  0x4d   : > { %p1085_p5 = scmp.ne.s32.totalorder %s1340_s24, 0 }
  0x4f   : > { %570 = sbr.rel (%p1085_p5) target bundleno = 87 (0x57), region = 143 }
  0x54   : > { %v1358_v38 = vmov 0.0  }
  0x55   : > { %571 = vst [vmem:[%s1611_s18] sm:$0xff] %v1358_v38  ;;  %572 = vst [vmem:[%s1611_s18 + $0x8] sm:$0xff] %v1358_v38 }
  0x56   : > { %573 = vst [vmem:[%s1611_s18 + $0x10] sm:$0xff] %v1358_v38  ;;  %574 = vst [vmem:[%s1611_s18 + $0x18] sm:$0xff] %v1358_v38 }
  0x57 PF: > { %v1219_v39 = vld [vmem:[%s1607_s15 + $0x74] ss:$8 sps:$4 sm:$0xff]   ;;  %v1221_v40 = vld [vmem:[%s1607_s15 + $0x70] ss:$8 sps:$4 sm:$0xff]   ;;  %v1222_v41 = vld [vmem:[%s1607_s15 + $0x64] ss:$8 sps:$4 sm:$0xff]  }
  0x58   : > { %783 = vmatprep.subr.bf16.mxu0 %v1219_v39  ;;  %v1224_v42 = vld [vmem:[%s1607_s15 + $0x60] ss:$8 sps:$4 sm:$0xff]   ;;  %v1225_v43 = vld [vmem:[%s1607_s15 + $0x54] ss:$8 sps:$4 sm:$0xff]   ;;  %v1227_v44 = vld [vmem:[%s1607_s15 + $0x50] ss:$8 sps:$4 sm:$0xff]  }
  0x59   : > { %784 = vmatpush1.bf16.msra.mxu0 %v1221_v40  ;;  %v1228_v45 = vld [vmem:[%s1607_s15 + $0x44] ss:$8 sps:$4 sm:$0xff]   ;;  %v1230_v46 = vld [vmem:[%s1607_s15 + $0x40] ss:$8 sps:$4 sm:$0xff]   ;;  %v1231_v47 = vld [vmem:[%s1607_s15 + $0x34] ss:$8 sps:$4 sm:$0xff]  }
  0x5a   : > { %785 = vmatprep.subr.bf16.mxu0 %v1222_v41  ;;  %v1233_v48 = vld [vmem:[%s1607_s15 + $0x30] ss:$8 sps:$4 sm:$0xff]   ;;  %v1234_v49 = vld [vmem:[%s1607_s15 + $0x24] ss:$8 sps:$4 sm:$0xff]   ;;  %v1236_v50 = vld [vmem:[%s1607_s15 + $0x20] ss:$8 sps:$4 sm:$0xff]  }
  0x5b   : > { %v1237_v51 = vld [vmem:[%s1607_s15 + $0x14] ss:$8 sps:$4 sm:$0xff]   ;;  %v1239_v53 = vld [vmem:[%s1607_s15 + $0x10] ss:$8 sps:$4 sm:$0xff]   ;;  %v1240_v54 = vld [vmem:[%s1607_s15 + $0x4] ss:$8 sps:$4 sm:$0xff]  }
  0x5c   : > { %v1269_v52 = vld [vmem:[%s495_s22 + $0x4] ss:$8 sps:$4 sm:$0xff]   ;;  %v1242_v55 = vld [vmem:[%s1607_s15] ss:$8 sps:$4 sm:$0xff]   ;;  %v1245_v57 = vld [vmem:[%s1607_s15 + $0xf0] ss:$8 sps:$4 sm:$0xff]  }
  0x5d   : > { %786 = vmatpush1.bf16.msra.mxu0 %v1224_v42  ;;  %815 = vmatprep.mubr.bf16.mxu0 %v1269_v52  ;;  %v1243_v56 = vld [vmem:[%s1607_s15 + $0xf4] ss:$8 sps:$4 sm:$0xff]   ;;  %v1246_v58 = vld [vmem:[%s1607_s15 + $0xe4] ss:$8 sps:$4 sm:$0xff]   ;;  %v1248_v59 = vld [vmem:[%s1607_s15 + $0xe0] ss:$8 sps:$4 sm:$0xff]  }
  0x5e   : > { %787 = vmatprep.subr.bf16.mxu0 %v1225_v43  ;;  %v1249_v60 = vld [vmem:[%s1607_s15 + $0xd4] ss:$8 sps:$4 sm:$0xff]   ;;  %v1251_v61 = vld [vmem:[%s1607_s15 + $0xd0] ss:$8 sps:$4 sm:$0xff]   ;;  %v1252_v62 = vld [vmem:[%s1607_s15 + $0xc4] ss:$8 sps:$4 sm:$0xff]  }
  0x5f   : > { %v1254_v63 = vld [vmem:[%s1607_s15 + $0xc0] ss:$8 sps:$4 sm:$0xff]   ;;  %v1255_v0 = vld [vmem:[%s1607_s15 + $0xb4] ss:$8 sps:$4 sm:$0xff]   ;;  %v1257_v1 = vld [vmem:[%s1607_s15 + $0xb0] ss:$8 sps:$4 sm:$0xff]  }
  0x60   : > { %v1258_v2 = vld [vmem:[%s1607_s15 + $0xa4] ss:$8 sps:$4 sm:$0xff]   ;;  %v1260_v3 = vld [vmem:[%s1607_s15 + $0xa0] ss:$8 sps:$4 sm:$0xff]   ;;  %v1261_v4 = vld [vmem:[%s1607_s15 + $0x94] ss:$8 sps:$4 sm:$0xff]  }
  0x61   : > { %788 = vmatpush1.bf16.msra.mxu0 %v1227_v44  ;;  %v1263_v5 = vld [vmem:[%s1607_s15 + $0x90] ss:$8 sps:$4 sm:$0xff]   ;;  %v1264_v6 = vld [vmem:[%s1607_s15 + $0x84] ss:$8 sps:$4 sm:$0xff]   ;;  %v1266_v7 = vld [vmem:[%s1607_s15 + $0x80] ss:$8 sps:$4 sm:$0xff]  }
  0x62   : > { %789 = vmatprep.subr.bf16.mxu0 %v1228_v45  ;;  %v1267_v8 = vld [vmem:[%s495_s22] ss:$8 sps:$4 sm:$0xff]   ;;  %p1120_p6 = scmp.ne.s32.totalorder %s1340_s24, 17 }
  0x63   : > { %v575_v9 = vld [vmem:[%s1611_s18] sm:$0xff]  ;;  %v576_v11 = vld [vmem:[%s1611_s18 + $0x8] sm:$0xff]  ;;  %v577_v14 = vld [vmem:[%s1611_s18 + $0x10] sm:$0xff] }
  0x64   : > { %v578_v17 = vld [vmem:[%s1611_s18 + $0x18] sm:$0xff] }
  0x65   : > { %790 = vmatpush1.bf16.msra.mxu0 %v1230_v46 }
  0x66   : > { %791 = vmatprep.subr.bf16.mxu0 %v1231_v47 }
  0x69   : > { %792 = vmatpush1.bf16.msra.mxu0 %v1233_v48 }
  0x6a   : > { %793 = vmatprep.subr.bf16.mxu0 %v1234_v49 }
  0x6d   : > { %794 = vmatpush1.bf16.msra.mxu0 %v1236_v50 }
  0x6e   : > { %795 = vmatprep.subr.bf16.mxu0 %v1237_v51 }
  0x71   : > { %796 = vmatpush1.bf16.msra.mxu0 %v1239_v53 }
  0x72   : > { %797 = vmatprep.subr.bf16.mxu0 %v1240_v54 }
  0x75   : > { %798 = vmatpush1.bf16.msra.mxu0 %v1242_v55 }
  0x76   : > { %799 = vmatprep.subr.bf16.mxu0 %v1243_v56 }
  0x79   : > { %800 = vmatpush2.bf16.msra.mxu0 %v1245_v57 }
  0x7a   : > { %801 = vmatprep.subr.bf16.mxu0 %v1246_v58 }
  0x7d   : > { %802 = vmatpush2.bf16.msra.mxu0 %v1248_v59 }
  0x7e   : > { %803 = vmatprep.subr.bf16.mxu0 %v1249_v60 }
  0x81   : > { %804 = vmatpush2.bf16.msra.mxu0 %v1251_v61 }
  0x82   : > { %805 = vmatprep.subr.bf16.mxu0 %v1252_v62 }
  0x85   : > { %806 = vmatpush2.bf16.msra.mxu0 %v1254_v63 }
  0x86   : > { %807 = vmatprep.subr.bf16.mxu0 %v1255_v0 }
  0x89   : > { %808 = vmatpush2.bf16.msra.mxu0 %v1257_v1 }
  0x8a   : > { %809 = vmatprep.subr.bf16.mxu0 %v1258_v2 }
  0x8d   : > { %810 = vmatpush2.bf16.msra.mxu0 %v1260_v3 }
  0x8e   : > { %811 = vmatprep.subr.bf16.mxu0 %v1261_v4 }
  0x91   : > { %812 = vmatpush2.bf16.msra.mxu0 %v1263_v5 }
  0x92   : > { %813 = vmatprep.subr.bf16.mxu0 %v1264_v6 }
  0x95   : > { %814 = vmatpush2.bf16.msra.mxu0 %v1266_v7 }
  0x98   : > { %816 = vmatmul.mubr.bf16.vlgmr.msra.gmra.mxu0 %v1267_v8 }
 0x158   : > { %v817_v10 = vpop.f32.mrf.mxu0 }
 0x159   : > { %v826_v12 = vadd.f32 %v817_v10, %v575_v9 }
 0x15a   : > { %v819_v13 = vpop.f32.mrf.mxu0 }
 0x15b   : > { %830 = vst [vmem:[%s1611_s18] sm:$0xff] %v826_v12  ;;  %v827_v15 = vadd.f32 %v819_v13, %v576_v11 }
 0x15c   : > { %v821_v16 = vpop.f32.mrf.mxu0 }
 0x15d   : > { %831 = vst [vmem:[%s1611_s18 + $0x8] sm:$0xff] %v827_v15  ;;  %v828_v18 = vadd.f32 %v821_v16, %v577_v14  ;;  %837 = sbr.rel (%p1120_p6) target bundleno = 372 (0x174), region = 147 }
 0x15e   : > { %v823_v19 = vpop.f32.mrf.mxu0 }
 0x15f   : > { %832 = vst [vmem:[%s1611_s18 + $0x10] sm:$0xff] %v828_v18  ;;  %v829_v20 = vadd.f32 %v823_v19, %v578_v17 }
 0x161   : > { %833 = vst [vmem:[%s1611_s18 + $0x18] sm:$0xff] %v829_v20 }
 0x162   : > { %v844_v21 = vlaneseq  ;;  %v842_v23 = vld [vmem:[%s556_s16] sm:$0x3]  ;;  %v875_v40 = vld [vmem:[%s1609_s29 + $0x8] sm:$0xff]  ;;  %v876_v41 = vld [vmem:[%s1609_s29 + $0x10] sm:$0xff] }
 0x163   : > { %v858_v24 = vld [vmem:[%s561_s20] sm:$0x3]  ;;  %v877_v42 = vld [vmem:[%s1609_s29 + $0x18] sm:$0xff] }
 0x164   : > { %v845_v22 = vshrl.u32 %v844_v21, 7  ;;  %v838_v25 = vld [vmem:[%s1611_s18] sm:$0xff]  ;;  %v839_v28 = vld [vmem:[%s1611_s18 + $0x8] sm:$0xff] }
 0x165   : > { %v874_v36 = vld [vmem:[%s1609_s29] sm:$0xff] }
 0x166   : > { %v846_v26 = vsub.s32 0, %v845_v22  ;;  %v850_v27 = vsub.s32 1, %v845_v22  ;;  %v840_v29 = vld [vmem:[%s1611_s18 + $0x10] sm:$0xff] }
 0x168   : > { %v841_v30 = vld [vmem:[%s1611_s18 + $0x18] sm:$0xff]  ;;  %v847_v31 = vrot.slane %v842_v23, %v846_v26  ;;  %v863_v32 = vrot.slane %v858_v24, %v846_v26  ;;  %v851_v33 = vrot.slane %v842_v23, %v850_v27  ;;  %v867_v34 = vrot.slane %v858_v24, %v850_v27 }
 0x16a   : > { %v854_v35 = vmul.f32 %v847_v31, %v838_v25  ;;  %v855_v37 = vmul.f32 %v851_v33, %v839_v28  ;;  %v856_v38 = vmul.f32 %v847_v31, %v840_v29  ;;  %v857_v39 = vmul.f32 %v851_v33, %v841_v30 }
 0x16c   : > { %v870_v43 = vadd.f32 %v863_v32, %v854_v35  ;;  %v871_v44 = vadd.f32 %v867_v34, %v855_v37  ;;  %v872_v45 = vadd.f32 %v863_v32, %v856_v38  ;;  %v873_v46 = vadd.f32 %v867_v34, %v857_v39 }
 0x16e   : > { %v878_v47 = vadd.f32 %v874_v36, %v870_v43  ;;  %v879_v48 = vadd.f32 %v875_v40, %v871_v44  ;;  %v880_v49 = vadd.f32 %v876_v41, %v872_v45  ;;  %v881_v50 = vadd.f32 %v877_v42, %v873_v46 }
 0x170   : > { %v882_v51 = vmax.f32 %v878_v47, 0.0  ;;  %v883_v52 = vmax.f32 %v879_v48, 0.0  ;;  %v884_v53 = vmax.f32 %v880_v49, 0.0  ;;  %v885_v54 = vmax.f32 %v881_v50, 0.0 }
 0x172   : > { %886 = vst [vmem:[%s1611_s18] sm:$0xff] %v882_v51  ;;  %887 = vst [vmem:[%s1611_s18 + $0x8] sm:$0xff] %v883_v52 }
 0x173   : > { %888 = vst [vmem:[%s1611_s18 + $0x10] sm:$0xff] %v884_v53  ;;  %889 = vst [vmem:[%s1611_s18 + $0x18] sm:$0xff] %v885_v54 }
 0x174 PF: > { %896 = sbr.rel (!%p1493_p13) target bundleno = 380 (0x17c), region = 151  ;;  %s1129_s24 = sshll.u32 (%p1493_p13), %s1344_s25, 4 }
 0x175   : > { %s902_s14 = scalar_lea.vmem (%p1493_p13), %s1733_s5, %s1129_s24 }
 0x179   : > { %v915_v55 = vld [vmem:[%s1611_s18] sm:$0xff]  ;;  %v917_v56 = vld [vmem:[%s1611_s18 + $0x8] sm:$0xff] }
 0x17a   : > { %v919_v57 = vld [vmem:[%s1611_s18 + $0x10] sm:$0xff]  ;;  %v921_v58 = vld [vmem:[%s1611_s18 + $0x18] sm:$0xff]  ;;  %916 = vst [vmem:[%s902_s14] sm:$0xff] %v915_v55  ;;  %918 = vst [vmem:[%s902_s14 + $0x8] sm:$0xff] %v917_v56 }
 0x17b   : > { %920 = vst [vmem:[%s902_s14 + $0x20] sm:$0xff] %v919_v57  ;;  %922 = vst [vmem:[%s902_s14 + $0x28] sm:$0xff] %v921_v58 }
 0x17c PF: > { %s15_s28 = sadd.s32 1, %s1356_s28   ;;  %s1747_s8 = sld [smem:[#allocation11_spill]] }
 0x17d   : > { %p12_p7 = scmp.ge.s32.totalorder %s15_s28, 38   ;;  %s1748_s25 = sld [smem:[#allocation10_spill]] }
 0x17e   : > { %s1749_s22 = sld [smem:[#allocation6_spill]]  ;;  %s1753_s18 = smov %s1320_s19 }
 0x17f   : > { %s1750_s23 = sld [smem:[#allocation9_spill]]  ;;  %s1755_s20 = smov %s1328_s21 }
 0x180   : > { %s1751_s11 = sld [smem:[#allocation7_spill]]  ;;  %s1757_s24 = smov %s1348_s26 }
 0x181   : > { %s1752_s16 = sld [smem:[#allocation8_spill]] }
 0x182   : > { %s1754_s19 = smov %s1747_s8 }
 0x183   : > { %s1756_s21 = smov %s1748_s25  ;;  %s1758_s25 = smov %s1352_s27 }
 0x184   :  { %14 = sbr.rel (!%p12_p7) target bundleno = 6 (0x6), region = 227 }
 0x186   : > { %s1759_s26 = smov %s1751_s11 }
 0x187   : > { %s1760_s27 = smov %s1752_s16 }

// kernel: resnet_proto_forward.40
= control target key start
LH: loop header
LB: loop body
LE: loop exit
PB: predicated region body
PF: predicated region fallthrough
CT: control target
= control target key end

     0   :  { %s1270_s15 = smov 0   ;;  %s1272_s16 = smov 0   ;;  %s1586_s0 = inlined_call_operand.vmem [shape: bf16[16,4608], index: 0, kind: input, shape index: {}]   ;;  %s1587_s1 = inlined_call_operand.vmem [shape: bf16[4608,512], index: 1, kind: input, shape index: {}]   ;;  %s1588_s2 = inlined_call_operand.vmem [shape: f32[1,512], index: 2, kind: input, shape index: {}]   ;;  %s1589_s3 = inlined_call_operand.vmem [shape: f32[1,512], index: 3, kind: input, shape index: {}]   ;;  %s1590_s4 = inlined_call_operand.vmem [shape: f32[16,512], index: 4, kind: output, shape index: {}]  }
   0x1   :  { %s1274_s17 = smov 0   ;;  %s1276_s18 = smov 0  }
   0x2   :  { %s1278_s19 = smov 0   ;;  %s1280_s20 = smov 0  }
   0x3   :  { %s1282_s21 = smov 0   ;;  %s1284_s22 = smov 0  }
   0x4   :  { %s1286_s23 = smov 0   ;;  %s1288_s24 = smov 0  }
   0x5   :  { %s1290_s25 = smov 0  }
   0x6 LB: > { %1594 = sst [smem:[#allocation5_spill]] %s1222_s20  ;;  %s954_s26 = sadd.s32 4294967295, %s1242_s25   ;;  %s1242_s25 = sphi %s1290_s25, %s14_s25   ;;  %s1238_s24 = sphi %s1288_s24, %s1612_s24   ;;  %s1234_s23 = sphi %s1286_s23, %s1611_s23   ;;  %s1230_s22 = sphi %s1284_s22, %s1610_s22   ;;  %s1226_s21 = sphi %s1282_s21, %s1609_s21   ;;  %s1222_s20 = sphi %s1280_s20, %s1602_s20   ;;  %s1218_s19 = sphi %s1278_s19, %s1601_s19   ;;  %s1214_s18 = sphi %s1276_s18, %s1608_s18   ;;  %s1210_s17 = sphi %s1274_s17, %s1607_s17   ;;  %s1206_s16 = sphi %s1272_s16, %s1606_s16   ;;  %s1202_s15 = sphi %s1270_s15, %s1605_s15  }
   0x7   : > { %s26_s27 = sadd.s32 1, %s1234_s23  ;;  %s29_s28 = sadd.s32 1, %s1238_s24 }
   0x8   : > { %p27_p0 = scmp.ge.s32.totalorder %s26_s27, 18  ;;  %s42_s29 = sadd.s32 1, %s1222_s20 }
   0x9   : > { %p49_p1 = scmp.ne.s32.totalorder %s1222_s20, %s1218_s19  ;;  %p50_p2 = scmp.eq.s32.totalorder %s1242_s25, 0 }
   0xa   : > { %s1614_s27 = smov (%p27_p0, %s26_s27), 0  ;;  %s1616_s28 = smov (!%p27_p0, %s29_s28), %s1238_s24 }
   0xb   : > { %1595 = sst [smem:[#allocation6_spill]] %s1614_s27  ;;  %s38_s30 = ssub.s32 %s1234_s23, %s1614_s27 }
   0xc   : > { %p31_p3 = scmp.ge.s32.totalorder %s1616_s28, 2  ;;  %p40_p4 = scmp.eq.s32.totalorder %s38_s30, 0 }
   0xd   : > { %p1337_p5 = por %p50_p2, %p49_p1  ;;  %s70_s6 = sadd.s32 1, %s1214_s18 }
   0xe   : > { %s1618_s28 = smov (%p31_p3, %s1616_s28), 0  ;;  %p77_p6 = scmp.ne.s32.totalorder %s1214_s18, %s1210_s17 }
   0xf   : > { %1597 = sst [smem:[#allocation7_spill]] %s1618_s28  ;;  %s66_s8 = ssub.s32 %s1238_s24, %s1618_s28 }
  0x10   : > { %s1345_s7 = scalar_select %p40_p4, %s1222_s20, %s42_s29  }
  0x11   : > { %s67_s9 = sor.u32 %s66_s8, %s38_s30  ;;  %p148_p7 = scmp.eq.s32.totalorder %s66_s8, 0 }
  0x12   : > { %1598 = sst [smem:[#allocation8_spill]] %s1345_s7  ;;  %p68_p8 = scmp.eq.s32.totalorder %s67_s9, 0 }
  0x13   : > { %p1351_p9 = por %p77_p6, %p50_p2  ;;  %s150_s11 = sadd.s32 1, %s1206_s16 }
  0x14   : > { %p160_p10 = scmp.ne.s32.totalorder %s1206_s16, %s1202_s15  ;;  %p161_p11 = scmp.eq.s32.totalorder %s954_s26, 35 }
  0x15   : > { %s1359_s12 = scalar_select %p68_p8, %s1214_s18, %s70_s6  }
  0x16   : > { %s1362_s13 = scalar_select %p148_p7, %s1206_s16, %s150_s11  }
  0x17   : > { %p1364_p12 = por %p161_p11, %p160_p10  ;;  %p957_p13 = scmp.ge.s32.totalorder %s1242_s25, 36 }
  0x19   : > { %183 = sbr.rel (%p957_p13) target bundleno = 58 (0x3a), region = 16 }
  0x1e   : > { %186 = sbr.rel (!%p1337_p5) target bundleno = 35 (0x23), region = 20  ;;  %s188_s29 = sand.u32 (%p1337_p5), 1, %s1222_s20  }
  0x1f   : > { %s1013_s30 = sshll.u32 (%p1337_p5), %s1234_s23, 3  ;;  %s958_s8 = sshll.u32 (%p1337_p5), %s188_s29, 4 }
  0x20   : > { %s196_s11 = scalar_lea.vmem (%p1337_p5), %s1586_s0, %s1013_s30  ;;  %s190_s26 = scalar_lea.vmem (%p1337_p5), [#allocation2], %s958_s8 }
  0x21   : > { %v227_v0 = vld [vmem:[%s196_s11] sm:$0xff] (%p1337_p5)  ;;  %v229_v1 = vld [vmem:[%s196_s11 + $0x90] sm:$0xff] (%p1337_p5) }
  0x22   : > { %228 = vst [vmem:[%s190_s26] sm:$0xff] (%p1337_p5), %v227_v0  ;;  %230 = vst [vmem:[%s190_s26 + $0x8] sm:$0xff] (%p1337_p5), %v229_v1 }
  0x23 PF: > { %236 = sbr.rel (!%p1351_p9) target bundleno = 58 (0x3a), region = 58  ;;  %s238_s5 = sand.u32 (%p1351_p9), 1, %s1214_s18  }
  0x24   : > { %s963_s28 = sshll.u32 (%p1351_p9), %s1238_s24, 1  ;;  %s961_s27 = sshll.u32 (%p1351_p9), %s238_s5, 8 }
  0x25   : > { %s1014_s29 = sshll.u32 (%p1351_p9), %s1234_s23, 7  ;;  %s1389_s10 = scalar_lea.vmem (%p1351_p9), [#allocation3], %s961_s27 }
  0x26   : > { %s244_s7 = sadd.s32 (%p1351_p9), %s1014_s29, %s963_s28 }
  0x27   : > { %s965_s20 = sshll.u32 (%p1351_p9), %s244_s7, 2 }
  0x28   : > { %s1384_s9 = scalar_lea.vmem %s1587_s1, %s965_s20 }
  0x29   : > { %v337_v2 = vld [vmem:[%s1384_s9] sm:$0xff]  ;;  %v339_v3 = vld [vmem:[%s1384_s9 + $0x10] sm:$0xff] }
  0x2a   : > { %v341_v4 = vld [vmem:[%s1384_s9 + $0x20] sm:$0xff]  ;;  %338 = vst [vmem:[%s1389_s10] sm:$0xff] %v337_v2  ;;  %340 = vst [vmem:[%s1389_s10 + $0x8] sm:$0xff] %v339_v3  ;;  %v343_v5 = vld [vmem:[%s1384_s9 + $0x30] sm:$0xff] }
  0x2b   : > { %342 = vst [vmem:[%s1389_s10 + $0x10] sm:$0xff] %v341_v4  ;;  %v345_v6 = vld [vmem:[%s1384_s9 + $0x40] sm:$0xff]  ;;  %v347_v7 = vld [vmem:[%s1384_s9 + $0x50] sm:$0xff]  ;;  %344 = vst [vmem:[%s1389_s10 + $0x18] sm:$0xff] %v343_v5 }
  0x2c   : > { %346 = vst [vmem:[%s1389_s10 + $0x20] sm:$0xff] %v345_v6  ;;  %348 = vst [vmem:[%s1389_s10 + $0x28] sm:$0xff] %v347_v7  ;;  %v349_v8 = vld [vmem:[%s1384_s9 + $0x60] sm:$0xff]  ;;  %v351_v9 = vld [vmem:[%s1384_s9 + $0x70] sm:$0xff] }
  0x2d   : > { %v353_v10 = vld [vmem:[%s1384_s9 + $0x80] sm:$0xff]  ;;  %350 = vst [vmem:[%s1389_s10 + $0x30] sm:$0xff] %v349_v8  ;;  %352 = vst [vmem:[%s1389_s10 + $0x38] sm:$0xff] %v351_v9  ;;  %v355_v11 = vld [vmem:[%s1384_s9 + $0x90] sm:$0xff] }
  0x2e   : > { %354 = vst [vmem:[%s1389_s10 + $0x40] sm:$0xff] %v353_v10  ;;  %v357_v12 = vld [vmem:[%s1384_s9 + $0xa0] sm:$0xff]  ;;  %v359_v13 = vld [vmem:[%s1384_s9 + $0xb0] sm:$0xff]  ;;  %356 = vst [vmem:[%s1389_s10 + $0x48] sm:$0xff] %v355_v11 }
  0x2f   : > { %358 = vst [vmem:[%s1389_s10 + $0x50] sm:$0xff] %v357_v12  ;;  %360 = vst [vmem:[%s1389_s10 + $0x58] sm:$0xff] %v359_v13  ;;  %v361_v14 = vld [vmem:[%s1384_s9 + $0xc0] sm:$0xff]  ;;  %v363_v15 = vld [vmem:[%s1384_s9 + $0xd0] sm:$0xff] }
  0x30   : > { %v365_v16 = vld [vmem:[%s1384_s9 + $0xe0] sm:$0xff]  ;;  %362 = vst [vmem:[%s1389_s10 + $0x60] sm:$0xff] %v361_v14  ;;  %364 = vst [vmem:[%s1389_s10 + $0x68] sm:$0xff] %v363_v15  ;;  %v367_v17 = vld [vmem:[%s1384_s9 + $0xf0] sm:$0xff] }
  0x31   : > { %366 = vst [vmem:[%s1389_s10 + $0x70] sm:$0xff] %v365_v16  ;;  %v369_v18 = vld [vmem:[%s1384_s9 + $0x100] sm:$0xff]  ;;  %v371_v19 = vld [vmem:[%s1384_s9 + $0x110] sm:$0xff]  ;;  %368 = vst [vmem:[%s1389_s10 + $0x78] sm:$0xff] %v367_v17 }
  0x32   : > { %370 = vst [vmem:[%s1389_s10 + $0x80] sm:$0xff] %v369_v18  ;;  %372 = vst [vmem:[%s1389_s10 + $0x88] sm:$0xff] %v371_v19  ;;  %v373_v20 = vld [vmem:[%s1384_s9 + $0x120] sm:$0xff]  ;;  %v375_v21 = vld [vmem:[%s1384_s9 + $0x130] sm:$0xff] }
  0x33   : > { %v377_v22 = vld [vmem:[%s1384_s9 + $0x140] sm:$0xff]  ;;  %374 = vst [vmem:[%s1389_s10 + $0x90] sm:$0xff] %v373_v20  ;;  %376 = vst [vmem:[%s1389_s10 + $0x98] sm:$0xff] %v375_v21  ;;  %v379_v23 = vld [vmem:[%s1384_s9 + $0x150] sm:$0xff] }
  0x34   : > { %378 = vst [vmem:[%s1389_s10 + $0xa0] sm:$0xff] %v377_v22  ;;  %v381_v24 = vld [vmem:[%s1384_s9 + $0x160] sm:$0xff]  ;;  %v383_v25 = vld [vmem:[%s1384_s9 + $0x170] sm:$0xff]  ;;  %380 = vst [vmem:[%s1389_s10 + $0xa8] sm:$0xff] %v379_v23 }
  0x35   : > { %382 = vst [vmem:[%s1389_s10 + $0xb0] sm:$0xff] %v381_v24  ;;  %384 = vst [vmem:[%s1389_s10 + $0xb8] sm:$0xff] %v383_v25  ;;  %v385_v26 = vld [vmem:[%s1384_s9 + $0x180] sm:$0xff]  ;;  %v387_v27 = vld [vmem:[%s1384_s9 + $0x190] sm:$0xff] }
  0x36   : > { %v389_v28 = vld [vmem:[%s1384_s9 + $0x1a0] sm:$0xff]  ;;  %386 = vst [vmem:[%s1389_s10 + $0xc0] sm:$0xff] %v385_v26  ;;  %388 = vst [vmem:[%s1389_s10 + $0xc8] sm:$0xff] %v387_v27  ;;  %v391_v29 = vld [vmem:[%s1384_s9 + $0x1b0] sm:$0xff] }
  0x37   : > { %390 = vst [vmem:[%s1389_s10 + $0xd0] sm:$0xff] %v389_v28  ;;  %v393_v30 = vld [vmem:[%s1384_s9 + $0x1c0] sm:$0xff]  ;;  %v395_v31 = vld [vmem:[%s1384_s9 + $0x1d0] sm:$0xff]  ;;  %392 = vst [vmem:[%s1389_s10 + $0xd8] sm:$0xff] %v391_v29 }
  0x38   : > { %394 = vst [vmem:[%s1389_s10 + $0xe0] sm:$0xff] %v393_v30  ;;  %396 = vst [vmem:[%s1389_s10 + $0xe8] sm:$0xff] %v395_v31  ;;  %v397_v32 = vld [vmem:[%s1384_s9 + $0x1e0] sm:$0xff]  ;;  %v399_v33 = vld [vmem:[%s1384_s9 + $0x1f0] sm:$0xff] }
  0x39   : > { %398 = vst [vmem:[%s1389_s10 + $0xf0] sm:$0xff] %v397_v32  ;;  %400 = vst [vmem:[%s1389_s10 + $0xf8] sm:$0xff] %v399_v33 }
  0x3a PF: > { %p966_p0 = scmp.ge.s32.totalorder %s1242_s25, 1  ;;  %p421_p1 = scmp.lt.s32.totalorder %s1242_s25, 37 }
  0x3c   : > { %p422_p2 = pnand %p966_p0, %p421_p1 }
  0x3d   : > { %s428_s20 = sand.u32 (!%p422_p2), 1, %s1218_s19   ;;  %s435_s27 = sand.u32 (!%p422_p2), 1, %s1210_s17  }
  0x3e   : > { %425 = sbr.rel (%p422_p2) target bundleno = 368 (0x170), region = 104  ;;  %s1456_s28 = sshll.u32 (!%p422_p2), %s428_s20, 4 }
  0x3f   : > { %s968_s7 = sshll.u32 (!%p422_p2), %s435_s27, 8  ;;  %s468_s8 = sand.u32 (!%p422_p2), 1, %s1202_s15  }
  0x40   : > { %s970_s11 = sshll.u32 (!%p422_p2), %s1230_s22, 1  ;;  %s969_s26 = sshll.u32 (!%p422_p2), %s468_s8, 5 }
  0x41   : > { %p476_p3 = scmp.lt.s32.totalorder (!%p422_p2), %s970_s11, 3  ;;  %s430_s19 = scalar_lea.vmem (!%p422_p2), [#allocation2], %s1456_s28 }
  0x42   : > { %s1471_s10 = scalar_lea.vmem (!%p422_p2), [#allocation3], %s968_s7  ;;  %s1473_s20 = scalar_lea.vmem (!%p422_p2), [#allocation4], %s969_s26 }
  0x43   : > { %s1620_s11 = smov (!%p476_p3, %s970_s11), 3  ;;  %p972_p4 = scmp.ne.s32.totalorder %s1226_s21, 0 }
  0x44   : > { %s478_s6 = scalar_lea.vmem %s1588_s2, %s1620_s11  ;;  %s483_s17 = scalar_lea.vmem %s1589_s3, %s1620_s11 }
  0x45   : > { %490 = sbr.rel (%p972_p4) target bundleno = 77 (0x4d), region = 116 }
  0x4a   : > { %v1244_v34 = vmov 0.0  }
  0x4b   : > { %491 = vst [vmem:[%s1473_s20] sm:$0xff] %v1244_v34  ;;  %492 = vst [vmem:[%s1473_s20 + $0x8] sm:$0xff] %v1244_v34 }
  0x4c   : > { %493 = vst [vmem:[%s1473_s20 + $0x10] sm:$0xff] %v1244_v34  ;;  %494 = vst [vmem:[%s1473_s20 + $0x18] sm:$0xff] %v1244_v34 }
  0x4d PF: > { %v1105_v35 = vld [vmem:[%s1471_s10 + $0x74] ss:$8 sps:$4 sm:$0xff]   ;;  %v1107_v36 = vld [vmem:[%s1471_s10 + $0x70] ss:$8 sps:$4 sm:$0xff]   ;;  %v1108_v37 = vld [vmem:[%s1471_s10 + $0x64] ss:$8 sps:$4 sm:$0xff]  }
  0x4e   : > { %703 = vmatprep.subr.bf16.mxu0 %v1105_v35  ;;  %v1110_v38 = vld [vmem:[%s1471_s10 + $0x60] ss:$8 sps:$4 sm:$0xff]   ;;  %v1111_v39 = vld [vmem:[%s1471_s10 + $0x54] ss:$8 sps:$4 sm:$0xff]   ;;  %v1113_v40 = vld [vmem:[%s1471_s10 + $0x50] ss:$8 sps:$4 sm:$0xff]  }
  0x4f   : > { %704 = vmatpush1.bf16.msra.mxu0 %v1107_v36  ;;  %v1114_v41 = vld [vmem:[%s1471_s10 + $0x44] ss:$8 sps:$4 sm:$0xff]   ;;  %v1116_v42 = vld [vmem:[%s1471_s10 + $0x40] ss:$8 sps:$4 sm:$0xff]   ;;  %v1117_v43 = vld [vmem:[%s1471_s10 + $0x34] ss:$8 sps:$4 sm:$0xff]  }
  0x50   : > { %705 = vmatprep.subr.bf16.mxu0 %v1108_v37  ;;  %v1119_v44 = vld [vmem:[%s1471_s10 + $0x30] ss:$8 sps:$4 sm:$0xff]   ;;  %v1120_v45 = vld [vmem:[%s1471_s10 + $0x24] ss:$8 sps:$4 sm:$0xff]   ;;  %v1122_v46 = vld [vmem:[%s1471_s10 + $0x20] ss:$8 sps:$4 sm:$0xff]  }
  0x51   : > { %v1123_v47 = vld [vmem:[%s1471_s10 + $0x14] ss:$8 sps:$4 sm:$0xff]   ;;  %v1125_v49 = vld [vmem:[%s1471_s10 + $0x10] ss:$8 sps:$4 sm:$0xff]   ;;  %v1126_v50 = vld [vmem:[%s1471_s10 + $0x4] ss:$8 sps:$4 sm:$0xff]  }
  0x52   : > { %v1155_v48 = vld [vmem:[%s430_s19 + $0x4] ss:$8 sps:$4 sm:$0xff]   ;;  %v1128_v51 = vld [vmem:[%s1471_s10] ss:$8 sps:$4 sm:$0xff]   ;;  %v1131_v53 = vld [vmem:[%s1471_s10 + $0xf0] ss:$8 sps:$4 sm:$0xff]  }
  0x53   : > { %706 = vmatpush1.bf16.msra.mxu0 %v1110_v38  ;;  %735 = vmatprep.mubr.bf16.mxu0 %v1155_v48  ;;  %v1129_v52 = vld [vmem:[%s1471_s10 + $0xf4] ss:$8 sps:$4 sm:$0xff]   ;;  %v1132_v54 = vld [vmem:[%s1471_s10 + $0xe4] ss:$8 sps:$4 sm:$0xff]   ;;  %v1134_v55 = vld [vmem:[%s1471_s10 + $0xe0] ss:$8 sps:$4 sm:$0xff]  }
  0x54   : > { %707 = vmatprep.subr.bf16.mxu0 %v1111_v39  ;;  %v1135_v56 = vld [vmem:[%s1471_s10 + $0xd4] ss:$8 sps:$4 sm:$0xff]   ;;  %v1137_v57 = vld [vmem:[%s1471_s10 + $0xd0] ss:$8 sps:$4 sm:$0xff]   ;;  %v1138_v58 = vld [vmem:[%s1471_s10 + $0xc4] ss:$8 sps:$4 sm:$0xff]  }
  0x55   : > { %v1140_v59 = vld [vmem:[%s1471_s10 + $0xc0] ss:$8 sps:$4 sm:$0xff]   ;;  %v1141_v60 = vld [vmem:[%s1471_s10 + $0xb4] ss:$8 sps:$4 sm:$0xff]   ;;  %v1143_v61 = vld [vmem:[%s1471_s10 + $0xb0] ss:$8 sps:$4 sm:$0xff]  }
  0x56   : > { %v1144_v62 = vld [vmem:[%s1471_s10 + $0xa4] ss:$8 sps:$4 sm:$0xff]   ;;  %v1146_v63 = vld [vmem:[%s1471_s10 + $0xa0] ss:$8 sps:$4 sm:$0xff]   ;;  %v1147_v0 = vld [vmem:[%s1471_s10 + $0x94] ss:$8 sps:$4 sm:$0xff]  }
  0x57   : > { %708 = vmatpush1.bf16.msra.mxu0 %v1113_v40  ;;  %v1149_v1 = vld [vmem:[%s1471_s10 + $0x90] ss:$8 sps:$4 sm:$0xff]   ;;  %v1150_v2 = vld [vmem:[%s1471_s10 + $0x84] ss:$8 sps:$4 sm:$0xff]   ;;  %v1152_v3 = vld [vmem:[%s1471_s10 + $0x80] ss:$8 sps:$4 sm:$0xff]  }
  0x58   : > { %709 = vmatprep.subr.bf16.mxu0 %v1114_v41  ;;  %v1153_v4 = vld [vmem:[%s430_s19] ss:$8 sps:$4 sm:$0xff]   ;;  %p1007_p5 = scmp.ne.s32.totalorder %s1226_s21, 17 }
  0x59   : > { %v495_v5 = vld [vmem:[%s1473_s20] sm:$0xff]  ;;  %v496_v7 = vld [vmem:[%s1473_s20 + $0x8] sm:$0xff]  ;;  %v497_v10 = vld [vmem:[%s1473_s20 + $0x10] sm:$0xff] }
  0x5a   : > { %v498_v13 = vld [vmem:[%s1473_s20 + $0x18] sm:$0xff] }
  0x5b   : > { %710 = vmatpush1.bf16.msra.mxu0 %v1116_v42 }
  0x5c   : > { %711 = vmatprep.subr.bf16.mxu0 %v1117_v43 }
  0x5f   : > { %712 = vmatpush1.bf16.msra.mxu0 %v1119_v44 }
  0x60   : > { %713 = vmatprep.subr.bf16.mxu0 %v1120_v45 }
  0x63   : > { %714 = vmatpush1.bf16.msra.mxu0 %v1122_v46 }
  0x64   : > { %715 = vmatprep.subr.bf16.mxu0 %v1123_v47 }
  0x67   : > { %716 = vmatpush1.bf16.msra.mxu0 %v1125_v49 }
  0x68   : > { %717 = vmatprep.subr.bf16.mxu0 %v1126_v50 }
  0x6b   : > { %718 = vmatpush1.bf16.msra.mxu0 %v1128_v51 }
  0x6c   : > { %719 = vmatprep.subr.bf16.mxu0 %v1129_v52 }
  0x6f   : > { %720 = vmatpush2.bf16.msra.mxu0 %v1131_v53 }
  0x70   : > { %721 = vmatprep.subr.bf16.mxu0 %v1132_v54 }
  0x73   : > { %722 = vmatpush2.bf16.msra.mxu0 %v1134_v55 }
  0x74   : > { %723 = vmatprep.subr.bf16.mxu0 %v1135_v56 }
  0x77   : > { %724 = vmatpush2.bf16.msra.mxu0 %v1137_v57 }
  0x78   : > { %725 = vmatprep.subr.bf16.mxu0 %v1138_v58 }
  0x7b   : > { %726 = vmatpush2.bf16.msra.mxu0 %v1140_v59 }
  0x7c   : > { %727 = vmatprep.subr.bf16.mxu0 %v1141_v60 }
  0x7f   : > { %728 = vmatpush2.bf16.msra.mxu0 %v1143_v61 }
  0x80   : > { %729 = vmatprep.subr.bf16.mxu0 %v1144_v62 }
  0x83   : > { %730 = vmatpush2.bf16.msra.mxu0 %v1146_v63 }
  0x84   : > { %731 = vmatprep.subr.bf16.mxu0 %v1147_v0 }
  0x87   : > { %732 = vmatpush2.bf16.msra.mxu0 %v1149_v1 }
  0x88   : > { %733 = vmatprep.subr.bf16.mxu0 %v1150_v2 }
  0x8b   : > { %734 = vmatpush2.bf16.msra.mxu0 %v1152_v3 }
  0x8e   : > { %736 = vmatmul.mubr.bf16.vlgmr.msra.gmra.mxu0 %v1153_v4 }
 0x14e   : > { %v737_v6 = vpop.f32.mrf.mxu0 }
 0x14f   : > { %v746_v8 = vadd.f32 %v737_v6, %v495_v5 }
 0x150   : > { %v739_v9 = vpop.f32.mrf.mxu0 }
 0x151   : > { %750 = vst [vmem:[%s1473_s20] sm:$0xff] %v746_v8  ;;  %v747_v11 = vadd.f32 %v739_v9, %v496_v7 }
 0x152   : > { %v741_v12 = vpop.f32.mrf.mxu0 }
 0x153   : > { %751 = vst [vmem:[%s1473_s20 + $0x8] sm:$0xff] %v747_v11  ;;  %v748_v14 = vadd.f32 %v741_v12, %v497_v10  ;;  %757 = sbr.rel (%p1007_p5) target bundleno = 360 (0x168), region = 120 }
 0x154   : > { %v743_v15 = vpop.f32.mrf.mxu0 }
 0x155   : > { %752 = vst [vmem:[%s1473_s20 + $0x10] sm:$0xff] %v748_v14  ;;  %v749_v16 = vadd.f32 %v743_v15, %v498_v13 }
 0x157   : > { %753 = vst [vmem:[%s1473_s20 + $0x18] sm:$0xff] %v749_v16 }
 0x158   : > { %v764_v17 = vlaneseq  ;;  %v762_v19 = vld [vmem:[%s478_s6] sm:$0x3] }
 0x159   : > { %v778_v20 = vld [vmem:[%s483_s17] sm:$0x3] }
 0x15a   : > { %v765_v18 = vshrl.u32 %v764_v17, 7  ;;  %v758_v21 = vld [vmem:[%s1473_s20] sm:$0xff]  ;;  %v759_v24 = vld [vmem:[%s1473_s20 + $0x8] sm:$0xff] }
 0x15c   : > { %v766_v22 = vsub.s32 0, %v765_v18  ;;  %v770_v23 = vsub.s32 1, %v765_v18  ;;  %v760_v25 = vld [vmem:[%s1473_s20 + $0x10] sm:$0xff] }
 0x15e   : > { %v761_v26 = vld [vmem:[%s1473_s20 + $0x18] sm:$0xff]  ;;  %v767_v27 = vrot.slane %v762_v19, %v766_v22  ;;  %v783_v28 = vrot.slane %v778_v20, %v766_v22  ;;  %v771_v29 = vrot.slane %v762_v19, %v770_v23  ;;  %v787_v30 = vrot.slane %v778_v20, %v770_v23 }
 0x160   : > { %v774_v31 = vmul.f32 %v767_v27, %v758_v21  ;;  %v775_v32 = vmul.f32 %v771_v29, %v759_v24  ;;  %v776_v33 = vmul.f32 %v767_v27, %v760_v25  ;;  %v777_v34 = vmul.f32 %v771_v29, %v761_v26 }
 0x162   : > { %v790_v35 = vadd.f32 %v783_v28, %v774_v31  ;;  %v791_v36 = vadd.f32 %v787_v30, %v775_v32  ;;  %v792_v37 = vadd.f32 %v783_v28, %v776_v33  ;;  %v793_v38 = vadd.f32 %v787_v30, %v777_v34 }
 0x164   : > { %v794_v39 = vmax.f32 %v790_v35, 0.0  ;;  %v795_v40 = vmax.f32 %v791_v36, 0.0  ;;  %v796_v41 = vmax.f32 %v792_v37, 0.0  ;;  %v797_v42 = vmax.f32 %v793_v38, 0.0 }
 0x166   : > { %798 = vst [vmem:[%s1473_s20] sm:$0xff] %v794_v39  ;;  %799 = vst [vmem:[%s1473_s20 + $0x8] sm:$0xff] %v795_v40 }
 0x167   : > { %800 = vst [vmem:[%s1473_s20 + $0x10] sm:$0xff] %v796_v41  ;;  %801 = vst [vmem:[%s1473_s20 + $0x18] sm:$0xff] %v797_v42 }
 0x168 PF: > { %808 = sbr.rel (!%p1364_p12) target bundleno = 368 (0x170), region = 124  ;;  %s1015_s21 = sshll.u32 (%p1364_p12), %s1230_s22, 4 }
 0x169   : > { %s814_s26 = scalar_lea.vmem (%p1364_p12), %s1590_s4, %s1015_s21 }
 0x16d   : > { %v827_v43 = vld [vmem:[%s1473_s20] sm:$0xff]  ;;  %v829_v44 = vld [vmem:[%s1473_s20 + $0x8] sm:$0xff] }
 0x16e   : > { %v831_v45 = vld [vmem:[%s1473_s20 + $0x10] sm:$0xff]  ;;  %v833_v46 = vld [vmem:[%s1473_s20 + $0x18] sm:$0xff]  ;;  %828 = vst [vmem:[%s814_s26] sm:$0xff] %v827_v43  ;;  %830 = vst [vmem:[%s814_s26 + $0x8] sm:$0xff] %v829_v44 }
 0x16f   : > { %832 = vst [vmem:[%s814_s26 + $0x20] sm:$0xff] %v831_v45  ;;  %834 = vst [vmem:[%s814_s26 + $0x28] sm:$0xff] %v833_v46 }
 0x170 PF: > { %s14_s25 = sadd.s32 1, %s1242_s25   ;;  %s1601_s19 = sld [smem:[#allocation5_spill]] }
 0x171   : > { %p11_p6 = scmp.ge.s32.totalorder %s14_s25, 38   ;;  %s1602_s20 = sld [smem:[#allocation8_spill]] }
 0x172   : > { %s1603_s14 = sld [smem:[#allocation6_spill]]  ;;  %s1605_s15 = smov %s1206_s16 }
 0x173   : > { %s1604_s5 = sld [smem:[#allocation7_spill]]  ;;  %s1606_s16 = smov %s1362_s13 }
 0x174   : > { %s1607_s17 = smov %s1214_s18  ;;  %s1608_s18 = smov %s1359_s12 }
 0x175   : > { %s1609_s21 = smov %s1234_s23  ;;  %s1610_s22 = smov %s1238_s24 }
 0x176   :  { %13 = sbr.rel (!%p11_p6) target bundleno = 6 (0x6), region = 192 }
 0x178   : > { %s1611_s23 = smov %s1603_s14 }
 0x179   : > { %s1612_s24 = smov %s1604_s5 }

// kernel: resnet_proto_forward.42
= control target key start
LH: loop header
LB: loop body
LE: loop exit
PB: predicated region body
PF: predicated region fallthrough
CT: control target
= control target key end

     0   :  { %s193_s6 = smov 0   ;;  %s213_s0 = inlined_call_operand.vmem [shape: f32[2,1,512], index: 0, kind: input, shape index: {}]   ;;  %s214_s1 = inlined_call_operand.vmem [shape: f32[2,1,512], index: 1, kind: output, shape index: {}]  }
   0x1 LB: > { %s172_s7 = sadd.s32 4294967295, %s195_s6   ;;  %p176_p0 = scmp.ge.s32.totalorder %s195_s6, 1  ;;  %s195_s6 = sphi %s193_s6, %s11_s6  }
   0x2   : > { %p86_p1 = scmp.lt.s32.totalorder %s195_s6, 3 }
   0x4   : > { %p87_p2 = pnand %p176_p0, %p86_p1 }
   0x5   : > { %p104_p3 = scmp.lt.s32.totalorder (!%p87_p2), %s172_s7, 1 }
   0x6   : > { %90 = sbr.rel (%p87_p2) target bundleno = 16 (0x10), region = 24 }
   0xb   : > { %v114_v0 = vlaneseq  ;;  %s216_s7 = smov (!%p104_p3, %s172_s7), 1 }
   0xc   : > { %s177_s8 = sshll.u32 %s216_s7, 2 }
   0xd   : > { %vm116_vm0 = vcmp.lt.s32.totalorder %v114_v0, 512  ;;  %s107_s11 = scalar_lea.vmem %s213_s0, %s177_s8  ;;  %s111_s14 = scalar_lea.vmem %s214_s1, %s177_s8 }
   0xe   : > { %v112_v1 = vld [vmem:[%s107_s11] sm:$0xf] }
   0xf   : > { %118 = vst.msk [vmem:[%s111_s14] sm:$0xf] %vm116_vm0, %v112_v1 }
  0x10 PF: > { %s11_s6 = sadd.s32 1, %s195_s6  }
  0x11   : > { %p8_p4 = scmp.ge.s32.totalorder %s11_s6, 4  }
  0x13   :  { %10 = sbr.rel (!%p8_p4) target bundleno = 1 (0x1), region = 54 }

// kernel: resnet_proto_forward.43
= control target key start
LH: loop header
LB: loop body
LE: loop exit
PB: predicated region body
PF: predicated region fallthrough
CT: control target
= control target key end

     0   :  { %s886_s15 = smov 0   ;;  %s888_s16 = smov 0   ;;  %s1014_s0 = inlined_call_operand.vmem [shape: bf16[16,512], index: 0, kind: input, shape index: {}]   ;;  %s1015_s1 = inlined_call_operand.vmem [shape: bf16[512,128], index: 1, kind: input, shape index: {}]   ;;  %s1016_s2 = inlined_call_operand.vmem [shape: f32[1,128], index: 2, kind: input, shape index: {}]   ;;  %s1017_s3 = inlined_call_operand.vmem [shape: f32[1,128], index: 3, kind: input, shape index: {}]   ;;  %s1018_s4 = inlined_call_operand.vmem [shape: f32[16,128], index: 4, kind: output, shape index: {}]  }
   0x1   :  { %s890_s17 = smov 0   ;;  %s892_s18 = smov 0  }
   0x2   :  { %s894_s19 = smov 0  }
   0x3 LB: > { %s26_s20 = sadd.s32 1, %s854_s18  ;;  %p49_p1 = scmp.ne.s32.totalorder %s846_s16, %s842_s15  ;;  %s858_s19 = sphi %s894_s19, %s14_s19   ;;  %s854_s18 = sphi %s892_s18, %s1022_s18   ;;  %s850_s17 = sphi %s890_s17, %s1021_s17   ;;  %s846_s16 = sphi %s888_s16, %s1020_s16   ;;  %s842_s15 = sphi %s886_s15, %s1019_s15  }
   0x4   : > { %p27_p0 = scmp.ge.s32.totalorder %s26_s20, 2  ;;  %p50_p2 = scmp.eq.s32.totalorder %s858_s19, 0 }
   0x5   : > { %s42_s22 = sadd.s32 1, %s846_s16  ;;  %p693_p5 = scmp.ge.s32.totalorder %s858_s19, 2 }
   0x6   : > { %s1024_s20 = smov (%p27_p0, %s26_s20), 0  ;;  %p51_p3 = por %p50_p2, %p49_p1 }
   0x7   : > { %s38_s21 = ssub.s32 %s854_s18, %s1024_s20  ;;  %195 = sbr.rel (%p693_p5) target bundleno = 17 (0x11), region = 24 }
   0x8   : > { %p40_p4 = scmp.eq.s32.totalorder %s38_s21, 0 }
   0xa   : > { %s921_s23 = scalar_select %p40_p4, %s846_s16, %s42_s22  }
   0xc   : > { %198 = sbr.rel (!%p51_p3) target bundleno = 17 (0x11), region = 28  ;;  %s200_s24 = sand.u32 (%p51_p3), 1, %s846_s16  }
   0xd   : > { %s729_s25 = sshll.u32 (%p51_p3), %s854_s18, 3  ;;  %s694_s26 = sshll.u32 (%p51_p3), %s200_s24, 4 }
   0xe   : > { %s208_s29 = scalar_lea.vmem (%p51_p3), %s1014_s0, %s729_s25  ;;  %s202_s30 = scalar_lea.vmem (%p51_p3), [#allocation2], %s694_s26 }
   0xf   : > { %v239_v0 = vld [vmem:[%s208_s29] sm:$0xff] (%p51_p3)  ;;  %v241_v1 = vld [vmem:[%s208_s29 + $0x10] sm:$0xff] (%p51_p3) }
  0x10   : > { %240 = vst [vmem:[%s202_s30] sm:$0xff] (%p51_p3), %v239_v0  ;;  %242 = vst [vmem:[%s202_s30 + $0x8] sm:$0xff] (%p51_p3), %v241_v1 }
  0x11 PF: > { %p697_p6 = scmp.ge.s32.totalorder %s858_s19, 1  ;;  %p259_p7 = scmp.lt.s32.totalorder %s858_s19, 3 }
  0x13   : > { %p260_p8 = pnand %p697_p6, %p259_p7 }
  0x14   : > { %s266_s5 = sand.u32 (!%p260_p8), 1, %s842_s15   ;;  %s699_s6 = sshll.u32 (!%p260_p8), %s850_s17, 5 }
  0x15   : > { %263 = sbr.rel (%p260_p8) target bundleno = 314 (0x13a), region = 70  ;;  %s933_s7 = sshll.u32 (!%p260_p8), %s266_s5, 4 }
  0x16   : > { %p311_p9 = scmp.lt.s32.totalorder (!%p260_p8), %s699_s6, 63  ;;  %s268_s12 = scalar_lea.vmem (!%p260_p8), [#allocation2], %s933_s7 }
  0x17   : > { %p701_p10 = scmp.ne.s32.totalorder (!%p260_p8), %s850_s17, 0 }
  0x1a   : > { %s1026_s6 = smov (!%p311_p9, %s699_s6), 63  ;;  %338 = sbr.rel (%p701_p10) target bundleno = 33 (0x21), region = 78 }
  0x1b   : > { %s700_s8 = sshll.u32 %s1026_s6, 2 }
  0x1c   : > { %s938_s11 = scalar_lea.vmem %s1015_s1, %s700_s8 }
  0x1f   : > { %v860_v2 = vmov 0.0  }
  0x20   : > { %339 = vst [vmem:[%s1018_s4] sm:$0xff] %v860_v2  ;;  %340 = vst [vmem:[%s1018_s4 + $0x8] sm:$0xff] %v860_v2 }
  0x21 PF: > { %v793_v3 = vld [vmem:[%s938_s11 + $0x78] sm:$0xff]   ;;  %v795_v5 = vld [vmem:[%s938_s11 + $0x70] sm:$0xff]   ;;  %v797_v7 = vld [vmem:[%s938_s11 + $0x68] sm:$0xff]   ;;  %p720_p11 = scmp.ne.s32.totalorder %s850_s17, 1 }
  0x22   : > { %v794_v4 = vld [vmem:[%s938_s11 + $0x38] sm:$0xff]   ;;  %730 = vmatprep.subr.bf16.mxu0 %v793_v3  ;;  %v796_v6 = vld [vmem:[%s938_s11 + $0x30] sm:$0xff]   ;;  %v798_v8 = vld [vmem:[%s938_s11 + $0x28] sm:$0xff]  }
  0x23   : > { %731 = vmatpush3.bf16.msra.mxu0 %v794_v4  ;;  %v799_v9 = vld [vmem:[%s938_s11 + $0x60] sm:$0xff]   ;;  %v801_v11 = vld [vmem:[%s938_s11 + $0x58] sm:$0xff]   ;;  %v803_v13 = vld [vmem:[%s938_s11 + $0x50] sm:$0xff]  }
  0x24   : > { %732 = vmatprep.subr.bf16.mxu0 %v795_v5  ;;  %v800_v10 = vld [vmem:[%s938_s11 + $0x20] sm:$0xff]   ;;  %v802_v12 = vld [vmem:[%s938_s11 + $0x18] sm:$0xff]   ;;  %v804_v15 = vld [vmem:[%s938_s11 + $0x10] sm:$0xff]  }
  0x25   : > { %v811_v14 = vld [vmem:[%s268_s12 + $0x4] ss:$8 sps:$4 sm:$0xff]   ;;  %v809_v20 = vld [vmem:[%s268_s12] ss:$8 sps:$4 sm:$0xff]  }
  0x26   : > { %515 = vmatprep.mubr.bf16.mxu0 %v811_v14  ;;  %v805_v16 = vld [vmem:[%s938_s11 + $0x48] sm:$0xff]   ;;  %v807_v18 = vld [vmem:[%s938_s11 + $0x40] sm:$0xff]  }
  0x27   : > { %733 = vmatpush3.bf16.msra.mxu0 %v796_v6  ;;  %v806_v17 = vld [vmem:[%s938_s11 + $0x8] sm:$0xff]   ;;  %v808_v19 = vld [vmem:[%s938_s11] sm:$0xff]  }
  0x28   : > { %734 = vmatprep.subr.bf16.mxu0 %v797_v7  ;;  %v341_v22 = vld [vmem:[%s1018_s4] sm:$0xff]  ;;  %v342_v27 = vld [vmem:[%s1018_s4 + $0x8] sm:$0xff] }
  0x2b   : > { %735 = vmatpush3.bf16.msra.mxu0 %v798_v8 }
  0x2c   : > { %736 = vmatprep.subr.bf16.mxu0 %v799_v9 }
  0x2f   : > { %737 = vmatpush3.bf16.msra.mxu0 %v800_v10 }
  0x30   : > { %738 = vmatprep.subr.bf16.mxu0 %v801_v11 }
  0x33   : > { %739 = vmatpush3.bf16.msra.mxu0 %v802_v12 }
  0x34   : > { %740 = vmatprep.subr.bf16.mxu0 %v803_v13 }
  0x37   : > { %741 = vmatpush3.bf16.msra.mxu0 %v804_v15 }
  0x38   : > { %742 = vmatprep.subr.bf16.mxu0 %v805_v16 }
  0x3b   : > { %743 = vmatpush3.bf16.msra.mxu0 %v806_v17 }
  0x3c   : > { %744 = vmatprep.subr.bf16.mxu0 %v807_v18 }
  0x3f   : > { %745 = vmatpush3.bf16.msra.mxu0 %v808_v19 }
  0x42   : > { %516 = vmatmul.mubr.bf16.vlgmr.msra.gmra.mxu0 %v809_v20 }
 0x102   : > { %v746_v21 = vpop.f32.mrf.mxu0 }
 0x104   : > { %v747_v23 = vpop.f32.mrf.mxu0 }
 0x105   : > { %v748_v24 = vadd.f32 %v747_v23, %v746_v21 }
 0x106   : > { %v749_v25 = vpop.f32.mrf.mxu0 }
 0x107   : > { %v524_v26 = vadd.f32 %v748_v24, %v341_v22 }
 0x108   : > { %v750_v28 = vpop.f32.mrf.mxu0 }
 0x109   : > { %526 = vst [vmem:[%s1018_s4] sm:$0xff] %v524_v26  ;;  %v751_v29 = vadd.f32 %v750_v28, %v749_v25  ;;  %531 = sbr.rel (%p720_p11) target bundleno = 314 (0x13a), region = 82 }
 0x10b   : > { %v525_v30 = vadd.f32 %v751_v29, %v342_v27 }
 0x10d   : > { %527 = vst [vmem:[%s1018_s4 + $0x8] sm:$0xff] %v525_v30 }
 0x10e   : > { %v721_v32 = vld [vmem:[%s1016_s2] ss:$0 sm:$0xff] }
 0x10f   : > { %v722_v33 = vld [vmem:[%s1017_s3] ss:$0 sm:$0xff] }
 0x110   : > { %v532_v31 = vld [vmem:[%s1018_s4] sm:$0xff] }
 0x111   : > { %v541_v34 = vmul.f32 %v721_v32, %v532_v31 }
 0x113   : > { %v550_v37 = vadd.f32 %v722_v33, %v541_v34 }
 0x114   : > { %v533_v35 = vld [vmem:[%s1018_s4 + $0x8] sm:$0xff] }
 0x115   : > { %v542_v36 = vmul.f32 %v721_v32, %v533_v35  ;;  %v723_v39 = vmul.f32 -1.442695, %v550_v37 }
 0x117   : > { %v551_v38 = vadd.f32 %v722_v33, %v542_v36  ;;  %812 = vpow2.f32 %v723_v39 }
 0x119   : > { %v724_v40 = vmul.f32 -1.442695, %v551_v38 }
 0x11b   : > { %814 = vpow2.f32 %v724_v40 }
 0x124   : > { %v813_v41 = vpop.eup %812 }
 0x125   : > { %v558_v43 = vadd.f32 1.0, %v813_v41 }
 0x127   : > { %816 = vrcp.f32 %v558_v43 }
 0x128   : > { %v815_v42 = vpop.eup %814 }
 0x129   : > { %v559_v44 = vadd.f32 1.0, %v815_v42 }
 0x12b   : > { %818 = vrcp.f32 %v559_v44 }
 0x134   : > { %v817_v45 = vpop.eup %816 }
 0x135   : > { %564 = vst [vmem:[%s1018_s4] sm:$0xff] %v817_v45 }
 0x138   : > { %v819_v46 = vpop.eup %818 }
 0x139   : > { %565 = vst [vmem:[%s1018_s4 + $0x8] sm:$0xff] %v819_v46 }
 0x13a PF: > { %s14_s19 = sadd.s32 1, %s858_s19   ;;  %s1019_s15 = smov %s846_s16 }
 0x13b   : > { %p11_p12 = scmp.ge.s32.totalorder %s14_s19, 4   ;;  %s1020_s16 = smov %s921_s23 }
 0x13c   : > { %s1021_s17 = smov %s854_s18  ;;  %s1022_s18 = smov %s1024_s20 }
 0x13d   :  { %13 = sbr.rel (!%p11_p12) target bundleno = 3 (0x3), region = 126 }

</bundles_post_ra>
